<compile_context>
chip_gen: v7x
topology: tpu7x:2x2x1
jax: 0.10.0
libtpu: 0.0.40
codegen_flags: <defaults>
</compile_context>

<pallas_src>
import functools

import numpy as np
import jax
import jax.numpy as jnp
from jax.experimental import pallas as pl
from jax.experimental.pallas import tpu as pltpu

VMEM_LIMIT = 48 * 1024 * 1024
ENC_TH_CAP = 32     # output-row tile for encoder convs
HEAD_TH_CAP = 16    # output-row tile for the 3x3 head conv
GEMM_TM = 512       # M tile for 1x1 projection GEMMs
LOSS_TR = 256       # row tile for the loss reduction

SEG_CH = 32
ENC_CH = [3, 8, 16, 32, 64, 128]   # stride-2 pyramid: 2, 4, 8, 16, 32


# ---------------------------------------------------------------------------
# Kernel 1: direct conv as per-output-row tap GEMMs (no im2col in HBM).
#   x_ref  : (1, th, ws, cs)        row-tile of the (space-to-depth'd) input
#   xb_ref : (1, 1, max_dy, ws, cs) boundary rows of the next tile (tiny)
#   w_ref  : (T, cs, cout_w)        per-tap weight matrices (bf16)
#   s_ref  : (1, cout_w)            folded-BN scale (f32), optional
#   b_ref  : (1, cout_w)            bias (f32)
#   o_ref  : (1, th, wo, cout)      output tile
# ---------------------------------------------------------------------------
def _conv_taps_kernel(x_ref, xb_ref, w_ref, s_ref, b_ref, o_ref,
                      *, taps, th, wo, relu, use_scale, store_cols):
    w_taps = [w_ref[k, :, :] for k in range(len(taps))]
    scale = s_ref[...] if use_scale else None
    bias = b_ref[...]
    for t in range(th):
        acc = None
        for k, (dy, dx) in enumerate(taps):
            r = t + dy
            if r < th:
                row = x_ref[0, r, :, :]                 # (ws, cs) bf16
            else:
                row = xb_ref[0, 0, r - th, :, :]        # boundary row
            a = row[dx:dx + wo, :]                      # unit shift along W
            d = jnp.dot(a, w_taps[k], preferred_element_type=jnp.float32)
            acc = d if acc is None else acc + d
        if use_scale:
            acc = acc * scale
        acc = acc + bias
        if relu:
            acc = jnp.maximum(acc, 0.0)
        if store_cols is not None:
            acc = acc[:, :store_cols]
        o_ref[0, t, :, :] = acc.astype(o_ref.dtype)


def _conv_taps_call(xs, xb, w_taps, scale, bias, taps, *, ho, wo, nt, th,
                    relu, use_scale, store_cols, out_dtype):
    n, _, ws, cs = xs.shape
    t_cnt, _, cout_w = w_taps.shape
    cout = store_cols if store_cols is not None else cout_w
    max_dy = xb.shape[2]
    kernel = functools.partial(
        _conv_taps_kernel, taps=taps, th=th, wo=wo, relu=relu,
        use_scale=use_scale, store_cols=store_cols)
    return pl.pallas_call(
        kernel,
        out_shape=jax.ShapeDtypeStruct((n, ho, wo, cout), out_dtype),
        grid=(n, nt),
        in_specs=[
            pl.BlockSpec((1, th, ws, cs), lambda b, i: (b, i, 0, 0)),
            pl.BlockSpec((1, 1, max_dy, ws, cs), lambda b, i: (b, i, 0, 0, 0)),
            pl.BlockSpec((t_cnt, cs, cout_w), lambda b, i: (0, 0, 0)),
            pl.BlockSpec((1, cout_w), lambda b, i: (0, 0)),
            pl.BlockSpec((1, cout_w), lambda b, i: (0, 0)),
        ],
        out_specs=pl.BlockSpec((1, th, wo, cout), lambda b, i: (b, i, 0, 0)),
        compiler_params=pltpu.CompilerParams(
            dimension_semantics=("parallel", "parallel"),
            vmem_limit_bytes=VMEM_LIMIT),
    )(xs, xb, w_taps, scale, bias)


def conv3x3_s2_bn_relu(x, w3, scale, bias, *, th_cap=ENC_TH_CAP):
    """3x3 / stride 2 / pad 1 conv + folded BN + ReLU.  x: (N,H,W,Cin) bf16."""
    n, h, w, cin = x.shape
    cout = w3.shape[-1]
    ho = (h - 1) // 2 + 1
    wo = (w - 1) // 2 + 1
    th = max(1, min(ho, th_cap))
    nt = pl.cdiv(ho, th)
    hs = nt * th + 1
    ws = wo + 1
    # conv zero-padding (+alignment padding), then 2x2 space-to-depth so the
    # stride-2 taps become unit shifts handled inside the kernel (single copy).
    xp = jnp.pad(x, ((0, 0), (1, 2 * hs - h - 1), (1, 2 * ws - w - 1), (0, 0)))
    xs = xp.reshape(n, hs, 2, ws, 2, cin).transpose(0, 1, 3, 2, 4, 5)
    xs = xs.reshape(n, hs, ws, 4 * cin)
    # boundary row of each row tile (tiny gather, keeps BlockSpecs block-aligned)
    idx = ((np.arange(nt) + 1) * th).astype(np.int32)
    xb = xs[:, idx, :, :].reshape(n, nt, 1, ws, 4 * cin)
    # fold the 3x3 kernel into 4 space-to-depth taps: tap (py,px), K = 4*Cin
    w4 = jnp.pad(w3, ((0, 1), (0, 1), (0, 0), (0, 0)))          # (4,4,Cin,Cout)
    w_taps = w4.reshape(2, 2, 2, 2, cin, cout).transpose(0, 2, 1, 3, 4, 5)
    w_taps = w_taps.reshape(4, 4 * cin, cout).astype(jnp.bfloat16)
    taps = ((0, 0), (0, 1), (1, 0), (1, 1))
    return _conv_taps_call(
        xs, xb, w_taps,
        scale.reshape(1, cout).astype(jnp.float32),
        bias.reshape(1, cout).astype(jnp.float32),
        taps, ho=ho, wo=wo, nt=nt, th=th, relu=True, use_scale=True,
        store_cols=None, out_dtype=jnp.bfloat16)


def conv3x3_s1_head(x, w3, bias, *, th_cap=HEAD_TH_CAP):
    """3x3 / stride 1 / pad 1 head conv (Cout=1).  Lane-dense padded weights."""
    n, h, w, cin = x.shape
    cout = w3.shape[-1]
    ho, wo = h, w
    th = max(1, min(ho, th_cap))
    nt = pl.cdiv(ho, th)
    hp = nt * th + 2
    wp = wo + 2
    xp = jnp.pad(x, ((0, 0), (1, hp - h - 1), (1, wp - w - 1), (0, 0)))
    idx = ((np.arange(nt)[:, None] + 1) * th
           + np.arange(2)[None, :]).reshape(-1).astype(np.int32)
    xb = xp[:, idx, :, :].reshape(n, nt, 2, wp, cin)
    taps = tuple((dy, dx) for dy in range(3) for dx in range(3))
    cp = 128                                    # pad Cout=1 -> 128 for the MXU
    w_taps = jnp.pad(w3.reshape(9, cin, cout),
                     ((0, 0), (0, 0), (0, cp - cout))).astype(jnp.bfloat16)
    b_pad = jnp.pad(bias.reshape(1, cout).astype(jnp.float32),
                    ((0, 0), (0, cp - cout)))
    ones = jnp.ones((1, cp), jnp.float32)       # unused (use_scale=False)
    return _conv_taps_call(
        xp, xb, w_taps, ones, b_pad, taps,
        ho=ho, wo=wo, nt=nt, th=th, relu=False, use_scale=False,
        store_cols=cout, out_dtype=jnp.float32)


# ---------------------------------------------------------------------------
# Kernel 2: tiled bf16 GEMM (1x1 decoder projections), f32 accumulate.
# ---------------------------------------------------------------------------
def _matmul_kernel(a_ref, w_ref, o_ref):
    o_ref[...] = jnp.dot(a_ref[...], w_ref[...],
                         preferred_element_type=jnp.float32).astype(o_ref.dtype)


def matmul_tiled(a, w, out_dtype=jnp.float32, tm=GEMM_TM):
    m, k = a.shape
    k2, nc = w.shape
    assert k == k2
    tm = min(m, tm)
    return pl.pallas_call(
        _matmul_kernel,
        out_shape=jax.ShapeDtypeStruct((m, nc), out_dtype),
        grid=(pl.cdiv(m, tm),),
        in_specs=[pl.BlockSpec((tm, k), lambda i: (i, 0)),
                  pl.BlockSpec((k, nc), lambda i: (0, 0))],
        out_specs=pl.BlockSpec((tm, nc), lambda i: (i, 0)),
        compiler_params=pltpu.CompilerParams(
            dimension_semantics=("parallel",),
            vmem_limit_bytes=VMEM_LIMIT),
    )(a.astype(jnp.bfloat16), w.astype(jnp.bfloat16))


# ---------------------------------------------------------------------------
# Kernel 3: Dice + BCE reductions, grid-tiled with resident accumulators.
# ---------------------------------------------------------------------------
def _loss_kernel(x_ref, y_ref, inter_ref, card_ref, bce_ref, ysum_ref):
    @pl.when(pl.program_id(0) == 0)
    def _():
        inter_ref[...] = jnp.zeros_like(inter_ref)
        card_ref[...] = jnp.zeros_like(card_ref)
        bce_ref[...] = jnp.zeros_like(bce_ref)
        ysum_ref[...] = jnp.zeros_like(ysum_ref)

    x = x_ref[...]
    y = y_ref[...]
    e = jnp.exp(-jnp.abs(x))                 # single exp, reused twice
    r = 1.0 / (1.0 + e)
    p = jnp.where(x >= 0, r, e * r)          # sigmoid(x)
    bce = jnp.maximum(x, 0.0) - x * y + jnp.log(1.0 + e)
    inter_ref[...] += jnp.sum(p * y, keepdims=True)
    card_ref[...] += jnp.sum(p + y, keepdims=True)
    bce_ref[...] += jnp.sum(bce, keepdims=True)
    ysum_ref[...] += jnp.sum(y, keepdims=True)


def dice_plus_bce(logits_nchw, masks_nchw):
    e_cnt = logits_nchw.size
    lanes = 128
    rows = pl.cdiv(e_cnt, lanes)
    tr = min(rows, LOSS_TR)
    nt = pl.cdiv(rows, tr)
    total = nt * tr * lanes
    pad = total - e_cnt                      # zero-pad; corrected analytically
    x = jnp.pad(logits_nchw.reshape(-1).astype(jnp.float32), (0, pad))
    y = jnp.pad(masks_nchw.reshape(-1).astype(jnp.float32), (0, pad))
    x = x.reshape(nt * tr, lanes)
    y = y.reshape(nt * tr, lanes)
    inter, card, bce, ysum = pl.pallas_call(
        _loss_kernel,
        out_shape=tuple(jax.ShapeDtypeStruct((1, 1), jnp.float32)
                        for _ in range(4)),
        grid=(nt,),
        in_specs=[pl.BlockSpec((tr, lanes), lambda i: (i, 0)),
                  pl.BlockSpec((tr, lanes), lambda i: (i, 0))],
        out_specs=tuple(pl.BlockSpec((1, 1), lambda i: (0, 0))
                        for _ in range(4)),
        compiler_params=pltpu.CompilerParams(
            dimension_semantics=("arbitrary",)),
    )(x, y)
    # padded elements (x=0,y=0) contribute 0.5 to card and log(2) to bce
    card_c = card[0, 0] - 0.5 * pad
    bce_c = bce[0, 0] - float(np.log(2.0)) * pad
    eps = 1e-7
    dice_score = (2.0 * inter[0, 0]) / jnp.maximum(card_c, eps)
    dice_loss = (1.0 - dice_score) * (ysum[0, 0] > 0).astype(jnp.float32)
    bce_loss = bce_c / e_cnt
    return dice_loss + bce_loss


# ---------------------------------------------------------------------------
# Parameters (unchanged from previous version — same RNG stream / semantics).
# ---------------------------------------------------------------------------
def init_conv_bn(key, kh, kw, cin, cout):
    k1, k2, k3 = jax.random.split(key, 3)
    w = 0.1 * jax.random.normal(k1, (kh, kw, cin, cout), jnp.float32)
    gamma = 1.0 + 0.1 * jax.random.normal(k2, (cout,), jnp.float32)
    beta = 0.1 * jax.random.normal(k3, (cout,), jnp.float32)
    eps = 1e-5
    scale = gamma / jnp.sqrt(1.0 + eps)   # eval-mode BN, running stats (0, 1)
    return w, scale, beta


def init_params(key):
    ks = jax.random.split(key, 12)
    encoder = [init_conv_bn(ks[i], 3, 3, ENC_CH[i], ENC_CH[i + 1])
               for i in range(5)]
    skip_ch = ENC_CH[2:][::-1]                     # [128, 64, 32, 16]
    mlp = []
    for j, c in enumerate(skip_ch):
        ka, kb = jax.random.split(ks[5 + j], 2)
        w = 0.1 * jax.random.normal(ka, (c, SEG_CH), jnp.float32)
        b = 0.01 * jax.random.normal(kb, (SEG_CH,), jnp.float32)
        mlp.append((w, b))
    fuse = init_conv_bn(ks[9], 1, 1, len(skip_ch) * SEG_CH, SEG_CH)
    kh1, kh2 = jax.random.split(ks[10], 2)
    head_w = 0.1 * jax.random.normal(kh1, (3, 3, SEG_CH, 1), jnp.float32)
    head_b = 0.01 * jax.random.normal(kh2, (1,), jnp.float32)
    return {"encoder": encoder, "mlp": mlp, "fuse": fuse, "head": (head_w, head_b)}


# ---------------------------------------------------------------------------
# Model forward
# ---------------------------------------------------------------------------
def segformer_forward(params, images_nchw):
    x = jnp.transpose(images_nchw, (0, 2, 3, 1)).astype(jnp.bfloat16)  # NHWC
    feats = []
    h = x
    for (w, s, b) in params["encoder"]:
        h = conv3x3_s2_bn_relu(h, w, s, b)
        feats.append(h)
    skips = feats[1:]                                   # strides 4, 8, 16, 32
    n, th4, tw4, _ = skips[0].shape

    # Fold per-skip 1x1 MLP -> concat -> 1x1 fuse conv (+ folded BN) into one
    # effective (Cj, SEG_CH) matrix per skip + a single shared bias.  All ops
    # are linear and commute with the bilinear upsample, so the stride-4
    # resolution concat + fuse GEMM (and its HBM round trips) disappear.
    wf, sf, bf = params["fuse"]
    wf2 = wf.reshape(len(params["mlp"]) * SEG_CH, SEG_CH)
    fused_acc = None
    bias_total = bf.astype(jnp.float32)
    for j, (f, (wp, bp)) in enumerate(zip(skips[::-1], params["mlp"])):
        wf_j = wf2[j * SEG_CH:(j + 1) * SEG_CH, :]
        w_eff = (wp @ wf_j) * sf[None, :]
        bias_total = bias_total + (bp @ wf_j) * sf
        nb, hh, ww, c = f.shape
        g = matmul_tiled(f.reshape(nb * hh * ww, c), w_eff,
                         out_dtype=jnp.float32)
        g = g.reshape(nb, hh, ww, SEG_CH)
        if (hh, ww) != (th4, tw4):
            g = jax.image.resize(g, (nb, th4, tw4, SEG_CH), method="bilinear")
        fused_acc = g if fused_acc is None else fused_acc + g
    fused = jnp.maximum(fused_acc + bias_total[None, None, None, :], 0.0)

    head_w, head_b = params["head"]
    logits_s4 = conv3x3_s1_head(fused.astype(jnp.bfloat16), head_w, head_b)
    logits = jax.image.resize(logits_s4, (n, th4 * 4, tw4 * 4, 1),
                              method="bilinear")
    return jnp.transpose(logits, (0, 3, 1, 2))          # NHWC -> NCHW


def segmentation_model(params, images, masks=None):
    logits = segformer_forward(params, images)
    if masks is not None:
        return logits, dice_plus_bce(logits, masks)
    return logits


# ---------------------------------------------------------------------------
if __name__ == "__main__":
    key = jax.random.PRNGKey(0)
    kp, kx, km = jax.random.split(key, 3)

    images = jax.random.normal(kx, (2, 3, 32, 32), jnp.float32)        # NCHW
    masks = (jax.random.uniform(km, (2, 1, 32, 32)) > 0.5).astype(jnp.float32)

    params = init_params(kp)

    fwd = jax.jit(segformer_forward)
    fwd_loss = jax.jit(lambda p, x, m: segmentation_model(p, x, m))

    logits = fwd(params, images)                                       # no mask
    logits2, loss = fwd_loss(params, images, masks)                    # with mask

    jax.block_until_ready((logits, logits2, loss))
    assert logits.shape == (2, 1, 32, 32)
    assert logits2.shape == (2, 1, 32, 32)
    assert loss.shape == ()
    print("KERNEL_OK")
</pallas_src>

<mosaic_0001>
module attributes {stable_mosaic.version = 11 : i64} {
  func.func @_conv_taps_kernel(%arg0: i32, %arg1: i32, %arg2: memref<1x16x17x12xbf16, #tpu.memory_space<vmem>>, %arg3: memref<1x1x1x17x12xbf16, #tpu.memory_space<vmem>>, %arg4: memref<4x12x8xbf16, #tpu.memory_space<vmem>>, %arg5: memref<1x8xf32, #tpu.memory_space<vmem>>, %arg6: memref<1x8xf32, #tpu.memory_space<vmem>>, %arg7: memref<1x16x16x8xbf16, #tpu.memory_space<vmem>>) attributes {dimension_semantics = [#tpu.dimension_semantics<parallel>, #tpu.dimension_semantics<parallel>], iteration_bounds = array<i64: 2, 1>, scalar_prefetch = 0 : i64, scratch_operands = 0 : i64, tpu.core_type = #tpu.core_type<tc>, window_params = [{transform_indices = @transform_0, window_bounds = array<i64: 1, 16, 17, 12>}, {transform_indices = @transform_1, window_bounds = array<i64: 1, 1, 1, 17, 12>}, {pipeline_mode = #tpu.pipeline_mode<synchronous>, transform_indices = @transform_2, window_bounds = array<i64: 4, 12, 8>}, {pipeline_mode = #tpu.pipeline_mode<synchronous>, transform_indices = @transform_3, window_bounds = array<i64: 1, 8>}, {pipeline_mode = #tpu.pipeline_mode<synchronous>, transform_indices = @transform_4, window_bounds = array<i64: 1, 8>}, {transform_indices = @transform_5, window_bounds = array<i64: 1, 16, 16, 8>}]} {
    %c0 = arith.constant 0 : index
    %c0_0 = arith.constant 0 : index
    %c0_1 = arith.constant 0 : index
    %0 = vector.load %arg4[%c0, %c0_0, %c0_1] : memref<4x12x8xbf16, #tpu.memory_space<vmem>>, vector<1x12x8xbf16>
    %1 = vector.shape_cast %0 : vector<1x12x8xbf16> to vector<12x8xbf16>
    %c1 = arith.constant 1 : index
    %c0_2 = arith.constant 0 : index
    %c0_3 = arith.constant 0 : index
    %2 = vector.load %arg4[%c1, %c0_2, %c0_3] : memref<4x12x8xbf16, #tpu.memory_space<vmem>>, vector<1x12x8xbf16>
    %3 = vector.shape_cast %2 : vector<1x12x8xbf16> to vector<12x8xbf16>
    %c2 = arith.constant 2 : index
    %c0_4 = arith.constant 0 : index
    %c0_5 = arith.constant 0 : index
    %4 = vector.load %arg4[%c2, %c0_4, %c0_5] : memref<4x12x8xbf16, #tpu.memory_space<vmem>>, vector<1x12x8xbf16>
    %5 = vector.shape_cast %4 : vector<1x12x8xbf16> to vector<12x8xbf16>
    %c3 = arith.constant 3 : index
    %c0_6 = arith.constant 0 : index
    %c0_7 = arith.constant 0 : index
    %6 = vector.load %arg4[%c3, %c0_6, %c0_7] : memref<4x12x8xbf16, #tpu.memory_space<vmem>>, vector<1x12x8xbf16>
    %7 = vector.shape_cast %6 : vector<1x12x8xbf16> to vector<12x8xbf16>
    %c0_8 = arith.constant 0 : index
    %c0_9 = arith.constant 0 : index
    %8 = vector.load %arg5[%c0_8, %c0_9] : memref<1x8xf32, #tpu.memory_space<vmem>>, vector<1x8xf32>
    %c0_10 = arith.constant 0 : index
    %c0_11 = arith.constant 0 : index
    %9 = vector.load %arg6[%c0_10, %c0_11] : memref<1x8xf32, #tpu.memory_space<vmem>>, vector<1x8xf32>
    %c0_12 = arith.constant 0 : index
    %c0_13 = arith.constant 0 : index
    %c0_14 = arith.constant 0 : index
    %c0_15 = arith.constant 0 : index
    %10 = vector.load %arg2[%c0_12, %c0_13, %c0_14, %c0_15] : memref<1x16x17x12xbf16, #tpu.memory_space<vmem>>, vector<1x1x17x12xbf16>
    %11 = vector.shape_cast %10 : vector<1x1x17x12xbf16> to vector<17x12xbf16>
    %12 = vector.extract_strided_slice %11 {offsets = [0, 0], sizes = [16, 12], strides = [1, 1]} : vector<17x12xbf16> to vector<16x12xbf16>
    %cst = arith.constant dense<0.000000e+00> : vector<16x8xf32>
    %13 = tpu.matmul %12, %1, %cst {dimension_numbers = #tpu.dot_dimension_numbers<[1], [0], [0], [1], [0, 0, 1, 1], [], []>} : vector<16x12xbf16>, vector<12x8xbf16>, vector<16x8xf32> -> vector<16x8xf32>
    %c0_16 = arith.constant 0 : index
    %c0_17 = arith.constant 0 : index
    %c0_18 = arith.constant 0 : index
    %c0_19 = arith.constant 0 : index
    %14 = vector.load %arg2[%c0_16, %c0_17, %c0_18, %c0_19] : memref<1x16x17x12xbf16, #tpu.memory_space<vmem>>, vector<1x1x17x12xbf16>
    %15 = vector.shape_cast %14 : vector<1x1x17x12xbf16> to vector<17x12xbf16>
    %16 = vector.extract_strided_slice %15 {offsets = [1, 0], sizes = [16, 12], strides = [1, 1]} : vector<17x12xbf16> to vector<16x12xbf16>
    %cst_20 = arith.constant dense<0.000000e+00> : vector<16x8xf32>
    %17 = tpu.matmul %16, %3, %cst_20 {dimension_numbers = #tpu.dot_dimension_numbers<[1], [0], [0], [1], [0, 0, 1, 1], [], []>} : vector<16x12xbf16>, vector<12x8xbf16>, vector<16x8xf32> -> vector<16x8xf32>
    %18 = arith.addf %13, %17 : vector<16x8xf32>
    %c0_21 = arith.constant 0 : index
    %c1_22 = arith.constant 1 : index
    %c0_23 = arith.constant 0 : index
    %c0_24 = arith.constant 0 : index
    %19 = vector.load %arg2[%c0_21, %c1_22, %c0_23, %c0_24] : memref<1x16x17x12xbf16, #tpu.memory_space<vmem>>, vector<1x1x17x12xbf16>
    %20 = vector.shape_cast %19 : vector<1x1x17x12xbf16> to vector<17x12xbf16>
    %21 = vector.extract_strided_slice %20 {offsets = [0, 0], sizes = [16, 12], strides = [1, 1]} : vector<17x12xbf16> to vector<16x12xbf16>
    %cst_25 = arith.constant dense<0.000000e+00> : vector<16x8xf32>
    %22 = tpu.matmul %21, %5, %cst_25 {dimension_numbers = #tpu.dot_dimension_numbers<[1], [0], [0], [1], [0, 0, 1, 1], [], []>} : vector<16x12xbf16>, vector<12x8xbf16>, vector<16x8xf32> -> vector<16x8xf32>
    %23 = arith.addf %18, %22 : vector<16x8xf32>
    %c0_26 = arith.constant 0 : index
    %c1_27 = arith.constant 1 : index
    %c0_28 = arith.constant 0 : index
    %c0_29 = arith.constant 0 : index
    %24 = vector.load %arg2[%c0_26, %c1_27, %c0_28, %c0_29] : memref<1x16x17x12xbf16, #tpu.memory_space<vmem>>, vector<1x1x17x12xbf16>
    %25 = vector.shape_cast %24 : vector<1x1x17x12xbf16> to vector<17x12xbf16>
    %26 = vector.extract_strided_slice %25 {offsets = [1, 0], sizes = [16, 12], strides = [1, 1]} : vector<17x12xbf16> to vector<16x12xbf16>
    %cst_30 = arith.constant dense<0.000000e+00> : vector<16x8xf32>
    %27 = tpu.matmul %26, %7, %cst_30 {dimension_numbers = #tpu.dot_dimension_numbers<[1], [0], [0], [1], [0, 0, 1, 1], [], []>} : vector<16x12xbf16>, vector<12x8xbf16>, vector<16x8xf32> -> vector<16x8xf32>
    %28 = arith.addf %23, %27 : vector<16x8xf32>
    %29 = vector.broadcast %8 : vector<1x8xf32> to vector<16x8xf32>
    %30 = arith.mulf %28, %29 : vector<16x8xf32>
    %31 = vector.broadcast %9 : vector<1x8xf32> to vector<16x8xf32>
    %32 = arith.addf %30, %31 : vector<16x8xf32>
    %cst_31 = arith.constant 0.000000e+00 : f32
    %33 = vector.broadcast %cst_31 : f32 to vector<16x8xf32>
    %34 = arith.maximumf %32, %33 : vector<16x8xf32>
    %35 = arith.truncf %34 : vector<16x8xf32> to vector<16x8xbf16>
    %c0_32 = arith.constant 0 : index
    %c0_33 = arith.constant 0 : index
    %c0_34 = arith.constant 0 : index
    %c0_35 = arith.constant 0 : index
    %36 = vector.load %arg7[%c0_32, %c0_33, %c0_34, %c0_35] : memref<1x16x16x8xbf16, #tpu.memory_space<vmem>>, vector<1x1x16x8xbf16>
    %37 = vector.shape_cast %36 : vector<1x1x16x8xbf16> to vector<16x8xbf16>
    %38 = vector.shape_cast %35 : vector<16x8xbf16> to vector<1x1x16x8xbf16>
    tpu.vector_store %arg7[%c0_32, %c0_33, %c0_34, %c0_35], %38 {strides = array<i32>} : memref<1x16x16x8xbf16, #tpu.memory_space<vmem>>, vector<1x1x16x8xbf16>,
    %c0_36 = arith.constant 0 : index
    %c1_37 = arith.constant 1 : index
    %c0_38 = arith.constant 0 : index
    %c0_39 = arith.constant 0 : index
    %39 = vector.load %arg2[%c0_36, %c1_37, %c0_38, %c0_39] : memref<1x16x17x12xbf16, #tpu.memory_space<vmem>>, vector<1x1x17x12xbf16>
    %40 = vector.shape_cast %39 : vector<1x1x17x12xbf16> to vector<17x12xbf16>
    %41 = vector.extract_strided_slice %40 {offsets = [0, 0], sizes = [16, 12], strides = [1, 1]} : vector<17x12xbf16> to vector<16x12xbf16>
    %cst_40 = arith.constant dense<0.000000e+00> : vector<16x8xf32>
    %42 = tpu.matmul %41, %1, %cst_40 {dimension_numbers = #tpu.dot_dimension_numbers<[1], [0], [0], [1], [0, 0, 1, 1], [], []>} : vector<16x12xbf16>, vector<12x8xbf16>, vector<16x8xf32> -> vector<16x8xf32>
    %c0_41 = arith.constant 0 : index
    %c1_42 = arith.constant 1 : index
    %c0_43 = arith.constant 0 : index
    %c0_44 = arith.constant 0 : index
    %43 = vector.load %arg2[%c0_41, %c1_42, %c0_43, %c0_44] : memref<1x16x17x12xbf16, #tpu.memory_space<vmem>>, vector<1x1x17x12xbf16>
    %44 = vector.shape_cast %43 : vector<1x1x17x12xbf16> to vector<17x12xbf16>
    %45 = vector.extract_strided_slice %44 {offsets = [1, 0], sizes = [16, 12], strides = [1, 1]} : vector<17x12xbf16> to vector<16x12xbf16>
    %cst_45 = arith.constant dense<0.000000e+00> : vector<16x8xf32>
    %46 = tpu.matmul %45, %3, %cst_45 {dimension_numbers = #tpu.dot_dimension_numbers<[1], [0], [0], [1], [0, 0, 1, 1], [], []>} : vector<16x12xbf16>, vector<12x8xbf16>, vector<16x8xf32> -> vector<16x8xf32>
    %47 = arith.addf %42, %46 : vector<16x8xf32>
    %c0_46 = arith.constant 0 : index
    %c2_47 = arith.constant 2 : index
    %c0_48 = arith.constant 0 : index
    %c0_49 = arith.constant 0 : index
    %48 = vector.load %arg2[%c0_46, %c2_47, %c0_48, %c0_49] : memref<1x16x17x12xbf16, #tpu.memory_space<vmem>>, vector<1x1x17x12xbf16>
    %49 = vector.shape_cast %48 : vector<1x1x17x12xbf16> to vector<17x12xbf16>
    %50 = vector.extract_strided_slice %49 {offsets = [0, 0], sizes = [16, 12], strides = [1, 1]} : vector<17x12xbf16> to vector<16x12xbf16>
    %cst_50 = arith.constant dense<0.000000e+00> : vector<16x8xf32>
    %51 = tpu.matmul %50, %5, %cst_50 {dimension_numbers = #tpu.dot_dimension_numbers<[1], [0], [0], [1], [0, 0, 1, 1], [], []>} : vector<16x12xbf16>, vector<12x8xbf16>, vector<16x8xf32> -> vector<16x8xf32>
    %52 = arith.addf %47, %51 : vector<16x8xf32>
    %c0_51 = arith.constant 0 : index
    %c2_52 = arith.constant 2 : index
    %c0_53 = arith.constant 0 : index
    %c0_54 = arith.constant 0 : index
    %53 = vector.load %arg2[%c0_51, %c2_52, %c0_53, %c0_54] : memref<1x16x17x12xbf16, #tpu.memory_space<vmem>>, vector<1x1x17x12xbf16>
    %54 = vector.shape_cast %53 : vector<1x1x17x12xbf16> to vector<17x12xbf16>
    %55 = vector.extract_strided_slice %54 {offsets = [1, 0], sizes = [16, 12], strides = [1, 1]} : vector<17x12xbf16> to vector<16x12xbf16>
    %cst_55 = arith.constant dense<0.000000e+00> : vector<16x8xf32>
    %56 = tpu.matmul %55, %7, %cst_55 {dimension_numbers = #tpu.dot_dimension_numbers<[1], [0], [0], [1], [0, 0, 1, 1], [], []>} : vector<16x12xbf16>, vector<12x8xbf16>, vector<16x8xf32> -> vector<16x8xf32>
    %57 = arith.addf %52, %56 : vector<16x8xf32>
    %58 = vector.broadcast %8 : vector<1x8xf32> to vector<16x8xf32>
    %59 = arith.mulf %57, %58 : vector<16x8xf32>
    %60 = vector.broadcast %9 : vector<1x8xf32> to vector<16x8xf32>
    %61 = arith.addf %59, %60 : vector<16x8xf32>
    %cst_56 = arith.constant 0.000000e+00 : f32
    %62 = vector.broadcast %cst_56 : f32 to vector<16x8xf32>
    %63 = arith.maximumf %61, %62 : vector<16x8xf32>
    %64 = arith.truncf %63 : vector<16x8xf32> to vector<16x8xbf16>
    %c0_57 = arith.constant 0 : index
    %c1_58 = arith.constant 1 : index
    %c0_59 = arith.constant 0 : index
    %c0_60 = arith.constant 0 : index
    %65 = vector.load %arg7[%c0_57, %c1_58, %c0_59, %c0_60] : memref<1x16x16x8xbf16, #tpu.memory_space<vmem>>, vector<1x1x16x8xbf16>
    %66 = vector.shape_cast %65 : vector<1x1x16x8xbf16> to vector<16x8xbf16>
    %67 = vector.shape_cast %64 : vector<16x8xbf16> to vector<1x1x16x8xbf16>
    tpu.vector_store %arg7[%c0_57, %c1_58, %c0_59, %c0_60], %67 {strides = array<i32>} : memref<1x16x16x8xbf16, #tpu.memory_space<vmem>>, vector<1x1x16x8xbf16>,
    %c0_61 = arith.constant 0 : index
    %c2_62 = arith.constant 2 : index
    %c0_63 = arith.constant 0 : index
    %c0_64 = arith.constant 0 : index
    %68 = vector.load %arg2[%c0_61, %c2_62, %c0_63, %c0_64] : memref<1x16x17x12xbf16, #tpu.memory_space<vmem>>, vector<1x1x17x12xbf16>
    %69 = vector.shape_cast %68 : vector<1x1x17x12xbf16> to vector<17x12xbf16>
    %70 = vector.extract_strided_slice %69 {offsets = [0, 0], sizes = [16, 12], strides = [1, 1]} : vector<17x12xbf16> to vector<16x12xbf16>
    %cst_65 = arith.constant dense<0.000000e+00> : vector<16x8xf32>
    %71 = tpu.matmul %70, %1, %cst_65 {dimension_numbers = #tpu.dot_dimension_numbers<[1], [0], [0], [1], [0, 0, 1, 1], [], []>} : vector<16x12xbf16>, vector<12x8xbf16>, vector<16x8xf32> -> vector<16x8xf32>
    %c0_66 = arith.constant 0 : index
    %c2_67 = arith.constant 2 : index
    %c0_68 = arith.constant 0 : index
    %c0_69 = arith.constant 0 : index
    %72 = vector.load %arg2[%c0_66, %c2_67, %c0_68, %c0_69] : memref<1x16x17x12xbf16, #tpu.memory_space<vmem>>, vector<1x1x17x12xbf16>
    %73 = vector.shape_cast %72 : vector<1x1x17x12xbf16> to vector<17x12xbf16>
    %74 = vector.extract_strided_slice %73 {offsets = [1, 0], sizes = [16, 12], strides = [1, 1]} : vector<17x12xbf16> to vector<16x12xbf16>
    %cst_70 = arith.constant dense<0.000000e+00> : vector<16x8xf32>
    %75 = tpu.matmul %74, %3, %cst_70 {dimension_numbers = #tpu.dot_dimension_numbers<[1], [0], [0], [1], [0, 0, 1, 1], [], []>} : vector<16x12xbf16>, vector<12x8xbf16>, vector<16x8xf32> -> vector<16x8xf32>
    %76 = arith.addf %71, %75 : vector<16x8xf32>
    %c0_71 = arith.constant 0 : index
    %c3_72 = arith.constant 3 : index
    %c0_73 = arith.constant 0 : index
    %c0_74 = arith.constant 0 : index
    %77 = vector.load %arg2[%c0_71, %c3_72, %c0_73, %c0_74] : memref<1x16x17x12xbf16, #tpu.memory_space<vmem>>, vector<1x1x17x12xbf16>
    %78 = vector.shape_cast %77 : vector<1x1x17x12xbf16> to vector<17x12xbf16>
    %79 = vector.extract_strided_slice %78 {offsets = [0, 0], sizes = [16, 12], strides = [1, 1]} : vector<17x12xbf16> to vector<16x12xbf16>
    %cst_75 = arith.constant dense<0.000000e+00> : vector<16x8xf32>
    %80 = tpu.matmul %79, %5, %cst_75 {dimension_numbers = #tpu.dot_dimension_numbers<[1], [0], [0], [1], [0, 0, 1, 1], [], []>} : vector<16x12xbf16>, vector<12x8xbf16>, vector<16x8xf32> -> vector<16x8xf32>
    %81 = arith.addf %76, %80 : vector<16x8xf32>
    %c0_76 = arith.constant 0 : index
    %c3_77 = arith.constant 3 : index
    %c0_78 = arith.constant 0 : index
    %c0_79 = arith.constant 0 : index
    %82 = vector.load %arg2[%c0_76, %c3_77, %c0_78, %c0_79] : memref<1x16x17x12xbf16, #tpu.memory_space<vmem>>, vector<1x1x17x12xbf16>
    %83 = vector.shape_cast %82 : vector<1x1x17x12xbf16> to vector<17x12xbf16>
    %84 = vector.extract_strided_slice %83 {offsets = [1, 0], sizes = [16, 12], strides = [1, 1]} : vector<17x12xbf16> to vector<16x12xbf16>
    %cst_80 = arith.constant dense<0.000000e+00> : vector<16x8xf32>
    %85 = tpu.matmul %84, %7, %cst_80 {dimension_numbers = #tpu.dot_dimension_numbers<[1], [0], [0], [1], [0, 0, 1, 1], [], []>} : vector<16x12xbf16>, vector<12x8xbf16>, vector<16x8xf32> -> vector<16x8xf32>
    %86 = arith.addf %81, %85 : vector<16x8xf32>
    %87 = vector.broadcast %8 : vector<1x8xf32> to vector<16x8xf32>
    %88 = arith.mulf %86, %87 : vector<16x8xf32>
    %89 = vector.broadcast %9 : vector<1x8xf32> to vector<16x8xf32>
    %90 = arith.addf %88, %89 : vector<16x8xf32>
    %cst_81 = arith.constant 0.000000e+00 : f32
    %91 = vector.broadcast %cst_81 : f32 to vector<16x8xf32>
    %92 = arith.maximumf %90, %91 : vector<16x8xf32>
    %93 = arith.truncf %92 : vector<16x8xf32> to vector<16x8xbf16>
    %c0_82 = arith.constant 0 : index
    %c2_83 = arith.constant 2 : index
    %c0_84 = arith.constant 0 : index
    %c0_85 = arith.constant 0 : index
    %94 = vector.load %arg7[%c0_82, %c2_83, %c0_84, %c0_85] : memref<1x16x16x8xbf16, #tpu.memory_space<vmem>>, vector<1x1x16x8xbf16>
    %95 = vector.shape_cast %94 : vector<1x1x16x8xbf16> to vector<16x8xbf16>
    %96 = vector.shape_cast %93 : vector<16x8xbf16> to vector<1x1x16x8xbf16>
    tpu.vector_store %arg7[%c0_82, %c2_83, %c0_84, %c0_85], %96 {strides = array<i32>} : memref<1x16x16x8xbf16, #tpu.memory_space<vmem>>, vector<1x1x16x8xbf16>,
    %c0_86 = arith.constant 0 : index
    %c3_87 = arith.constant 3 : index
    %c0_88 = arith.constant 0 : index
    %c0_89 = arith.constant 0 : index
    %97 = vector.load %arg2[%c0_86, %c3_87, %c0_88, %c0_89] : memref<1x16x17x12xbf16, #tpu.memory_space<vmem>>, vector<1x1x17x12xbf16>
    %98 = vector.shape_cast %97 : vector<1x1x17x12xbf16> to vector<17x12xbf16>
    %99 = vector.extract_strided_slice %98 {offsets = [0, 0], sizes = [16, 12], strides = [1, 1]} : vector<17x12xbf16> to vector<16x12xbf16>
    %cst_90 = arith.constant dense<0.000000e+00> : vector<16x8xf32>
    %100 = tpu.matmul %99, %1, %cst_90 {dimension_numbers = #tpu.dot_dimension_numbers<[1], [0], [0], [1], [0, 0, 1, 1], [], []>} : vector<16x12xbf16>, vector<12x8xbf16>, vector<16x8xf32> -> vector<16x8xf32>
    %c0_91 = arith.constant 0 : index
    %c3_92 = arith.constant 3 : index
    %c0_93 = arith.constant 0 : index
    %c0_94 = arith.constant 0 : index
    %101 = vector.load %arg2[%c0_91, %c3_92, %c0_93, %c0_94] : memref<1x16x17x12xbf16, #tpu.memory_space<vmem>>, vector<1x1x17x12xbf16>
    %102 = vector.shape_cast %101 : vector<1x1x17x12xbf16> to vector<17x12xbf16>
    %103 = vector.extract_strided_slice %102 {offsets = [1, 0], sizes = [16, 12], strides = [1, 1]} : vector<17x12xbf16> to vector<16x12xbf16>
    %cst_95 = arith.constant dense<0.000000e+00> : vector<16x8xf32>
    %104 = tpu.matmul %103, %3, %cst_95 {dimension_numbers = #tpu.dot_dimension_numbers<[1], [0], [0], [1], [0, 0, 1, 1], [], []>} : vector<16x12xbf16>, vector<12x8xbf16>, vector<16x8xf32> -> vector<16x8xf32>
    %105 = arith.addf %100, %104 : vector<16x8xf32>
    %c0_96 = arith.constant 0 : index
    %c4 = arith.constant 4 : index
    %c0_97 = arith.constant 0 : index
    %c0_98 = arith.constant 0 : index
    %106 = vector.load %arg2[%c0_96, %c4, %c0_97, %c0_98] : memref<1x16x17x12xbf16, #tpu.memory_space<vmem>>, vector<1x1x17x12xbf16>
    %107 = vector.shape_cast %106 : vector<1x1x17x12xbf16> to vector<17x12xbf16>
    %108 = vector.extract_strided_slice %107 {offsets = [0, 0], sizes = [16, 12], strides = [1, 1]} : vector<17x12xbf16> to vector<16x12xbf16>
    %cst_99 = arith.constant dense<0.000000e+00> : vector<16x8xf32>
    %109 = tpu.matmul %108, %5, %cst_99 {dimension_numbers = #tpu.dot_dimension_numbers<[1], [0], [0], [1], [0, 0, 1, 1], [], []>} : vector<16x12xbf16>, vector<12x8xbf16>, vector<16x8xf32> -> vector<16x8xf32>
    %110 = arith.addf %105, %109 : vector<16x8xf32>
    %c0_100 = arith.constant 0 : index
    %c4_101 = arith.constant 4 : index
    %c0_102 = arith.constant 0 : index
    %c0_103 = arith.constant 0 : index
    %111 = vector.load %arg2[%c0_100, %c4_101, %c0_102, %c0_103] : memref<1x16x17x12xbf16, #tpu.memory_space<vmem>>, vector<1x1x17x12xbf16>
    %112 = vector.shape_cast %111 : vector<1x1x17x12xbf16> to vector<17x12xbf16>
    %113 = vector.extract_strided_slice %112 {offsets = [1, 0], sizes = [16, 12], strides = [1, 1]} : vector<17x12xbf16> to vector<16x12xbf16>
    %cst_104 = arith.constant dense<0.000000e+00> : vector<16x8xf32>
    %114 = tpu.matmul %113, %7, %cst_104 {dimension_numbers = #tpu.dot_dimension_numbers<[1], [0], [0], [1], [0, 0, 1, 1], [], []>} : vector<16x12xbf16>, vector<12x8xbf16>, vector<16x8xf32> -> vector<16x8xf32>
    %115 = arith.addf %110, %114 : vector<16x8xf32>
    %116 = vector.broadcast %8 : vector<1x8xf32> to vector<16x8xf32>
    %117 = arith.mulf %115, %116 : vector<16x8xf32>
    %118 = vector.broadcast %9 : vector<1x8xf32> to vector<16x8xf32>
    %119 = arith.addf %117, %118 : vector<16x8xf32>
    %cst_105 = arith.constant 0.000000e+00 : f32
    %120 = vector.broadcast %cst_105 : f32 to vector<16x8xf32>
    %121 = arith.maximumf %119, %120 : vector<16x8xf32>
    %122 = arith.truncf %121 : vector<16x8xf32> to vector<16x8xbf16>
    %c0_106 = arith.constant 0 : index
    %c3_107 = arith.constant 3 : index
    %c0_108 = arith.constant 0 : index
    %c0_109 = arith.constant 0 : index
    %123 = vector.load %arg7[%c0_106, %c3_107, %c0_108, %c0_109] : memref<1x16x16x8xbf16, #tpu.memory_space<vmem>>, vector<1x1x16x8xbf16>
    %124 = vector.shape_cast %123 : vector<1x1x16x8xbf16> to vector<16x8xbf16>
    %125 = vector.shape_cast %122 : vector<16x8xbf16> to vector<1x1x16x8xbf16>
    tpu.vector_store %arg7[%c0_106, %c3_107, %c0_108, %c0_109], %125 {strides = array<i32>} : memref<1x16x16x8xbf16, #tpu.memory_space<vmem>>, vector<1x1x16x8xbf16>,
    %c0_110 = arith.constant 0 : index
    %c4_111 = arith.constant 4 : index
    %c0_112 = arith.constant 0 : index
    %c0_113 = arith.constant 0 : index
    %126 = vector.load %arg2[%c0_110, %c4_111, %c0_112, %c0_113] : memref<1x16x17x12xbf16, #tpu.memory_space<vmem>>, vector<1x1x17x12xbf16>
    %127 = vector.shape_cast %126 : vector<1x1x17x12xbf16> to vector<17x12xbf16>
    %128 = vector.extract_strided_slice %127 {offsets = [0, 0], sizes = [16, 12], strides = [1, 1]} : vector<17x12xbf16> to vector<16x12xbf16>
    %cst_114 = arith.constant dense<0.000000e+00> : vector<16x8xf32>
    %129 = tpu.matmul %128, %1, %cst_114 {dimension_numbers = #tpu.dot_dimension_numbers<[1], [0], [0], [1], [0, 0, 1, 1], [], []>} : vector<16x12xbf16>, vector<12x8xbf16>, vector<16x8xf32> -> vector<16x8xf32>
    %c0_115 = arith.constant 0 : index
    %c4_116 = arith.constant 4 : index
    %c0_117 = arith.constant 0 : index
    %c0_118 = arith.constant 0 : index
    %130 = vector.load %arg2[%c0_115, %c4_116, %c0_117, %c0_118] : memref<1x16x17x12xbf16, #tpu.memory_space<vmem>>, vector<1x1x17x12xbf16>
    %131 = vector.shape_cast %130 : vector<1x1x17x12xbf16> to vector<17x12xbf16>
    %132 = vector.extract_strided_slice %131 {offsets = [1, 0], sizes = [16, 12], strides = [1, 1]} : vector<17x12xbf16> to vector<16x12xbf16>
    %cst_119 = arith.constant dense<0.000000e+00> : vector<16x8xf32>
    %133 = tpu.matmul %132, %3, %cst_119 {dimension_numbers = #tpu.dot_dimension_numbers<[1], [0], [0], [1], [0, 0, 1, 1], [], []>} : vector<16x12xbf16>, vector<12x8xbf16>, vector<16x8xf32> -> vector<16x8xf32>
    %134 = arith.addf %129, %133 : vector<16x8xf32>
    %c0_120 = arith.constant 0 : index
    %c5 = arith.constant 5 : index
    %c0_121 = arith.constant 0 : index
    %c0_122 = arith.constant 0 : index
    %135 = vector.load %arg2[%c0_120, %c5, %c0_121, %c0_122] : memref<1x16x17x12xbf16, #tpu.memory_space<vmem>>, vector<1x1x17x12xbf16>
    %136 = vector.shape_cast %135 : vector<1x1x17x12xbf16> to vector<17x12xbf16>
    %137 = vector.extract_strided_slice %136 {offsets = [0, 0], sizes = [16, 12], strides = [1, 1]} : vector<17x12xbf16> to vector<16x12xbf16>
    %cst_123 = arith.constant dense<0.000000e+00> : vector<16x8xf32>
    %138 = tpu.matmul %137, %5, %cst_123 {dimension_numbers = #tpu.dot_dimension_numbers<[1], [0], [0], [1], [0, 0, 1, 1], [], []>} : vector<16x12xbf16>, vector<12x8xbf16>, vector<16x8xf32> -> vector<16x8xf32>
    %139 = arith.addf %134, %138 : vector<16x8xf32>
    %c0_124 = arith.constant 0 : index
    %c5_125 = arith.constant 5 : index
    %c0_126 = arith.constant 0 : index
    %c0_127 = arith.constant 0 : index
    %140 = vector.load %arg2[%c0_124, %c5_125, %c0_126, %c0_127] : memref<1x16x17x12xbf16, #tpu.memory_space<vmem>>, vector<1x1x17x12xbf16>
    %141 = vector.shape_cast %140 : vector<1x1x17x12xbf16> to vector<17x12xbf16>
    %142 = vector.extract_strided_slice %141 {offsets = [1, 0], sizes = [16, 12], strides = [1, 1]} : vector<17x12xbf16> to vector<16x12xbf16>
    %cst_128 = arith.constant dense<0.000000e+00> : vector<16x8xf32>
    %143 = tpu.matmul %142, %7, %cst_128 {dimension_numbers = #tpu.dot_dimension_numbers<[1], [0], [0], [1], [0, 0, 1, 1], [], []>} : vector<16x12xbf16>, vector<12x8xbf16>, vector<16x8xf32> -> vector<16x8xf32>
    %144 = arith.addf %139, %143 : vector<16x8xf32>
    %145 = vector.broadcast %8 : vector<1x8xf32> to vector<16x8xf32>
    %146 = arith.mulf %144, %145 : vector<16x8xf32>
    %147 = vector.broadcast %9 : vector<1x8xf32> to vector<16x8xf32>
    %148 = arith.addf %146, %147 : vector<16x8xf32>
    %cst_129 = arith.constant 0.000000e+00 : f32
    %149 = vector.broadcast %cst_129 : f32 to vector<16x8xf32>
    %150 = arith.maximumf %148, %149 : vector<16x8xf32>
    %151 = arith.truncf %150 : vector<16x8xf32> to vector<16x8xbf16>
    %c0_130 = arith.constant 0 : index
    %c4_131 = arith.constant 4 : index
    %c0_132 = arith.constant 0 : index
    %c0_133 = arith.constant 0 : index
    %152 = vector.load %arg7[%c0_130, %c4_131, %c0_132, %c0_133] : memref<1x16x16x8xbf16, #tpu.memory_space<vmem>>, vector<1x1x16x8xbf16>
    %153 = vector.shape_cast %152 : vector<1x1x16x8xbf16> to vector<16x8xbf16>
    %154 = vector.shape_cast %151 : vector<16x8xbf16> to vector<1x1x16x8xbf16>
    tpu.vector_store %arg7[%c0_130, %c4_131, %c0_132, %c0_133], %154 {strides = array<i32>} : memref<1x16x16x8xbf16, #tpu.memory_space<vmem>>, vector<1x1x16x8xbf16>,
    %c0_134 = arith.constant 0 : index
    %c5_135 = arith.constant 5 : index
    %c0_136 = arith.constant 0 : index
    %c0_137 = arith.constant 0 : index
    %155 = vector.load %arg2[%c0_134, %c5_135, %c0_136, %c0_137] : memref<1x16x17x12xbf16, #tpu.memory_space<vmem>>, vector<1x1x17x12xbf16>
    %156 = vector.shape_cast %155 : vector<1x1x17x12xbf16> to vector<17x12xbf16>
    %157 = vector.extract_strided_slice %156 {offsets = [0, 0], sizes = [16, 12], strides = [1, 1]} : vector<17x12xbf16> to vector<16x12xbf16>
    %cst_138 = arith.constant dense<0.000000e+00> : vector<16x8xf32>
    %158 = tpu.matmul %157, %1, %cst_138 {dimension_numbers = #tpu.dot_dimension_numbers<[1], [0], [0], [1], [0, 0, 1, 1], [], []>} : vector<16x12xbf16>, vector<12x8xbf16>, vector<16x8xf32> -> vector<16x8xf32>
    %c0_139 = arith.constant 0 : index
    %c5_140 = arith.constant 5 : index
    %c0_141 = arith.constant 0 : index
    %c0_142 = arith.constant 0 : index
    %159 = vector.load %arg2[%c0_139, %c5_140, %c0_141, %c0_142] : memref<1x16x17x12xbf16, #tpu.memory_space<vmem>>, vector<1x1x17x12xbf16>
    %160 = vector.shape_cast %159 : vector<1x1x17x12xbf16> to vector<17x12xbf16>
    %161 = vector.extract_strided_slice %160 {offsets = [1, 0], sizes = [16, 12], strides = [1, 1]} : vector<17x12xbf16> to vector<16x12xbf16>
    %cst_143 = arith.constant dense<0.000000e+00> : vector<16x8xf32>
    %162 = tpu.matmul %161, %3, %cst_143 {dimension_numbers = #tpu.dot_dimension_numbers<[1], [0], [0], [1], [0, 0, 1, 1], [], []>} : vector<16x12xbf16>, vector<12x8xbf16>, vector<16x8xf32> -> vector<16x8xf32>
    %163 = arith.addf %158, %162 : vector<16x8xf32>
    %c0_144 = arith.constant 0 : index
    %c6 = arith.constant 6 : index
    %c0_145 = arith.constant 0 : index
    %c0_146 = arith.constant 0 : index
    %164 = vector.load %arg2[%c0_144, %c6, %c0_145, %c0_146] : memref<1x16x17x12xbf16, #tpu.memory_space<vmem>>, vector<1x1x17x12xbf16>
    %165 = vector.shape_cast %164 : vector<1x1x17x12xbf16> to vector<17x12xbf16>
    %166 = vector.extract_strided_slice %165 {offsets = [0, 0], sizes = [16, 12], strides = [1, 1]} : vector<17x12xbf16> to vector<16x12xbf16>
    %cst_147 = arith.constant dense<0.000000e+00> : vector<16x8xf32>
    %167 = tpu.matmul %166, %5, %cst_147 {dimension_numbers = #tpu.dot_dimension_numbers<[1], [0], [0], [1], [0, 0, 1, 1], [], []>} : vector<16x12xbf16>, vector<12x8xbf16>, vector<16x8xf32> -> vector<16x8xf32>
    %168 = arith.addf %163, %167 : vector<16x8xf32>
    %c0_148 = arith.constant 0 : index
    %c6_149 = arith.constant 6 : index
    %c0_150 = arith.constant 0 : index
    %c0_151 = arith.constant 0 : index
    %169 = vector.load %arg2[%c0_148, %c6_149, %c0_150, %c0_151] : memref<1x16x17x12xbf16, #tpu.memory_space<vmem>>, vector<1x1x17x12xbf16>
    %170 = vector.shape_cast %169 : vector<1x1x17x12xbf16> to vector<17x12xbf16>
    %171 = vector.extract_strided_slice %170 {offsets = [1, 0], sizes = [16, 12], strides = [1, 1]} : vector<17x12xbf16> to vector<16x12xbf16>
    %cst_152 = arith.constant dense<0.000000e+00> : vector<16x8xf32>
    %172 = tpu.matmul %171, %7, %cst_152 {dimension_numbers = #tpu.dot_dimension_numbers<[1], [0], [0], [1], [0, 0, 1, 1], [], []>} : vector<16x12xbf16>, vector<12x8xbf16>, vector<16x8xf32> -> vector<16x8xf32>
    %173 = arith.addf %168, %172 : vector<16x8xf32>
    %174 = vector.broadcast %8 : vector<1x8xf32> to vector<16x8xf32>
    %175 = arith.mulf %173, %174 : vector<16x8xf32>
    %176 = vector.broadcast %9 : vector<1x8xf32> to vector<16x8xf32>
    %177 = arith.addf %175, %176 : vector<16x8xf32>
    %cst_153 = arith.constant 0.000000e+00 : f32
    %178 = vector.broadcast %cst_153 : f32 to vector<16x8xf32>
    %179 = arith.maximumf %177, %178 : vector<16x8xf32>
    %180 = arith.truncf %179 : vector<16x8xf32> to vector<16x8xbf16>
    %c0_154 = arith.constant 0 : index
    %c5_155 = arith.constant 5 : index
    %c0_156 = arith.constant 0 : index
    %c0_157 = arith.constant 0 : index
    %181 = vector.load %arg7[%c0_154, %c5_155, %c0_156, %c0_157] : memref<1x16x16x8xbf16, #tpu.memory_space<vmem>>, vector<1x1x16x8xbf16>
    %182 = vector.shape_cast %181 : vector<1x1x16x8xbf16> to vector<16x8xbf16>
    %183 = vector.shape_cast %180 : vector<16x8xbf16> to vector<1x1x16x8xbf16>
    tpu.vector_store %arg7[%c0_154, %c5_155, %c0_156, %c0_157], %183 {strides = array<i32>} : memref<1x16x16x8xbf16, #tpu.memory_space<vmem>>, vector<1x1x16x8xbf16>,
    %c0_158 = arith.constant 0 : index
    %c6_159 = arith.constant 6 : index
    %c0_160 = arith.constant 0 : index
    %c0_161 = arith.constant 0 : index
    %184 = vector.load %arg2[%c0_158, %c6_159, %c0_160, %c0_161] : memref<1x16x17x12xbf16, #tpu.memory_space<vmem>>, vector<1x1x17x12xbf16>
    %185 = vector.shape_cast %184 : vector<1x1x17x12xbf16> to vector<17x12xbf16>
    %186 = vector.extract_strided_slice %185 {offsets = [0, 0], sizes = [16, 12], strides = [1, 1]} : vector<17x12xbf16> to vector<16x12xbf16>
    %cst_162 = arith.constant dense<0.000000e+00> : vector<16x8xf32>
    %187 = tpu.matmul %186, %1, %cst_162 {dimension_numbers = #tpu.dot_dimension_numbers<[1], [0], [0], [1], [0, 0, 1, 1], [], []>} : vector<16x12xbf16>, vector<12x8xbf16>, vector<16x8xf32> -> vector<16x8xf32>
    %c0_163 = arith.constant 0 : index
    %c6_164 = arith.constant 6 : index
    %c0_165 = arith.constant 0 : index
    %c0_166 = arith.constant 0 : index
    %188 = vector.load %arg2[%c0_163, %c6_164, %c0_165, %c0_166] : memref<1x16x17x12xbf16, #tpu.memory_space<vmem>>, vector<1x1x17x12xbf16>
    %189 = vector.shape_cast %188 : vector<1x1x17x12xbf16> to vector<17x12xbf16>
    %190 = vector.extract_strided_slice %189 {offsets = [1, 0], sizes = [16, 12], strides = [1, 1]} : vector<17x12xbf16> to vector<16x12xbf16>
    %cst_167 = arith.constant dense<0.000000e+00> : vector<16x8xf32>
    %191 = tpu.matmul %190, %3, %cst_167 {dimension_numbers = #tpu.dot_dimension_numbers<[1], [0], [0], [1], [0, 0, 1, 1], [], []>} : vector<16x12xbf16>, vector<12x8xbf16>, vector<16x8xf32> -> vector<16x8xf32>
    %192 = arith.addf %187, %191 : vector<16x8xf32>
    %c0_168 = arith.constant 0 : index
    %c7 = arith.constant 7 : index
    %c0_169 = arith.constant 0 : index
    %c0_170 = arith.constant 0 : index
    %193 = vector.load %arg2[%c0_168, %c7, %c0_169, %c0_170] : memref<1x16x17x12xbf16, #tpu.memory_space<vmem>>, vector<1x1x17x12xbf16>
    %194 = vector.shape_cast %193 : vector<1x1x17x12xbf16> to vector<17x12xbf16>
    %195 = vector.extract_strided_slice %194 {offsets = [0, 0], sizes = [16, 12], strides = [1, 1]} : vector<17x12xbf16> to vector<16x12xbf16>
    %cst_171 = arith.constant dense<0.000000e+00> : vector<16x8xf32>
    %196 = tpu.matmul %195, %5, %cst_171 {dimension_numbers = #tpu.dot_dimension_numbers<[1], [0], [0], [1], [0, 0, 1, 1], [], []>} : vector<16x12xbf16>, vector<12x8xbf16>, vector<16x8xf32> -> vector<16x8xf32>
    %197 = arith.addf %192, %196 : vector<16x8xf32>
    %c0_172 = arith.constant 0 : index
    %c7_173 = arith.constant 7 : index
    %c0_174 = arith.constant 0 : index
    %c0_175 = arith.constant 0 : index
    %198 = vector.load %arg2[%c0_172, %c7_173, %c0_174, %c0_175] : memref<1x16x17x12xbf16, #tpu.memory_space<vmem>>, vector<1x1x17x12xbf16>
    %199 = vector.shape_cast %198 : vector<1x1x17x12xbf16> to vector<17x12xbf16>
    %200 = vector.extract_strided_slice %199 {offsets = [1, 0], sizes = [16, 12], strides = [1, 1]} : vector<17x12xbf16> to vector<16x12xbf16>
    %cst_176 = arith.constant dense<0.000000e+00> : vector<16x8xf32>
    %201 = tpu.matmul %200, %7, %cst_176 {dimension_numbers = #tpu.dot_dimension_numbers<[1], [0], [0], [1], [0, 0, 1, 1], [], []>} : vector<16x12xbf16>, vector<12x8xbf16>, vector<16x8xf32> -> vector<16x8xf32>
    %202 = arith.addf %197, %201 : vector<16x8xf32>
    %203 = vector.broadcast %8 : vector<1x8xf32> to vector<16x8xf32>
    %204 = arith.mulf %202, %203 : vector<16x8xf32>
    %205 = vector.broadcast %9 : vector<1x8xf32> to vector<16x8xf32>
    %206 = arith.addf %204, %205 : vector<16x8xf32>
    %cst_177 = arith.constant 0.000000e+00 : f32
    %207 = vector.broadcast %cst_177 : f32 to vector<16x8xf32>
    %208 = arith.maximumf %206, %207 : vector<16x8xf32>
    %209 = arith.truncf %208 : vector<16x8xf32> to vector<16x8xbf16>
    %c0_178 = arith.constant 0 : index
    %c6_179 = arith.constant 6 : index
    %c0_180 = arith.constant 0 : index
    %c0_181 = arith.constant 0 : index
    %210 = vector.load %arg7[%c0_178, %c6_179, %c0_180, %c0_181] : memref<1x16x16x8xbf16, #tpu.memory_space<vmem>>, vector<1x1x16x8xbf16>
    %211 = vector.shape_cast %210 : vector<1x1x16x8xbf16> to vector<16x8xbf16>
    %212 = vector.shape_cast %209 : vector<16x8xbf16> to vector<1x1x16x8xbf16>
    tpu.vector_store %arg7[%c0_178, %c6_179, %c0_180, %c0_181], %212 {strides = array<i32>} : memref<1x16x16x8xbf16, #tpu.memory_space<vmem>>, vector<1x1x16x8xbf16>,
    %c0_182 = arith.constant 0 : index
    %c7_183 = arith.constant 7 : index
    %c0_184 = arith.constant 0 : index
    %c0_185 = arith.constant 0 : index
    %213 = vector.load %arg2[%c0_182, %c7_183, %c0_184, %c0_185] : memref<1x16x17x12xbf16, #tpu.memory_space<vmem>>, vector<1x1x17x12xbf16>
    %214 = vector.shape_cast %213 : vector<1x1x17x12xbf16> to vector<17x12xbf16>
    %215 = vector.extract_strided_slice %214 {offsets = [0, 0], sizes = [16, 12], strides = [1, 1]} : vector<17x12xbf16> to vector<16x12xbf16>
    %cst_186 = arith.constant dense<0.000000e+00> : vector<16x8xf32>
    %216 = tpu.matmul %215, %1, %cst_186 {dimension_numbers = #tpu.dot_dimension_numbers<[1], [0], [0], [1], [0, 0, 1, 1], [], []>} : vector<16x12xbf16>, vector<12x8xbf16>, vector<16x8xf32> -> vector<16x8xf32>
    %c0_187 = arith.constant 0 : index
    %c7_188 = arith.constant 7 : index
    %c0_189 = arith.constant 0 : index
    %c0_190 = arith.constant 0 : index
    %217 = vector.load %arg2[%c0_187, %c7_188, %c0_189, %c0_190] : memref<1x16x17x12xbf16, #tpu.memory_space<vmem>>, vector<1x1x17x12xbf16>
    %218 = vector.shape_cast %217 : vector<1x1x17x12xbf16> to vector<17x12xbf16>
    %219 = vector.extract_strided_slice %218 {offsets = [1, 0], sizes = [16, 12], strides = [1, 1]} : vector<17x12xbf16> to vector<16x12xbf16>
    %cst_191 = arith.constant dense<0.000000e+00> : vector<16x8xf32>
    %220 = tpu.matmul %219, %3, %cst_191 {dimension_numbers = #tpu.dot_dimension_numbers<[1], [0], [0], [1], [0, 0, 1, 1], [], []>} : vector<16x12xbf16>, vector<12x8xbf16>, vector<16x8xf32> -> vector<16x8xf32>
    %221 = arith.addf %216, %220 : vector<16x8xf32>
    %c0_192 = arith.constant 0 : index
    %c8 = arith.constant 8 : index
    %c0_193 = arith.constant 0 : index
    %c0_194 = arith.constant 0 : index
    %222 = vector.load %arg2[%c0_192, %c8, %c0_193, %c0_194] : memref<1x16x17x12xbf16, #tpu.memory_space<vmem>>, vector<1x1x17x12xbf16>
    %223 = vector.shape_cast %222 : vector<1x1x17x12xbf16> to vector<17x12xbf16>
    %224 = vector.extract_strided_slice %223 {offsets = [0, 0], sizes = [16, 12], strides = [1, 1]} : vector<17x12xbf16> to vector<16x12xbf16>
    %cst_195 = arith.constant dense<0.000000e+00> : vector<16x8xf32>
    %225 = tpu.matmul %224, %5, %cst_195 {dimension_numbers = #tpu.dot_dimension_numbers<[1], [0], [0], [1], [0, 0, 1, 1], [], []>} : vector<16x12xbf16>, vector<12x8xbf16>, vector<16x8xf32> -> vector<16x8xf32>
    %226 = arith.addf %221, %225 : vector<16x8xf32>
    %c0_196 = arith.constant 0 : index
    %c8_197 = arith.constant 8 : index
    %c0_198 = arith.constant 0 : index
    %c0_199 = arith.constant 0 : index
    %227 = vector.load %arg2[%c0_196, %c8_197, %c0_198, %c0_199] : memref<1x16x17x12xbf16, #tpu.memory_space<vmem>>, vector<1x1x17x12xbf16>
    %228 = vector.shape_cast %227 : vector<1x1x17x12xbf16> to vector<17x12xbf16>
    %229 = vector.extract_strided_slice %228 {offsets = [1, 0], sizes = [16, 12], strides = [1, 1]} : vector<17x12xbf16> to vector<16x12xbf16>
    %cst_200 = arith.constant dense<0.000000e+00> : vector<16x8xf32>
    %230 = tpu.matmul %229, %7, %cst_200 {dimension_numbers = #tpu.dot_dimension_numbers<[1], [0], [0], [1], [0, 0, 1, 1], [], []>} : vector<16x12xbf16>, vector<12x8xbf16>, vector<16x8xf32> -> vector<16x8xf32>
    %231 = arith.addf %226, %230 : vector<16x8xf32>
    %232 = vector.broadcast %8 : vector<1x8xf32> to vector<16x8xf32>
    %233 = arith.mulf %231, %232 : vector<16x8xf32>
    %234 = vector.broadcast %9 : vector<1x8xf32> to vector<16x8xf32>
    %235 = arith.addf %233, %234 : vector<16x8xf32>
    %cst_201 = arith.constant 0.000000e+00 : f32
    %236 = vector.broadcast %cst_201 : f32 to vector<16x8xf32>
    %237 = arith.maximumf %235, %236 : vector<16x8xf32>
    %238 = arith.truncf %237 : vector<16x8xf32> to vector<16x8xbf16>
    %c0_202 = arith.constant 0 : index
    %c7_203 = arith.constant 7 : index
    %c0_204 = arith.constant 0 : index
    %c0_205 = arith.constant 0 : index
    %239 = vector.load %arg7[%c0_202, %c7_203, %c0_204, %c0_205] : memref<1x16x16x8xbf16, #tpu.memory_space<vmem>>, vector<1x1x16x8xbf16>
    %240 = vector.shape_cast %239 : vector<1x1x16x8xbf16> to vector<16x8xbf16>
    %241 = vector.shape_cast %238 : vector<16x8xbf16> to vector<1x1x16x8xbf16>
    tpu.vector_store %arg7[%c0_202, %c7_203, %c0_204, %c0_205], %241 {strides = array<i32>} : memref<1x16x16x8xbf16, #tpu.memory_space<vmem>>, vector<1x1x16x8xbf16>,
    %c0_206 = arith.constant 0 : index
    %c8_207 = arith.constant 8 : index
    %c0_208 = arith.constant 0 : index
    %c0_209 = arith.constant 0 : index
    %242 = vector.load %arg2[%c0_206, %c8_207, %c0_208, %c0_209] : memref<1x16x17x12xbf16, #tpu.memory_space<vmem>>, vector<1x1x17x12xbf16>
    %243 = vector.shape_cast %242 : vector<1x1x17x12xbf16> to vector<17x12xbf16>
    %244 = vector.extract_strided_slice %243 {offsets = [0, 0], sizes = [16, 12], strides = [1, 1]} : vector<17x12xbf16> to vector<16x12xbf16>
    %cst_210 = arith.constant dense<0.000000e+00> : vector<16x8xf32>
    %245 = tpu.matmul %244, %1, %cst_210 {dimension_numbers = #tpu.dot_dimension_numbers<[1], [0], [0], [1], [0, 0, 1, 1], [], []>} : vector<16x12xbf16>, vector<12x8xbf16>, vector<16x8xf32> -> vector<16x8xf32>
    %c0_211 = arith.constant 0 : index
    %c8_212 = arith.constant 8 : index
    %c0_213 = arith.constant 0 : index
    %c0_214 = arith.constant 0 : index
    %246 = vector.load %arg2[%c0_211, %c8_212, %c0_213, %c0_214] : memref<1x16x17x12xbf16, #tpu.memory_space<vmem>>, vector<1x1x17x12xbf16>
    %247 = vector.shape_cast %246 : vector<1x1x17x12xbf16> to vector<17x12xbf16>
    %248 = vector.extract_strided_slice %247 {offsets = [1, 0], sizes = [16, 12], strides = [1, 1]} : vector<17x12xbf16> to vector<16x12xbf16>
    %cst_215 = arith.constant dense<0.000000e+00> : vector<16x8xf32>
    %249 = tpu.matmul %248, %3, %cst_215 {dimension_numbers = #tpu.dot_dimension_numbers<[1], [0], [0], [1], [0, 0, 1, 1], [], []>} : vector<16x12xbf16>, vector<12x8xbf16>, vector<16x8xf32> -> vector<16x8xf32>
    %250 = arith.addf %245, %249 : vector<16x8xf32>
    %c0_216 = arith.constant 0 : index
    %c9 = arith.constant 9 : index
    %c0_217 = arith.constant 0 : index
    %c0_218 = arith.constant 0 : index
    %251 = vector.load %arg2[%c0_216, %c9, %c0_217, %c0_218] : memref<1x16x17x12xbf16, #tpu.memory_space<vmem>>, vector<1x1x17x12xbf16>
    %252 = vector.shape_cast %251 : vector<1x1x17x12xbf16> to vector<17x12xbf16>
    %253 = vector.extract_strided_slice %252 {offsets = [0, 0], sizes = [16, 12], strides = [1, 1]} : vector<17x12xbf16> to vector<16x12xbf16>
    %cst_219 = arith.constant dense<0.000000e+00> : vector<16x8xf32>
    %254 = tpu.matmul %253, %5, %cst_219 {dimension_numbers = #tpu.dot_dimension_numbers<[1], [0], [0], [1], [0, 0, 1, 1], [], []>} : vector<16x12xbf16>, vector<12x8xbf16>, vector<16x8xf32> -> vector<16x8xf32>
    %255 = arith.addf %250, %254 : vector<16x8xf32>
    %c0_220 = arith.constant 0 : index
    %c9_221 = arith.constant 9 : index
    %c0_222 = arith.constant 0 : index
    %c0_223 = arith.constant 0 : index
    %256 = vector.load %arg2[%c0_220, %c9_221, %c0_222, %c0_223] : memref<1x16x17x12xbf16, #tpu.memory_space<vmem>>, vector<1x1x17x12xbf16>
    %257 = vector.shape_cast %256 : vector<1x1x17x12xbf16> to vector<17x12xbf16>
    %258 = vector.extract_strided_slice %257 {offsets = [1, 0], sizes = [16, 12], strides = [1, 1]} : vector<17x12xbf16> to vector<16x12xbf16>
    %cst_224 = arith.constant dense<0.000000e+00> : vector<16x8xf32>
    %259 = tpu.matmul %258, %7, %cst_224 {dimension_numbers = #tpu.dot_dimension_numbers<[1], [0], [0], [1], [0, 0, 1, 1], [], []>} : vector<16x12xbf16>, vector<12x8xbf16>, vector<16x8xf32> -> vector<16x8xf32>
    %260 = arith.addf %255, %259 : vector<16x8xf32>
    %261 = vector.broadcast %8 : vector<1x8xf32> to vector<16x8xf32>
    %262 = arith.mulf %260, %261 : vector<16x8xf32>
    %263 = vector.broadcast %9 : vector<1x8xf32> to vector<16x8xf32>
    %264 = arith.addf %262, %263 : vector<16x8xf32>
    %cst_225 = arith.constant 0.000000e+00 : f32
    %265 = vector.broadcast %cst_225 : f32 to vector<16x8xf32>
    %266 = arith.maximumf %264, %265 : vector<16x8xf32>
    %267 = arith.truncf %266 : vector<16x8xf32> to vector<16x8xbf16>
    %c0_226 = arith.constant 0 : index
    %c8_227 = arith.constant 8 : index
    %c0_228 = arith.constant 0 : index
    %c0_229 = arith.constant 0 : index
    %268 = vector.load %arg7[%c0_226, %c8_227, %c0_228, %c0_229] : memref<1x16x16x8xbf16, #tpu.memory_space<vmem>>, vector<1x1x16x8xbf16>
    %269 = vector.shape_cast %268 : vector<1x1x16x8xbf16> to vector<16x8xbf16>
    %270 = vector.shape_cast %267 : vector<16x8xbf16> to vector<1x1x16x8xbf16>
    tpu.vector_store %arg7[%c0_226, %c8_227, %c0_228, %c0_229], %270 {strides = array<i32>} : memref<1x16x16x8xbf16, #tpu.memory_space<vmem>>, vector<1x1x16x8xbf16>,
    %c0_230 = arith.constant 0 : index
    %c9_231 = arith.constant 9 : index
    %c0_232 = arith.constant 0 : index
    %c0_233 = arith.constant 0 : index
    %271 = vector.load %arg2[%c0_230, %c9_231, %c0_232, %c0_233] : memref<1x16x17x12xbf16, #tpu.memory_space<vmem>>, vector<1x1x17x12xbf16>
    %272 = vector.shape_cast %271 : vector<1x1x17x12xbf16> to vector<17x12xbf16>
    %273 = vector.extract_strided_slice %272 {offsets = [0, 0], sizes = [16, 12], strides = [1, 1]} : vector<17x12xbf16> to vector<16x12xbf16>
    %cst_234 = arith.constant dense<0.000000e+00> : vector<16x8xf32>
    %274 = tpu.matmul %273, %1, %cst_234 {dimension_numbers = #tpu.dot_dimension_numbers<[1], [0], [0], [1], [0, 0, 1, 1], [], []>} : vector<16x12xbf16>, vector<12x8xbf16>, vector<16x8xf32> -> vector<16x8xf32>
    %c0_235 = arith.constant 0 : index
    %c9_236 = arith.constant 9 : index
    %c0_237 = arith.constant 0 : index
    %c0_238 = arith.constant 0 : index
    %275 = vector.load %arg2[%c0_235, %c9_236, %c0_237, %c0_238] : memref<1x16x17x12xbf16, #tpu.memory_space<vmem>>, vector<1x1x17x12xbf16>
    %276 = vector.shape_cast %275 : vector<1x1x17x12xbf16> to vector<17x12xbf16>
    %277 = vector.extract_strided_slice %276 {offsets = [1, 0], sizes = [16, 12], strides = [1, 1]} : vector<17x12xbf16> to vector<16x12xbf16>
    %cst_239 = arith.constant dense<0.000000e+00> : vector<16x8xf32>
    %278 = tpu.matmul %277, %3, %cst_239 {dimension_numbers = #tpu.dot_dimension_numbers<[1], [0], [0], [1], [0, 0, 1, 1], [], []>} : vector<16x12xbf16>, vector<12x8xbf16>, vector<16x8xf32> -> vector<16x8xf32>
    %279 = arith.addf %274, %278 : vector<16x8xf32>
    %c0_240 = arith.constant 0 : index
    %c10 = arith.constant 10 : index
    %c0_241 = arith.constant 0 : index
    %c0_242 = arith.constant 0 : index
    %280 = vector.load %arg2[%c0_240, %c10, %c0_241, %c0_242] : memref<1x16x17x12xbf16, #tpu.memory_space<vmem>>, vector<1x1x17x12xbf16>
    %281 = vector.shape_cast %280 : vector<1x1x17x12xbf16> to vector<17x12xbf16>
    %282 = vector.extract_strided_slice %281 {offsets = [0, 0], sizes = [16, 12], strides = [1, 1]} : vector<17x12xbf16> to vector<16x12xbf16>
    %cst_243 = arith.constant dense<0.000000e+00> : vector<16x8xf32>
    %283 = tpu.matmul %282, %5, %cst_243 {dimension_numbers = #tpu.dot_dimension_numbers<[1], [0], [0], [1], [0, 0, 1, 1], [], []>} : vector<16x12xbf16>, vector<12x8xbf16>, vector<16x8xf32> -> vector<16x8xf32>
    %284 = arith.addf %279, %283 : vector<16x8xf32>
    %c0_244 = arith.constant 0 : index
    %c10_245 = arith.constant 10 : index
    %c0_246 = arith.constant 0 : index
    %c0_247 = arith.constant 0 : index
    %285 = vector.load %arg2[%c0_244, %c10_245, %c0_246, %c0_247] : memref<1x16x17x12xbf16, #tpu.memory_space<vmem>>, vector<1x1x17x12xbf16>
    %286 = vector.shape_cast %285 : vector<1x1x17x12xbf16> to vector<17x12xbf16>
    %287 = vector.extract_strided_slice %286 {offsets = [1, 0], sizes = [16, 12], strides = [1, 1]} : vector<17x12xbf16> to vector<16x12xbf16>
    %cst_248 = arith.constant dense<0.000000e+00> : vector<16x8xf32>
    %288 = tpu.matmul %287, %7, %cst_248 {dimension_numbers = #tpu.dot_dimension_numbers<[1], [0], [0], [1], [0, 0, 1, 1], [], []>} : vector<16x12xbf16>, vector<12x8xbf16>, vector<16x8xf32> -> vector<16x8xf32>
    %289 = arith.addf %284, %288 : vector<16x8xf32>
    %290 = vector.broadcast %8 : vector<1x8xf32> to vector<16x8xf32>
    %291 = arith.mulf %289, %290 : vector<16x8xf32>
    %292 = vector.broadcast %9 : vector<1x8xf32> to vector<16x8xf32>
    %293 = arith.addf %291, %292 : vector<16x8xf32>
    %cst_249 = arith.constant 0.000000e+00 : f32
    %294 = vector.broadcast %cst_249 : f32 to vector<16x8xf32>
    %295 = arith.maximumf %293, %294 : vector<16x8xf32>
    %296 = arith.truncf %295 : vector<16x8xf32> to vector<16x8xbf16>
    %c0_250 = arith.constant 0 : index
    %c9_251 = arith.constant 9 : index
    %c0_252 = arith.constant 0 : index
    %c0_253 = arith.constant 0 : index
    %297 = vector.load %arg7[%c0_250, %c9_251, %c0_252, %c0_253] : memref<1x16x16x8xbf16, #tpu.memory_space<vmem>>, vector<1x1x16x8xbf16>
    %298 = vector.shape_cast %297 : vector<1x1x16x8xbf16> to vector<16x8xbf16>
    %299 = vector.shape_cast %296 : vector<16x8xbf16> to vector<1x1x16x8xbf16>
    tpu.vector_store %arg7[%c0_250, %c9_251, %c0_252, %c0_253], %299 {strides = array<i32>} : memref<1x16x16x8xbf16, #tpu.memory_space<vmem>>, vector<1x1x16x8xbf16>,
    %c0_254 = arith.constant 0 : index
    %c10_255 = arith.constant 10 : index
    %c0_256 = arith.constant 0 : index
    %c0_257 = arith.constant 0 : index
    %300 = vector.load %arg2[%c0_254, %c10_255, %c0_256, %c0_257] : memref<1x16x17x12xbf16, #tpu.memory_space<vmem>>, vector<1x1x17x12xbf16>
    %301 = vector.shape_cast %300 : vector<1x1x17x12xbf16> to vector<17x12xbf16>
    %302 = vector.extract_strided_slice %301 {offsets = [0, 0], sizes = [16, 12], strides = [1, 1]} : vector<17x12xbf16> to vector<16x12xbf16>
    %cst_258 = arith.constant dense<0.000000e+00> : vector<16x8xf32>
    %303 = tpu.matmul %302, %1, %cst_258 {dimension_numbers = #tpu.dot_dimension_numbers<[1], [0], [0], [1], [0, 0, 1, 1], [], []>} : vector<16x12xbf16>, vector<12x8xbf16>, vector<16x8xf32> -> vector<16x8xf32>
    %c0_259 = arith.constant 0 : index
    %c10_260 = arith.constant 10 : index
    %c0_261 = arith.constant 0 : index
    %c0_262 = arith.constant 0 : index
    %304 = vector.load %arg2[%c0_259, %c10_260, %c0_261, %c0_262] : memref<1x16x17x12xbf16, #tpu.memory_space<vmem>>, vector<1x1x17x12xbf16>
    %305 = vector.shape_cast %304 : vector<1x1x17x12xbf16> to vector<17x12xbf16>
    %306 = vector.extract_strided_slice %305 {offsets = [1, 0], sizes = [16, 12], strides = [1, 1]} : vector<17x12xbf16> to vector<16x12xbf16>
    %cst_263 = arith.constant dense<0.000000e+00> : vector<16x8xf32>
    %307 = tpu.matmul %306, %3, %cst_263 {dimension_numbers = #tpu.dot_dimension_numbers<[1], [0], [0], [1], [0, 0, 1, 1], [], []>} : vector<16x12xbf16>, vector<12x8xbf16>, vector<16x8xf32> -> vector<16x8xf32>
    %308 = arith.addf %303, %307 : vector<16x8xf32>
    %c0_264 = arith.constant 0 : index
    %c11 = arith.constant 11 : index
    %c0_265 = arith.constant 0 : index
    %c0_266 = arith.constant 0 : index
    %309 = vector.load %arg2[%c0_264, %c11, %c0_265, %c0_266] : memref<1x16x17x12xbf16, #tpu.memory_space<vmem>>, vector<1x1x17x12xbf16>
    %310 = vector.shape_cast %309 : vector<1x1x17x12xbf16> to vector<17x12xbf16>
    %311 = vector.extract_strided_slice %310 {offsets = [0, 0], sizes = [16, 12], strides = [1, 1]} : vector<17x12xbf16> to vector<16x12xbf16>
    %cst_267 = arith.constant dense<0.000000e+00> : vector<16x8xf32>
    %312 = tpu.matmul %311, %5, %cst_267 {dimension_numbers = #tpu.dot_dimension_numbers<[1], [0], [0], [1], [0, 0, 1, 1], [], []>} : vector<16x12xbf16>, vector<12x8xbf16>, vector<16x8xf32> -> vector<16x8xf32>
    %313 = arith.addf %308, %312 : vector<16x8xf32>
    %c0_268 = arith.constant 0 : index
    %c11_269 = arith.constant 11 : index
    %c0_270 = arith.constant 0 : index
    %c0_271 = arith.constant 0 : index
    %314 = vector.load %arg2[%c0_268, %c11_269, %c0_270, %c0_271] : memref<1x16x17x12xbf16, #tpu.memory_space<vmem>>, vector<1x1x17x12xbf16>
    %315 = vector.shape_cast %314 : vector<1x1x17x12xbf16> to vector<17x12xbf16>
    %316 = vector.extract_strided_slice %315 {offsets = [1, 0], sizes = [16, 12], strides = [1, 1]} : vector<17x12xbf16> to vector<16x12xbf16>
    %cst_272 = arith.constant dense<0.000000e+00> : vector<16x8xf32>
    %317 = tpu.matmul %316, %7, %cst_272 {dimension_numbers = #tpu.dot_dimension_numbers<[1], [0], [0], [1], [0, 0, 1, 1], [], []>} : vector<16x12xbf16>, vector<12x8xbf16>, vector<16x8xf32> -> vector<16x8xf32>
    %318 = arith.addf %313, %317 : vector<16x8xf32>
    %319 = vector.broadcast %8 : vector<1x8xf32> to vector<16x8xf32>
    %320 = arith.mulf %318, %319 : vector<16x8xf32>
    %321 = vector.broadcast %9 : vector<1x8xf32> to vector<16x8xf32>
    %322 = arith.addf %320, %321 : vector<16x8xf32>
    %cst_273 = arith.constant 0.000000e+00 : f32
    %323 = vector.broadcast %cst_273 : f32 to vector<16x8xf32>
    %324 = arith.maximumf %322, %323 : vector<16x8xf32>
    %325 = arith.truncf %324 : vector<16x8xf32> to vector<16x8xbf16>
    %c0_274 = arith.constant 0 : index
    %c10_275 = arith.constant 10 : index
    %c0_276 = arith.constant 0 : index
    %c0_277 = arith.constant 0 : index
    %326 = vector.load %arg7[%c0_274, %c10_275, %c0_276, %c0_277] : memref<1x16x16x8xbf16, #tpu.memory_space<vmem>>, vector<1x1x16x8xbf16>
    %327 = vector.shape_cast %326 : vector<1x1x16x8xbf16> to vector<16x8xbf16>
    %328 = vector.shape_cast %325 : vector<16x8xbf16> to vector<1x1x16x8xbf16>
    tpu.vector_store %arg7[%c0_274, %c10_275, %c0_276, %c0_277], %328 {strides = array<i32>} : memref<1x16x16x8xbf16, #tpu.memory_space<vmem>>, vector<1x1x16x8xbf16>,
    %c0_278 = arith.constant 0 : index
    %c11_279 = arith.constant 11 : index
    %c0_280 = arith.constant 0 : index
    %c0_281 = arith.constant 0 : index
    %329 = vector.load %arg2[%c0_278, %c11_279, %c0_280, %c0_281] : memref<1x16x17x12xbf16, #tpu.memory_space<vmem>>, vector<1x1x17x12xbf16>
    %330 = vector.shape_cast %329 : vector<1x1x17x12xbf16> to vector<17x12xbf16>
    %331 = vector.extract_strided_slice %330 {offsets = [0, 0], sizes = [16, 12], strides = [1, 1]} : vector<17x12xbf16> to vector<16x12xbf16>
    %cst_282 = arith.constant dense<0.000000e+00> : vector<16x8xf32>
    %332 = tpu.matmul %331, %1, %cst_282 {dimension_numbers = #tpu.dot_dimension_numbers<[1], [0], [0], [1], [0, 0, 1, 1], [], []>} : vector<16x12xbf16>, vector<12x8xbf16>, vector<16x8xf32> -> vector<16x8xf32>
    %c0_283 = arith.constant 0 : index
    %c11_284 = arith.constant 11 : index
    %c0_285 = arith.constant 0 : index
    %c0_286 = arith.constant 0 : index
    %333 = vector.load %arg2[%c0_283, %c11_284, %c0_285, %c0_286] : memref<1x16x17x12xbf16, #tpu.memory_space<vmem>>, vector<1x1x17x12xbf16>
    %334 = vector.shape_cast %333 : vector<1x1x17x12xbf16> to vector<17x12xbf16>
    %335 = vector.extract_strided_slice %334 {offsets = [1, 0], sizes = [16, 12], strides = [1, 1]} : vector<17x12xbf16> to vector<16x12xbf16>
    %cst_287 = arith.constant dense<0.000000e+00> : vector<16x8xf32>
    %336 = tpu.matmul %335, %3, %cst_287 {dimension_numbers = #tpu.dot_dimension_numbers<[1], [0], [0], [1], [0, 0, 1, 1], [], []>} : vector<16x12xbf16>, vector<12x8xbf16>, vector<16x8xf32> -> vector<16x8xf32>
    %337 = arith.addf %332, %336 : vector<16x8xf32>
    %c0_288 = arith.constant 0 : index
    %c12 = arith.constant 12 : index
    %c0_289 = arith.constant 0 : index
    %c0_290 = arith.constant 0 : index
    %338 = vector.load %arg2[%c0_288, %c12, %c0_289, %c0_290] : memref<1x16x17x12xbf16, #tpu.memory_space<vmem>>, vector<1x1x17x12xbf16>
    %339 = vector.shape_cast %338 : vector<1x1x17x12xbf16> to vector<17x12xbf16>
    %340 = vector.extract_strided_slice %339 {offsets = [0, 0], sizes = [16, 12], strides = [1, 1]} : vector<17x12xbf16> to vector<16x12xbf16>
    %cst_291 = arith.constant dense<0.000000e+00> : vector<16x8xf32>
    %341 = tpu.matmul %340, %5, %cst_291 {dimension_numbers = #tpu.dot_dimension_numbers<[1], [0], [0], [1], [0, 0, 1, 1], [], []>} : vector<16x12xbf16>, vector<12x8xbf16>, vector<16x8xf32> -> vector<16x8xf32>
    %342 = arith.addf %337, %341 : vector<16x8xf32>
    %c0_292 = arith.constant 0 : index
    %c12_293 = arith.constant 12 : index
    %c0_294 = arith.constant 0 : index
    %c0_295 = arith.constant 0 : index
    %343 = vector.load %arg2[%c0_292, %c12_293, %c0_294, %c0_295] : memref<1x16x17x12xbf16, #tpu.memory_space<vmem>>, vector<1x1x17x12xbf16>
    %344 = vector.shape_cast %343 : vector<1x1x17x12xbf16> to vector<17x12xbf16>
    %345 = vector.extract_strided_slice %344 {offsets = [1, 0], sizes = [16, 12], strides = [1, 1]} : vector<17x12xbf16> to vector<16x12xbf16>
    %cst_296 = arith.constant dense<0.000000e+00> : vector<16x8xf32>
    %346 = tpu.matmul %345, %7, %cst_296 {dimension_numbers = #tpu.dot_dimension_numbers<[1], [0], [0], [1], [0, 0, 1, 1], [], []>} : vector<16x12xbf16>, vector<12x8xbf16>, vector<16x8xf32> -> vector<16x8xf32>
    %347 = arith.addf %342, %346 : vector<16x8xf32>
    %348 = vector.broadcast %8 : vector<1x8xf32> to vector<16x8xf32>
    %349 = arith.mulf %347, %348 : vector<16x8xf32>
    %350 = vector.broadcast %9 : vector<1x8xf32> to vector<16x8xf32>
    %351 = arith.addf %349, %350 : vector<16x8xf32>
    %cst_297 = arith.constant 0.000000e+00 : f32
    %352 = vector.broadcast %cst_297 : f32 to vector<16x8xf32>
    %353 = arith.maximumf %351, %352 : vector<16x8xf32>
    %354 = arith.truncf %353 : vector<16x8xf32> to vector<16x8xbf16>
    %c0_298 = arith.constant 0 : index
    %c11_299 = arith.constant 11 : index
    %c0_300 = arith.constant 0 : index
    %c0_301 = arith.constant 0 : index
    %355 = vector.load %arg7[%c0_298, %c11_299, %c0_300, %c0_301] : memref<1x16x16x8xbf16, #tpu.memory_space<vmem>>, vector<1x1x16x8xbf16>
    %356 = vector.shape_cast %355 : vector<1x1x16x8xbf16> to vector<16x8xbf16>
    %357 = vector.shape_cast %354 : vector<16x8xbf16> to vector<1x1x16x8xbf16>
    tpu.vector_store %arg7[%c0_298, %c11_299, %c0_300, %c0_301], %357 {strides = array<i32>} : memref<1x16x16x8xbf16, #tpu.memory_space<vmem>>, vector<1x1x16x8xbf16>,
    %c0_302 = arith.constant 0 : index
    %c12_303 = arith.constant 12 : index
    %c0_304 = arith.constant 0 : index
    %c0_305 = arith.constant 0 : index
    %358 = vector.load %arg2[%c0_302, %c12_303, %c0_304, %c0_305] : memref<1x16x17x12xbf16, #tpu.memory_space<vmem>>, vector<1x1x17x12xbf16>
    %359 = vector.shape_cast %358 : vector<1x1x17x12xbf16> to vector<17x12xbf16>
    %360 = vector.extract_strided_slice %359 {offsets = [0, 0], sizes = [16, 12], strides = [1, 1]} : vector<17x12xbf16> to vector<16x12xbf16>
    %cst_306 = arith.constant dense<0.000000e+00> : vector<16x8xf32>
    %361 = tpu.matmul %360, %1, %cst_306 {dimension_numbers = #tpu.dot_dimension_numbers<[1], [0], [0], [1], [0, 0, 1, 1], [], []>} : vector<16x12xbf16>, vector<12x8xbf16>, vector<16x8xf32> -> vector<16x8xf32>
    %c0_307 = arith.constant 0 : index
    %c12_308 = arith.constant 12 : index
    %c0_309 = arith.constant 0 : index
    %c0_310 = arith.constant 0 : index
    %362 = vector.load %arg2[%c0_307, %c12_308, %c0_309, %c0_310] : memref<1x16x17x12xbf16, #tpu.memory_space<vmem>>, vector<1x1x17x12xbf16>
    %363 = vector.shape_cast %362 : vector<1x1x17x12xbf16> to vector<17x12xbf16>
    %364 = vector.extract_strided_slice %363 {offsets = [1, 0], sizes = [16, 12], strides = [1, 1]} : vector<17x12xbf16> to vector<16x12xbf16>
    %cst_311 = arith.constant dense<0.000000e+00> : vector<16x8xf32>
    %365 = tpu.matmul %364, %3, %cst_311 {dimension_numbers = #tpu.dot_dimension_numbers<[1], [0], [0], [1], [0, 0, 1, 1], [], []>} : vector<16x12xbf16>, vector<12x8xbf16>, vector<16x8xf32> -> vector<16x8xf32>
    %366 = arith.addf %361, %365 : vector<16x8xf32>
    %c0_312 = arith.constant 0 : index
    %c13 = arith.constant 13 : index
    %c0_313 = arith.constant 0 : index
    %c0_314 = arith.constant 0 : index
    %367 = vector.load %arg2[%c0_312, %c13, %c0_313, %c0_314] : memref<1x16x17x12xbf16, #tpu.memory_space<vmem>>, vector<1x1x17x12xbf16>
    %368 = vector.shape_cast %367 : vector<1x1x17x12xbf16> to vector<17x12xbf16>
    %369 = vector.extract_strided_slice %368 {offsets = [0, 0], sizes = [16, 12], strides = [1, 1]} : vector<17x12xbf16> to vector<16x12xbf16>
    %cst_315 = arith.constant dense<0.000000e+00> : vector<16x8xf32>
    %370 = tpu.matmul %369, %5, %cst_315 {dimension_numbers = #tpu.dot_dimension_numbers<[1], [0], [0], [1], [0, 0, 1, 1], [], []>} : vector<16x12xbf16>, vector<12x8xbf16>, vector<16x8xf32> -> vector<16x8xf32>
    %371 = arith.addf %366, %370 : vector<16x8xf32>
    %c0_316 = arith.constant 0 : index
    %c13_317 = arith.constant 13 : index
    %c0_318 = arith.constant 0 : index
    %c0_319 = arith.constant 0 : index
    %372 = vector.load %arg2[%c0_316, %c13_317, %c0_318, %c0_319] : memref<1x16x17x12xbf16, #tpu.memory_space<vmem>>, vector<1x1x17x12xbf16>
    %373 = vector.shape_cast %372 : vector<1x1x17x12xbf16> to vector<17x12xbf16>
    %374 = vector.extract_strided_slice %373 {offsets = [1, 0], sizes = [16, 12], strides = [1, 1]} : vector<17x12xbf16> to vector<16x12xbf16>
    %cst_320 = arith.constant dense<0.000000e+00> : vector<16x8xf32>
    %375 = tpu.matmul %374, %7, %cst_320 {dimension_numbers = #tpu.dot_dimension_numbers<[1], [0], [0], [1], [0, 0, 1, 1], [], []>} : vector<16x12xbf16>, vector<12x8xbf16>, vector<16x8xf32> -> vector<16x8xf32>
    %376 = arith.addf %371, %375 : vector<16x8xf32>
    %377 = vector.broadcast %8 : vector<1x8xf32> to vector<16x8xf32>
    %378 = arith.mulf %376, %377 : vector<16x8xf32>
    %379 = vector.broadcast %9 : vector<1x8xf32> to vector<16x8xf32>
    %380 = arith.addf %378, %379 : vector<16x8xf32>
    %cst_321 = arith.constant 0.000000e+00 : f32
    %381 = vector.broadcast %cst_321 : f32 to vector<16x8xf32>
    %382 = arith.maximumf %380, %381 : vector<16x8xf32>
    %383 = arith.truncf %382 : vector<16x8xf32> to vector<16x8xbf16>
    %c0_322 = arith.constant 0 : index
    %c12_323 = arith.constant 12 : index
    %c0_324 = arith.constant 0 : index
    %c0_325 = arith.constant 0 : index
    %384 = vector.load %arg7[%c0_322, %c12_323, %c0_324, %c0_325] : memref<1x16x16x8xbf16, #tpu.memory_space<vmem>>, vector<1x1x16x8xbf16>
    %385 = vector.shape_cast %384 : vector<1x1x16x8xbf16> to vector<16x8xbf16>
    %386 = vector.shape_cast %383 : vector<16x8xbf16> to vector<1x1x16x8xbf16>
    tpu.vector_store %arg7[%c0_322, %c12_323, %c0_324, %c0_325], %386 {strides = array<i32>} : memref<1x16x16x8xbf16, #tpu.memory_space<vmem>>, vector<1x1x16x8xbf16>,
    %c0_326 = arith.constant 0 : index
    %c13_327 = arith.constant 13 : index
    %c0_328 = arith.constant 0 : index
    %c0_329 = arith.constant 0 : index
    %387 = vector.load %arg2[%c0_326, %c13_327, %c0_328, %c0_329] : memref<1x16x17x12xbf16, #tpu.memory_space<vmem>>, vector<1x1x17x12xbf16>
    %388 = vector.shape_cast %387 : vector<1x1x17x12xbf16> to vector<17x12xbf16>
    %389 = vector.extract_strided_slice %388 {offsets = [0, 0], sizes = [16, 12], strides = [1, 1]} : vector<17x12xbf16> to vector<16x12xbf16>
    %cst_330 = arith.constant dense<0.000000e+00> : vector<16x8xf32>
    %390 = tpu.matmul %389, %1, %cst_330 {dimension_numbers = #tpu.dot_dimension_numbers<[1], [0], [0], [1], [0, 0, 1, 1], [], []>} : vector<16x12xbf16>, vector<12x8xbf16>, vector<16x8xf32> -> vector<16x8xf32>
    %c0_331 = arith.constant 0 : index
    %c13_332 = arith.constant 13 : index
    %c0_333 = arith.constant 0 : index
    %c0_334 = arith.constant 0 : index
    %391 = vector.load %arg2[%c0_331, %c13_332, %c0_333, %c0_334] : memref<1x16x17x12xbf16, #tpu.memory_space<vmem>>, vector<1x1x17x12xbf16>
    %392 = vector.shape_cast %391 : vector<1x1x17x12xbf16> to vector<17x12xbf16>
    %393 = vector.extract_strided_slice %392 {offsets = [1, 0], sizes = [16, 12], strides = [1, 1]} : vector<17x12xbf16> to vector<16x12xbf16>
    %cst_335 = arith.constant dense<0.000000e+00> : vector<16x8xf32>
    %394 = tpu.matmul %393, %3, %cst_335 {dimension_numbers = #tpu.dot_dimension_numbers<[1], [0], [0], [1], [0, 0, 1, 1], [], []>} : vector<16x12xbf16>, vector<12x8xbf16>, vector<16x8xf32> -> vector<16x8xf32>
    %395 = arith.addf %390, %394 : vector<16x8xf32>
    %c0_336 = arith.constant 0 : index
    %c14 = arith.constant 14 : index
    %c0_337 = arith.constant 0 : index
    %c0_338 = arith.constant 0 : index
    %396 = vector.load %arg2[%c0_336, %c14, %c0_337, %c0_338] : memref<1x16x17x12xbf16, #tpu.memory_space<vmem>>, vector<1x1x17x12xbf16>
    %397 = vector.shape_cast %396 : vector<1x1x17x12xbf16> to vector<17x12xbf16>
    %398 = vector.extract_strided_slice %397 {offsets = [0, 0], sizes = [16, 12], strides = [1, 1]} : vector<17x12xbf16> to vector<16x12xbf16>
    %cst_339 = arith.constant dense<0.000000e+00> : vector<16x8xf32>
    %399 = tpu.matmul %398, %5, %cst_339 {dimension_numbers = #tpu.dot_dimension_numbers<[1], [0], [0], [1], [0, 0, 1, 1], [], []>} : vector<16x12xbf16>, vector<12x8xbf16>, vector<16x8xf32> -> vector<16x8xf32>
    %400 = arith.addf %395, %399 : vector<16x8xf32>
    %c0_340 = arith.constant 0 : index
    %c14_341 = arith.constant 14 : index
    %c0_342 = arith.constant 0 : index
    %c0_343 = arith.constant 0 : index
    %401 = vector.load %arg2[%c0_340, %c14_341, %c0_342, %c0_343] : memref<1x16x17x12xbf16, #tpu.memory_space<vmem>>, vector<1x1x17x12xbf16>
    %402 = vector.shape_cast %401 : vector<1x1x17x12xbf16> to vector<17x12xbf16>
    %403 = vector.extract_strided_slice %402 {offsets = [1, 0], sizes = [16, 12], strides = [1, 1]} : vector<17x12xbf16> to vector<16x12xbf16>
    %cst_344 = arith.constant dense<0.000000e+00> : vector<16x8xf32>
    %404 = tpu.matmul %403, %7, %cst_344 {dimension_numbers = #tpu.dot_dimension_numbers<[1], [0], [0], [1], [0, 0, 1, 1], [], []>} : vector<16x12xbf16>, vector<12x8xbf16>, vector<16x8xf32> -> vector<16x8xf32>
    %405 = arith.addf %400, %404 : vector<16x8xf32>
    %406 = vector.broadcast %8 : vector<1x8xf32> to vector<16x8xf32>
    %407 = arith.mulf %405, %406 : vector<16x8xf32>
    %408 = vector.broadcast %9 : vector<1x8xf32> to vector<16x8xf32>
    %409 = arith.addf %407, %408 : vector<16x8xf32>
    %cst_345 = arith.constant 0.000000e+00 : f32
    %410 = vector.broadcast %cst_345 : f32 to vector<16x8xf32>
    %411 = arith.maximumf %409, %410 : vector<16x8xf32>
    %412 = arith.truncf %411 : vector<16x8xf32> to vector<16x8xbf16>
    %c0_346 = arith.constant 0 : index
    %c13_347 = arith.constant 13 : index
    %c0_348 = arith.constant 0 : index
    %c0_349 = arith.constant 0 : index
    %413 = vector.load %arg7[%c0_346, %c13_347, %c0_348, %c0_349] : memref<1x16x16x8xbf16, #tpu.memory_space<vmem>>, vector<1x1x16x8xbf16>
    %414 = vector.shape_cast %413 : vector<1x1x16x8xbf16> to vector<16x8xbf16>
    %415 = vector.shape_cast %412 : vector<16x8xbf16> to vector<1x1x16x8xbf16>
    tpu.vector_store %arg7[%c0_346, %c13_347, %c0_348, %c0_349], %415 {strides = array<i32>} : memref<1x16x16x8xbf16, #tpu.memory_space<vmem>>, vector<1x1x16x8xbf16>,
    %c0_350 = arith.constant 0 : index
    %c14_351 = arith.constant 14 : index
    %c0_352 = arith.constant 0 : index
    %c0_353 = arith.constant 0 : index
    %416 = vector.load %arg2[%c0_350, %c14_351, %c0_352, %c0_353] : memref<1x16x17x12xbf16, #tpu.memory_space<vmem>>, vector<1x1x17x12xbf16>
    %417 = vector.shape_cast %416 : vector<1x1x17x12xbf16> to vector<17x12xbf16>
    %418 = vector.extract_strided_slice %417 {offsets = [0, 0], sizes = [16, 12], strides = [1, 1]} : vector<17x12xbf16> to vector<16x12xbf16>
    %cst_354 = arith.constant dense<0.000000e+00> : vector<16x8xf32>
    %419 = tpu.matmul %418, %1, %cst_354 {dimension_numbers = #tpu.dot_dimension_numbers<[1], [0], [0], [1], [0, 0, 1, 1], [], []>} : vector<16x12xbf16>, vector<12x8xbf16>, vector<16x8xf32> -> vector<16x8xf32>
    %c0_355 = arith.constant 0 : index
    %c14_356 = arith.constant 14 : index
    %c0_357 = arith.constant 0 : index
    %c0_358 = arith.constant 0 : index
    %420 = vector.load %arg2[%c0_355, %c14_356, %c0_357, %c0_358] : memref<1x16x17x12xbf16, #tpu.memory_space<vmem>>, vector<1x1x17x12xbf16>
    %421 = vector.shape_cast %420 : vector<1x1x17x12xbf16> to vector<17x12xbf16>
    %422 = vector.extract_strided_slice %421 {offsets = [1, 0], sizes = [16, 12], strides = [1, 1]} : vector<17x12xbf16> to vector<16x12xbf16>
    %cst_359 = arith.constant dense<0.000000e+00> : vector<16x8xf32>
    %423 = tpu.matmul %422, %3, %cst_359 {dimension_numbers = #tpu.dot_dimension_numbers<[1], [0], [0], [1], [0, 0, 1, 1], [], []>} : vector<16x12xbf16>, vector<12x8xbf16>, vector<16x8xf32> -> vector<16x8xf32>
    %424 = arith.addf %419, %423 : vector<16x8xf32>
    %c0_360 = arith.constant 0 : index
    %c15 = arith.constant 15 : index
    %c0_361 = arith.constant 0 : index
    %c0_362 = arith.constant 0 : index
    %425 = vector.load %arg2[%c0_360, %c15, %c0_361, %c0_362] : memref<1x16x17x12xbf16, #tpu.memory_space<vmem>>, vector<1x1x17x12xbf16>
    %426 = vector.shape_cast %425 : vector<1x1x17x12xbf16> to vector<17x12xbf16>
    %427 = vector.extract_strided_slice %426 {offsets = [0, 0], sizes = [16, 12], strides = [1, 1]} : vector<17x12xbf16> to vector<16x12xbf16>
    %cst_363 = arith.constant dense<0.000000e+00> : vector<16x8xf32>
    %428 = tpu.matmul %427, %5, %cst_363 {dimension_numbers = #tpu.dot_dimension_numbers<[1], [0], [0], [1], [0, 0, 1, 1], [], []>} : vector<16x12xbf16>, vector<12x8xbf16>, vector<16x8xf32> -> vector<16x8xf32>
    %429 = arith.addf %424, %428 : vector<16x8xf32>
    %c0_364 = arith.constant 0 : index
    %c15_365 = arith.constant 15 : index
    %c0_366 = arith.constant 0 : index
    %c0_367 = arith.constant 0 : index
    %430 = vector.load %arg2[%c0_364, %c15_365, %c0_366, %c0_367] : memref<1x16x17x12xbf16, #tpu.memory_space<vmem>>, vector<1x1x17x12xbf16>
    %431 = vector.shape_cast %430 : vector<1x1x17x12xbf16> to vector<17x12xbf16>
    %432 = vector.extract_strided_slice %431 {offsets = [1, 0], sizes = [16, 12], strides = [1, 1]} : vector<17x12xbf16> to vector<16x12xbf16>
    %cst_368 = arith.constant dense<0.000000e+00> : vector<16x8xf32>
    %433 = tpu.matmul %432, %7, %cst_368 {dimension_numbers = #tpu.dot_dimension_numbers<[1], [0], [0], [1], [0, 0, 1, 1], [], []>} : vector<16x12xbf16>, vector<12x8xbf16>, vector<16x8xf32> -> vector<16x8xf32>
    %434 = arith.addf %429, %433 : vector<16x8xf32>
    %435 = vector.broadcast %8 : vector<1x8xf32> to vector<16x8xf32>
    %436 = arith.mulf %434, %435 : vector<16x8xf32>
    %437 = vector.broadcast %9 : vector<1x8xf32> to vector<16x8xf32>
    %438 = arith.addf %436, %437 : vector<16x8xf32>
    %cst_369 = arith.constant 0.000000e+00 : f32
    %439 = vector.broadcast %cst_369 : f32 to vector<16x8xf32>
    %440 = arith.maximumf %438, %439 : vector<16x8xf32>
    %441 = arith.truncf %440 : vector<16x8xf32> to vector<16x8xbf16>
    %c0_370 = arith.constant 0 : index
    %c14_371 = arith.constant 14 : index
    %c0_372 = arith.constant 0 : index
    %c0_373 = arith.constant 0 : index
    %442 = vector.load %arg7[%c0_370, %c14_371, %c0_372, %c0_373] : memref<1x16x16x8xbf16, #tpu.memory_space<vmem>>, vector<1x1x16x8xbf16>
    %443 = vector.shape_cast %442 : vector<1x1x16x8xbf16> to vector<16x8xbf16>
    %444 = vector.shape_cast %441 : vector<16x8xbf16> to vector<1x1x16x8xbf16>
    tpu.vector_store %arg7[%c0_370, %c14_371, %c0_372, %c0_373], %444 {strides = array<i32>} : memref<1x16x16x8xbf16, #tpu.memory_space<vmem>>, vector<1x1x16x8xbf16>,
    %c0_374 = arith.constant 0 : index
    %c15_375 = arith.constant 15 : index
    %c0_376 = arith.constant 0 : index
    %c0_377 = arith.constant 0 : index
    %445 = vector.load %arg2[%c0_374, %c15_375, %c0_376, %c0_377] : memref<1x16x17x12xbf16, #tpu.memory_space<vmem>>, vector<1x1x17x12xbf16>
    %446 = vector.shape_cast %445 : vector<1x1x17x12xbf16> to vector<17x12xbf16>
    %447 = vector.extract_strided_slice %446 {offsets = [0, 0], sizes = [16, 12], strides = [1, 1]} : vector<17x12xbf16> to vector<16x12xbf16>
    %cst_378 = arith.constant dense<0.000000e+00> : vector<16x8xf32>
    %448 = tpu.matmul %447, %1, %cst_378 {dimension_numbers = #tpu.dot_dimension_numbers<[1], [0], [0], [1], [0, 0, 1, 1], [], []>} : vector<16x12xbf16>, vector<12x8xbf16>, vector<16x8xf32> -> vector<16x8xf32>
    %c0_379 = arith.constant 0 : index
    %c15_380 = arith.constant 15 : index
    %c0_381 = arith.constant 0 : index
    %c0_382 = arith.constant 0 : index
    %449 = vector.load %arg2[%c0_379, %c15_380, %c0_381, %c0_382] : memref<1x16x17x12xbf16, #tpu.memory_space<vmem>>, vector<1x1x17x12xbf16>
    %450 = vector.shape_cast %449 : vector<1x1x17x12xbf16> to vector<17x12xbf16>
    %451 = vector.extract_strided_slice %450 {offsets = [1, 0], sizes = [16, 12], strides = [1, 1]} : vector<17x12xbf16> to vector<16x12xbf16>
    %cst_383 = arith.constant dense<0.000000e+00> : vector<16x8xf32>
    %452 = tpu.matmul %451, %3, %cst_383 {dimension_numbers = #tpu.dot_dimension_numbers<[1], [0], [0], [1], [0, 0, 1, 1], [], []>} : vector<16x12xbf16>, vector<12x8xbf16>, vector<16x8xf32> -> vector<16x8xf32>
    %453 = arith.addf %448, %452 : vector<16x8xf32>
    %c0_384 = arith.constant 0 : index
    %c0_385 = arith.constant 0 : index
    %c0_386 = arith.constant 0 : index
    %c0_387 = arith.constant 0 : index
    %c0_388 = arith.constant 0 : index
    %454 = vector.load %arg3[%c0_384, %c0_385, %c0_386, %c0_387, %c0_388] : memref<1x1x1x17x12xbf16, #tpu.memory_space<vmem>>, vector<1x1x1x17x12xbf16>
    %455 = vector.shape_cast %454 : vector<1x1x1x17x12xbf16> to vector<17x12xbf16>
    %456 = vector.extract_strided_slice %455 {offsets = [0, 0], sizes = [16, 12], strides = [1, 1]} : vector<17x12xbf16> to vector<16x12xbf16>
    %cst_389 = arith.constant dense<0.000000e+00> : vector<16x8xf32>
    %457 = tpu.matmul %456, %5, %cst_389 {dimension_numbers = #tpu.dot_dimension_numbers<[1], [0], [0], [1], [0, 0, 1, 1], [], []>} : vector<16x12xbf16>, vector<12x8xbf16>, vector<16x8xf32> -> vector<16x8xf32>
    %458 = arith.addf %453, %457 : vector<16x8xf32>
    %c0_390 = arith.constant 0 : index
    %c0_391 = arith.constant 0 : index
    %c0_392 = arith.constant 0 : index
    %c0_393 = arith.constant 0 : index
    %c0_394 = arith.constant 0 : index
    %459 = vector.load %arg3[%c0_390, %c0_391, %c0_392, %c0_393, %c0_394] : memref<1x1x1x17x12xbf16, #tpu.memory_space<vmem>>, vector<1x1x1x17x12xbf16>
    %460 = vector.shape_cast %459 : vector<1x1x1x17x12xbf16> to vector<17x12xbf16>
    %461 = vector.extract_strided_slice %460 {offsets = [1, 0], sizes = [16, 12], strides = [1, 1]} : vector<17x12xbf16> to vector<16x12xbf16>
    %cst_395 = arith.constant dense<0.000000e+00> : vector<16x8xf32>
    %462 = tpu.matmul %461, %7, %cst_395 {dimension_numbers = #tpu.dot_dimension_numbers<[1], [0], [0], [1], [0, 0, 1, 1], [], []>} : vector<16x12xbf16>, vector<12x8xbf16>, vector<16x8xf32> -> vector<16x8xf32>
    %463 = arith.addf %458, %462 : vector<16x8xf32>
    %464 = vector.broadcast %8 : vector<1x8xf32> to vector<16x8xf32>
    %465 = arith.mulf %463, %464 : vector<16x8xf32>
    %466 = vector.broadcast %9 : vector<1x8xf32> to vector<16x8xf32>
    %467 = arith.addf %465, %466 : vector<16x8xf32>
    %cst_396 = arith.constant 0.000000e+00 : f32
    %468 = vector.broadcast %cst_396 : f32 to vector<16x8xf32>
    %469 = arith.maximumf %467, %468 : vector<16x8xf32>
    %470 = arith.truncf %469 : vector<16x8xf32> to vector<16x8xbf16>
    %c0_397 = arith.constant 0 : index
    %c15_398 = arith.constant 15 : index
    %c0_399 = arith.constant 0 : index
    %c0_400 = arith.constant 0 : index
    %471 = vector.load %arg7[%c0_397, %c15_398, %c0_399, %c0_400] : memref<1x16x16x8xbf16, #tpu.memory_space<vmem>>, vector<1x1x16x8xbf16>
    %472 = vector.shape_cast %471 : vector<1x1x16x8xbf16> to vector<16x8xbf16>
    %473 = vector.shape_cast %470 : vector<16x8xbf16> to vector<1x1x16x8xbf16>
    tpu.vector_store %arg7[%c0_397, %c15_398, %c0_399, %c0_400], %473 {strides = array<i32>} : memref<1x16x16x8xbf16, #tpu.memory_space<vmem>>, vector<1x1x16x8xbf16>,
    return
  }
  func.func @transform_0(%arg0: i32, %arg1: i32) -> (i32, i32, i32, i32) {
    %c0_i32 = arith.constant 0 : i32
    %c0_i32_0 = arith.constant 0 : i32
    %c0_i32_1 = arith.constant 0 : i32
    return %arg0, %arg1, %c0_i32, %c0_i32_0 : i32, i32, i32, i32
  }
  func.func @transform_1(%arg0: i32, %arg1: i32) -> (i32, i32, i32, i32, i32) {
    %c0_i32 = arith.constant 0 : i32
    %c0_i32_0 = arith.constant 0 : i32
    %c0_i32_1 = arith.constant 0 : i32
    %c0_i32_2 = arith.constant 0 : i32
    return %arg0, %arg1, %c0_i32, %c0_i32_0, %c0_i32_1 : i32, i32, i32, i32, i32
  }
  func.func @transform_2(%arg0: i32, %arg1: i32) -> (i32, i32, i32) {
    %c0_i32 = arith.constant 0 : i32
    %c0_i32_0 = arith.constant 0 : i32
    %c0_i32_1 = arith.constant 0 : i32
    %c0_i32_2 = arith.constant 0 : i32
    return %c0_i32, %c0_i32_0, %c0_i32_1 : i32, i32, i32
  }
  func.func @transform_3(%arg0: i32, %arg1: i32) -> (i32, i32) {
    %c0_i32 = arith.constant 0 : i32
    %c0_i32_0 = arith.constant 0 : i32
    %c0_i32_1 = arith.constant 0 : i32
    return %c0_i32, %c0_i32_0 : i32, i32
  }
  func.func @transform_4(%arg0: i32, %arg1: i32) -> (i32, i32) {
    %c0_i32 = arith.constant 0 : i32
    %c0_i32_0 = arith.constant 0 : i32
    %c0_i32_1 = arith.constant 0 : i32
    return %c0_i32, %c0_i32_0 : i32, i32
  }
  func.func @transform_5(%arg0: i32, %arg1: i32) -> (i32, i32, i32, i32) {
    %c0_i32 = arith.constant 0 : i32
    %c0_i32_0 = arith.constant 0 : i32
    %c0_i32_1 = arith.constant 0 : i32
    return %arg0, %arg1, %c0_i32, %c0_i32_0 : i32, i32, i32, i32
  }
}

module attributes {stable_mosaic.version = 11 : i64} {
  func.func @_conv_taps_kernel(%arg0: i32, %arg1: i32, %arg2: memref<1x8x9x32xbf16, #tpu.memory_space<vmem>>, %arg3: memref<1x1x1x9x32xbf16, #tpu.memory_space<vmem>>, %arg4: memref<4x32x16xbf16, #tpu.memory_space<vmem>>, %arg5: memref<1x16xf32, #tpu.memory_space<vmem>>, %arg6: memref<1x16xf32, #tpu.memory_space<vmem>>, %arg7: memref<1x8x8x16xbf16, #tpu.memory_space<vmem>>) attributes {dimension_semantics = [#tpu.dimension_semantics<parallel>, #tpu.dimension_semantics<parallel>], iteration_bounds = array<i64: 2, 1>, scalar_prefetch = 0 : i64, scratch_operands = 0 : i64, tpu.core_type = #tpu.core_type<tc>, window_params = [{transform_indices = @transform_0, window_bounds = array<i64: 1, 8, 9, 32>}, {transform_indices = @transform_1, window_bounds = array<i64: 1, 1, 1, 9, 32>}, {pipeline_mode = #tpu.pipeline_mode<synchronous>, transform_indices = @transform_2, window_bounds = array<i64: 4, 32, 16>}, {pipeline_mode = #tpu.pipeline_mode<synchronous>, transform_indices = @transform_3, window_bounds = array<i64: 1, 16>}, {pipeline_mode = #tpu.pipeline_mode<synchronous>, transform_indices = @transform_4, window_bounds = array<i64: 1, 16>}, {transform_indices = @transform_5, window_bounds = array<i64: 1, 8, 8, 16>}]} {
    %c0 = arith.constant 0 : index
    %c0_0 = arith.constant 0 : index
    %c0_1 = arith.constant 0 : index
    %0 = vector.load %arg4[%c0, %c0_0, %c0_1] : memref<4x32x16xbf16, #tpu.memory_space<vmem>>, vector<1x32x16xbf16>
    %1 = vector.shape_cast %0 : vector<1x32x16xbf16> to vector<32x16xbf16>
    %c1 = arith.constant 1 : index
    %c0_2 = arith.constant 0 : index
    %c0_3 = arith.constant 0 : index
    %2 = vector.load %arg4[%c1, %c0_2, %c0_3] : memref<4x32x16xbf16, #tpu.memory_space<vmem>>, vector<1x32x16xbf16>
    %3 = vector.shape_cast %2 : vector<1x32x16xbf16> to vector<32x16xbf16>
    %c2 = arith.constant 2 : index
    %c0_4 = arith.constant 0 : index
    %c0_5 = arith.constant 0 : index
    %4 = vector.load %arg4[%c2, %c0_4, %c0_5] : memref<4x32x16xbf16, #tpu.memory_space<vmem>>, vector<1x32x16xbf16>
    %5 = vector.shape_cast %4 : vector<1x32x16xbf16> to vector<32x16xbf16>
    %c3 = arith.constant 3 : index
    %c0_6 = arith.constant 0 : index
    %c0_7 = arith.constant 0 : index
    %6 = vector.load %arg4[%c3, %c0_6, %c0_7] : memref<4x32x16xbf16, #tpu.memory_space<vmem>>, vector<1x32x16xbf16>
    %7 = vector.shape_cast %6 : vector<1x32x16xbf16> to vector<32x16xbf16>
    %c0_8 = arith.constant 0 : index
    %c0_9 = arith.constant 0 : index
    %8 = vector.load %arg5[%c0_8, %c0_9] : memref<1x16xf32, #tpu.memory_space<vmem>>, vector<1x16xf32>
    %c0_10 = arith.constant 0 : index
    %c0_11 = arith.constant 0 : index
    %9 = vector.load %arg6[%c0_10, %c0_11] : memref<1x16xf32, #tpu.memory_space<vmem>>, vector<1x16xf32>
    %c0_12 = arith.constant 0 : index
    %c0_13 = arith.constant 0 : index
    %c0_14 = arith.constant 0 : index
    %c0_15 = arith.constant 0 : index
    %10 = vector.load %arg2[%c0_12, %c0_13, %c0_14, %c0_15] : memref<1x8x9x32xbf16, #tpu.memory_space<vmem>>, vector<1x1x9x32xbf16>
    %11 = vector.shape_cast %10 : vector<1x1x9x32xbf16> to vector<9x32xbf16>
    %12 = vector.extract_strided_slice %11 {offsets = [0, 0], sizes = [8, 32], strides = [1, 1]} : vector<9x32xbf16> to vector<8x32xbf16>
    %cst = arith.constant dense<0.000000e+00> : vector<8x16xf32>
    %13 = tpu.matmul %12, %1, %cst {dimension_numbers = #tpu.dot_dimension_numbers<[1], [0], [0], [1], [0, 0, 1, 1], [], []>} : vector<8x32xbf16>, vector<32x16xbf16>, vector<8x16xf32> -> vector<8x16xf32>
    %c0_16 = arith.constant 0 : index
    %c0_17 = arith.constant 0 : index
    %c0_18 = arith.constant 0 : index
    %c0_19 = arith.constant 0 : index
    %14 = vector.load %arg2[%c0_16, %c0_17, %c0_18, %c0_19] : memref<1x8x9x32xbf16, #tpu.memory_space<vmem>>, vector<1x1x9x32xbf16>
    %15 = vector.shape_cast %14 : vector<1x1x9x32xbf16> to vector<9x32xbf16>
    %16 = vector.extract_strided_slice %15 {offsets = [1, 0], sizes = [8, 32], strides = [1, 1]} : vector<9x32xbf16> to vector<8x32xbf16>
    %cst_20 = arith.constant dense<0.000000e+00> : vector<8x16xf32>
    %17 = tpu.matmul %16, %3, %cst_20 {dimension_numbers = #tpu.dot_dimension_numbers<[1], [0], [0], [1], [0, 0, 1, 1], [], []>} : vector<8x32xbf16>, vector<32x16xbf16>, vector<8x16xf32> -> vector<8x16xf32>
    %18 = arith.addf %13, %17 : vector<8x16xf32>
    %c0_21 = arith.constant 0 : index
    %c1_22 = arith.constant 1 : index
    %c0_23 = arith.constant 0 : index
    %c0_24 = arith.constant 0 : index
    %19 = vector.load %arg2[%c0_21, %c1_22, %c0_23, %c0_24] : memref<1x8x9x32xbf16, #tpu.memory_space<vmem>>, vector<1x1x9x32xbf16>
    %20 = vector.shape_cast %19 : vector<1x1x9x32xbf16> to vector<9x32xbf16>
    %21 = vector.extract_strided_slice %20 {offsets = [0, 0], sizes = [8, 32], strides = [1, 1]} : vector<9x32xbf16> to vector<8x32xbf16>
    %cst_25 = arith.constant dense<0.000000e+00> : vector<8x16xf32>
    %22 = tpu.matmul %21, %5, %cst_25 {dimension_numbers = #tpu.dot_dimension_numbers<[1], [0], [0], [1], [0, 0, 1, 1], [], []>} : vector<8x32xbf16>, vector<32x16xbf16>, vector<8x16xf32> -> vector<8x16xf32>
    %23 = arith.addf %18, %22 : vector<8x16xf32>
    %c0_26 = arith.constant 0 : index
    %c1_27 = arith.constant 1 : index
    %c0_28 = arith.constant 0 : index
    %c0_29 = arith.constant 0 : index
    %24 = vector.load %arg2[%c0_26, %c1_27, %c0_28, %c0_29] : memref<1x8x9x32xbf16, #tpu.memory_space<vmem>>, vector<1x1x9x32xbf16>
    %25 = vector.shape_cast %24 : vector<1x1x9x32xbf16> to vector<9x32xbf16>
    %26 = vector.extract_strided_slice %25 {offsets = [1, 0], sizes = [8, 32], strides = [1, 1]} : vector<9x32xbf16> to vector<8x32xbf16>
    %cst_30 = arith.constant dense<0.000000e+00> : vector<8x16xf32>
    %27 = tpu.matmul %26, %7, %cst_30 {dimension_numbers = #tpu.dot_dimension_numbers<[1], [0], [0], [1], [0, 0, 1, 1], [], []>} : vector<8x32xbf16>, vector<32x16xbf16>, vector<8x16xf32> -> vector<8x16xf32>
    %28 = arith.addf %23, %27 : vector<8x16xf32>
    %29 = vector.broadcast %8 : vector<1x16xf32> to vector<8x16xf32>
    %30 = arith.mulf %28, %29 : vector<8x16xf32>
    %31 = vector.broadcast %9 : vector<1x16xf32> to vector<8x16xf32>
    %32 = arith.addf %30, %31 : vector<8x16xf32>
    %cst_31 = arith.constant 0.000000e+00 : f32
    %33 = vector.broadcast %cst_31 : f32 to vector<8x16xf32>
    %34 = arith.maximumf %32, %33 : vector<8x16xf32>
    %35 = arith.truncf %34 : vector<8x16xf32> to vector<8x16xbf16>
    %c0_32 = arith.constant 0 : index
    %c0_33 = arith.constant 0 : index
    %c0_34 = arith.constant 0 : index
    %c0_35 = arith.constant 0 : index
    %36 = vector.load %arg7[%c0_32, %c0_33, %c0_34, %c0_35] : memref<1x8x8x16xbf16, #tpu.memory_space<vmem>>, vector<1x1x8x16xbf16>
    %37 = vector.shape_cast %36 : vector<1x1x8x16xbf16> to vector<8x16xbf16>
    %38 = vector.shape_cast %35 : vector<8x16xbf16> to vector<1x1x8x16xbf16>
    tpu.vector_store %arg7[%c0_32, %c0_33, %c0_34, %c0_35], %38 {strides = array<i32>} : memref<1x8x8x16xbf16, #tpu.memory_space<vmem>>, vector<1x1x8x16xbf16>,
    %c0_36 = arith.constant 0 : index
    %c1_37 = arith.constant 1 : index
    %c0_38 = arith.constant 0 : index
    %c0_39 = arith.constant 0 : index
    %39 = vector.load %arg2[%c0_36, %c1_37, %c0_38, %c0_39] : memref<1x8x9x32xbf16, #tpu.memory_space<vmem>>, vector<1x1x9x32xbf16>
    %40 = vector.shape_cast %39 : vector<1x1x9x32xbf16> to vector<9x32xbf16>
    %41 = vector.extract_strided_slice %40 {offsets = [0, 0], sizes = [8, 32], strides = [1, 1]} : vector<9x32xbf16> to vector<8x32xbf16>
    %cst_40 = arith.constant dense<0.000000e+00> : vector<8x16xf32>
    %42 = tpu.matmul %41, %1, %cst_40 {dimension_numbers = #tpu.dot_dimension_numbers<[1], [0], [0], [1], [0, 0, 1, 1], [], []>} : vector<8x32xbf16>, vector<32x16xbf16>, vector<8x16xf32> -> vector<8x16xf32>
    %c0_41 = arith.constant 0 : index
    %c1_42 = arith.constant 1 : index
    %c0_43 = arith.constant 0 : index
    %c0_44 = arith.constant 0 : index
    %43 = vector.load %arg2[%c0_41, %c1_42, %c0_43, %c0_44] : memref<1x8x9x32xbf16, #tpu.memory_space<vmem>>, vector<1x1x9x32xbf16>
    %44 = vector.shape_cast %43 : vector<1x1x9x32xbf16> to vector<9x32xbf16>
    %45 = vector.extract_strided_slice %44 {offsets = [1, 0], sizes = [8, 32], strides = [1, 1]} : vector<9x32xbf16> to vector<8x32xbf16>
    %cst_45 = arith.constant dense<0.000000e+00> : vector<8x16xf32>
    %46 = tpu.matmul %45, %3, %cst_45 {dimension_numbers = #tpu.dot_dimension_numbers<[1], [0], [0], [1], [0, 0, 1, 1], [], []>} : vector<8x32xbf16>, vector<32x16xbf16>, vector<8x16xf32> -> vector<8x16xf32>
    %47 = arith.addf %42, %46 : vector<8x16xf32>
    %c0_46 = arith.constant 0 : index
    %c2_47 = arith.constant 2 : index
    %c0_48 = arith.constant 0 : index
    %c0_49 = arith.constant 0 : index
    %48 = vector.load %arg2[%c0_46, %c2_47, %c0_48, %c0_49] : memref<1x8x9x32xbf16, #tpu.memory_space<vmem>>, vector<1x1x9x32xbf16>
    %49 = vector.shape_cast %48 : vector<1x1x9x32xbf16> to vector<9x32xbf16>
    %50 = vector.extract_strided_slice %49 {offsets = [0, 0], sizes = [8, 32], strides = [1, 1]} : vector<9x32xbf16> to vector<8x32xbf16>
    %cst_50 = arith.constant dense<0.000000e+00> : vector<8x16xf32>
    %51 = tpu.matmul %50, %5, %cst_50 {dimension_numbers = #tpu.dot_dimension_numbers<[1], [0], [0], [1], [0, 0, 1, 1], [], []>} : vector<8x32xbf16>, vector<32x16xbf16>, vector<8x16xf32> -> vector<8x16xf32>
    %52 = arith.addf %47, %51 : vector<8x16xf32>
    %c0_51 = arith.constant 0 : index
    %c2_52 = arith.constant 2 : index
    %c0_53 = arith.constant 0 : index
    %c0_54 = arith.constant 0 : index
    %53 = vector.load %arg2[%c0_51, %c2_52, %c0_53, %c0_54] : memref<1x8x9x32xbf16, #tpu.memory_space<vmem>>, vector<1x1x9x32xbf16>
    %54 = vector.shape_cast %53 : vector<1x1x9x32xbf16> to vector<9x32xbf16>
    %55 = vector.extract_strided_slice %54 {offsets = [1, 0], sizes = [8, 32], strides = [1, 1]} : vector<9x32xbf16> to vector<8x32xbf16>
    %cst_55 = arith.constant dense<0.000000e+00> : vector<8x16xf32>
    %56 = tpu.matmul %55, %7, %cst_55 {dimension_numbers = #tpu.dot_dimension_numbers<[1], [0], [0], [1], [0, 0, 1, 1], [], []>} : vector<8x32xbf16>, vector<32x16xbf16>, vector<8x16xf32> -> vector<8x16xf32>
    %57 = arith.addf %52, %56 : vector<8x16xf32>
    %58 = vector.broadcast %8 : vector<1x16xf32> to vector<8x16xf32>
    %59 = arith.mulf %57, %58 : vector<8x16xf32>
    %60 = vector.broadcast %9 : vector<1x16xf32> to vector<8x16xf32>
    %61 = arith.addf %59, %60 : vector<8x16xf32>
    %cst_56 = arith.constant 0.000000e+00 : f32
    %62 = vector.broadcast %cst_56 : f32 to vector<8x16xf32>
    %63 = arith.maximumf %61, %62 : vector<8x16xf32>
    %64 = arith.truncf %63 : vector<8x16xf32> to vector<8x16xbf16>
    %c0_57 = arith.constant 0 : index
    %c1_58 = arith.constant 1 : index
    %c0_59 = arith.constant 0 : index
    %c0_60 = arith.constant 0 : index
    %65 = vector.load %arg7[%c0_57, %c1_58, %c0_59, %c0_60] : memref<1x8x8x16xbf16, #tpu.memory_space<vmem>>, vector<1x1x8x16xbf16>
    %66 = vector.shape_cast %65 : vector<1x1x8x16xbf16> to vector<8x16xbf16>
    %67 = vector.shape_cast %64 : vector<8x16xbf16> to vector<1x1x8x16xbf16>
    tpu.vector_store %arg7[%c0_57, %c1_58, %c0_59, %c0_60], %67 {strides = array<i32>} : memref<1x8x8x16xbf16, #tpu.memory_space<vmem>>, vector<1x1x8x16xbf16>,
    %c0_61 = arith.constant 0 : index
    %c2_62 = arith.constant 2 : index
    %c0_63 = arith.constant 0 : index
    %c0_64 = arith.constant 0 : index
    %68 = vector.load %arg2[%c0_61, %c2_62, %c0_63, %c0_64] : memref<1x8x9x32xbf16, #tpu.memory_space<vmem>>, vector<1x1x9x32xbf16>
    %69 = vector.shape_cast %68 : vector<1x1x9x32xbf16> to vector<9x32xbf16>
    %70 = vector.extract_strided_slice %69 {offsets = [0, 0], sizes = [8, 32], strides = [1, 1]} : vector<9x32xbf16> to vector<8x32xbf16>
    %cst_65 = arith.constant dense<0.000000e+00> : vector<8x16xf32>
    %71 = tpu.matmul %70, %1, %cst_65 {dimension_numbers = #tpu.dot_dimension_numbers<[1], [0], [0], [1], [0, 0, 1, 1], [], []>} : vector<8x32xbf16>, vector<32x16xbf16>, vector<8x16xf32> -> vector<8x16xf32>
    %c0_66 = arith.constant 0 : index
    %c2_67 = arith.constant 2 : index
    %c0_68 = arith.constant 0 : index
    %c0_69 = arith.constant 0 : index
    %72 = vector.load %arg2[%c0_66, %c2_67, %c0_68, %c0_69] : memref<1x8x9x32xbf16, #tpu.memory_space<vmem>>, vector<1x1x9x32xbf16>
    %73 = vector.shape_cast %72 : vector<1x1x9x32xbf16> to vector<9x32xbf16>
    %74 = vector.extract_strided_slice %73 {offsets = [1, 0], sizes = [8, 32], strides = [1, 1]} : vector<9x32xbf16> to vector<8x32xbf16>
    %cst_70 = arith.constant dense<0.000000e+00> : vector<8x16xf32>
    %75 = tpu.matmul %74, %3, %cst_70 {dimension_numbers = #tpu.dot_dimension_numbers<[1], [0], [0], [1], [0, 0, 1, 1], [], []>} : vector<8x32xbf16>, vector<32x16xbf16>, vector<8x16xf32> -> vector<8x16xf32>
    %76 = arith.addf %71, %75 : vector<8x16xf32>
    %c0_71 = arith.constant 0 : index
    %c3_72 = arith.constant 3 : index
    %c0_73 = arith.constant 0 : index
    %c0_74 = arith.constant 0 : index
    %77 = vector.load %arg2[%c0_71, %c3_72, %c0_73, %c0_74] : memref<1x8x9x32xbf16, #tpu.memory_space<vmem>>, vector<1x1x9x32xbf16>
    %78 = vector.shape_cast %77 : vector<1x1x9x32xbf16> to vector<9x32xbf16>
    %79 = vector.extract_strided_slice %78 {offsets = [0, 0], sizes = [8, 32], strides = [1, 1]} : vector<9x32xbf16> to vector<8x32xbf16>
    %cst_75 = arith.constant dense<0.000000e+00> : vector<8x16xf32>
    %80 = tpu.matmul %79, %5, %cst_75 {dimension_numbers = #tpu.dot_dimension_numbers<[1], [0], [0], [1], [0, 0, 1, 1], [], []>} : vector<8x32xbf16>, vector<32x16xbf16>, vector<8x16xf32> -> vector<8x16xf32>
    %81 = arith.addf %76, %80 : vector<8x16xf32>
    %c0_76 = arith.constant 0 : index
    %c3_77 = arith.constant 3 : index
    %c0_78 = arith.constant 0 : index
    %c0_79 = arith.constant 0 : index
    %82 = vector.load %arg2[%c0_76, %c3_77, %c0_78, %c0_79] : memref<1x8x9x32xbf16, #tpu.memory_space<vmem>>, vector<1x1x9x32xbf16>
    %83 = vector.shape_cast %82 : vector<1x1x9x32xbf16> to vector<9x32xbf16>
    %84 = vector.extract_strided_slice %83 {offsets = [1, 0], sizes = [8, 32], strides = [1, 1]} : vector<9x32xbf16> to vector<8x32xbf16>
    %cst_80 = arith.constant dense<0.000000e+00> : vector<8x16xf32>
    %85 = tpu.matmul %84, %7, %cst_80 {dimension_numbers = #tpu.dot_dimension_numbers<[1], [0], [0], [1], [0, 0, 1, 1], [], []>} : vector<8x32xbf16>, vector<32x16xbf16>, vector<8x16xf32> -> vector<8x16xf32>
    %86 = arith.addf %81, %85 : vector<8x16xf32>
    %87 = vector.broadcast %8 : vector<1x16xf32> to vector<8x16xf32>
    %88 = arith.mulf %86, %87 : vector<8x16xf32>
    %89 = vector.broadcast %9 : vector<1x16xf32> to vector<8x16xf32>
    %90 = arith.addf %88, %89 : vector<8x16xf32>
    %cst_81 = arith.constant 0.000000e+00 : f32
    %91 = vector.broadcast %cst_81 : f32 to vector<8x16xf32>
    %92 = arith.maximumf %90, %91 : vector<8x16xf32>
    %93 = arith.truncf %92 : vector<8x16xf32> to vector<8x16xbf16>
    %c0_82 = arith.constant 0 : index
    %c2_83 = arith.constant 2 : index
    %c0_84 = arith.constant 0 : index
    %c0_85 = arith.constant 0 : index
    %94 = vector.load %arg7[%c0_82, %c2_83, %c0_84, %c0_85] : memref<1x8x8x16xbf16, #tpu.memory_space<vmem>>, vector<1x1x8x16xbf16>
    %95 = vector.shape_cast %94 : vector<1x1x8x16xbf16> to vector<8x16xbf16>
    %96 = vector.shape_cast %93 : vector<8x16xbf16> to vector<1x1x8x16xbf16>
    tpu.vector_store %arg7[%c0_82, %c2_83, %c0_84, %c0_85], %96 {strides = array<i32>} : memref<1x8x8x16xbf16, #tpu.memory_space<vmem>>, vector<1x1x8x16xbf16>,
    %c0_86 = arith.constant 0 : index
    %c3_87 = arith.constant 3 : index
    %c0_88 = arith.constant 0 : index
    %c0_89 = arith.constant 0 : index
    %97 = vector.load %arg2[%c0_86, %c3_87, %c0_88, %c0_89] : memref<1x8x9x32xbf16, #tpu.memory_space<vmem>>, vector<1x1x9x32xbf16>
    %98 = vector.shape_cast %97 : vector<1x1x9x32xbf16> to vector<9x32xbf16>
    %99 = vector.extract_strided_slice %98 {offsets = [0, 0], sizes = [8, 32], strides = [1, 1]} : vector<9x32xbf16> to vector<8x32xbf16>
    %cst_90 = arith.constant dense<0.000000e+00> : vector<8x16xf32>
    %100 = tpu.matmul %99, %1, %cst_90 {dimension_numbers = #tpu.dot_dimension_numbers<[1], [0], [0], [1], [0, 0, 1, 1], [], []>} : vector<8x32xbf16>, vector<32x16xbf16>, vector<8x16xf32> -> vector<8x16xf32>
    %c0_91 = arith.constant 0 : index
    %c3_92 = arith.constant 3 : index
    %c0_93 = arith.constant 0 : index
    %c0_94 = arith.constant 0 : index
    %101 = vector.load %arg2[%c0_91, %c3_92, %c0_93, %c0_94] : memref<1x8x9x32xbf16, #tpu.memory_space<vmem>>, vector<1x1x9x32xbf16>
    %102 = vector.shape_cast %101 : vector<1x1x9x32xbf16> to vector<9x32xbf16>
    %103 = vector.extract_strided_slice %102 {offsets = [1, 0], sizes = [8, 32], strides = [1, 1]} : vector<9x32xbf16> to vector<8x32xbf16>
    %cst_95 = arith.constant dense<0.000000e+00> : vector<8x16xf32>
    %104 = tpu.matmul %103, %3, %cst_95 {dimension_numbers = #tpu.dot_dimension_numbers<[1], [0], [0], [1], [0, 0, 1, 1], [], []>} : vector<8x32xbf16>, vector<32x16xbf16>, vector<8x16xf32> -> vector<8x16xf32>
    %105 = arith.addf %100, %104 : vector<8x16xf32>
    %c0_96 = arith.constant 0 : index
    %c4 = arith.constant 4 : index
    %c0_97 = arith.constant 0 : index
    %c0_98 = arith.constant 0 : index
    %106 = vector.load %arg2[%c0_96, %c4, %c0_97, %c0_98] : memref<1x8x9x32xbf16, #tpu.memory_space<vmem>>, vector<1x1x9x32xbf16>
    %107 = vector.shape_cast %106 : vector<1x1x9x32xbf16> to vector<9x32xbf16>
    %108 = vector.extract_strided_slice %107 {offsets = [0, 0], sizes = [8, 32], strides = [1, 1]} : vector<9x32xbf16> to vector<8x32xbf16>
    %cst_99 = arith.constant dense<0.000000e+00> : vector<8x16xf32>
    %109 = tpu.matmul %108, %5, %cst_99 {dimension_numbers = #tpu.dot_dimension_numbers<[1], [0], [0], [1], [0, 0, 1, 1], [], []>} : vector<8x32xbf16>, vector<32x16xbf16>, vector<8x16xf32> -> vector<8x16xf32>
    %110 = arith.addf %105, %109 : vector<8x16xf32>
    %c0_100 = arith.constant 0 : index
    %c4_101 = arith.constant 4 : index
    %c0_102 = arith.constant 0 : index
    %c0_103 = arith.constant 0 : index
    %111 = vector.load %arg2[%c0_100, %c4_101, %c0_102, %c0_103] : memref<1x8x9x32xbf16, #tpu.memory_space<vmem>>, vector<1x1x9x32xbf16>
    %112 = vector.shape_cast %111 : vector<1x1x9x32xbf16> to vector<9x32xbf16>
    %113 = vector.extract_strided_slice %112 {offsets = [1, 0], sizes = [8, 32], strides = [1, 1]} : vector<9x32xbf16> to vector<8x32xbf16>
    %cst_104 = arith.constant dense<0.000000e+00> : vector<8x16xf32>
    %114 = tpu.matmul %113, %7, %cst_104 {dimension_numbers = #tpu.dot_dimension_numbers<[1], [0], [0], [1], [0, 0, 1, 1], [], []>} : vector<8x32xbf16>, vector<32x16xbf16>, vector<8x16xf32> -> vector<8x16xf32>
    %115 = arith.addf %110, %114 : vector<8x16xf32>
    %116 = vector.broadcast %8 : vector<1x16xf32> to vector<8x16xf32>
    %117 = arith.mulf %115, %116 : vector<8x16xf32>
    %118 = vector.broadcast %9 : vector<1x16xf32> to vector<8x16xf32>
    %119 = arith.addf %117, %118 : vector<8x16xf32>
    %cst_105 = arith.constant 0.000000e+00 : f32
    %120 = vector.broadcast %cst_105 : f32 to vector<8x16xf32>
    %121 = arith.maximumf %119, %120 : vector<8x16xf32>
    %122 = arith.truncf %121 : vector<8x16xf32> to vector<8x16xbf16>
    %c0_106 = arith.constant 0 : index
    %c3_107 = arith.constant 3 : index
    %c0_108 = arith.constant 0 : index
    %c0_109 = arith.constant 0 : index
    %123 = vector.load %arg7[%c0_106, %c3_107, %c0_108, %c0_109] : memref<1x8x8x16xbf16, #tpu.memory_space<vmem>>, vector<1x1x8x16xbf16>
    %124 = vector.shape_cast %123 : vector<1x1x8x16xbf16> to vector<8x16xbf16>
    %125 = vector.shape_cast %122 : vector<8x16xbf16> to vector<1x1x8x16xbf16>
    tpu.vector_store %arg7[%c0_106, %c3_107, %c0_108, %c0_109], %125 {strides = array<i32>} : memref<1x8x8x16xbf16, #tpu.memory_space<vmem>>, vector<1x1x8x16xbf16>,
    %c0_110 = arith.constant 0 : index
    %c4_111 = arith.constant 4 : index
    %c0_112 = arith.constant 0 : index
    %c0_113 = arith.constant 0 : index
    %126 = vector.load %arg2[%c0_110, %c4_111, %c0_112, %c0_113] : memref<1x8x9x32xbf16, #tpu.memory_space<vmem>>, vector<1x1x9x32xbf16>
    %127 = vector.shape_cast %126 : vector<1x1x9x32xbf16> to vector<9x32xbf16>
    %128 = vector.extract_strided_slice %127 {offsets = [0, 0], sizes = [8, 32], strides = [1, 1]} : vector<9x32xbf16> to vector<8x32xbf16>
    %cst_114 = arith.constant dense<0.000000e+00> : vector<8x16xf32>
    %129 = tpu.matmul %128, %1, %cst_114 {dimension_numbers = #tpu.dot_dimension_numbers<[1], [0], [0], [1], [0, 0, 1, 1], [], []>} : vector<8x32xbf16>, vector<32x16xbf16>, vector<8x16xf32> -> vector<8x16xf32>
    %c0_115 = arith.constant 0 : index
    %c4_116 = arith.constant 4 : index
    %c0_117 = arith.constant 0 : index
    %c0_118 = arith.constant 0 : index
    %130 = vector.load %arg2[%c0_115, %c4_116, %c0_117, %c0_118] : memref<1x8x9x32xbf16, #tpu.memory_space<vmem>>, vector<1x1x9x32xbf16>
    %131 = vector.shape_cast %130 : vector<1x1x9x32xbf16> to vector<9x32xbf16>
    %132 = vector.extract_strided_slice %131 {offsets = [1, 0], sizes = [8, 32], strides = [1, 1]} : vector<9x32xbf16> to vector<8x32xbf16>
    %cst_119 = arith.constant dense<0.000000e+00> : vector<8x16xf32>
    %133 = tpu.matmul %132, %3, %cst_119 {dimension_numbers = #tpu.dot_dimension_numbers<[1], [0], [0], [1], [0, 0, 1, 1], [], []>} : vector<8x32xbf16>, vector<32x16xbf16>, vector<8x16xf32> -> vector<8x16xf32>
    %134 = arith.addf %129, %133 : vector<8x16xf32>
    %c0_120 = arith.constant 0 : index
    %c5 = arith.constant 5 : index
    %c0_121 = arith.constant 0 : index
    %c0_122 = arith.constant 0 : index
    %135 = vector.load %arg2[%c0_120, %c5, %c0_121, %c0_122] : memref<1x8x9x32xbf16, #tpu.memory_space<vmem>>, vector<1x1x9x32xbf16>
    %136 = vector.shape_cast %135 : vector<1x1x9x32xbf16> to vector<9x32xbf16>
    %137 = vector.extract_strided_slice %136 {offsets = [0, 0], sizes = [8, 32], strides = [1, 1]} : vector<9x32xbf16> to vector<8x32xbf16>
    %cst_123 = arith.constant dense<0.000000e+00> : vector<8x16xf32>
    %138 = tpu.matmul %137, %5, %cst_123 {dimension_numbers = #tpu.dot_dimension_numbers<[1], [0], [0], [1], [0, 0, 1, 1], [], []>} : vector<8x32xbf16>, vector<32x16xbf16>, vector<8x16xf32> -> vector<8x16xf32>
    %139 = arith.addf %134, %138 : vector<8x16xf32>
    %c0_124 = arith.constant 0 : index
    %c5_125 = arith.constant 5 : index
    %c0_126 = arith.constant 0 : index
    %c0_127 = arith.constant 0 : index
    %140 = vector.load %arg2[%c0_124, %c5_125, %c0_126, %c0_127] : memref<1x8x9x32xbf16, #tpu.memory_space<vmem>>, vector<1x1x9x32xbf16>
    %141 = vector.shape_cast %140 : vector<1x1x9x32xbf16> to vector<9x32xbf16>
    %142 = vector.extract_strided_slice %141 {offsets = [1, 0], sizes = [8, 32], strides = [1, 1]} : vector<9x32xbf16> to vector<8x32xbf16>
    %cst_128 = arith.constant dense<0.000000e+00> : vector<8x16xf32>
    %143 = tpu.matmul %142, %7, %cst_128 {dimension_numbers = #tpu.dot_dimension_numbers<[1], [0], [0], [1], [0, 0, 1, 1], [], []>} : vector<8x32xbf16>, vector<32x16xbf16>, vector<8x16xf32> -> vector<8x16xf32>
    %144 = arith.addf %139, %143 : vector<8x16xf32>
    %145 = vector.broadcast %8 : vector<1x16xf32> to vector<8x16xf32>
    %146 = arith.mulf %144, %145 : vector<8x16xf32>
    %147 = vector.broadcast %9 : vector<1x16xf32> to vector<8x16xf32>
    %148 = arith.addf %146, %147 : vector<8x16xf32>
    %cst_129 = arith.constant 0.000000e+00 : f32
    %149 = vector.broadcast %cst_129 : f32 to vector<8x16xf32>
    %150 = arith.maximumf %148, %149 : vector<8x16xf32>
    %151 = arith.truncf %150 : vector<8x16xf32> to vector<8x16xbf16>
    %c0_130 = arith.constant 0 : index
    %c4_131 = arith.constant 4 : index
    %c0_132 = arith.constant 0 : index
    %c0_133 = arith.constant 0 : index
    %152 = vector.load %arg7[%c0_130, %c4_131, %c0_132, %c0_133] : memref<1x8x8x16xbf16, #tpu.memory_space<vmem>>, vector<1x1x8x16xbf16>
    %153 = vector.shape_cast %152 : vector<1x1x8x16xbf16> to vector<8x16xbf16>
    %154 = vector.shape_cast %151 : vector<8x16xbf16> to vector<1x1x8x16xbf16>
    tpu.vector_store %arg7[%c0_130, %c4_131, %c0_132, %c0_133], %154 {strides = array<i32>} : memref<1x8x8x16xbf16, #tpu.memory_space<vmem>>, vector<1x1x8x16xbf16>,
    %c0_134 = arith.constant 0 : index
    %c5_135 = arith.constant 5 : index
    %c0_136 = arith.constant 0 : index
    %c0_137 = arith.constant 0 : index
    %155 = vector.load %arg2[%c0_134, %c5_135, %c0_136, %c0_137] : memref<1x8x9x32xbf16, #tpu.memory_space<vmem>>, vector<1x1x9x32xbf16>
    %156 = vector.shape_cast %155 : vector<1x1x9x32xbf16> to vector<9x32xbf16>
    %157 = vector.extract_strided_slice %156 {offsets = [0, 0], sizes = [8, 32], strides = [1, 1]} : vector<9x32xbf16> to vector<8x32xbf16>
    %cst_138 = arith.constant dense<0.000000e+00> : vector<8x16xf32>
    %158 = tpu.matmul %157, %1, %cst_138 {dimension_numbers = #tpu.dot_dimension_numbers<[1], [0], [0], [1], [0, 0, 1, 1], [], []>} : vector<8x32xbf16>, vector<32x16xbf16>, vector<8x16xf32> -> vector<8x16xf32>
    %c0_139 = arith.constant 0 : index
    %c5_140 = arith.constant 5 : index
    %c0_141 = arith.constant 0 : index
    %c0_142 = arith.constant 0 : index
    %159 = vector.load %arg2[%c0_139, %c5_140, %c0_141, %c0_142] : memref<1x8x9x32xbf16, #tpu.memory_space<vmem>>, vector<1x1x9x32xbf16>
    %160 = vector.shape_cast %159 : vector<1x1x9x32xbf16> to vector<9x32xbf16>
    %161 = vector.extract_strided_slice %160 {offsets = [1, 0], sizes = [8, 32], strides = [1, 1]} : vector<9x32xbf16> to vector<8x32xbf16>
    %cst_143 = arith.constant dense<0.000000e+00> : vector<8x16xf32>
    %162 = tpu.matmul %161, %3, %cst_143 {dimension_numbers = #tpu.dot_dimension_numbers<[1], [0], [0], [1], [0, 0, 1, 1], [], []>} : vector<8x32xbf16>, vector<32x16xbf16>, vector<8x16xf32> -> vector<8x16xf32>
    %163 = arith.addf %158, %162 : vector<8x16xf32>
    %c0_144 = arith.constant 0 : index
    %c6 = arith.constant 6 : index
    %c0_145 = arith.constant 0 : index
    %c0_146 = arith.constant 0 : index
    %164 = vector.load %arg2[%c0_144, %c6, %c0_145, %c0_146] : memref<1x8x9x32xbf16, #tpu.memory_space<vmem>>, vector<1x1x9x32xbf16>
    %165 = vector.shape_cast %164 : vector<1x1x9x32xbf16> to vector<9x32xbf16>
    %166 = vector.extract_strided_slice %165 {offsets = [0, 0], sizes = [8, 32], strides = [1, 1]} : vector<9x32xbf16> to vector<8x32xbf16>
    %cst_147 = arith.constant dense<0.000000e+00> : vector<8x16xf32>
    %167 = tpu.matmul %166, %5, %cst_147 {dimension_numbers = #tpu.dot_dimension_numbers<[1], [0], [0], [1], [0, 0, 1, 1], [], []>} : vector<8x32xbf16>, vector<32x16xbf16>, vector<8x16xf32> -> vector<8x16xf32>
    %168 = arith.addf %163, %167 : vector<8x16xf32>
    %c0_148 = arith.constant 0 : index
    %c6_149 = arith.constant 6 : index
    %c0_150 = arith.constant 0 : index
    %c0_151 = arith.constant 0 : index
    %169 = vector.load %arg2[%c0_148, %c6_149, %c0_150, %c0_151] : memref<1x8x9x32xbf16, #tpu.memory_space<vmem>>, vector<1x1x9x32xbf16>
    %170 = vector.shape_cast %169 : vector<1x1x9x32xbf16> to vector<9x32xbf16>
    %171 = vector.extract_strided_slice %170 {offsets = [1, 0], sizes = [8, 32], strides = [1, 1]} : vector<9x32xbf16> to vector<8x32xbf16>
    %cst_152 = arith.constant dense<0.000000e+00> : vector<8x16xf32>
    %172 = tpu.matmul %171, %7, %cst_152 {dimension_numbers = #tpu.dot_dimension_numbers<[1], [0], [0], [1], [0, 0, 1, 1], [], []>} : vector<8x32xbf16>, vector<32x16xbf16>, vector<8x16xf32> -> vector<8x16xf32>
    %173 = arith.addf %168, %172 : vector<8x16xf32>
    %174 = vector.broadcast %8 : vector<1x16xf32> to vector<8x16xf32>
    %175 = arith.mulf %173, %174 : vector<8x16xf32>
    %176 = vector.broadcast %9 : vector<1x16xf32> to vector<8x16xf32>
    %177 = arith.addf %175, %176 : vector<8x16xf32>
    %cst_153 = arith.constant 0.000000e+00 : f32
    %178 = vector.broadcast %cst_153 : f32 to vector<8x16xf32>
    %179 = arith.maximumf %177, %178 : vector<8x16xf32>
    %180 = arith.truncf %179 : vector<8x16xf32> to vector<8x16xbf16>
    %c0_154 = arith.constant 0 : index
    %c5_155 = arith.constant 5 : index
    %c0_156 = arith.constant 0 : index
    %c0_157 = arith.constant 0 : index
    %181 = vector.load %arg7[%c0_154, %c5_155, %c0_156, %c0_157] : memref<1x8x8x16xbf16, #tpu.memory_space<vmem>>, vector<1x1x8x16xbf16>
    %182 = vector.shape_cast %181 : vector<1x1x8x16xbf16> to vector<8x16xbf16>
    %183 = vector.shape_cast %180 : vector<8x16xbf16> to vector<1x1x8x16xbf16>
    tpu.vector_store %arg7[%c0_154, %c5_155, %c0_156, %c0_157], %183 {strides = array<i32>} : memref<1x8x8x16xbf16, #tpu.memory_space<vmem>>, vector<1x1x8x16xbf16>,
    %c0_158 = arith.constant 0 : index
    %c6_159 = arith.constant 6 : index
    %c0_160 = arith.constant 0 : index
    %c0_161 = arith.constant 0 : index
    %184 = vector.load %arg2[%c0_158, %c6_159, %c0_160, %c0_161] : memref<1x8x9x32xbf16, #tpu.memory_space<vmem>>, vector<1x1x9x32xbf16>
    %185 = vector.shape_cast %184 : vector<1x1x9x32xbf16> to vector<9x32xbf16>
    %186 = vector.extract_strided_slice %185 {offsets = [0, 0], sizes = [8, 32], strides = [1, 1]} : vector<9x32xbf16> to vector<8x32xbf16>
    %cst_162 = arith.constant dense<0.000000e+00> : vector<8x16xf32>
    %187 = tpu.matmul %186, %1, %cst_162 {dimension_numbers = #tpu.dot_dimension_numbers<[1], [0], [0], [1], [0, 0, 1, 1], [], []>} : vector<8x32xbf16>, vector<32x16xbf16>, vector<8x16xf32> -> vector<8x16xf32>
    %c0_163 = arith.constant 0 : index
    %c6_164 = arith.constant 6 : index
    %c0_165 = arith.constant 0 : index
    %c0_166 = arith.constant 0 : index
    %188 = vector.load %arg2[%c0_163, %c6_164, %c0_165, %c0_166] : memref<1x8x9x32xbf16, #tpu.memory_space<vmem>>, vector<1x1x9x32xbf16>
    %189 = vector.shape_cast %188 : vector<1x1x9x32xbf16> to vector<9x32xbf16>
    %190 = vector.extract_strided_slice %189 {offsets = [1, 0], sizes = [8, 32], strides = [1, 1]} : vector<9x32xbf16> to vector<8x32xbf16>
    %cst_167 = arith.constant dense<0.000000e+00> : vector<8x16xf32>
    %191 = tpu.matmul %190, %3, %cst_167 {dimension_numbers = #tpu.dot_dimension_numbers<[1], [0], [0], [1], [0, 0, 1, 1], [], []>} : vector<8x32xbf16>, vector<32x16xbf16>, vector<8x16xf32> -> vector<8x16xf32>
    %192 = arith.addf %187, %191 : vector<8x16xf32>
    %c0_168 = arith.constant 0 : index
    %c7 = arith.constant 7 : index
    %c0_169 = arith.constant 0 : index
    %c0_170 = arith.constant 0 : index
    %193 = vector.load %arg2[%c0_168, %c7, %c0_169, %c0_170] : memref<1x8x9x32xbf16, #tpu.memory_space<vmem>>, vector<1x1x9x32xbf16>
    %194 = vector.shape_cast %193 : vector<1x1x9x32xbf16> to vector<9x32xbf16>
    %195 = vector.extract_strided_slice %194 {offsets = [0, 0], sizes = [8, 32], strides = [1, 1]} : vector<9x32xbf16> to vector<8x32xbf16>
    %cst_171 = arith.constant dense<0.000000e+00> : vector<8x16xf32>
    %196 = tpu.matmul %195, %5, %cst_171 {dimension_numbers = #tpu.dot_dimension_numbers<[1], [0], [0], [1], [0, 0, 1, 1], [], []>} : vector<8x32xbf16>, vector<32x16xbf16>, vector<8x16xf32> -> vector<8x16xf32>
    %197 = arith.addf %192, %196 : vector<8x16xf32>
    %c0_172 = arith.constant 0 : index
    %c7_173 = arith.constant 7 : index
    %c0_174 = arith.constant 0 : index
    %c0_175 = arith.constant 0 : index
    %198 = vector.load %arg2[%c0_172, %c7_173, %c0_174, %c0_175] : memref<1x8x9x32xbf16, #tpu.memory_space<vmem>>, vector<1x1x9x32xbf16>
    %199 = vector.shape_cast %198 : vector<1x1x9x32xbf16> to vector<9x32xbf16>
    %200 = vector.extract_strided_slice %199 {offsets = [1, 0], sizes = [8, 32], strides = [1, 1]} : vector<9x32xbf16> to vector<8x32xbf16>
    %cst_176 = arith.constant dense<0.000000e+00> : vector<8x16xf32>
    %201 = tpu.matmul %200, %7, %cst_176 {dimension_numbers = #tpu.dot_dimension_numbers<[1], [0], [0], [1], [0, 0, 1, 1], [], []>} : vector<8x32xbf16>, vector<32x16xbf16>, vector<8x16xf32> -> vector<8x16xf32>
    %202 = arith.addf %197, %201 : vector<8x16xf32>
    %203 = vector.broadcast %8 : vector<1x16xf32> to vector<8x16xf32>
    %204 = arith.mulf %202, %203 : vector<8x16xf32>
    %205 = vector.broadcast %9 : vector<1x16xf32> to vector<8x16xf32>
    %206 = arith.addf %204, %205 : vector<8x16xf32>
    %cst_177 = arith.constant 0.000000e+00 : f32
    %207 = vector.broadcast %cst_177 : f32 to vector<8x16xf32>
    %208 = arith.maximumf %206, %207 : vector<8x16xf32>
    %209 = arith.truncf %208 : vector<8x16xf32> to vector<8x16xbf16>
    %c0_178 = arith.constant 0 : index
    %c6_179 = arith.constant 6 : index
    %c0_180 = arith.constant 0 : index
    %c0_181 = arith.constant 0 : index
    %210 = vector.load %arg7[%c0_178, %c6_179, %c0_180, %c0_181] : memref<1x8x8x16xbf16, #tpu.memory_space<vmem>>, vector<1x1x8x16xbf16>
    %211 = vector.shape_cast %210 : vector<1x1x8x16xbf16> to vector<8x16xbf16>
    %212 = vector.shape_cast %209 : vector<8x16xbf16> to vector<1x1x8x16xbf16>
    tpu.vector_store %arg7[%c0_178, %c6_179, %c0_180, %c0_181], %212 {strides = array<i32>} : memref<1x8x8x16xbf16, #tpu.memory_space<vmem>>, vector<1x1x8x16xbf16>,
    %c0_182 = arith.constant 0 : index
    %c7_183 = arith.constant 7 : index
    %c0_184 = arith.constant 0 : index
    %c0_185 = arith.constant 0 : index
    %213 = vector.load %arg2[%c0_182, %c7_183, %c0_184, %c0_185] : memref<1x8x9x32xbf16, #tpu.memory_space<vmem>>, vector<1x1x9x32xbf16>
    %214 = vector.shape_cast %213 : vector<1x1x9x32xbf16> to vector<9x32xbf16>
    %215 = vector.extract_strided_slice %214 {offsets = [0, 0], sizes = [8, 32], strides = [1, 1]} : vector<9x32xbf16> to vector<8x32xbf16>
    %cst_186 = arith.constant dense<0.000000e+00> : vector<8x16xf32>
    %216 = tpu.matmul %215, %1, %cst_186 {dimension_numbers = #tpu.dot_dimension_numbers<[1], [0], [0], [1], [0, 0, 1, 1], [], []>} : vector<8x32xbf16>, vector<32x16xbf16>, vector<8x16xf32> -> vector<8x16xf32>
    %c0_187 = arith.constant 0 : index
    %c7_188 = arith.constant 7 : index
    %c0_189 = arith.constant 0 : index
    %c0_190 = arith.constant 0 : index
    %217 = vector.load %arg2[%c0_187, %c7_188, %c0_189, %c0_190] : memref<1x8x9x32xbf16, #tpu.memory_space<vmem>>, vector<1x1x9x32xbf16>
    %218 = vector.shape_cast %217 : vector<1x1x9x32xbf16> to vector<9x32xbf16>
    %219 = vector.extract_strided_slice %218 {offsets = [1, 0], sizes = [8, 32], strides = [1, 1]} : vector<9x32xbf16> to vector<8x32xbf16>
    %cst_191 = arith.constant dense<0.000000e+00> : vector<8x16xf32>
    %220 = tpu.matmul %219, %3, %cst_191 {dimension_numbers = #tpu.dot_dimension_numbers<[1], [0], [0], [1], [0, 0, 1, 1], [], []>} : vector<8x32xbf16>, vector<32x16xbf16>, vector<8x16xf32> -> vector<8x16xf32>
    %221 = arith.addf %216, %220 : vector<8x16xf32>
    %c0_192 = arith.constant 0 : index
    %c0_193 = arith.constant 0 : index
    %c0_194 = arith.constant 0 : index
    %c0_195 = arith.constant 0 : index
    %c0_196 = arith.constant 0 : index
    %222 = vector.load %arg3[%c0_192, %c0_193, %c0_194, %c0_195, %c0_196] : memref<1x1x1x9x32xbf16, #tpu.memory_space<vmem>>, vector<1x1x1x9x32xbf16>
    %223 = vector.shape_cast %222 : vector<1x1x1x9x32xbf16> to vector<9x32xbf16>
    %224 = vector.extract_strided_slice %223 {offsets = [0, 0], sizes = [8, 32], strides = [1, 1]} : vector<9x32xbf16> to vector<8x32xbf16>
    %cst_197 = arith.constant dense<0.000000e+00> : vector<8x16xf32>
    %225 = tpu.matmul %224, %5, %cst_197 {dimension_numbers = #tpu.dot_dimension_numbers<[1], [0], [0], [1], [0, 0, 1, 1], [], []>} : vector<8x32xbf16>, vector<32x16xbf16>, vector<8x16xf32> -> vector<8x16xf32>
    %226 = arith.addf %221, %225 : vector<8x16xf32>
    %c0_198 = arith.constant 0 : index
    %c0_199 = arith.constant 0 : index
    %c0_200 = arith.constant 0 : index
    %c0_201 = arith.constant 0 : index
    %c0_202 = arith.constant 0 : index
    %227 = vector.load %arg3[%c0_198, %c0_199, %c0_200, %c0_201, %c0_202] : memref<1x1x1x9x32xbf16, #tpu.memory_space<vmem>>, vector<1x1x1x9x32xbf16>
    %228 = vector.shape_cast %227 : vector<1x1x1x9x32xbf16> to vector<9x32xbf16>
    %229 = vector.extract_strided_slice %228 {offsets = [1, 0], sizes = [8, 32], strides = [1, 1]} : vector<9x32xbf16> to vector<8x32xbf16>
    %cst_203 = arith.constant dense<0.000000e+00> : vector<8x16xf32>
    %230 = tpu.matmul %229, %7, %cst_203 {dimension_numbers = #tpu.dot_dimension_numbers<[1], [0], [0], [1], [0, 0, 1, 1], [], []>} : vector<8x32xbf16>, vector<32x16xbf16>, vector<8x16xf32> -> vector<8x16xf32>
    %231 = arith.addf %226, %230 : vector<8x16xf32>
    %232 = vector.broadcast %8 : vector<1x16xf32> to vector<8x16xf32>
    %233 = arith.mulf %231, %232 : vector<8x16xf32>
    %234 = vector.broadcast %9 : vector<1x16xf32> to vector<8x16xf32>
    %235 = arith.addf %233, %234 : vector<8x16xf32>
    %cst_204 = arith.constant 0.000000e+00 : f32
    %236 = vector.broadcast %cst_204 : f32 to vector<8x16xf32>
    %237 = arith.maximumf %235, %236 : vector<8x16xf32>
    %238 = arith.truncf %237 : vector<8x16xf32> to vector<8x16xbf16>
    %c0_205 = arith.constant 0 : index
    %c7_206 = arith.constant 7 : index
    %c0_207 = arith.constant 0 : index
    %c0_208 = arith.constant 0 : index
    %239 = vector.load %arg7[%c0_205, %c7_206, %c0_207, %c0_208] : memref<1x8x8x16xbf16, #tpu.memory_space<vmem>>, vector<1x1x8x16xbf16>
    %240 = vector.shape_cast %239 : vector<1x1x8x16xbf16> to vector<8x16xbf16>
    %241 = vector.shape_cast %238 : vector<8x16xbf16> to vector<1x1x8x16xbf16>
    tpu.vector_store %arg7[%c0_205, %c7_206, %c0_207, %c0_208], %241 {strides = array<i32>} : memref<1x8x8x16xbf16, #tpu.memory_space<vmem>>, vector<1x1x8x16xbf16>,
    return
  }
  func.func @transform_0(%arg0: i32, %arg1: i32) -> (i32, i32, i32, i32) {
    %c0_i32 = arith.constant 0 : i32
    %c0_i32_0 = arith.constant 0 : i32
    %c0_i32_1 = arith.constant 0 : i32
    return %arg0, %arg1, %c0_i32, %c0_i32_0 : i32, i32, i32, i32
  }
  func.func @transform_1(%arg0: i32, %arg1: i32) -> (i32, i32, i32, i32, i32) {
    %c0_i32 = arith.constant 0 : i32
    %c0_i32_0 = arith.constant 0 : i32
    %c0_i32_1 = arith.constant 0 : i32
    %c0_i32_2 = arith.constant 0 : i32
    return %arg0, %arg1, %c0_i32, %c0_i32_0, %c0_i32_1 : i32, i32, i32, i32, i32
  }
  func.func @transform_2(%arg0: i32, %arg1: i32) -> (i32, i32, i32) {
    %c0_i32 = arith.constant 0 : i32
    %c0_i32_0 = arith.constant 0 : i32
    %c0_i32_1 = arith.constant 0 : i32
    %c0_i32_2 = arith.constant 0 : i32
    return %c0_i32, %c0_i32_0, %c0_i32_1 : i32, i32, i32
  }
  func.func @transform_3(%arg0: i32, %arg1: i32) -> (i32, i32) {
    %c0_i32 = arith.constant 0 : i32
    %c0_i32_0 = arith.constant 0 : i32
    %c0_i32_1 = arith.constant 0 : i32
    return %c0_i32, %c0_i32_0 : i32, i32
  }
  func.func @transform_4(%arg0: i32, %arg1: i32) -> (i32, i32) {
    %c0_i32 = arith.constant 0 : i32
    %c0_i32_0 = arith.constant 0 : i32
    %c0_i32_1 = arith.constant 0 : i32
    return %c0_i32, %c0_i32_0 : i32, i32
  }
  func.func @transform_5(%arg0: i32, %arg1: i32) -> (i32, i32, i32, i32) {
    %c0_i32 = arith.constant 0 : i32
    %c0_i32_0 = arith.constant 0 : i32
    %c0_i32_1 = arith.constant 0 : i32
    return %arg0, %arg1, %c0_i32, %c0_i32_0 : i32, i32, i32, i32
  }
}

module attributes {stable_mosaic.version = 11 : i64} {
  func.func @_conv_taps_kernel(%arg0: i32, %arg1: i32, %arg2: memref<1x4x5x64xbf16, #tpu.memory_space<vmem>>, %arg3: memref<1x1x1x5x64xbf16, #tpu.memory_space<vmem>>, %arg4: memref<4x64x32xbf16, #tpu.memory_space<vmem>>, %arg5: memref<1x32xf32, #tpu.memory_space<vmem>>, %arg6: memref<1x32xf32, #tpu.memory_space<vmem>>, %arg7: memref<1x4x4x32xbf16, #tpu.memory_space<vmem>>) attributes {dimension_semantics = [#tpu.dimension_semantics<parallel>, #tpu.dimension_semantics<parallel>], iteration_bounds = array<i64: 2, 1>, scalar_prefetch = 0 : i64, scratch_operands = 0 : i64, tpu.core_type = #tpu.core_type<tc>, window_params = [{transform_indices = @transform_0, window_bounds = array<i64: 1, 4, 5, 64>}, {transform_indices = @transform_1, window_bounds = array<i64: 1, 1, 1, 5, 64>}, {pipeline_mode = #tpu.pipeline_mode<synchronous>, transform_indices = @transform_2, window_bounds = array<i64: 4, 64, 32>}, {pipeline_mode = #tpu.pipeline_mode<synchronous>, transform_indices = @transform_3, window_bounds = array<i64: 1, 32>}, {pipeline_mode = #tpu.pipeline_mode<synchronous>, transform_indices = @transform_4, window_bounds = array<i64: 1, 32>}, {transform_indices = @transform_5, window_bounds = array<i64: 1, 4, 4, 32>}]} {
    %c0 = arith.constant 0 : index
    %c0_0 = arith.constant 0 : index
    %c0_1 = arith.constant 0 : index
    %0 = vector.load %arg4[%c0, %c0_0, %c0_1] : memref<4x64x32xbf16, #tpu.memory_space<vmem>>, vector<1x64x32xbf16>
    %1 = vector.shape_cast %0 : vector<1x64x32xbf16> to vector<64x32xbf16>
    %c1 = arith.constant 1 : index
    %c0_2 = arith.constant 0 : index
    %c0_3 = arith.constant 0 : index
    %2 = vector.load %arg4[%c1, %c0_2, %c0_3] : memref<4x64x32xbf16, #tpu.memory_space<vmem>>, vector<1x64x32xbf16>
    %3 = vector.shape_cast %2 : vector<1x64x32xbf16> to vector<64x32xbf16>
    %c2 = arith.constant 2 : index
    %c0_4 = arith.constant 0 : index
    %c0_5 = arith.constant 0 : index
    %4 = vector.load %arg4[%c2, %c0_4, %c0_5] : memref<4x64x32xbf16, #tpu.memory_space<vmem>>, vector<1x64x32xbf16>
    %5 = vector.shape_cast %4 : vector<1x64x32xbf16> to vector<64x32xbf16>
    %c3 = arith.constant 3 : index
    %c0_6 = arith.constant 0 : index
    %c0_7 = arith.constant 0 : index
    %6 = vector.load %arg4[%c3, %c0_6, %c0_7] : memref<4x64x32xbf16, #tpu.memory_space<vmem>>, vector<1x64x32xbf16>
    %7 = vector.shape_cast %6 : vector<1x64x32xbf16> to vector<64x32xbf16>
    %c0_8 = arith.constant 0 : index
    %c0_9 = arith.constant 0 : index
    %8 = vector.load %arg5[%c0_8, %c0_9] : memref<1x32xf32, #tpu.memory_space<vmem>>, vector<1x32xf32>
    %c0_10 = arith.constant 0 : index
    %c0_11 = arith.constant 0 : index
    %9 = vector.load %arg6[%c0_10, %c0_11] : memref<1x32xf32, #tpu.memory_space<vmem>>, vector<1x32xf32>
    %c0_12 = arith.constant 0 : index
    %c0_13 = arith.constant 0 : index
    %c0_14 = arith.constant 0 : index
    %c0_15 = arith.constant 0 : index
    %10 = vector.load %arg2[%c0_12, %c0_13, %c0_14, %c0_15] : memref<1x4x5x64xbf16, #tpu.memory_space<vmem>>, vector<1x1x5x64xbf16>
    %11 = vector.shape_cast %10 : vector<1x1x5x64xbf16> to vector<5x64xbf16>
    %12 = vector.extract_strided_slice %11 {offsets = [0, 0], sizes = [4, 64], strides = [1, 1]} : vector<5x64xbf16> to vector<4x64xbf16>
    %cst = arith.constant dense<0.000000e+00> : vector<4x32xf32>
    %13 = tpu.matmul %12, %1, %cst {dimension_numbers = #tpu.dot_dimension_numbers<[1], [0], [0], [1], [0, 0, 1, 1], [], []>} : vector<4x64xbf16>, vector<64x32xbf16>, vector<4x32xf32> -> vector<4x32xf32>
    %c0_16 = arith.constant 0 : index
    %c0_17 = arith.constant 0 : index
    %c0_18 = arith.constant 0 : index
    %c0_19 = arith.constant 0 : index
    %14 = vector.load %arg2[%c0_16, %c0_17, %c0_18, %c0_19] : memref<1x4x5x64xbf16, #tpu.memory_space<vmem>>, vector<1x1x5x64xbf16>
    %15 = vector.shape_cast %14 : vector<1x1x5x64xbf16> to vector<5x64xbf16>
    %16 = vector.extract_strided_slice %15 {offsets = [1, 0], sizes = [4, 64], strides = [1, 1]} : vector<5x64xbf16> to vector<4x64xbf16>
    %cst_20 = arith.constant dense<0.000000e+00> : vector<4x32xf32>
    %17 = tpu.matmul %16, %3, %cst_20 {dimension_numbers = #tpu.dot_dimension_numbers<[1], [0], [0], [1], [0, 0, 1, 1], [], []>} : vector<4x64xbf16>, vector<64x32xbf16>, vector<4x32xf32> -> vector<4x32xf32>
    %18 = arith.addf %13, %17 : vector<4x32xf32>
    %c0_21 = arith.constant 0 : index
    %c1_22 = arith.constant 1 : index
    %c0_23 = arith.constant 0 : index
    %c0_24 = arith.constant 0 : index
    %19 = vector.load %arg2[%c0_21, %c1_22, %c0_23, %c0_24] : memref<1x4x5x64xbf16, #tpu.memory_space<vmem>>, vector<1x1x5x64xbf16>
    %20 = vector.shape_cast %19 : vector<1x1x5x64xbf16> to vector<5x64xbf16>
    %21 = vector.extract_strided_slice %20 {offsets = [0, 0], sizes = [4, 64], strides = [1, 1]} : vector<5x64xbf16> to vector<4x64xbf16>
    %cst_25 = arith.constant dense<0.000000e+00> : vector<4x32xf32>
    %22 = tpu.matmul %21, %5, %cst_25 {dimension_numbers = #tpu.dot_dimension_numbers<[1], [0], [0], [1], [0, 0, 1, 1], [], []>} : vector<4x64xbf16>, vector<64x32xbf16>, vector<4x32xf32> -> vector<4x32xf32>
    %23 = arith.addf %18, %22 : vector<4x32xf32>
    %c0_26 = arith.constant 0 : index
    %c1_27 = arith.constant 1 : index
    %c0_28 = arith.constant 0 : index
    %c0_29 = arith.constant 0 : index
    %24 = vector.load %arg2[%c0_26, %c1_27, %c0_28, %c0_29] : memref<1x4x5x64xbf16, #tpu.memory_space<vmem>>, vector<1x1x5x64xbf16>
    %25 = vector.shape_cast %24 : vector<1x1x5x64xbf16> to vector<5x64xbf16>
    %26 = vector.extract_strided_slice %25 {offsets = [1, 0], sizes = [4, 64], strides = [1, 1]} : vector<5x64xbf16> to vector<4x64xbf16>
    %cst_30 = arith.constant dense<0.000000e+00> : vector<4x32xf32>
    %27 = tpu.matmul %26, %7, %cst_30 {dimension_numbers = #tpu.dot_dimension_numbers<[1], [0], [0], [1], [0, 0, 1, 1], [], []>} : vector<4x64xbf16>, vector<64x32xbf16>, vector<4x32xf32> -> vector<4x32xf32>
    %28 = arith.addf %23, %27 : vector<4x32xf32>
    %29 = vector.broadcast %8 : vector<1x32xf32> to vector<4x32xf32>
    %30 = arith.mulf %28, %29 : vector<4x32xf32>
    %31 = vector.broadcast %9 : vector<1x32xf32> to vector<4x32xf32>
    %32 = arith.addf %30, %31 : vector<4x32xf32>
    %cst_31 = arith.constant 0.000000e+00 : f32
    %33 = vector.broadcast %cst_31 : f32 to vector<4x32xf32>
    %34 = arith.maximumf %32, %33 : vector<4x32xf32>
    %35 = arith.truncf %34 : vector<4x32xf32> to vector<4x32xbf16>
    %c0_32 = arith.constant 0 : index
    %c0_33 = arith.constant 0 : index
    %c0_34 = arith.constant 0 : index
    %c0_35 = arith.constant 0 : index
    %36 = vector.load %arg7[%c0_32, %c0_33, %c0_34, %c0_35] : memref<1x4x4x32xbf16, #tpu.memory_space<vmem>>, vector<1x1x4x32xbf16>
    %37 = vector.shape_cast %36 : vector<1x1x4x32xbf16> to vector<4x32xbf16>
    %38 = vector.shape_cast %35 : vector<4x32xbf16> to vector<1x1x4x32xbf16>
    tpu.vector_store %arg7[%c0_32, %c0_33, %c0_34, %c0_35], %38 {strides = array<i32>} : memref<1x4x4x32xbf16, #tpu.memory_space<vmem>>, vector<1x1x4x32xbf16>,
    %c0_36 = arith.constant 0 : index
    %c1_37 = arith.constant 1 : index
    %c0_38 = arith.constant 0 : index
    %c0_39 = arith.constant 0 : index
    %39 = vector.load %arg2[%c0_36, %c1_37, %c0_38, %c0_39] : memref<1x4x5x64xbf16, #tpu.memory_space<vmem>>, vector<1x1x5x64xbf16>
    %40 = vector.shape_cast %39 : vector<1x1x5x64xbf16> to vector<5x64xbf16>
    %41 = vector.extract_strided_slice %40 {offsets = [0, 0], sizes = [4, 64], strides = [1, 1]} : vector<5x64xbf16> to vector<4x64xbf16>
    %cst_40 = arith.constant dense<0.000000e+00> : vector<4x32xf32>
    %42 = tpu.matmul %41, %1, %cst_40 {dimension_numbers = #tpu.dot_dimension_numbers<[1], [0], [0], [1], [0, 0, 1, 1], [], []>} : vector<4x64xbf16>, vector<64x32xbf16>, vector<4x32xf32> -> vector<4x32xf32>
    %c0_41 = arith.constant 0 : index
    %c1_42 = arith.constant 1 : index
    %c0_43 = arith.constant 0 : index
    %c0_44 = arith.constant 0 : index
    %43 = vector.load %arg2[%c0_41, %c1_42, %c0_43, %c0_44] : memref<1x4x5x64xbf16, #tpu.memory_space<vmem>>, vector<1x1x5x64xbf16>
    %44 = vector.shape_cast %43 : vector<1x1x5x64xbf16> to vector<5x64xbf16>
    %45 = vector.extract_strided_slice %44 {offsets = [1, 0], sizes = [4, 64], strides = [1, 1]} : vector<5x64xbf16> to vector<4x64xbf16>
    %cst_45 = arith.constant dense<0.000000e+00> : vector<4x32xf32>
    %46 = tpu.matmul %45, %3, %cst_45 {dimension_numbers = #tpu.dot_dimension_numbers<[1], [0], [0], [1], [0, 0, 1, 1], [], []>} : vector<4x64xbf16>, vector<64x32xbf16>, vector<4x32xf32> -> vector<4x32xf32>
    %47 = arith.addf %42, %46 : vector<4x32xf32>
    %c0_46 = arith.constant 0 : index
    %c2_47 = arith.constant 2 : index
    %c0_48 = arith.constant 0 : index
    %c0_49 = arith.constant 0 : index
    %48 = vector.load %arg2[%c0_46, %c2_47, %c0_48, %c0_49] : memref<1x4x5x64xbf16, #tpu.memory_space<vmem>>, vector<1x1x5x64xbf16>
    %49 = vector.shape_cast %48 : vector<1x1x5x64xbf16> to vector<5x64xbf16>
    %50 = vector.extract_strided_slice %49 {offsets = [0, 0], sizes = [4, 64], strides = [1, 1]} : vector<5x64xbf16> to vector<4x64xbf16>
    %cst_50 = arith.constant dense<0.000000e+00> : vector<4x32xf32>
    %51 = tpu.matmul %50, %5, %cst_50 {dimension_numbers = #tpu.dot_dimension_numbers<[1], [0], [0], [1], [0, 0, 1, 1], [], []>} : vector<4x64xbf16>, vector<64x32xbf16>, vector<4x32xf32> -> vector<4x32xf32>
    %52 = arith.addf %47, %51 : vector<4x32xf32>
    %c0_51 = arith.constant 0 : index
    %c2_52 = arith.constant 2 : index
    %c0_53 = arith.constant 0 : index
    %c0_54 = arith.constant 0 : index
    %53 = vector.load %arg2[%c0_51, %c2_52, %c0_53, %c0_54] : memref<1x4x5x64xbf16, #tpu.memory_space<vmem>>, vector<1x1x5x64xbf16>
    %54 = vector.shape_cast %53 : vector<1x1x5x64xbf16> to vector<5x64xbf16>
    %55 = vector.extract_strided_slice %54 {offsets = [1, 0], sizes = [4, 64], strides = [1, 1]} : vector<5x64xbf16> to vector<4x64xbf16>
    %cst_55 = arith.constant dense<0.000000e+00> : vector<4x32xf32>
    %56 = tpu.matmul %55, %7, %cst_55 {dimension_numbers = #tpu.dot_dimension_numbers<[1], [0], [0], [1], [0, 0, 1, 1], [], []>} : vector<4x64xbf16>, vector<64x32xbf16>, vector<4x32xf32> -> vector<4x32xf32>
    %57 = arith.addf %52, %56 : vector<4x32xf32>
    %58 = vector.broadcast %8 : vector<1x32xf32> to vector<4x32xf32>
    %59 = arith.mulf %57, %58 : vector<4x32xf32>
    %60 = vector.broadcast %9 : vector<1x32xf32> to vector<4x32xf32>
    %61 = arith.addf %59, %60 : vector<4x32xf32>
    %cst_56 = arith.constant 0.000000e+00 : f32
    %62 = vector.broadcast %cst_56 : f32 to vector<4x32xf32>
    %63 = arith.maximumf %61, %62 : vector<4x32xf32>
    %64 = arith.truncf %63 : vector<4x32xf32> to vector<4x32xbf16>
    %c0_57 = arith.constant 0 : index
    %c1_58 = arith.constant 1 : index
    %c0_59 = arith.constant 0 : index
    %c0_60 = arith.constant 0 : index
    %65 = vector.load %arg7[%c0_57, %c1_58, %c0_59, %c0_60] : memref<1x4x4x32xbf16, #tpu.memory_space<vmem>>, vector<1x1x4x32xbf16>
    %66 = vector.shape_cast %65 : vector<1x1x4x32xbf16> to vector<4x32xbf16>
    %67 = vector.shape_cast %64 : vector<4x32xbf16> to vector<1x1x4x32xbf16>
    tpu.vector_store %arg7[%c0_57, %c1_58, %c0_59, %c0_60], %67 {strides = array<i32>} : memref<1x4x4x32xbf16, #tpu.memory_space<vmem>>, vector<1x1x4x32xbf16>,
    %c0_61 = arith.constant 0 : index
    %c2_62 = arith.constant 2 : index
    %c0_63 = arith.constant 0 : index
    %c0_64 = arith.constant 0 : index
    %68 = vector.load %arg2[%c0_61, %c2_62, %c0_63, %c0_64] : memref<1x4x5x64xbf16, #tpu.memory_space<vmem>>, vector<1x1x5x64xbf16>
    %69 = vector.shape_cast %68 : vector<1x1x5x64xbf16> to vector<5x64xbf16>
    %70 = vector.extract_strided_slice %69 {offsets = [0, 0], sizes = [4, 64], strides = [1, 1]} : vector<5x64xbf16> to vector<4x64xbf16>
    %cst_65 = arith.constant dense<0.000000e+00> : vector<4x32xf32>
    %71 = tpu.matmul %70, %1, %cst_65 {dimension_numbers = #tpu.dot_dimension_numbers<[1], [0], [0], [1], [0, 0, 1, 1], [], []>} : vector<4x64xbf16>, vector<64x32xbf16>, vector<4x32xf32> -> vector<4x32xf32>
    %c0_66 = arith.constant 0 : index
    %c2_67 = arith.constant 2 : index
    %c0_68 = arith.constant 0 : index
    %c0_69 = arith.constant 0 : index
    %72 = vector.load %arg2[%c0_66, %c2_67, %c0_68, %c0_69] : memref<1x4x5x64xbf16, #tpu.memory_space<vmem>>, vector<1x1x5x64xbf16>
    %73 = vector.shape_cast %72 : vector<1x1x5x64xbf16> to vector<5x64xbf16>
    %74 = vector.extract_strided_slice %73 {offsets = [1, 0], sizes = [4, 64], strides = [1, 1]} : vector<5x64xbf16> to vector<4x64xbf16>
    %cst_70 = arith.constant dense<0.000000e+00> : vector<4x32xf32>
    %75 = tpu.matmul %74, %3, %cst_70 {dimension_numbers = #tpu.dot_dimension_numbers<[1], [0], [0], [1], [0, 0, 1, 1], [], []>} : vector<4x64xbf16>, vector<64x32xbf16>, vector<4x32xf32> -> vector<4x32xf32>
    %76 = arith.addf %71, %75 : vector<4x32xf32>
    %c0_71 = arith.constant 0 : index
    %c3_72 = arith.constant 3 : index
    %c0_73 = arith.constant 0 : index
    %c0_74 = arith.constant 0 : index
    %77 = vector.load %arg2[%c0_71, %c3_72, %c0_73, %c0_74] : memref<1x4x5x64xbf16, #tpu.memory_space<vmem>>, vector<1x1x5x64xbf16>
    %78 = vector.shape_cast %77 : vector<1x1x5x64xbf16> to vector<5x64xbf16>
    %79 = vector.extract_strided_slice %78 {offsets = [0, 0], sizes = [4, 64], strides = [1, 1]} : vector<5x64xbf16> to vector<4x64xbf16>
    %cst_75 = arith.constant dense<0.000000e+00> : vector<4x32xf32>
    %80 = tpu.matmul %79, %5, %cst_75 {dimension_numbers = #tpu.dot_dimension_numbers<[1], [0], [0], [1], [0, 0, 1, 1], [], []>} : vector<4x64xbf16>, vector<64x32xbf16>, vector<4x32xf32> -> vector<4x32xf32>
    %81 = arith.addf %76, %80 : vector<4x32xf32>
    %c0_76 = arith.constant 0 : index
    %c3_77 = arith.constant 3 : index
    %c0_78 = arith.constant 0 : index
    %c0_79 = arith.constant 0 : index
    %82 = vector.load %arg2[%c0_76, %c3_77, %c0_78, %c0_79] : memref<1x4x5x64xbf16, #tpu.memory_space<vmem>>, vector<1x1x5x64xbf16>
    %83 = vector.shape_cast %82 : vector<1x1x5x64xbf16> to vector<5x64xbf16>
    %84 = vector.extract_strided_slice %83 {offsets = [1, 0], sizes = [4, 64], strides = [1, 1]} : vector<5x64xbf16> to vector<4x64xbf16>
    %cst_80 = arith.constant dense<0.000000e+00> : vector<4x32xf32>
    %85 = tpu.matmul %84, %7, %cst_80 {dimension_numbers = #tpu.dot_dimension_numbers<[1], [0], [0], [1], [0, 0, 1, 1], [], []>} : vector<4x64xbf16>, vector<64x32xbf16>, vector<4x32xf32> -> vector<4x32xf32>
    %86 = arith.addf %81, %85 : vector<4x32xf32>
    %87 = vector.broadcast %8 : vector<1x32xf32> to vector<4x32xf32>
    %88 = arith.mulf %86, %87 : vector<4x32xf32>
    %89 = vector.broadcast %9 : vector<1x32xf32> to vector<4x32xf32>
    %90 = arith.addf %88, %89 : vector<4x32xf32>
    %cst_81 = arith.constant 0.000000e+00 : f32
    %91 = vector.broadcast %cst_81 : f32 to vector<4x32xf32>
    %92 = arith.maximumf %90, %91 : vector<4x32xf32>
    %93 = arith.truncf %92 : vector<4x32xf32> to vector<4x32xbf16>
    %c0_82 = arith.constant 0 : index
    %c2_83 = arith.constant 2 : index
    %c0_84 = arith.constant 0 : index
    %c0_85 = arith.constant 0 : index
    %94 = vector.load %arg7[%c0_82, %c2_83, %c0_84, %c0_85] : memref<1x4x4x32xbf16, #tpu.memory_space<vmem>>, vector<1x1x4x32xbf16>
    %95 = vector.shape_cast %94 : vector<1x1x4x32xbf16> to vector<4x32xbf16>
    %96 = vector.shape_cast %93 : vector<4x32xbf16> to vector<1x1x4x32xbf16>
    tpu.vector_store %arg7[%c0_82, %c2_83, %c0_84, %c0_85], %96 {strides = array<i32>} : memref<1x4x4x32xbf16, #tpu.memory_space<vmem>>, vector<1x1x4x32xbf16>,
    %c0_86 = arith.constant 0 : index
    %c3_87 = arith.constant 3 : index
    %c0_88 = arith.constant 0 : index
    %c0_89 = arith.constant 0 : index
    %97 = vector.load %arg2[%c0_86, %c3_87, %c0_88, %c0_89] : memref<1x4x5x64xbf16, #tpu.memory_space<vmem>>, vector<1x1x5x64xbf16>
    %98 = vector.shape_cast %97 : vector<1x1x5x64xbf16> to vector<5x64xbf16>
    %99 = vector.extract_strided_slice %98 {offsets = [0, 0], sizes = [4, 64], strides = [1, 1]} : vector<5x64xbf16> to vector<4x64xbf16>
    %cst_90 = arith.constant dense<0.000000e+00> : vector<4x32xf32>
    %100 = tpu.matmul %99, %1, %cst_90 {dimension_numbers = #tpu.dot_dimension_numbers<[1], [0], [0], [1], [0, 0, 1, 1], [], []>} : vector<4x64xbf16>, vector<64x32xbf16>, vector<4x32xf32> -> vector<4x32xf32>
    %c0_91 = arith.constant 0 : index
    %c3_92 = arith.constant 3 : index
    %c0_93 = arith.constant 0 : index
    %c0_94 = arith.constant 0 : index
    %101 = vector.load %arg2[%c0_91, %c3_92, %c0_93, %c0_94] : memref<1x4x5x64xbf16, #tpu.memory_space<vmem>>, vector<1x1x5x64xbf16>
    %102 = vector.shape_cast %101 : vector<1x1x5x64xbf16> to vector<5x64xbf16>
    %103 = vector.extract_strided_slice %102 {offsets = [1, 0], sizes = [4, 64], strides = [1, 1]} : vector<5x64xbf16> to vector<4x64xbf16>
    %cst_95 = arith.constant dense<0.000000e+00> : vector<4x32xf32>
    %104 = tpu.matmul %103, %3, %cst_95 {dimension_numbers = #tpu.dot_dimension_numbers<[1], [0], [0], [1], [0, 0, 1, 1], [], []>} : vector<4x64xbf16>, vector<64x32xbf16>, vector<4x32xf32> -> vector<4x32xf32>
    %105 = arith.addf %100, %104 : vector<4x32xf32>
    %c0_96 = arith.constant 0 : index
    %c0_97 = arith.constant 0 : index
    %c0_98 = arith.constant 0 : index
    %c0_99 = arith.constant 0 : index
    %c0_100 = arith.constant 0 : index
    %106 = vector.load %arg3[%c0_96, %c0_97, %c0_98, %c0_99, %c0_100] : memref<1x1x1x5x64xbf16, #tpu.memory_space<vmem>>, vector<1x1x1x5x64xbf16>
    %107 = vector.shape_cast %106 : vector<1x1x1x5x64xbf16> to vector<5x64xbf16>
    %108 = vector.extract_strided_slice %107 {offsets = [0, 0], sizes = [4, 64], strides = [1, 1]} : vector<5x64xbf16> to vector<4x64xbf16>
    %cst_101 = arith.constant dense<0.000000e+00> : vector<4x32xf32>
    %109 = tpu.matmul %108, %5, %cst_101 {dimension_numbers = #tpu.dot_dimension_numbers<[1], [0], [0], [1], [0, 0, 1, 1], [], []>} : vector<4x64xbf16>, vector<64x32xbf16>, vector<4x32xf32> -> vector<4x32xf32>
    %110 = arith.addf %105, %109 : vector<4x32xf32>
    %c0_102 = arith.constant 0 : index
    %c0_103 = arith.constant 0 : index
    %c0_104 = arith.constant 0 : index
    %c0_105 = arith.constant 0 : index
    %c0_106 = arith.constant 0 : index
    %111 = vector.load %arg3[%c0_102, %c0_103, %c0_104, %c0_105, %c0_106] : memref<1x1x1x5x64xbf16, #tpu.memory_space<vmem>>, vector<1x1x1x5x64xbf16>
    %112 = vector.shape_cast %111 : vector<1x1x1x5x64xbf16> to vector<5x64xbf16>
    %113 = vector.extract_strided_slice %112 {offsets = [1, 0], sizes = [4, 64], strides = [1, 1]} : vector<5x64xbf16> to vector<4x64xbf16>
    %cst_107 = arith.constant dense<0.000000e+00> : vector<4x32xf32>
    %114 = tpu.matmul %113, %7, %cst_107 {dimension_numbers = #tpu.dot_dimension_numbers<[1], [0], [0], [1], [0, 0, 1, 1], [], []>} : vector<4x64xbf16>, vector<64x32xbf16>, vector<4x32xf32> -> vector<4x32xf32>
    %115 = arith.addf %110, %114 : vector<4x32xf32>
    %116 = vector.broadcast %8 : vector<1x32xf32> to vector<4x32xf32>
    %117 = arith.mulf %115, %116 : vector<4x32xf32>
    %118 = vector.broadcast %9 : vector<1x32xf32> to vector<4x32xf32>
    %119 = arith.addf %117, %118 : vector<4x32xf32>
    %cst_108 = arith.constant 0.000000e+00 : f32
    %120 = vector.broadcast %cst_108 : f32 to vector<4x32xf32>
    %121 = arith.maximumf %119, %120 : vector<4x32xf32>
    %122 = arith.truncf %121 : vector<4x32xf32> to vector<4x32xbf16>
    %c0_109 = arith.constant 0 : index
    %c3_110 = arith.constant 3 : index
    %c0_111 = arith.constant 0 : index
    %c0_112 = arith.constant 0 : index
    %123 = vector.load %arg7[%c0_109, %c3_110, %c0_111, %c0_112] : memref<1x4x4x32xbf16, #tpu.memory_space<vmem>>, vector<1x1x4x32xbf16>
    %124 = vector.shape_cast %123 : vector<1x1x4x32xbf16> to vector<4x32xbf16>
    %125 = vector.shape_cast %122 : vector<4x32xbf16> to vector<1x1x4x32xbf16>
    tpu.vector_store %arg7[%c0_109, %c3_110, %c0_111, %c0_112], %125 {strides = array<i32>} : memref<1x4x4x32xbf16, #tpu.memory_space<vmem>>, vector<1x1x4x32xbf16>,
    return
  }
  func.func @transform_0(%arg0: i32, %arg1: i32) -> (i32, i32, i32, i32) {
    %c0_i32 = arith.constant 0 : i32
    %c0_i32_0 = arith.constant 0 : i32
    %c0_i32_1 = arith.constant 0 : i32
    return %arg0, %arg1, %c0_i32, %c0_i32_0 : i32, i32, i32, i32
  }
  func.func @transform_1(%arg0: i32, %arg1: i32) -> (i32, i32, i32, i32, i32) {
    %c0_i32 = arith.constant 0 : i32
    %c0_i32_0 = arith.constant 0 : i32
    %c0_i32_1 = arith.constant 0 : i32
    %c0_i32_2 = arith.constant 0 : i32
    return %arg0, %arg1, %c0_i32, %c0_i32_0, %c0_i32_1 : i32, i32, i32, i32, i32
  }
  func.func @transform_2(%arg0: i32, %arg1: i32) -> (i32, i32, i32) {
    %c0_i32 = arith.constant 0 : i32
    %c0_i32_0 = arith.constant 0 : i32
    %c0_i32_1 = arith.constant 0 : i32
    %c0_i32_2 = arith.constant 0 : i32
    return %c0_i32, %c0_i32_0, %c0_i32_1 : i32, i32, i32
  }
  func.func @transform_3(%arg0: i32, %arg1: i32) -> (i32, i32) {
    %c0_i32 = arith.constant 0 : i32
    %c0_i32_0 = arith.constant 0 : i32
    %c0_i32_1 = arith.constant 0 : i32
    return %c0_i32, %c0_i32_0 : i32, i32
  }
  func.func @transform_4(%arg0: i32, %arg1: i32) -> (i32, i32) {
    %c0_i32 = arith.constant 0 : i32
    %c0_i32_0 = arith.constant 0 : i32
    %c0_i32_1 = arith.constant 0 : i32
    return %c0_i32, %c0_i32_0 : i32, i32
  }
  func.func @transform_5(%arg0: i32, %arg1: i32) -> (i32, i32, i32, i32) {
    %c0_i32 = arith.constant 0 : i32
    %c0_i32_0 = arith.constant 0 : i32
    %c0_i32_1 = arith.constant 0 : i32
    return %arg0, %arg1, %c0_i32, %c0_i32_0 : i32, i32, i32, i32
  }
}

module attributes {stable_mosaic.version = 11 : i64} {
  func.func @_conv_taps_kernel(%arg0: i32, %arg1: i32, %arg2: memref<1x2x3x128xbf16, #tpu.memory_space<vmem>>, %arg3: memref<1x1x1x3x128xbf16, #tpu.memory_space<vmem>>, %arg4: memref<4x128x64xbf16, #tpu.memory_space<vmem>>, %arg5: memref<1x64xf32, #tpu.memory_space<vmem>>, %arg6: memref<1x64xf32, #tpu.memory_space<vmem>>, %arg7: memref<1x2x2x64xbf16, #tpu.memory_space<vmem>>) attributes {dimension_semantics = [#tpu.dimension_semantics<parallel>, #tpu.dimension_semantics<parallel>], iteration_bounds = array<i64: 2, 1>, scalar_prefetch = 0 : i64, scratch_operands = 0 : i64, tpu.core_type = #tpu.core_type<tc>, window_params = [{transform_indices = @transform_0, window_bounds = array<i64: 1, 2, 3, 128>}, {transform_indices = @transform_1, window_bounds = array<i64: 1, 1, 1, 3, 128>}, {pipeline_mode = #tpu.pipeline_mode<synchronous>, transform_indices = @transform_2, window_bounds = array<i64: 4, 128, 64>}, {pipeline_mode = #tpu.pipeline_mode<synchronous>, transform_indices = @transform_3, window_bounds = array<i64: 1, 64>}, {pipeline_mode = #tpu.pipeline_mode<synchronous>, transform_indices = @transform_4, window_bounds = array<i64: 1, 64>}, {transform_indices = @transform_5, window_bounds = array<i64: 1, 2, 2, 64>}]} {
    %c0 = arith.constant 0 : index
    %c0_0 = arith.constant 0 : index
    %c0_1 = arith.constant 0 : index
    %0 = vector.load %arg4[%c0, %c0_0, %c0_1] : memref<4x128x64xbf16, #tpu.memory_space<vmem>>, vector<1x128x64xbf16>
    %1 = vector.shape_cast %0 : vector<1x128x64xbf16> to vector<128x64xbf16>
    %c1 = arith.constant 1 : index
    %c0_2 = arith.constant 0 : index
    %c0_3 = arith.constant 0 : index
    %2 = vector.load %arg4[%c1, %c0_2, %c0_3] : memref<4x128x64xbf16, #tpu.memory_space<vmem>>, vector<1x128x64xbf16>
    %3 = vector.shape_cast %2 : vector<1x128x64xbf16> to vector<128x64xbf16>
    %c2 = arith.constant 2 : index
    %c0_4 = arith.constant 0 : index
    %c0_5 = arith.constant 0 : index
    %4 = vector.load %arg4[%c2, %c0_4, %c0_5] : memref<4x128x64xbf16, #tpu.memory_space<vmem>>, vector<1x128x64xbf16>
    %5 = vector.shape_cast %4 : vector<1x128x64xbf16> to vector<128x64xbf16>
    %c3 = arith.constant 3 : index
    %c0_6 = arith.constant 0 : index
    %c0_7 = arith.constant 0 : index
    %6 = vector.load %arg4[%c3, %c0_6, %c0_7] : memref<4x128x64xbf16, #tpu.memory_space<vmem>>, vector<1x128x64xbf16>
    %7 = vector.shape_cast %6 : vector<1x128x64xbf16> to vector<128x64xbf16>
    %c0_8 = arith.constant 0 : index
    %c0_9 = arith.constant 0 : index
    %8 = vector.load %arg5[%c0_8, %c0_9] : memref<1x64xf32, #tpu.memory_space<vmem>>, vector<1x64xf32>
    %c0_10 = arith.constant 0 : index
    %c0_11 = arith.constant 0 : index
    %9 = vector.load %arg6[%c0_10, %c0_11] : memref<1x64xf32, #tpu.memory_space<vmem>>, vector<1x64xf32>
    %c0_12 = arith.constant 0 : index
    %c0_13 = arith.constant 0 : index
    %c0_14 = arith.constant 0 : index
    %c0_15 = arith.constant 0 : index
    %10 = vector.load %arg2[%c0_12, %c0_13, %c0_14, %c0_15] : memref<1x2x3x128xbf16, #tpu.memory_space<vmem>>, vector<1x1x3x128xbf16>
    %11 = vector.shape_cast %10 : vector<1x1x3x128xbf16> to vector<3x128xbf16>
    %12 = vector.extract_strided_slice %11 {offsets = [0, 0], sizes = [2, 128], strides = [1, 1]} : vector<3x128xbf16> to vector<2x128xbf16>
    %cst = arith.constant dense<0.000000e+00> : vector<2x64xf32>
    %13 = tpu.matmul %12, %1, %cst {dimension_numbers = #tpu.dot_dimension_numbers<[1], [0], [0], [1], [0, 0, 1, 1], [], []>} : vector<2x128xbf16>, vector<128x64xbf16>, vector<2x64xf32> -> vector<2x64xf32>
    %c0_16 = arith.constant 0 : index
    %c0_17 = arith.constant 0 : index
    %c0_18 = arith.constant 0 : index
    %c0_19 = arith.constant 0 : index
    %14 = vector.load %arg2[%c0_16, %c0_17, %c0_18, %c0_19] : memref<1x2x3x128xbf16, #tpu.memory_space<vmem>>, vector<1x1x3x128xbf16>
    %15 = vector.shape_cast %14 : vector<1x1x3x128xbf16> to vector<3x128xbf16>
    %16 = vector.extract_strided_slice %15 {offsets = [1, 0], sizes = [2, 128], strides = [1, 1]} : vector<3x128xbf16> to vector<2x128xbf16>
    %cst_20 = arith.constant dense<0.000000e+00> : vector<2x64xf32>
    %17 = tpu.matmul %16, %3, %cst_20 {dimension_numbers = #tpu.dot_dimension_numbers<[1], [0], [0], [1], [0, 0, 1, 1], [], []>} : vector<2x128xbf16>, vector<128x64xbf16>, vector<2x64xf32> -> vector<2x64xf32>
    %18 = arith.addf %13, %17 : vector<2x64xf32>
    %c0_21 = arith.constant 0 : index
    %c1_22 = arith.constant 1 : index
    %c0_23 = arith.constant 0 : index
    %c0_24 = arith.constant 0 : index
    %19 = vector.load %arg2[%c0_21, %c1_22, %c0_23, %c0_24] : memref<1x2x3x128xbf16, #tpu.memory_space<vmem>>, vector<1x1x3x128xbf16>
    %20 = vector.shape_cast %19 : vector<1x1x3x128xbf16> to vector<3x128xbf16>
    %21 = vector.extract_strided_slice %20 {offsets = [0, 0], sizes = [2, 128], strides = [1, 1]} : vector<3x128xbf16> to vector<2x128xbf16>
    %cst_25 = arith.constant dense<0.000000e+00> : vector<2x64xf32>
    %22 = tpu.matmul %21, %5, %cst_25 {dimension_numbers = #tpu.dot_dimension_numbers<[1], [0], [0], [1], [0, 0, 1, 1], [], []>} : vector<2x128xbf16>, vector<128x64xbf16>, vector<2x64xf32> -> vector<2x64xf32>
    %23 = arith.addf %18, %22 : vector<2x64xf32>
    %c0_26 = arith.constant 0 : index
    %c1_27 = arith.constant 1 : index
    %c0_28 = arith.constant 0 : index
    %c0_29 = arith.constant 0 : index
    %24 = vector.load %arg2[%c0_26, %c1_27, %c0_28, %c0_29] : memref<1x2x3x128xbf16, #tpu.memory_space<vmem>>, vector<1x1x3x128xbf16>
    %25 = vector.shape_cast %24 : vector<1x1x3x128xbf16> to vector<3x128xbf16>
    %26 = vector.extract_strided_slice %25 {offsets = [1, 0], sizes = [2, 128], strides = [1, 1]} : vector<3x128xbf16> to vector<2x128xbf16>
    %cst_30 = arith.constant dense<0.000000e+00> : vector<2x64xf32>
    %27 = tpu.matmul %26, %7, %cst_30 {dimension_numbers = #tpu.dot_dimension_numbers<[1], [0], [0], [1], [0, 0, 1, 1], [], []>} : vector<2x128xbf16>, vector<128x64xbf16>, vector<2x64xf32> -> vector<2x64xf32>
    %28 = arith.addf %23, %27 : vector<2x64xf32>
    %29 = vector.broadcast %8 : vector<1x64xf32> to vector<2x64xf32>
    %30 = arith.mulf %28, %29 : vector<2x64xf32>
    %31 = vector.broadcast %9 : vector<1x64xf32> to vector<2x64xf32>
    %32 = arith.addf %30, %31 : vector<2x64xf32>
    %cst_31 = arith.constant 0.000000e+00 : f32
    %33 = vector.broadcast %cst_31 : f32 to vector<2x64xf32>
    %34 = arith.maximumf %32, %33 : vector<2x64xf32>
    %35 = arith.truncf %34 : vector<2x64xf32> to vector<2x64xbf16>
    %c0_32 = arith.constant 0 : index
    %c0_33 = arith.constant 0 : index
    %c0_34 = arith.constant 0 : index
    %c0_35 = arith.constant 0 : index
    %36 = vector.load %arg7[%c0_32, %c0_33, %c0_34, %c0_35] : memref<1x2x2x64xbf16, #tpu.memory_space<vmem>>, vector<1x1x2x64xbf16>
    %37 = vector.shape_cast %36 : vector<1x1x2x64xbf16> to vector<2x64xbf16>
    %38 = vector.shape_cast %35 : vector<2x64xbf16> to vector<1x1x2x64xbf16>
    tpu.vector_store %arg7[%c0_32, %c0_33, %c0_34, %c0_35], %38 {strides = array<i32>} : memref<1x2x2x64xbf16, #tpu.memory_space<vmem>>, vector<1x1x2x64xbf16>,
    %c0_36 = arith.constant 0 : index
    %c1_37 = arith.constant 1 : index
    %c0_38 = arith.constant 0 : index
    %c0_39 = arith.constant 0 : index
    %39 = vector.load %arg2[%c0_36, %c1_37, %c0_38, %c0_39] : memref<1x2x3x128xbf16, #tpu.memory_space<vmem>>, vector<1x1x3x128xbf16>
    %40 = vector.shape_cast %39 : vector<1x1x3x128xbf16> to vector<3x128xbf16>
    %41 = vector.extract_strided_slice %40 {offsets = [0, 0], sizes = [2, 128], strides = [1, 1]} : vector<3x128xbf16> to vector<2x128xbf16>
    %cst_40 = arith.constant dense<0.000000e+00> : vector<2x64xf32>
    %42 = tpu.matmul %41, %1, %cst_40 {dimension_numbers = #tpu.dot_dimension_numbers<[1], [0], [0], [1], [0, 0, 1, 1], [], []>} : vector<2x128xbf16>, vector<128x64xbf16>, vector<2x64xf32> -> vector<2x64xf32>
    %c0_41 = arith.constant 0 : index
    %c1_42 = arith.constant 1 : index
    %c0_43 = arith.constant 0 : index
    %c0_44 = arith.constant 0 : index
    %43 = vector.load %arg2[%c0_41, %c1_42, %c0_43, %c0_44] : memref<1x2x3x128xbf16, #tpu.memory_space<vmem>>, vector<1x1x3x128xbf16>
    %44 = vector.shape_cast %43 : vector<1x1x3x128xbf16> to vector<3x128xbf16>
    %45 = vector.extract_strided_slice %44 {offsets = [1, 0], sizes = [2, 128], strides = [1, 1]} : vector<3x128xbf16> to vector<2x128xbf16>
    %cst_45 = arith.constant dense<0.000000e+00> : vector<2x64xf32>
    %46 = tpu.matmul %45, %3, %cst_45 {dimension_numbers = #tpu.dot_dimension_numbers<[1], [0], [0], [1], [0, 0, 1, 1], [], []>} : vector<2x128xbf16>, vector<128x64xbf16>, vector<2x64xf32> -> vector<2x64xf32>
    %47 = arith.addf %42, %46 : vector<2x64xf32>
    %c0_46 = arith.constant 0 : index
    %c0_47 = arith.constant 0 : index
    %c0_48 = arith.constant 0 : index
    %c0_49 = arith.constant 0 : index
    %c0_50 = arith.constant 0 : index
    %48 = vector.load %arg3[%c0_46, %c0_47, %c0_48, %c0_49, %c0_50] : memref<1x1x1x3x128xbf16, #tpu.memory_space<vmem>>, vector<1x1x1x3x128xbf16>
    %49 = vector.shape_cast %48 : vector<1x1x1x3x128xbf16> to vector<3x128xbf16>
    %50 = vector.extract_strided_slice %49 {offsets = [0, 0], sizes = [2, 128], strides = [1, 1]} : vector<3x128xbf16> to vector<2x128xbf16>
    %cst_51 = arith.constant dense<0.000000e+00> : vector<2x64xf32>
    %51 = tpu.matmul %50, %5, %cst_51 {dimension_numbers = #tpu.dot_dimension_numbers<[1], [0], [0], [1], [0, 0, 1, 1], [], []>} : vector<2x128xbf16>, vector<128x64xbf16>, vector<2x64xf32> -> vector<2x64xf32>
    %52 = arith.addf %47, %51 : vector<2x64xf32>
    %c0_52 = arith.constant 0 : index
    %c0_53 = arith.constant 0 : index
    %c0_54 = arith.constant 0 : index
    %c0_55 = arith.constant 0 : index
    %c0_56 = arith.constant 0 : index
    %53 = vector.load %arg3[%c0_52, %c0_53, %c0_54, %c0_55, %c0_56] : memref<1x1x1x3x128xbf16, #tpu.memory_space<vmem>>, vector<1x1x1x3x128xbf16>
    %54 = vector.shape_cast %53 : vector<1x1x1x3x128xbf16> to vector<3x128xbf16>
    %55 = vector.extract_strided_slice %54 {offsets = [1, 0], sizes = [2, 128], strides = [1, 1]} : vector<3x128xbf16> to vector<2x128xbf16>
    %cst_57 = arith.constant dense<0.000000e+00> : vector<2x64xf32>
    %56 = tpu.matmul %55, %7, %cst_57 {dimension_numbers = #tpu.dot_dimension_numbers<[1], [0], [0], [1], [0, 0, 1, 1], [], []>} : vector<2x128xbf16>, vector<128x64xbf16>, vector<2x64xf32> -> vector<2x64xf32>
    %57 = arith.addf %52, %56 : vector<2x64xf32>
    %58 = vector.broadcast %8 : vector<1x64xf32> to vector<2x64xf32>
    %59 = arith.mulf %57, %58 : vector<2x64xf32>
    %60 = vector.broadcast %9 : vector<1x64xf32> to vector<2x64xf32>
    %61 = arith.addf %59, %60 : vector<2x64xf32>
    %cst_58 = arith.constant 0.000000e+00 : f32
    %62 = vector.broadcast %cst_58 : f32 to vector<2x64xf32>
    %63 = arith.maximumf %61, %62 : vector<2x64xf32>
    %64 = arith.truncf %63 : vector<2x64xf32> to vector<2x64xbf16>
    %c0_59 = arith.constant 0 : index
    %c1_60 = arith.constant 1 : index
    %c0_61 = arith.constant 0 : index
    %c0_62 = arith.constant 0 : index
    %65 = vector.load %arg7[%c0_59, %c1_60, %c0_61, %c0_62] : memref<1x2x2x64xbf16, #tpu.memory_space<vmem>>, vector<1x1x2x64xbf16>
    %66 = vector.shape_cast %65 : vector<1x1x2x64xbf16> to vector<2x64xbf16>
    %67 = vector.shape_cast %64 : vector<2x64xbf16> to vector<1x1x2x64xbf16>
    tpu.vector_store %arg7[%c0_59, %c1_60, %c0_61, %c0_62], %67 {strides = array<i32>} : memref<1x2x2x64xbf16, #tpu.memory_space<vmem>>, vector<1x1x2x64xbf16>,
    return
  }
  func.func @transform_0(%arg0: i32, %arg1: i32) -> (i32, i32, i32, i32) {
    %c0_i32 = arith.constant 0 : i32
    %c0_i32_0 = arith.constant 0 : i32
    %c0_i32_1 = arith.constant 0 : i32
    return %arg0, %arg1, %c0_i32, %c0_i32_0 : i32, i32, i32, i32
  }
  func.func @transform_1(%arg0: i32, %arg1: i32) -> (i32, i32, i32, i32, i32) {
    %c0_i32 = arith.constant 0 : i32
    %c0_i32_0 = arith.constant 0 : i32
    %c0_i32_1 = arith.constant 0 : i32
    %c0_i32_2 = arith.constant 0 : i32
    return %arg0, %arg1, %c0_i32, %c0_i32_0, %c0_i32_1 : i32, i32, i32, i32, i32
  }
  func.func @transform_2(%arg0: i32, %arg1: i32) -> (i32, i32, i32) {
    %c0_i32 = arith.constant 0 : i32
    %c0_i32_0 = arith.constant 0 : i32
    %c0_i32_1 = arith.constant 0 : i32
    %c0_i32_2 = arith.constant 0 : i32
    return %c0_i32, %c0_i32_0, %c0_i32_1 : i32, i32, i32
  }
  func.func @transform_3(%arg0: i32, %arg1: i32) -> (i32, i32) {
    %c0_i32 = arith.constant 0 : i32
    %c0_i32_0 = arith.constant 0 : i32
    %c0_i32_1 = arith.constant 0 : i32
    return %c0_i32, %c0_i32_0 : i32, i32
  }
  func.func @transform_4(%arg0: i32, %arg1: i32) -> (i32, i32) {
    %c0_i32 = arith.constant 0 : i32
    %c0_i32_0 = arith.constant 0 : i32
    %c0_i32_1 = arith.constant 0 : i32
    return %c0_i32, %c0_i32_0 : i32, i32
  }
  func.func @transform_5(%arg0: i32, %arg1: i32) -> (i32, i32, i32, i32) {
    %c0_i32 = arith.constant 0 : i32
    %c0_i32_0 = arith.constant 0 : i32
    %c0_i32_1 = arith.constant 0 : i32
    return %arg0, %arg1, %c0_i32, %c0_i32_0 : i32, i32, i32, i32
  }
}

module attributes {stable_mosaic.version = 11 : i64} {
  func.func @_conv_taps_kernel(%arg0: i32, %arg1: i32, %arg2: memref<1x1x2x256xbf16, #tpu.memory_space<vmem>>, %arg3: memref<1x1x1x2x256xbf16, #tpu.memory_space<vmem>>, %arg4: memref<4x256x128xbf16, #tpu.memory_space<vmem>>, %arg5: memref<1x128xf32, #tpu.memory_space<vmem>>, %arg6: memref<1x128xf32, #tpu.memory_space<vmem>>, %arg7: memref<1x1x1x128xbf16, #tpu.memory_space<vmem>>) attributes {dimension_semantics = [#tpu.dimension_semantics<parallel>, #tpu.dimension_semantics<parallel>], iteration_bounds = array<i64: 2, 1>, scalar_prefetch = 0 : i64, scratch_operands = 0 : i64, tpu.core_type = #tpu.core_type<tc>, window_params = [{transform_indices = @transform_0, window_bounds = array<i64: 1, 1, 2, 256>}, {transform_indices = @transform_1, window_bounds = array<i64: 1, 1, 1, 2, 256>}, {pipeline_mode = #tpu.pipeline_mode<synchronous>, transform_indices = @transform_2, window_bounds = array<i64: 4, 256, 128>}, {pipeline_mode = #tpu.pipeline_mode<synchronous>, transform_indices = @transform_3, window_bounds = array<i64: 1, 128>}, {pipeline_mode = #tpu.pipeline_mode<synchronous>, transform_indices = @transform_4, window_bounds = array<i64: 1, 128>}, {transform_indices = @transform_5, window_bounds = array<i64: 1, 1, 1, 128>}]} {
    %c0 = arith.constant 0 : index
    %c0_0 = arith.constant 0 : index
    %c0_1 = arith.constant 0 : index
    %0 = vector.load %arg4[%c0, %c0_0, %c0_1] : memref<4x256x128xbf16, #tpu.memory_space<vmem>>, vector<1x256x128xbf16>
    %1 = vector.shape_cast %0 : vector<1x256x128xbf16> to vector<256x128xbf16>
    %c1 = arith.constant 1 : index
    %c0_2 = arith.constant 0 : index
    %c0_3 = arith.constant 0 : index
    %2 = vector.load %arg4[%c1, %c0_2, %c0_3] : memref<4x256x128xbf16, #tpu.memory_space<vmem>>, vector<1x256x128xbf16>
    %3 = vector.shape_cast %2 : vector<1x256x128xbf16> to vector<256x128xbf16>
    %c2 = arith.constant 2 : index
    %c0_4 = arith.constant 0 : index
    %c0_5 = arith.constant 0 : index
    %4 = vector.load %arg4[%c2, %c0_4, %c0_5] : memref<4x256x128xbf16, #tpu.memory_space<vmem>>, vector<1x256x128xbf16>
    %5 = vector.shape_cast %4 : vector<1x256x128xbf16> to vector<256x128xbf16>
    %c3 = arith.constant 3 : index
    %c0_6 = arith.constant 0 : index
    %c0_7 = arith.constant 0 : index
    %6 = vector.load %arg4[%c3, %c0_6, %c0_7] : memref<4x256x128xbf16, #tpu.memory_space<vmem>>, vector<1x256x128xbf16>
    %7 = vector.shape_cast %6 : vector<1x256x128xbf16> to vector<256x128xbf16>
    %c0_8 = arith.constant 0 : index
    %c0_9 = arith.constant 0 : index
    %8 = vector.load %arg5[%c0_8, %c0_9] : memref<1x128xf32, #tpu.memory_space<vmem>>, vector<1x128xf32>
    %c0_10 = arith.constant 0 : index
    %c0_11 = arith.constant 0 : index
    %9 = vector.load %arg6[%c0_10, %c0_11] : memref<1x128xf32, #tpu.memory_space<vmem>>, vector<1x128xf32>
    %c0_12 = arith.constant 0 : index
    %c0_13 = arith.constant 0 : index
    %c0_14 = arith.constant 0 : index
    %c0_15 = arith.constant 0 : index
    %10 = vector.load %arg2[%c0_12, %c0_13, %c0_14, %c0_15] : memref<1x1x2x256xbf16, #tpu.memory_space<vmem>>, vector<1x1x2x256xbf16>
    %11 = vector.shape_cast %10 : vector<1x1x2x256xbf16> to vector<2x256xbf16>
    %12 = vector.extract_strided_slice %11 {offsets = [0, 0], sizes = [1, 256], strides = [1, 1]} : vector<2x256xbf16> to vector<1x256xbf16>
    %cst = arith.constant dense<0.000000e+00> : vector<1x128xf32>
    %13 = tpu.matmul %12, %1, %cst {dimension_numbers = #tpu.dot_dimension_numbers<[1], [0], [0], [1], [0, 0, 1, 1], [], []>} : vector<1x256xbf16>, vector<256x128xbf16>, vector<1x128xf32> -> vector<1x128xf32>
    %c0_16 = arith.constant 0 : index
    %c0_17 = arith.constant 0 : index
    %c0_18 = arith.constant 0 : index
    %c0_19 = arith.constant 0 : index
    %14 = vector.load %arg2[%c0_16, %c0_17, %c0_18, %c0_19] : memref<1x1x2x256xbf16, #tpu.memory_space<vmem>>, vector<1x1x2x256xbf16>
    %15 = vector.shape_cast %14 : vector<1x1x2x256xbf16> to vector<2x256xbf16>
    %16 = vector.extract_strided_slice %15 {offsets = [1, 0], sizes = [1, 256], strides = [1, 1]} : vector<2x256xbf16> to vector<1x256xbf16>
    %cst_20 = arith.constant dense<0.000000e+00> : vector<1x128xf32>
    %17 = tpu.matmul %16, %3, %cst_20 {dimension_numbers = #tpu.dot_dimension_numbers<[1], [0], [0], [1], [0, 0, 1, 1], [], []>} : vector<1x256xbf16>, vector<256x128xbf16>, vector<1x128xf32> -> vector<1x128xf32>
    %18 = arith.addf %13, %17 : vector<1x128xf32>
    %c0_21 = arith.constant 0 : index
    %c0_22 = arith.constant 0 : index
    %c0_23 = arith.constant 0 : index
    %c0_24 = arith.constant 0 : index
    %c0_25 = arith.constant 0 : index
    %19 = vector.load %arg3[%c0_21, %c0_22, %c0_23, %c0_24, %c0_25] : memref<1x1x1x2x256xbf16, #tpu.memory_space<vmem>>, vector<1x1x1x2x256xbf16>
    %20 = vector.shape_cast %19 : vector<1x1x1x2x256xbf16> to vector<2x256xbf16>
    %21 = vector.extract_strided_slice %20 {offsets = [0, 0], sizes = [1, 256], strides = [1, 1]} : vector<2x256xbf16> to vector<1x256xbf16>
    %cst_26 = arith.constant dense<0.000000e+00> : vector<1x128xf32>
    %22 = tpu.matmul %21, %5, %cst_26 {dimension_numbers = #tpu.dot_dimension_numbers<[1], [0], [0], [1], [0, 0, 1, 1], [], []>} : vector<1x256xbf16>, vector<256x128xbf16>, vector<1x128xf32> -> vector<1x128xf32>
    %23 = arith.addf %18, %22 : vector<1x128xf32>
    %c0_27 = arith.constant 0 : index
    %c0_28 = arith.constant 0 : index
    %c0_29 = arith.constant 0 : index
    %c0_30 = arith.constant 0 : index
    %c0_31 = arith.constant 0 : index
    %24 = vector.load %arg3[%c0_27, %c0_28, %c0_29, %c0_30, %c0_31] : memref<1x1x1x2x256xbf16, #tpu.memory_space<vmem>>, vector<1x1x1x2x256xbf16>
    %25 = vector.shape_cast %24 : vector<1x1x1x2x256xbf16> to vector<2x256xbf16>
    %26 = vector.extract_strided_slice %25 {offsets = [1, 0], sizes = [1, 256], strides = [1, 1]} : vector<2x256xbf16> to vector<1x256xbf16>
    %cst_32 = arith.constant dense<0.000000e+00> : vector<1x128xf32>
    %27 = tpu.matmul %26, %7, %cst_32 {dimension_numbers = #tpu.dot_dimension_numbers<[1], [0], [0], [1], [0, 0, 1, 1], [], []>} : vector<1x256xbf16>, vector<256x128xbf16>, vector<1x128xf32> -> vector<1x128xf32>
    %28 = arith.addf %23, %27 : vector<1x128xf32>
    %29 = arith.mulf %28, %8 : vector<1x128xf32>
    %30 = arith.addf %29, %9 : vector<1x128xf32>
    %cst_33 = arith.constant 0.000000e+00 : f32
    %31 = vector.broadcast %cst_33 : f32 to vector<1x128xf32>
    %32 = arith.maximumf %30, %31 : vector<1x128xf32>
    %33 = arith.truncf %32 : vector<1x128xf32> to vector<1x128xbf16>
    %c0_34 = arith.constant 0 : index
    %c0_35 = arith.constant 0 : index
    %c0_36 = arith.constant 0 : index
    %c0_37 = arith.constant 0 : index
    %34 = vector.load %arg7[%c0_34, %c0_35, %c0_36, %c0_37] : memref<1x1x1x128xbf16, #tpu.memory_space<vmem>>, vector<1x1x1x128xbf16>
    %35 = vector.shape_cast %34 : vector<1x1x1x128xbf16> to vector<1x128xbf16>
    %36 = vector.shape_cast %33 : vector<1x128xbf16> to vector<1x1x1x128xbf16>
    tpu.vector_store %arg7[%c0_34, %c0_35, %c0_36, %c0_37], %36 {strides = array<i32>} : memref<1x1x1x128xbf16, #tpu.memory_space<vmem>>, vector<1x1x1x128xbf16>,
    return
  }
  func.func @transform_0(%arg0: i32, %arg1: i32) -> (i32, i32, i32, i32) {
    %c0_i32 = arith.constant 0 : i32
    %c0_i32_0 = arith.constant 0 : i32
    %c0_i32_1 = arith.constant 0 : i32
    return %arg0, %arg1, %c0_i32, %c0_i32_0 : i32, i32, i32, i32
  }
  func.func @transform_1(%arg0: i32, %arg1: i32) -> (i32, i32, i32, i32, i32) {
    %c0_i32 = arith.constant 0 : i32
    %c0_i32_0 = arith.constant 0 : i32
    %c0_i32_1 = arith.constant 0 : i32
    %c0_i32_2 = arith.constant 0 : i32
    return %arg0, %arg1, %c0_i32, %c0_i32_0, %c0_i32_1 : i32, i32, i32, i32, i32
  }
  func.func @transform_2(%arg0: i32, %arg1: i32) -> (i32, i32, i32) {
    %c0_i32 = arith.constant 0 : i32
    %c0_i32_0 = arith.constant 0 : i32
    %c0_i32_1 = arith.constant 0 : i32
    %c0_i32_2 = arith.constant 0 : i32
    return %c0_i32, %c0_i32_0, %c0_i32_1 : i32, i32, i32
  }
  func.func @transform_3(%arg0: i32, %arg1: i32) -> (i32, i32) {
    %c0_i32 = arith.constant 0 : i32
    %c0_i32_0 = arith.constant 0 : i32
    %c0_i32_1 = arith.constant 0 : i32
    return %c0_i32, %c0_i32_0 : i32, i32
  }
  func.func @transform_4(%arg0: i32, %arg1: i32) -> (i32, i32) {
    %c0_i32 = arith.constant 0 : i32
    %c0_i32_0 = arith.constant 0 : i32
    %c0_i32_1 = arith.constant 0 : i32
    return %c0_i32, %c0_i32_0 : i32, i32
  }
  func.func @transform_5(%arg0: i32, %arg1: i32) -> (i32, i32, i32, i32) {
    %c0_i32 = arith.constant 0 : i32
    %c0_i32_0 = arith.constant 0 : i32
    %c0_i32_1 = arith.constant 0 : i32
    return %arg0, %arg1, %c0_i32, %c0_i32_0 : i32, i32, i32, i32
  }
}

module attributes {stable_mosaic.version = 11 : i64} {
  func.func @_matmul_kernel(%arg0: i32, %arg1: memref<8x64xbf16, #tpu.memory_space<vmem>>, %arg2: memref<64x32xbf16, #tpu.memory_space<vmem>>, %arg3: memref<8x32xf32, #tpu.memory_space<vmem>>) attributes {dimension_semantics = [#tpu.dimension_semantics<parallel>], iteration_bounds = array<i64: 1>, scalar_prefetch = 0 : i64, scratch_operands = 0 : i64, tpu.core_type = #tpu.core_type<tc>, window_params = [{transform_indices = @transform_0, window_bounds = array<i64: 8, 64>}, {pipeline_mode = #tpu.pipeline_mode<synchronous>, transform_indices = @transform_1, window_bounds = array<i64: 64, 32>}, {transform_indices = @transform_2, window_bounds = array<i64: 8, 32>}]} {
    %c0 = arith.constant 0 : index
    %c0_0 = arith.constant 0 : index
    %0 = vector.load %arg1[%c0, %c0_0] : memref<8x64xbf16, #tpu.memory_space<vmem>>, vector<8x64xbf16>
    %c0_1 = arith.constant 0 : index
    %c0_2 = arith.constant 0 : index
    %1 = vector.load %arg2[%c0_1, %c0_2] : memref<64x32xbf16, #tpu.memory_space<vmem>>, vector<64x32xbf16>
    %cst = arith.constant dense<0.000000e+00> : vector<8x32xf32>
    %2 = tpu.matmul %0, %1, %cst {dimension_numbers = #tpu.dot_dimension_numbers<[1], [0], [0], [1], [0, 0, 1, 1], [], []>} : vector<8x64xbf16>, vector<64x32xbf16>, vector<8x32xf32> -> vector<8x32xf32>
    %c0_3 = arith.constant 0 : index
    %c0_4 = arith.constant 0 : index
    %3 = vector.load %arg3[%c0_3, %c0_4] : memref<8x32xf32, #tpu.memory_space<vmem>>, vector<8x32xf32>
    tpu.vector_store %arg3[%c0_3, %c0_4], %2 {strides = array<i32>} : memref<8x32xf32, #tpu.memory_space<vmem>>, vector<8x32xf32>,
    return
  }
  func.func @transform_0(%arg0: i32) -> (i32, i32) {
    %c0_i32 = arith.constant 0 : i32
    %c0_i32_0 = arith.constant 0 : i32
    return %arg0, %c0_i32 : i32, i32
  }
  func.func @transform_1(%arg0: i32) -> (i32, i32) {
    %c0_i32 = arith.constant 0 : i32
    %c0_i32_0 = arith.constant 0 : i32
    %c0_i32_1 = arith.constant 0 : i32
    return %c0_i32, %c0_i32_0 : i32, i32
  }
  func.func @transform_2(%arg0: i32) -> (i32, i32) {
    %c0_i32 = arith.constant 0 : i32
    %c0_i32_0 = arith.constant 0 : i32
    return %arg0, %c0_i32 : i32, i32
  }
}

module attributes {stable_mosaic.version = 11 : i64} {
  func.func @_matmul_kernel(%arg0: i32, %arg1: memref<2x128xbf16, #tpu.memory_space<vmem>>, %arg2: memref<128x32xbf16, #tpu.memory_space<vmem>>, %arg3: memref<2x32xf32, #tpu.memory_space<vmem>>) attributes {dimension_semantics = [#tpu.dimension_semantics<parallel>], iteration_bounds = array<i64: 1>, scalar_prefetch = 0 : i64, scratch_operands = 0 : i64, tpu.core_type = #tpu.core_type<tc>, window_params = [{transform_indices = @transform_0, window_bounds = array<i64: 2, 128>}, {pipeline_mode = #tpu.pipeline_mode<synchronous>, transform_indices = @transform_1, window_bounds = array<i64: 128, 32>}, {transform_indices = @transform_2, window_bounds = array<i64: 2, 32>}]} {
    %c0 = arith.constant 0 : index
    %c0_0 = arith.constant 0 : index
    %0 = vector.load %arg1[%c0, %c0_0] : memref<2x128xbf16, #tpu.memory_space<vmem>>, vector<2x128xbf16>
    %c0_1 = arith.constant 0 : index
    %c0_2 = arith.constant 0 : index
    %1 = vector.load %arg2[%c0_1, %c0_2] : memref<128x32xbf16, #tpu.memory_space<vmem>>, vector<128x32xbf16>
    %cst = arith.constant dense<0.000000e+00> : vector<2x32xf32>
    %2 = tpu.matmul %0, %1, %cst {dimension_numbers = #tpu.dot_dimension_numbers<[1], [0], [0], [1], [0, 0, 1, 1], [], []>} : vector<2x128xbf16>, vector<128x32xbf16>, vector<2x32xf32> -> vector<2x32xf32>
    %c0_3 = arith.constant 0 : index
    %c0_4 = arith.constant 0 : index
    %3 = vector.load %arg3[%c0_3, %c0_4] : memref<2x32xf32, #tpu.memory_space<vmem>>, vector<2x32xf32>
    tpu.vector_store %arg3[%c0_3, %c0_4], %2 {strides = array<i32>} : memref<2x32xf32, #tpu.memory_space<vmem>>, vector<2x32xf32>,
    return
  }
  func.func @transform_0(%arg0: i32) -> (i32, i32) {
    %c0_i32 = arith.constant 0 : i32
    %c0_i32_0 = arith.constant 0 : i32
    return %arg0, %c0_i32 : i32, i32
  }
  func.func @transform_1(%arg0: i32) -> (i32, i32) {
    %c0_i32 = arith.constant 0 : i32
    %c0_i32_0 = arith.constant 0 : i32
    %c0_i32_1 = arith.constant 0 : i32
    return %c0_i32, %c0_i32_0 : i32, i32
  }
  func.func @transform_2(%arg0: i32) -> (i32, i32) {
    %c0_i32 = arith.constant 0 : i32
    %c0_i32_0 = arith.constant 0 : i32
    return %arg0, %c0_i32 : i32, i32
  }
}

module attributes {stable_mosaic.version = 11 : i64} {
  func.func @_matmul_kernel(%arg0: i32, %arg1: memref<32x32xbf16, #tpu.memory_space<vmem>>, %arg2: memref<32x32xbf16, #tpu.memory_space<vmem>>, %arg3: memref<32x32xf32, #tpu.memory_space<vmem>>) attributes {dimension_semantics = [#tpu.dimension_semantics<parallel>], iteration_bounds = array<i64: 1>, scalar_prefetch = 0 : i64, scratch_operands = 0 : i64, tpu.core_type = #tpu.core_type<tc>, window_params = [{transform_indices = @transform_0, window_bounds = array<i64: 32, 32>}, {pipeline_mode = #tpu.pipeline_mode<synchronous>, transform_indices = @transform_1, window_bounds = array<i64: 32, 32>}, {transform_indices = @transform_2, window_bounds = array<i64: 32, 32>}]} {
    %c0 = arith.constant 0 : index
    %c0_0 = arith.constant 0 : index
    %0 = vector.load %arg1[%c0, %c0_0] : memref<32x32xbf16, #tpu.memory_space<vmem>>, vector<32x32xbf16>
    %c0_1 = arith.constant 0 : index
    %c0_2 = arith.constant 0 : index
    %1 = vector.load %arg2[%c0_1, %c0_2] : memref<32x32xbf16, #tpu.memory_space<vmem>>, vector<32x32xbf16>
    %cst = arith.constant dense<0.000000e+00> : vector<32x32xf32>
    %2 = tpu.matmul %0, %1, %cst {dimension_numbers = #tpu.dot_dimension_numbers<[1], [0], [0], [1], [0, 0, 1, 1], [], []>} : vector<32x32xbf16>, vector<32x32xbf16>, vector<32x32xf32> -> vector<32x32xf32>
    %c0_3 = arith.constant 0 : index
    %c0_4 = arith.constant 0 : index
    %3 = vector.load %arg3[%c0_3, %c0_4] : memref<32x32xf32, #tpu.memory_space<vmem>>, vector<32x32xf32>
    tpu.vector_store %arg3[%c0_3, %c0_4], %2 {strides = array<i32>} : memref<32x32xf32, #tpu.memory_space<vmem>>, vector<32x32xf32>,
    return
  }
  func.func @transform_0(%arg0: i32) -> (i32, i32) {
    %c0_i32 = arith.constant 0 : i32
    %c0_i32_0 = arith.constant 0 : i32
    return %arg0, %c0_i32 : i32, i32
  }
  func.func @transform_1(%arg0: i32) -> (i32, i32) {
    %c0_i32 = arith.constant 0 : i32
    %c0_i32_0 = arith.constant 0 : i32
    %c0_i32_1 = arith.constant 0 : i32
    return %c0_i32, %c0_i32_0 : i32, i32
  }
  func.func @transform_2(%arg0: i32) -> (i32, i32) {
    %c0_i32 = arith.constant 0 : i32
    %c0_i32_0 = arith.constant 0 : i32
    return %arg0, %c0_i32 : i32, i32
  }
}

module attributes {stable_mosaic.version = 11 : i64} {
  func.func @_matmul_kernel(%arg0: i32, %arg1: memref<128x16xbf16, #tpu.memory_space<vmem>>, %arg2: memref<16x32xbf16, #tpu.memory_space<vmem>>, %arg3: memref<128x32xf32, #tpu.memory_space<vmem>>) attributes {dimension_semantics = [#tpu.dimension_semantics<parallel>], iteration_bounds = array<i64: 1>, scalar_prefetch = 0 : i64, scratch_operands = 0 : i64, tpu.core_type = #tpu.core_type<tc>, window_params = [{transform_indices = @transform_0, window_bounds = array<i64: 128, 16>}, {pipeline_mode = #tpu.pipeline_mode<synchronous>, transform_indices = @transform_1, window_bounds = array<i64: 16, 32>}, {transform_indices = @transform_2, window_bounds = array<i64: 128, 32>}]} {
    %c0 = arith.constant 0 : index
    %c0_0 = arith.constant 0 : index
    %0 = vector.load %arg1[%c0, %c0_0] : memref<128x16xbf16, #tpu.memory_space<vmem>>, vector<128x16xbf16>
    %c0_1 = arith.constant 0 : index
    %c0_2 = arith.constant 0 : index
    %1 = vector.load %arg2[%c0_1, %c0_2] : memref<16x32xbf16, #tpu.memory_space<vmem>>, vector<16x32xbf16>
    %cst = arith.constant dense<0.000000e+00> : vector<128x32xf32>
    %2 = tpu.matmul %0, %1, %cst {dimension_numbers = #tpu.dot_dimension_numbers<[1], [0], [0], [1], [0, 0, 1, 1], [], []>} : vector<128x16xbf16>, vector<16x32xbf16>, vector<128x32xf32> -> vector<128x32xf32>
    %c0_3 = arith.constant 0 : index
    %c0_4 = arith.constant 0 : index
    %3 = vector.load %arg3[%c0_3, %c0_4] : memref<128x32xf32, #tpu.memory_space<vmem>>, vector<128x32xf32>
    tpu.vector_store %arg3[%c0_3, %c0_4], %2 {strides = array<i32>} : memref<128x32xf32, #tpu.memory_space<vmem>>, vector<128x32xf32>,
    return
  }
  func.func @transform_0(%arg0: i32) -> (i32, i32) {
    %c0_i32 = arith.constant 0 : i32
    %c0_i32_0 = arith.constant 0 : i32
    return %arg0, %c0_i32 : i32, i32
  }
  func.func @transform_1(%arg0: i32) -> (i32, i32) {
    %c0_i32 = arith.constant 0 : i32
    %c0_i32_0 = arith.constant 0 : i32
    %c0_i32_1 = arith.constant 0 : i32
    return %c0_i32, %c0_i32_0 : i32, i32
  }
  func.func @transform_2(%arg0: i32) -> (i32, i32) {
    %c0_i32 = arith.constant 0 : i32
    %c0_i32_0 = arith.constant 0 : i32
    return %arg0, %c0_i32 : i32, i32
  }
}

module attributes {stable_mosaic.version = 11 : i64} {
  func.func @_conv_taps_kernel(%arg0: i32, %arg1: i32, %arg2: memref<1x8x10x32xbf16, #tpu.memory_space<vmem>>, %arg3: memref<1x1x2x10x32xbf16, #tpu.memory_space<vmem>>, %arg4: memref<9x32x128xbf16, #tpu.memory_space<vmem>>, %arg5: memref<1x128xf32, #tpu.memory_space<vmem>>, %arg6: memref<1x128xf32, #tpu.memory_space<vmem>>, %arg7: memref<1x8x8x1xf32, #tpu.memory_space<vmem>>) attributes {dimension_semantics = [#tpu.dimension_semantics<parallel>, #tpu.dimension_semantics<parallel>], iteration_bounds = array<i64: 2, 1>, scalar_prefetch = 0 : i64, scratch_operands = 0 : i64, tpu.core_type = #tpu.core_type<tc>, window_params = [{transform_indices = @transform_0, window_bounds = array<i64: 1, 8, 10, 32>}, {transform_indices = @transform_1, window_bounds = array<i64: 1, 1, 2, 10, 32>}, {pipeline_mode = #tpu.pipeline_mode<synchronous>, transform_indices = @transform_2, window_bounds = array<i64: 9, 32, 128>}, {pipeline_mode = #tpu.pipeline_mode<synchronous>, transform_indices = @transform_3, window_bounds = array<i64: 1, 128>}, {pipeline_mode = #tpu.pipeline_mode<synchronous>, transform_indices = @transform_4, window_bounds = array<i64: 1, 128>}, {transform_indices = @transform_5, window_bounds = array<i64: 1, 8, 8, 1>}]} {
    %c0 = arith.constant 0 : index
    %c0_0 = arith.constant 0 : index
    %c0_1 = arith.constant 0 : index
    %0 = vector.load %arg4[%c0, %c0_0, %c0_1] : memref<9x32x128xbf16, #tpu.memory_space<vmem>>, vector<1x32x128xbf16>
    %1 = vector.shape_cast %0 : vector<1x32x128xbf16> to vector<32x128xbf16>
    %c1 = arith.constant 1 : index
    %c0_2 = arith.constant 0 : index
    %c0_3 = arith.constant 0 : index
    %2 = vector.load %arg4[%c1, %c0_2, %c0_3] : memref<9x32x128xbf16, #tpu.memory_space<vmem>>, vector<1x32x128xbf16>
    %3 = vector.shape_cast %2 : vector<1x32x128xbf16> to vector<32x128xbf16>
    %c2 = arith.constant 2 : index
    %c0_4 = arith.constant 0 : index
    %c0_5 = arith.constant 0 : index
    %4 = vector.load %arg4[%c2, %c0_4, %c0_5] : memref<9x32x128xbf16, #tpu.memory_space<vmem>>, vector<1x32x128xbf16>
    %5 = vector.shape_cast %4 : vector<1x32x128xbf16> to vector<32x128xbf16>
    %c3 = arith.constant 3 : index
    %c0_6 = arith.constant 0 : index
    %c0_7 = arith.constant 0 : index
    %6 = vector.load %arg4[%c3, %c0_6, %c0_7] : memref<9x32x128xbf16, #tpu.memory_space<vmem>>, vector<1x32x128xbf16>
    %7 = vector.shape_cast %6 : vector<1x32x128xbf16> to vector<32x128xbf16>
    %c4 = arith.constant 4 : index
    %c0_8 = arith.constant 0 : index
    %c0_9 = arith.constant 0 : index
    %8 = vector.load %arg4[%c4, %c0_8, %c0_9] : memref<9x32x128xbf16, #tpu.memory_space<vmem>>, vector<1x32x128xbf16>
    %9 = vector.shape_cast %8 : vector<1x32x128xbf16> to vector<32x128xbf16>
    %c5 = arith.constant 5 : index
    %c0_10 = arith.constant 0 : index
    %c0_11 = arith.constant 0 : index
    %10 = vector.load %arg4[%c5, %c0_10, %c0_11] : memref<9x32x128xbf16, #tpu.memory_space<vmem>>, vector<1x32x128xbf16>
    %11 = vector.shape_cast %10 : vector<1x32x128xbf16> to vector<32x128xbf16>
    %c6 = arith.constant 6 : index
    %c0_12 = arith.constant 0 : index
    %c0_13 = arith.constant 0 : index
    %12 = vector.load %arg4[%c6, %c0_12, %c0_13] : memref<9x32x128xbf16, #tpu.memory_space<vmem>>, vector<1x32x128xbf16>
    %13 = vector.shape_cast %12 : vector<1x32x128xbf16> to vector<32x128xbf16>
    %c7 = arith.constant 7 : index
    %c0_14 = arith.constant 0 : index
    %c0_15 = arith.constant 0 : index
    %14 = vector.load %arg4[%c7, %c0_14, %c0_15] : memref<9x32x128xbf16, #tpu.memory_space<vmem>>, vector<1x32x128xbf16>
    %15 = vector.shape_cast %14 : vector<1x32x128xbf16> to vector<32x128xbf16>
    %c8 = arith.constant 8 : index
    %c0_16 = arith.constant 0 : index
    %c0_17 = arith.constant 0 : index
    %16 = vector.load %arg4[%c8, %c0_16, %c0_17] : memref<9x32x128xbf16, #tpu.memory_space<vmem>>, vector<1x32x128xbf16>
    %17 = vector.shape_cast %16 : vector<1x32x128xbf16> to vector<32x128xbf16>
    %c0_18 = arith.constant 0 : index
    %c0_19 = arith.constant 0 : index
    %18 = vector.load %arg6[%c0_18, %c0_19] : memref<1x128xf32, #tpu.memory_space<vmem>>, vector<1x128xf32>
    %c0_20 = arith.constant 0 : index
    %c0_21 = arith.constant 0 : index
    %c0_22 = arith.constant 0 : index
    %c0_23 = arith.constant 0 : index
    %19 = vector.load %arg2[%c0_20, %c0_21, %c0_22, %c0_23] : memref<1x8x10x32xbf16, #tpu.memory_space<vmem>>, vector<1x1x10x32xbf16>
    %20 = vector.shape_cast %19 : vector<1x1x10x32xbf16> to vector<10x32xbf16>
    %21 = vector.extract_strided_slice %20 {offsets = [0, 0], sizes = [8, 32], strides = [1, 1]} : vector<10x32xbf16> to vector<8x32xbf16>
    %cst = arith.constant dense<0.000000e+00> : vector<8x128xf32>
    %22 = tpu.matmul %21, %1, %cst {dimension_numbers = #tpu.dot_dimension_numbers<[1], [0], [0], [1], [0, 0, 1, 1], [], []>} : vector<8x32xbf16>, vector<32x128xbf16>, vector<8x128xf32> -> vector<8x128xf32>
    %c0_24 = arith.constant 0 : index
    %c0_25 = arith.constant 0 : index
    %c0_26 = arith.constant 0 : index
    %c0_27 = arith.constant 0 : index
    %23 = vector.load %arg2[%c0_24, %c0_25, %c0_26, %c0_27] : memref<1x8x10x32xbf16, #tpu.memory_space<vmem>>, vector<1x1x10x32xbf16>
    %24 = vector.shape_cast %23 : vector<1x1x10x32xbf16> to vector<10x32xbf16>
    %25 = vector.extract_strided_slice %24 {offsets = [1, 0], sizes = [8, 32], strides = [1, 1]} : vector<10x32xbf16> to vector<8x32xbf16>
    %cst_28 = arith.constant dense<0.000000e+00> : vector<8x128xf32>
    %26 = tpu.matmul %25, %3, %cst_28 {dimension_numbers = #tpu.dot_dimension_numbers<[1], [0], [0], [1], [0, 0, 1, 1], [], []>} : vector<8x32xbf16>, vector<32x128xbf16>, vector<8x128xf32> -> vector<8x128xf32>
    %27 = arith.addf %22, %26 : vector<8x128xf32>
    %c0_29 = arith.constant 0 : index
    %c0_30 = arith.constant 0 : index
    %c0_31 = arith.constant 0 : index
    %c0_32 = arith.constant 0 : index
    %28 = vector.load %arg2[%c0_29, %c0_30, %c0_31, %c0_32] : memref<1x8x10x32xbf16, #tpu.memory_space<vmem>>, vector<1x1x10x32xbf16>
    %29 = vector.shape_cast %28 : vector<1x1x10x32xbf16> to vector<10x32xbf16>
    %30 = vector.extract_strided_slice %29 {offsets = [2, 0], sizes = [8, 32], strides = [1, 1]} : vector<10x32xbf16> to vector<8x32xbf16>
    %cst_33 = arith.constant dense<0.000000e+00> : vector<8x128xf32>
    %31 = tpu.matmul %30, %5, %cst_33 {dimension_numbers = #tpu.dot_dimension_numbers<[1], [0], [0], [1], [0, 0, 1, 1], [], []>} : vector<8x32xbf16>, vector<32x128xbf16>, vector<8x128xf32> -> vector<8x128xf32>
    %32 = arith.addf %27, %31 : vector<8x128xf32>
    %c0_34 = arith.constant 0 : index
    %c1_35 = arith.constant 1 : index
    %c0_36 = arith.constant 0 : index
    %c0_37 = arith.constant 0 : index
    %33 = vector.load %arg2[%c0_34, %c1_35, %c0_36, %c0_37] : memref<1x8x10x32xbf16, #tpu.memory_space<vmem>>, vector<1x1x10x32xbf16>
    %34 = vector.shape_cast %33 : vector<1x1x10x32xbf16> to vector<10x32xbf16>
    %35 = vector.extract_strided_slice %34 {offsets = [0, 0], sizes = [8, 32], strides = [1, 1]} : vector<10x32xbf16> to vector<8x32xbf16>
    %cst_38 = arith.constant dense<0.000000e+00> : vector<8x128xf32>
    %36 = tpu.matmul %35, %7, %cst_38 {dimension_numbers = #tpu.dot_dimension_numbers<[1], [0], [0], [1], [0, 0, 1, 1], [], []>} : vector<8x32xbf16>, vector<32x128xbf16>, vector<8x128xf32> -> vector<8x128xf32>
    %37 = arith.addf %32, %36 : vector<8x128xf32>
    %c0_39 = arith.constant 0 : index
    %c1_40 = arith.constant 1 : index
    %c0_41 = arith.constant 0 : index
    %c0_42 = arith.constant 0 : index
    %38 = vector.load %arg2[%c0_39, %c1_40, %c0_41, %c0_42] : memref<1x8x10x32xbf16, #tpu.memory_space<vmem>>, vector<1x1x10x32xbf16>
    %39 = vector.shape_cast %38 : vector<1x1x10x32xbf16> to vector<10x32xbf16>
    %40 = vector.extract_strided_slice %39 {offsets = [1, 0], sizes = [8, 32], strides = [1, 1]} : vector<10x32xbf16> to vector<8x32xbf16>
    %cst_43 = arith.constant dense<0.000000e+00> : vector<8x128xf32>
    %41 = tpu.matmul %40, %9, %cst_43 {dimension_numbers = #tpu.dot_dimension_numbers<[1], [0], [0], [1], [0, 0, 1, 1], [], []>} : vector<8x32xbf16>, vector<32x128xbf16>, vector<8x128xf32> -> vector<8x128xf32>
    %42 = arith.addf %37, %41 : vector<8x128xf32>
    %c0_44 = arith.constant 0 : index
    %c1_45 = arith.constant 1 : index
    %c0_46 = arith.constant 0 : index
    %c0_47 = arith.constant 0 : index
    %43 = vector.load %arg2[%c0_44, %c1_45, %c0_46, %c0_47] : memref<1x8x10x32xbf16, #tpu.memory_space<vmem>>, vector<1x1x10x32xbf16>
    %44 = vector.shape_cast %43 : vector<1x1x10x32xbf16> to vector<10x32xbf16>
    %45 = vector.extract_strided_slice %44 {offsets = [2, 0], sizes = [8, 32], strides = [1, 1]} : vector<10x32xbf16> to vector<8x32xbf16>
    %cst_48 = arith.constant dense<0.000000e+00> : vector<8x128xf32>
    %46 = tpu.matmul %45, %11, %cst_48 {dimension_numbers = #tpu.dot_dimension_numbers<[1], [0], [0], [1], [0, 0, 1, 1], [], []>} : vector<8x32xbf16>, vector<32x128xbf16>, vector<8x128xf32> -> vector<8x128xf32>
    %47 = arith.addf %42, %46 : vector<8x128xf32>
    %c0_49 = arith.constant 0 : index
    %c2_50 = arith.constant 2 : index
    %c0_51 = arith.constant 0 : index
    %c0_52 = arith.constant 0 : index
    %48 = vector.load %arg2[%c0_49, %c2_50, %c0_51, %c0_52] : memref<1x8x10x32xbf16, #tpu.memory_space<vmem>>, vector<1x1x10x32xbf16>
    %49 = vector.shape_cast %48 : vector<1x1x10x32xbf16> to vector<10x32xbf16>
    %50 = vector.extract_strided_slice %49 {offsets = [0, 0], sizes = [8, 32], strides = [1, 1]} : vector<10x32xbf16> to vector<8x32xbf16>
    %cst_53 = arith.constant dense<0.000000e+00> : vector<8x128xf32>
    %51 = tpu.matmul %50, %13, %cst_53 {dimension_numbers = #tpu.dot_dimension_numbers<[1], [0], [0], [1], [0, 0, 1, 1], [], []>} : vector<8x32xbf16>, vector<32x128xbf16>, vector<8x128xf32> -> vector<8x128xf32>
    %52 = arith.addf %47, %51 : vector<8x128xf32>
    %c0_54 = arith.constant 0 : index
    %c2_55 = arith.constant 2 : index
    %c0_56 = arith.constant 0 : index
    %c0_57 = arith.constant 0 : index
    %53 = vector.load %arg2[%c0_54, %c2_55, %c0_56, %c0_57] : memref<1x8x10x32xbf16, #tpu.memory_space<vmem>>, vector<1x1x10x32xbf16>
    %54 = vector.shape_cast %53 : vector<1x1x10x32xbf16> to vector<10x32xbf16>
    %55 = vector.extract_strided_slice %54 {offsets = [1, 0], sizes = [8, 32], strides = [1, 1]} : vector<10x32xbf16> to vector<8x32xbf16>
    %cst_58 = arith.constant dense<0.000000e+00> : vector<8x128xf32>
    %56 = tpu.matmul %55, %15, %cst_58 {dimension_numbers = #tpu.dot_dimension_numbers<[1], [0], [0], [1], [0, 0, 1, 1], [], []>} : vector<8x32xbf16>, vector<32x128xbf16>, vector<8x128xf32> -> vector<8x128xf32>
    %57 = arith.addf %52, %56 : vector<8x128xf32>
    %c0_59 = arith.constant 0 : index
    %c2_60 = arith.constant 2 : index
    %c0_61 = arith.constant 0 : index
    %c0_62 = arith.constant 0 : index
    %58 = vector.load %arg2[%c0_59, %c2_60, %c0_61, %c0_62] : memref<1x8x10x32xbf16, #tpu.memory_space<vmem>>, vector<1x1x10x32xbf16>
    %59 = vector.shape_cast %58 : vector<1x1x10x32xbf16> to vector<10x32xbf16>
    %60 = vector.extract_strided_slice %59 {offsets = [2, 0], sizes = [8, 32], strides = [1, 1]} : vector<10x32xbf16> to vector<8x32xbf16>
    %cst_63 = arith.constant dense<0.000000e+00> : vector<8x128xf32>
    %61 = tpu.matmul %60, %17, %cst_63 {dimension_numbers = #tpu.dot_dimension_numbers<[1], [0], [0], [1], [0, 0, 1, 1], [], []>} : vector<8x32xbf16>, vector<32x128xbf16>, vector<8x128xf32> -> vector<8x128xf32>
    %62 = arith.addf %57, %61 : vector<8x128xf32>
    %63 = vector.broadcast %18 : vector<1x128xf32> to vector<8x128xf32>
    %64 = arith.addf %62, %63 : vector<8x128xf32>
    %65 = vector.extract_strided_slice %64 {offsets = [0, 0], sizes = [8, 1], strides = [1, 1]} : vector<8x128xf32> to vector<8x1xf32>
    %c0_64 = arith.constant 0 : index
    %c0_65 = arith.constant 0 : index
    %c0_66 = arith.constant 0 : index
    %c0_67 = arith.constant 0 : index
    %66 = vector.load %arg7[%c0_64, %c0_65, %c0_66, %c0_67] : memref<1x8x8x1xf32, #tpu.memory_space<vmem>>, vector<1x1x8x1xf32>
    %67 = vector.shape_cast %66 : vector<1x1x8x1xf32> to vector<8x1xf32>
    %68 = vector.shape_cast %65 : vector<8x1xf32> to vector<1x1x8x1xf32>
    tpu.vector_store %arg7[%c0_64, %c0_65, %c0_66, %c0_67], %68 {strides = array<i32>} : memref<1x8x8x1xf32, #tpu.memory_space<vmem>>, vector<1x1x8x1xf32>,
    %c0_68 = arith.constant 0 : index
    %c1_69 = arith.constant 1 : index
    %c0_70 = arith.constant 0 : index
    %c0_71 = arith.constant 0 : index
    %69 = vector.load %arg2[%c0_68, %c1_69, %c0_70, %c0_71] : memref<1x8x10x32xbf16, #tpu.memory_space<vmem>>, vector<1x1x10x32xbf16>
    %70 = vector.shape_cast %69 : vector<1x1x10x32xbf16> to vector<10x32xbf16>
    %71 = vector.extract_strided_slice %70 {offsets = [0, 0], sizes = [8, 32], strides = [1, 1]} : vector<10x32xbf16> to vector<8x32xbf16>
    %cst_72 = arith.constant dense<0.000000e+00> : vector<8x128xf32>
    %72 = tpu.matmul %71, %1, %cst_72 {dimension_numbers = #tpu.dot_dimension_numbers<[1], [0], [0], [1], [0, 0, 1, 1], [], []>} : vector<8x32xbf16>, vector<32x128xbf16>, vector<8x128xf32> -> vector<8x128xf32>
    %c0_73 = arith.constant 0 : index
    %c1_74 = arith.constant 1 : index
    %c0_75 = arith.constant 0 : index
    %c0_76 = arith.constant 0 : index
    %73 = vector.load %arg2[%c0_73, %c1_74, %c0_75, %c0_76] : memref<1x8x10x32xbf16, #tpu.memory_space<vmem>>, vector<1x1x10x32xbf16>
    %74 = vector.shape_cast %73 : vector<1x1x10x32xbf16> to vector<10x32xbf16>
    %75 = vector.extract_strided_slice %74 {offsets = [1, 0], sizes = [8, 32], strides = [1, 1]} : vector<10x32xbf16> to vector<8x32xbf16>
    %cst_77 = arith.constant dense<0.000000e+00> : vector<8x128xf32>
    %76 = tpu.matmul %75, %3, %cst_77 {dimension_numbers = #tpu.dot_dimension_numbers<[1], [0], [0], [1], [0, 0, 1, 1], [], []>} : vector<8x32xbf16>, vector<32x128xbf16>, vector<8x128xf32> -> vector<8x128xf32>
    %77 = arith.addf %72, %76 : vector<8x128xf32>
    %c0_78 = arith.constant 0 : index
    %c1_79 = arith.constant 1 : index
    %c0_80 = arith.constant 0 : index
    %c0_81 = arith.constant 0 : index
    %78 = vector.load %arg2[%c0_78, %c1_79, %c0_80, %c0_81] : memref<1x8x10x32xbf16, #tpu.memory_space<vmem>>, vector<1x1x10x32xbf16>
    %79 = vector.shape_cast %78 : vector<1x1x10x32xbf16> to vector<10x32xbf16>
    %80 = vector.extract_strided_slice %79 {offsets = [2, 0], sizes = [8, 32], strides = [1, 1]} : vector<10x32xbf16> to vector<8x32xbf16>
    %cst_82 = arith.constant dense<0.000000e+00> : vector<8x128xf32>
    %81 = tpu.matmul %80, %5, %cst_82 {dimension_numbers = #tpu.dot_dimension_numbers<[1], [0], [0], [1], [0, 0, 1, 1], [], []>} : vector<8x32xbf16>, vector<32x128xbf16>, vector<8x128xf32> -> vector<8x128xf32>
    %82 = arith.addf %77, %81 : vector<8x128xf32>
    %c0_83 = arith.constant 0 : index
    %c2_84 = arith.constant 2 : index
    %c0_85 = arith.constant 0 : index
    %c0_86 = arith.constant 0 : index
    %83 = vector.load %arg2[%c0_83, %c2_84, %c0_85, %c0_86] : memref<1x8x10x32xbf16, #tpu.memory_space<vmem>>, vector<1x1x10x32xbf16>
    %84 = vector.shape_cast %83 : vector<1x1x10x32xbf16> to vector<10x32xbf16>
    %85 = vector.extract_strided_slice %84 {offsets = [0, 0], sizes = [8, 32], strides = [1, 1]} : vector<10x32xbf16> to vector<8x32xbf16>
    %cst_87 = arith.constant dense<0.000000e+00> : vector<8x128xf32>
    %86 = tpu.matmul %85, %7, %cst_87 {dimension_numbers = #tpu.dot_dimension_numbers<[1], [0], [0], [1], [0, 0, 1, 1], [], []>} : vector<8x32xbf16>, vector<32x128xbf16>, vector<8x128xf32> -> vector<8x128xf32>
    %87 = arith.addf %82, %86 : vector<8x128xf32>
    %c0_88 = arith.constant 0 : index
    %c2_89 = arith.constant 2 : index
    %c0_90 = arith.constant 0 : index
    %c0_91 = arith.constant 0 : index
    %88 = vector.load %arg2[%c0_88, %c2_89, %c0_90, %c0_91] : memref<1x8x10x32xbf16, #tpu.memory_space<vmem>>, vector<1x1x10x32xbf16>
    %89 = vector.shape_cast %88 : vector<1x1x10x32xbf16> to vector<10x32xbf16>
    %90 = vector.extract_strided_slice %89 {offsets = [1, 0], sizes = [8, 32], strides = [1, 1]} : vector<10x32xbf16> to vector<8x32xbf16>
    %cst_92 = arith.constant dense<0.000000e+00> : vector<8x128xf32>
    %91 = tpu.matmul %90, %9, %cst_92 {dimension_numbers = #tpu.dot_dimension_numbers<[1], [0], [0], [1], [0, 0, 1, 1], [], []>} : vector<8x32xbf16>, vector<32x128xbf16>, vector<8x128xf32> -> vector<8x128xf32>
    %92 = arith.addf %87, %91 : vector<8x128xf32>
    %c0_93 = arith.constant 0 : index
    %c2_94 = arith.constant 2 : index
    %c0_95 = arith.constant 0 : index
    %c0_96 = arith.constant 0 : index
    %93 = vector.load %arg2[%c0_93, %c2_94, %c0_95, %c0_96] : memref<1x8x10x32xbf16, #tpu.memory_space<vmem>>, vector<1x1x10x32xbf16>
    %94 = vector.shape_cast %93 : vector<1x1x10x32xbf16> to vector<10x32xbf16>
    %95 = vector.extract_strided_slice %94 {offsets = [2, 0], sizes = [8, 32], strides = [1, 1]} : vector<10x32xbf16> to vector<8x32xbf16>
    %cst_97 = arith.constant dense<0.000000e+00> : vector<8x128xf32>
    %96 = tpu.matmul %95, %11, %cst_97 {dimension_numbers = #tpu.dot_dimension_numbers<[1], [0], [0], [1], [0, 0, 1, 1], [], []>} : vector<8x32xbf16>, vector<32x128xbf16>, vector<8x128xf32> -> vector<8x128xf32>
    %97 = arith.addf %92, %96 : vector<8x128xf32>
    %c0_98 = arith.constant 0 : index
    %c3_99 = arith.constant 3 : index
    %c0_100 = arith.constant 0 : index
    %c0_101 = arith.constant 0 : index
    %98 = vector.load %arg2[%c0_98, %c3_99, %c0_100, %c0_101] : memref<1x8x10x32xbf16, #tpu.memory_space<vmem>>, vector<1x1x10x32xbf16>
    %99 = vector.shape_cast %98 : vector<1x1x10x32xbf16> to vector<10x32xbf16>
    %100 = vector.extract_strided_slice %99 {offsets = [0, 0], sizes = [8, 32], strides = [1, 1]} : vector<10x32xbf16> to vector<8x32xbf16>
    %cst_102 = arith.constant dense<0.000000e+00> : vector<8x128xf32>
    %101 = tpu.matmul %100, %13, %cst_102 {dimension_numbers = #tpu.dot_dimension_numbers<[1], [0], [0], [1], [0, 0, 1, 1], [], []>} : vector<8x32xbf16>, vector<32x128xbf16>, vector<8x128xf32> -> vector<8x128xf32>
    %102 = arith.addf %97, %101 : vector<8x128xf32>
    %c0_103 = arith.constant 0 : index
    %c3_104 = arith.constant 3 : index
    %c0_105 = arith.constant 0 : index
    %c0_106 = arith.constant 0 : index
    %103 = vector.load %arg2[%c0_103, %c3_104, %c0_105, %c0_106] : memref<1x8x10x32xbf16, #tpu.memory_space<vmem>>, vector<1x1x10x32xbf16>
    %104 = vector.shape_cast %103 : vector<1x1x10x32xbf16> to vector<10x32xbf16>
    %105 = vector.extract_strided_slice %104 {offsets = [1, 0], sizes = [8, 32], strides = [1, 1]} : vector<10x32xbf16> to vector<8x32xbf16>
    %cst_107 = arith.constant dense<0.000000e+00> : vector<8x128xf32>
    %106 = tpu.matmul %105, %15, %cst_107 {dimension_numbers = #tpu.dot_dimension_numbers<[1], [0], [0], [1], [0, 0, 1, 1], [], []>} : vector<8x32xbf16>, vector<32x128xbf16>, vector<8x128xf32> -> vector<8x128xf32>
    %107 = arith.addf %102, %106 : vector<8x128xf32>
    %c0_108 = arith.constant 0 : index
    %c3_109 = arith.constant 3 : index
    %c0_110 = arith.constant 0 : index
    %c0_111 = arith.constant 0 : index
    %108 = vector.load %arg2[%c0_108, %c3_109, %c0_110, %c0_111] : memref<1x8x10x32xbf16, #tpu.memory_space<vmem>>, vector<1x1x10x32xbf16>
    %109 = vector.shape_cast %108 : vector<1x1x10x32xbf16> to vector<10x32xbf16>
    %110 = vector.extract_strided_slice %109 {offsets = [2, 0], sizes = [8, 32], strides = [1, 1]} : vector<10x32xbf16> to vector<8x32xbf16>
    %cst_112 = arith.constant dense<0.000000e+00> : vector<8x128xf32>
    %111 = tpu.matmul %110, %17, %cst_112 {dimension_numbers = #tpu.dot_dimension_numbers<[1], [0], [0], [1], [0, 0, 1, 1], [], []>} : vector<8x32xbf16>, vector<32x128xbf16>, vector<8x128xf32> -> vector<8x128xf32>
    %112 = arith.addf %107, %111 : vector<8x128xf32>
    %113 = vector.broadcast %18 : vector<1x128xf32> to vector<8x128xf32>
    %114 = arith.addf %112, %113 : vector<8x128xf32>
    %115 = vector.extract_strided_slice %114 {offsets = [0, 0], sizes = [8, 1], strides = [1, 1]} : vector<8x128xf32> to vector<8x1xf32>
    %c0_113 = arith.constant 0 : index
    %c1_114 = arith.constant 1 : index
    %c0_115 = arith.constant 0 : index
    %c0_116 = arith.constant 0 : index
    %116 = vector.load %arg7[%c0_113, %c1_114, %c0_115, %c0_116] : memref<1x8x8x1xf32, #tpu.memory_space<vmem>>, vector<1x1x8x1xf32>
    %117 = vector.shape_cast %116 : vector<1x1x8x1xf32> to vector<8x1xf32>
    %118 = vector.shape_cast %115 : vector<8x1xf32> to vector<1x1x8x1xf32>
    tpu.vector_store %arg7[%c0_113, %c1_114, %c0_115, %c0_116], %118 {strides = array<i32>} : memref<1x8x8x1xf32, #tpu.memory_space<vmem>>, vector<1x1x8x1xf32>,
    %c0_117 = arith.constant 0 : index
    %c2_118 = arith.constant 2 : index
    %c0_119 = arith.constant 0 : index
    %c0_120 = arith.constant 0 : index
    %119 = vector.load %arg2[%c0_117, %c2_118, %c0_119, %c0_120] : memref<1x8x10x32xbf16, #tpu.memory_space<vmem>>, vector<1x1x10x32xbf16>
    %120 = vector.shape_cast %119 : vector<1x1x10x32xbf16> to vector<10x32xbf16>
    %121 = vector.extract_strided_slice %120 {offsets = [0, 0], sizes = [8, 32], strides = [1, 1]} : vector<10x32xbf16> to vector<8x32xbf16>
    %cst_121 = arith.constant dense<0.000000e+00> : vector<8x128xf32>
    %122 = tpu.matmul %121, %1, %cst_121 {dimension_numbers = #tpu.dot_dimension_numbers<[1], [0], [0], [1], [0, 0, 1, 1], [], []>} : vector<8x32xbf16>, vector<32x128xbf16>, vector<8x128xf32> -> vector<8x128xf32>
    %c0_122 = arith.constant 0 : index
    %c2_123 = arith.constant 2 : index
    %c0_124 = arith.constant 0 : index
    %c0_125 = arith.constant 0 : index
    %123 = vector.load %arg2[%c0_122, %c2_123, %c0_124, %c0_125] : memref<1x8x10x32xbf16, #tpu.memory_space<vmem>>, vector<1x1x10x32xbf16>
    %124 = vector.shape_cast %123 : vector<1x1x10x32xbf16> to vector<10x32xbf16>
    %125 = vector.extract_strided_slice %124 {offsets = [1, 0], sizes = [8, 32], strides = [1, 1]} : vector<10x32xbf16> to vector<8x32xbf16>
    %cst_126 = arith.constant dense<0.000000e+00> : vector<8x128xf32>
    %126 = tpu.matmul %125, %3, %cst_126 {dimension_numbers = #tpu.dot_dimension_numbers<[1], [0], [0], [1], [0, 0, 1, 1], [], []>} : vector<8x32xbf16>, vector<32x128xbf16>, vector<8x128xf32> -> vector<8x128xf32>
    %127 = arith.addf %122, %126 : vector<8x128xf32>
    %c0_127 = arith.constant 0 : index
    %c2_128 = arith.constant 2 : index
    %c0_129 = arith.constant 0 : index
    %c0_130 = arith.constant 0 : index
    %128 = vector.load %arg2[%c0_127, %c2_128, %c0_129, %c0_130] : memref<1x8x10x32xbf16, #tpu.memory_space<vmem>>, vector<1x1x10x32xbf16>
    %129 = vector.shape_cast %128 : vector<1x1x10x32xbf16> to vector<10x32xbf16>
    %130 = vector.extract_strided_slice %129 {offsets = [2, 0], sizes = [8, 32], strides = [1, 1]} : vector<10x32xbf16> to vector<8x32xbf16>
    %cst_131 = arith.constant dense<0.000000e+00> : vector<8x128xf32>
    %131 = tpu.matmul %130, %5, %cst_131 {dimension_numbers = #tpu.dot_dimension_numbers<[1], [0], [0], [1], [0, 0, 1, 1], [], []>} : vector<8x32xbf16>, vector<32x128xbf16>, vector<8x128xf32> -> vector<8x128xf32>
    %132 = arith.addf %127, %131 : vector<8x128xf32>
    %c0_132 = arith.constant 0 : index
    %c3_133 = arith.constant 3 : index
    %c0_134 = arith.constant 0 : index
    %c0_135 = arith.constant 0 : index
    %133 = vector.load %arg2[%c0_132, %c3_133, %c0_134, %c0_135] : memref<1x8x10x32xbf16, #tpu.memory_space<vmem>>, vector<1x1x10x32xbf16>
    %134 = vector.shape_cast %133 : vector<1x1x10x32xbf16> to vector<10x32xbf16>
    %135 = vector.extract_strided_slice %134 {offsets = [0, 0], sizes = [8, 32], strides = [1, 1]} : vector<10x32xbf16> to vector<8x32xbf16>
    %cst_136 = arith.constant dense<0.000000e+00> : vector<8x128xf32>
    %136 = tpu.matmul %135, %7, %cst_136 {dimension_numbers = #tpu.dot_dimension_numbers<[1], [0], [0], [1], [0, 0, 1, 1], [], []>} : vector<8x32xbf16>, vector<32x128xbf16>, vector<8x128xf32> -> vector<8x128xf32>
    %137 = arith.addf %132, %136 : vector<8x128xf32>
    %c0_137 = arith.constant 0 : index
    %c3_138 = arith.constant 3 : index
    %c0_139 = arith.constant 0 : index
    %c0_140 = arith.constant 0 : index
    %138 = vector.load %arg2[%c0_137, %c3_138, %c0_139, %c0_140] : memref<1x8x10x32xbf16, #tpu.memory_space<vmem>>, vector<1x1x10x32xbf16>
    %139 = vector.shape_cast %138 : vector<1x1x10x32xbf16> to vector<10x32xbf16>
    %140 = vector.extract_strided_slice %139 {offsets = [1, 0], sizes = [8, 32], strides = [1, 1]} : vector<10x32xbf16> to vector<8x32xbf16>
    %cst_141 = arith.constant dense<0.000000e+00> : vector<8x128xf32>
    %141 = tpu.matmul %140, %9, %cst_141 {dimension_numbers = #tpu.dot_dimension_numbers<[1], [0], [0], [1], [0, 0, 1, 1], [], []>} : vector<8x32xbf16>, vector<32x128xbf16>, vector<8x128xf32> -> vector<8x128xf32>
    %142 = arith.addf %137, %141 : vector<8x128xf32>
    %c0_142 = arith.constant 0 : index
    %c3_143 = arith.constant 3 : index
    %c0_144 = arith.constant 0 : index
    %c0_145 = arith.constant 0 : index
    %143 = vector.load %arg2[%c0_142, %c3_143, %c0_144, %c0_145] : memref<1x8x10x32xbf16, #tpu.memory_space<vmem>>, vector<1x1x10x32xbf16>
    %144 = vector.shape_cast %143 : vector<1x1x10x32xbf16> to vector<10x32xbf16>
    %145 = vector.extract_strided_slice %144 {offsets = [2, 0], sizes = [8, 32], strides = [1, 1]} : vector<10x32xbf16> to vector<8x32xbf16>
    %cst_146 = arith.constant dense<0.000000e+00> : vector<8x128xf32>
    %146 = tpu.matmul %145, %11, %cst_146 {dimension_numbers = #tpu.dot_dimension_numbers<[1], [0], [0], [1], [0, 0, 1, 1], [], []>} : vector<8x32xbf16>, vector<32x128xbf16>, vector<8x128xf32> -> vector<8x128xf32>
    %147 = arith.addf %142, %146 : vector<8x128xf32>
    %c0_147 = arith.constant 0 : index
    %c4_148 = arith.constant 4 : index
    %c0_149 = arith.constant 0 : index
    %c0_150 = arith.constant 0 : index
    %148 = vector.load %arg2[%c0_147, %c4_148, %c0_149, %c0_150] : memref<1x8x10x32xbf16, #tpu.memory_space<vmem>>, vector<1x1x10x32xbf16>
    %149 = vector.shape_cast %148 : vector<1x1x10x32xbf16> to vector<10x32xbf16>
    %150 = vector.extract_strided_slice %149 {offsets = [0, 0], sizes = [8, 32], strides = [1, 1]} : vector<10x32xbf16> to vector<8x32xbf16>
    %cst_151 = arith.constant dense<0.000000e+00> : vector<8x128xf32>
    %151 = tpu.matmul %150, %13, %cst_151 {dimension_numbers = #tpu.dot_dimension_numbers<[1], [0], [0], [1], [0, 0, 1, 1], [], []>} : vector<8x32xbf16>, vector<32x128xbf16>, vector<8x128xf32> -> vector<8x128xf32>
    %152 = arith.addf %147, %151 : vector<8x128xf32>
    %c0_152 = arith.constant 0 : index
    %c4_153 = arith.constant 4 : index
    %c0_154 = arith.constant 0 : index
    %c0_155 = arith.constant 0 : index
    %153 = vector.load %arg2[%c0_152, %c4_153, %c0_154, %c0_155] : memref<1x8x10x32xbf16, #tpu.memory_space<vmem>>, vector<1x1x10x32xbf16>
    %154 = vector.shape_cast %153 : vector<1x1x10x32xbf16> to vector<10x32xbf16>
    %155 = vector.extract_strided_slice %154 {offsets = [1, 0], sizes = [8, 32], strides = [1, 1]} : vector<10x32xbf16> to vector<8x32xbf16>
    %cst_156 = arith.constant dense<0.000000e+00> : vector<8x128xf32>
    %156 = tpu.matmul %155, %15, %cst_156 {dimension_numbers = #tpu.dot_dimension_numbers<[1], [0], [0], [1], [0, 0, 1, 1], [], []>} : vector<8x32xbf16>, vector<32x128xbf16>, vector<8x128xf32> -> vector<8x128xf32>
    %157 = arith.addf %152, %156 : vector<8x128xf32>
    %c0_157 = arith.constant 0 : index
    %c4_158 = arith.constant 4 : index
    %c0_159 = arith.constant 0 : index
    %c0_160 = arith.constant 0 : index
    %158 = vector.load %arg2[%c0_157, %c4_158, %c0_159, %c0_160] : memref<1x8x10x32xbf16, #tpu.memory_space<vmem>>, vector<1x1x10x32xbf16>
    %159 = vector.shape_cast %158 : vector<1x1x10x32xbf16> to vector<10x32xbf16>
    %160 = vector.extract_strided_slice %159 {offsets = [2, 0], sizes = [8, 32], strides = [1, 1]} : vector<10x32xbf16> to vector<8x32xbf16>
    %cst_161 = arith.constant dense<0.000000e+00> : vector<8x128xf32>
    %161 = tpu.matmul %160, %17, %cst_161 {dimension_numbers = #tpu.dot_dimension_numbers<[1], [0], [0], [1], [0, 0, 1, 1], [], []>} : vector<8x32xbf16>, vector<32x128xbf16>, vector<8x128xf32> -> vector<8x128xf32>
    %162 = arith.addf %157, %161 : vector<8x128xf32>
    %163 = vector.broadcast %18 : vector<1x128xf32> to vector<8x128xf32>
    %164 = arith.addf %162, %163 : vector<8x128xf32>
    %165 = vector.extract_strided_slice %164 {offsets = [0, 0], sizes = [8, 1], strides = [1, 1]} : vector<8x128xf32> to vector<8x1xf32>
    %c0_162 = arith.constant 0 : index
    %c2_163 = arith.constant 2 : index
    %c0_164 = arith.constant 0 : index
    %c0_165 = arith.constant 0 : index
    %166 = vector.load %arg7[%c0_162, %c2_163, %c0_164, %c0_165] : memref<1x8x8x1xf32, #tpu.memory_space<vmem>>, vector<1x1x8x1xf32>
    %167 = vector.shape_cast %166 : vector<1x1x8x1xf32> to vector<8x1xf32>
    %168 = vector.shape_cast %165 : vector<8x1xf32> to vector<1x1x8x1xf32>
    tpu.vector_store %arg7[%c0_162, %c2_163, %c0_164, %c0_165], %168 {strides = array<i32>} : memref<1x8x8x1xf32, #tpu.memory_space<vmem>>, vector<1x1x8x1xf32>,
    %c0_166 = arith.constant 0 : index
    %c3_167 = arith.constant 3 : index
    %c0_168 = arith.constant 0 : index
    %c0_169 = arith.constant 0 : index
    %169 = vector.load %arg2[%c0_166, %c3_167, %c0_168, %c0_169] : memref<1x8x10x32xbf16, #tpu.memory_space<vmem>>, vector<1x1x10x32xbf16>
    %170 = vector.shape_cast %169 : vector<1x1x10x32xbf16> to vector<10x32xbf16>
    %171 = vector.extract_strided_slice %170 {offsets = [0, 0], sizes = [8, 32], strides = [1, 1]} : vector<10x32xbf16> to vector<8x32xbf16>
    %cst_170 = arith.constant dense<0.000000e+00> : vector<8x128xf32>
    %172 = tpu.matmul %171, %1, %cst_170 {dimension_numbers = #tpu.dot_dimension_numbers<[1], [0], [0], [1], [0, 0, 1, 1], [], []>} : vector<8x32xbf16>, vector<32x128xbf16>, vector<8x128xf32> -> vector<8x128xf32>
    %c0_171 = arith.constant 0 : index
    %c3_172 = arith.constant 3 : index
    %c0_173 = arith.constant 0 : index
    %c0_174 = arith.constant 0 : index
    %173 = vector.load %arg2[%c0_171, %c3_172, %c0_173, %c0_174] : memref<1x8x10x32xbf16, #tpu.memory_space<vmem>>, vector<1x1x10x32xbf16>
    %174 = vector.shape_cast %173 : vector<1x1x10x32xbf16> to vector<10x32xbf16>
    %175 = vector.extract_strided_slice %174 {offsets = [1, 0], sizes = [8, 32], strides = [1, 1]} : vector<10x32xbf16> to vector<8x32xbf16>
    %cst_175 = arith.constant dense<0.000000e+00> : vector<8x128xf32>
    %176 = tpu.matmul %175, %3, %cst_175 {dimension_numbers = #tpu.dot_dimension_numbers<[1], [0], [0], [1], [0, 0, 1, 1], [], []>} : vector<8x32xbf16>, vector<32x128xbf16>, vector<8x128xf32> -> vector<8x128xf32>
    %177 = arith.addf %172, %176 : vector<8x128xf32>
    %c0_176 = arith.constant 0 : index
    %c3_177 = arith.constant 3 : index
    %c0_178 = arith.constant 0 : index
    %c0_179 = arith.constant 0 : index
    %178 = vector.load %arg2[%c0_176, %c3_177, %c0_178, %c0_179] : memref<1x8x10x32xbf16, #tpu.memory_space<vmem>>, vector<1x1x10x32xbf16>
    %179 = vector.shape_cast %178 : vector<1x1x10x32xbf16> to vector<10x32xbf16>
    %180 = vector.extract_strided_slice %179 {offsets = [2, 0], sizes = [8, 32], strides = [1, 1]} : vector<10x32xbf16> to vector<8x32xbf16>
    %cst_180 = arith.constant dense<0.000000e+00> : vector<8x128xf32>
    %181 = tpu.matmul %180, %5, %cst_180 {dimension_numbers = #tpu.dot_dimension_numbers<[1], [0], [0], [1], [0, 0, 1, 1], [], []>} : vector<8x32xbf16>, vector<32x128xbf16>, vector<8x128xf32> -> vector<8x128xf32>
    %182 = arith.addf %177, %181 : vector<8x128xf32>
    %c0_181 = arith.constant 0 : index
    %c4_182 = arith.constant 4 : index
    %c0_183 = arith.constant 0 : index
    %c0_184 = arith.constant 0 : index
    %183 = vector.load %arg2[%c0_181, %c4_182, %c0_183, %c0_184] : memref<1x8x10x32xbf16, #tpu.memory_space<vmem>>, vector<1x1x10x32xbf16>
    %184 = vector.shape_cast %183 : vector<1x1x10x32xbf16> to vector<10x32xbf16>
    %185 = vector.extract_strided_slice %184 {offsets = [0, 0], sizes = [8, 32], strides = [1, 1]} : vector<10x32xbf16> to vector<8x32xbf16>
    %cst_185 = arith.constant dense<0.000000e+00> : vector<8x128xf32>
    %186 = tpu.matmul %185, %7, %cst_185 {dimension_numbers = #tpu.dot_dimension_numbers<[1], [0], [0], [1], [0, 0, 1, 1], [], []>} : vector<8x32xbf16>, vector<32x128xbf16>, vector<8x128xf32> -> vector<8x128xf32>
    %187 = arith.addf %182, %186 : vector<8x128xf32>
    %c0_186 = arith.constant 0 : index
    %c4_187 = arith.constant 4 : index
    %c0_188 = arith.constant 0 : index
    %c0_189 = arith.constant 0 : index
    %188 = vector.load %arg2[%c0_186, %c4_187, %c0_188, %c0_189] : memref<1x8x10x32xbf16, #tpu.memory_space<vmem>>, vector<1x1x10x32xbf16>
    %189 = vector.shape_cast %188 : vector<1x1x10x32xbf16> to vector<10x32xbf16>
    %190 = vector.extract_strided_slice %189 {offsets = [1, 0], sizes = [8, 32], strides = [1, 1]} : vector<10x32xbf16> to vector<8x32xbf16>
    %cst_190 = arith.constant dense<0.000000e+00> : vector<8x128xf32>
    %191 = tpu.matmul %190, %9, %cst_190 {dimension_numbers = #tpu.dot_dimension_numbers<[1], [0], [0], [1], [0, 0, 1, 1], [], []>} : vector<8x32xbf16>, vector<32x128xbf16>, vector<8x128xf32> -> vector<8x128xf32>
    %192 = arith.addf %187, %191 : vector<8x128xf32>
    %c0_191 = arith.constant 0 : index
    %c4_192 = arith.constant 4 : index
    %c0_193 = arith.constant 0 : index
    %c0_194 = arith.constant 0 : index
    %193 = vector.load %arg2[%c0_191, %c4_192, %c0_193, %c0_194] : memref<1x8x10x32xbf16, #tpu.memory_space<vmem>>, vector<1x1x10x32xbf16>
    %194 = vector.shape_cast %193 : vector<1x1x10x32xbf16> to vector<10x32xbf16>
    %195 = vector.extract_strided_slice %194 {offsets = [2, 0], sizes = [8, 32], strides = [1, 1]} : vector<10x32xbf16> to vector<8x32xbf16>
    %cst_195 = arith.constant dense<0.000000e+00> : vector<8x128xf32>
    %196 = tpu.matmul %195, %11, %cst_195 {dimension_numbers = #tpu.dot_dimension_numbers<[1], [0], [0], [1], [0, 0, 1, 1], [], []>} : vector<8x32xbf16>, vector<32x128xbf16>, vector<8x128xf32> -> vector<8x128xf32>
    %197 = arith.addf %192, %196 : vector<8x128xf32>
    %c0_196 = arith.constant 0 : index
    %c5_197 = arith.constant 5 : index
    %c0_198 = arith.constant 0 : index
    %c0_199 = arith.constant 0 : index
    %198 = vector.load %arg2[%c0_196, %c5_197, %c0_198, %c0_199] : memref<1x8x10x32xbf16, #tpu.memory_space<vmem>>, vector<1x1x10x32xbf16>
    %199 = vector.shape_cast %198 : vector<1x1x10x32xbf16> to vector<10x32xbf16>
    %200 = vector.extract_strided_slice %199 {offsets = [0, 0], sizes = [8, 32], strides = [1, 1]} : vector<10x32xbf16> to vector<8x32xbf16>
    %cst_200 = arith.constant dense<0.000000e+00> : vector<8x128xf32>
    %201 = tpu.matmul %200, %13, %cst_200 {dimension_numbers = #tpu.dot_dimension_numbers<[1], [0], [0], [1], [0, 0, 1, 1], [], []>} : vector<8x32xbf16>, vector<32x128xbf16>, vector<8x128xf32> -> vector<8x128xf32>
    %202 = arith.addf %197, %201 : vector<8x128xf32>
    %c0_201 = arith.constant 0 : index
    %c5_202 = arith.constant 5 : index
    %c0_203 = arith.constant 0 : index
    %c0_204 = arith.constant 0 : index
    %203 = vector.load %arg2[%c0_201, %c5_202, %c0_203, %c0_204] : memref<1x8x10x32xbf16, #tpu.memory_space<vmem>>, vector<1x1x10x32xbf16>
    %204 = vector.shape_cast %203 : vector<1x1x10x32xbf16> to vector<10x32xbf16>
    %205 = vector.extract_strided_slice %204 {offsets = [1, 0], sizes = [8, 32], strides = [1, 1]} : vector<10x32xbf16> to vector<8x32xbf16>
    %cst_205 = arith.constant dense<0.000000e+00> : vector<8x128xf32>
    %206 = tpu.matmul %205, %15, %cst_205 {dimension_numbers = #tpu.dot_dimension_numbers<[1], [0], [0], [1], [0, 0, 1, 1], [], []>} : vector<8x32xbf16>, vector<32x128xbf16>, vector<8x128xf32> -> vector<8x128xf32>
    %207 = arith.addf %202, %206 : vector<8x128xf32>
    %c0_206 = arith.constant 0 : index
    %c5_207 = arith.constant 5 : index
    %c0_208 = arith.constant 0 : index
    %c0_209 = arith.constant 0 : index
    %208 = vector.load %arg2[%c0_206, %c5_207, %c0_208, %c0_209] : memref<1x8x10x32xbf16, #tpu.memory_space<vmem>>, vector<1x1x10x32xbf16>
    %209 = vector.shape_cast %208 : vector<1x1x10x32xbf16> to vector<10x32xbf16>
    %210 = vector.extract_strided_slice %209 {offsets = [2, 0], sizes = [8, 32], strides = [1, 1]} : vector<10x32xbf16> to vector<8x32xbf16>
    %cst_210 = arith.constant dense<0.000000e+00> : vector<8x128xf32>
    %211 = tpu.matmul %210, %17, %cst_210 {dimension_numbers = #tpu.dot_dimension_numbers<[1], [0], [0], [1], [0, 0, 1, 1], [], []>} : vector<8x32xbf16>, vector<32x128xbf16>, vector<8x128xf32> -> vector<8x128xf32>
    %212 = arith.addf %207, %211 : vector<8x128xf32>
    %213 = vector.broadcast %18 : vector<1x128xf32> to vector<8x128xf32>
    %214 = arith.addf %212, %213 : vector<8x128xf32>
    %215 = vector.extract_strided_slice %214 {offsets = [0, 0], sizes = [8, 1], strides = [1, 1]} : vector<8x128xf32> to vector<8x1xf32>
    %c0_211 = arith.constant 0 : index
    %c3_212 = arith.constant 3 : index
    %c0_213 = arith.constant 0 : index
    %c0_214 = arith.constant 0 : index
    %216 = vector.load %arg7[%c0_211, %c3_212, %c0_213, %c0_214] : memref<1x8x8x1xf32, #tpu.memory_space<vmem>>, vector<1x1x8x1xf32>
    %217 = vector.shape_cast %216 : vector<1x1x8x1xf32> to vector<8x1xf32>
    %218 = vector.shape_cast %215 : vector<8x1xf32> to vector<1x1x8x1xf32>
    tpu.vector_store %arg7[%c0_211, %c3_212, %c0_213, %c0_214], %218 {strides = array<i32>} : memref<1x8x8x1xf32, #tpu.memory_space<vmem>>, vector<1x1x8x1xf32>,
    %c0_215 = arith.constant 0 : index
    %c4_216 = arith.constant 4 : index
    %c0_217 = arith.constant 0 : index
    %c0_218 = arith.constant 0 : index
    %219 = vector.load %arg2[%c0_215, %c4_216, %c0_217, %c0_218] : memref<1x8x10x32xbf16, #tpu.memory_space<vmem>>, vector<1x1x10x32xbf16>
    %220 = vector.shape_cast %219 : vector<1x1x10x32xbf16> to vector<10x32xbf16>
    %221 = vector.extract_strided_slice %220 {offsets = [0, 0], sizes = [8, 32], strides = [1, 1]} : vector<10x32xbf16> to vector<8x32xbf16>
    %cst_219 = arith.constant dense<0.000000e+00> : vector<8x128xf32>
    %222 = tpu.matmul %221, %1, %cst_219 {dimension_numbers = #tpu.dot_dimension_numbers<[1], [0], [0], [1], [0, 0, 1, 1], [], []>} : vector<8x32xbf16>, vector<32x128xbf16>, vector<8x128xf32> -> vector<8x128xf32>
    %c0_220 = arith.constant 0 : index
    %c4_221 = arith.constant 4 : index
    %c0_222 = arith.constant 0 : index
    %c0_223 = arith.constant 0 : index
    %223 = vector.load %arg2[%c0_220, %c4_221, %c0_222, %c0_223] : memref<1x8x10x32xbf16, #tpu.memory_space<vmem>>, vector<1x1x10x32xbf16>
    %224 = vector.shape_cast %223 : vector<1x1x10x32xbf16> to vector<10x32xbf16>
    %225 = vector.extract_strided_slice %224 {offsets = [1, 0], sizes = [8, 32], strides = [1, 1]} : vector<10x32xbf16> to vector<8x32xbf16>
    %cst_224 = arith.constant dense<0.000000e+00> : vector<8x128xf32>
    %226 = tpu.matmul %225, %3, %cst_224 {dimension_numbers = #tpu.dot_dimension_numbers<[1], [0], [0], [1], [0, 0, 1, 1], [], []>} : vector<8x32xbf16>, vector<32x128xbf16>, vector<8x128xf32> -> vector<8x128xf32>
    %227 = arith.addf %222, %226 : vector<8x128xf32>
    %c0_225 = arith.constant 0 : index
    %c4_226 = arith.constant 4 : index
    %c0_227 = arith.constant 0 : index
    %c0_228 = arith.constant 0 : index
    %228 = vector.load %arg2[%c0_225, %c4_226, %c0_227, %c0_228] : memref<1x8x10x32xbf16, #tpu.memory_space<vmem>>, vector<1x1x10x32xbf16>
    %229 = vector.shape_cast %228 : vector<1x1x10x32xbf16> to vector<10x32xbf16>
    %230 = vector.extract_strided_slice %229 {offsets = [2, 0], sizes = [8, 32], strides = [1, 1]} : vector<10x32xbf16> to vector<8x32xbf16>
    %cst_229 = arith.constant dense<0.000000e+00> : vector<8x128xf32>
    %231 = tpu.matmul %230, %5, %cst_229 {dimension_numbers = #tpu.dot_dimension_numbers<[1], [0], [0], [1], [0, 0, 1, 1], [], []>} : vector<8x32xbf16>, vector<32x128xbf16>, vector<8x128xf32> -> vector<8x128xf32>
    %232 = arith.addf %227, %231 : vector<8x128xf32>
    %c0_230 = arith.constant 0 : index
    %c5_231 = arith.constant 5 : index
    %c0_232 = arith.constant 0 : index
    %c0_233 = arith.constant 0 : index
    %233 = vector.load %arg2[%c0_230, %c5_231, %c0_232, %c0_233] : memref<1x8x10x32xbf16, #tpu.memory_space<vmem>>, vector<1x1x10x32xbf16>
    %234 = vector.shape_cast %233 : vector<1x1x10x32xbf16> to vector<10x32xbf16>
    %235 = vector.extract_strided_slice %234 {offsets = [0, 0], sizes = [8, 32], strides = [1, 1]} : vector<10x32xbf16> to vector<8x32xbf16>
    %cst_234 = arith.constant dense<0.000000e+00> : vector<8x128xf32>
    %236 = tpu.matmul %235, %7, %cst_234 {dimension_numbers = #tpu.dot_dimension_numbers<[1], [0], [0], [1], [0, 0, 1, 1], [], []>} : vector<8x32xbf16>, vector<32x128xbf16>, vector<8x128xf32> -> vector<8x128xf32>
    %237 = arith.addf %232, %236 : vector<8x128xf32>
    %c0_235 = arith.constant 0 : index
    %c5_236 = arith.constant 5 : index
    %c0_237 = arith.constant 0 : index
    %c0_238 = arith.constant 0 : index
    %238 = vector.load %arg2[%c0_235, %c5_236, %c0_237, %c0_238] : memref<1x8x10x32xbf16, #tpu.memory_space<vmem>>, vector<1x1x10x32xbf16>
    %239 = vector.shape_cast %238 : vector<1x1x10x32xbf16> to vector<10x32xbf16>
    %240 = vector.extract_strided_slice %239 {offsets = [1, 0], sizes = [8, 32], strides = [1, 1]} : vector<10x32xbf16> to vector<8x32xbf16>
    %cst_239 = arith.constant dense<0.000000e+00> : vector<8x128xf32>
    %241 = tpu.matmul %240, %9, %cst_239 {dimension_numbers = #tpu.dot_dimension_numbers<[1], [0], [0], [1], [0, 0, 1, 1], [], []>} : vector<8x32xbf16>, vector<32x128xbf16>, vector<8x128xf32> -> vector<8x128xf32>
    %242 = arith.addf %237, %241 : vector<8x128xf32>
    %c0_240 = arith.constant 0 : index
    %c5_241 = arith.constant 5 : index
    %c0_242 = arith.constant 0 : index
    %c0_243 = arith.constant 0 : index
    %243 = vector.load %arg2[%c0_240, %c5_241, %c0_242, %c0_243] : memref<1x8x10x32xbf16, #tpu.memory_space<vmem>>, vector<1x1x10x32xbf16>
    %244 = vector.shape_cast %243 : vector<1x1x10x32xbf16> to vector<10x32xbf16>
    %245 = vector.extract_strided_slice %244 {offsets = [2, 0], sizes = [8, 32], strides = [1, 1]} : vector<10x32xbf16> to vector<8x32xbf16>
    %cst_244 = arith.constant dense<0.000000e+00> : vector<8x128xf32>
    %246 = tpu.matmul %245, %11, %cst_244 {dimension_numbers = #tpu.dot_dimension_numbers<[1], [0], [0], [1], [0, 0, 1, 1], [], []>} : vector<8x32xbf16>, vector<32x128xbf16>, vector<8x128xf32> -> vector<8x128xf32>
    %247 = arith.addf %242, %246 : vector<8x128xf32>
    %c0_245 = arith.constant 0 : index
    %c6_246 = arith.constant 6 : index
    %c0_247 = arith.constant 0 : index
    %c0_248 = arith.constant 0 : index
    %248 = vector.load %arg2[%c0_245, %c6_246, %c0_247, %c0_248] : memref<1x8x10x32xbf16, #tpu.memory_space<vmem>>, vector<1x1x10x32xbf16>
    %249 = vector.shape_cast %248 : vector<1x1x10x32xbf16> to vector<10x32xbf16>
    %250 = vector.extract_strided_slice %249 {offsets = [0, 0], sizes = [8, 32], strides = [1, 1]} : vector<10x32xbf16> to vector<8x32xbf16>
    %cst_249 = arith.constant dense<0.000000e+00> : vector<8x128xf32>
    %251 = tpu.matmul %250, %13, %cst_249 {dimension_numbers = #tpu.dot_dimension_numbers<[1], [0], [0], [1], [0, 0, 1, 1], [], []>} : vector<8x32xbf16>, vector<32x128xbf16>, vector<8x128xf32> -> vector<8x128xf32>
    %252 = arith.addf %247, %251 : vector<8x128xf32>
    %c0_250 = arith.constant 0 : index
    %c6_251 = arith.constant 6 : index
    %c0_252 = arith.constant 0 : index
    %c0_253 = arith.constant 0 : index
    %253 = vector.load %arg2[%c0_250, %c6_251, %c0_252, %c0_253] : memref<1x8x10x32xbf16, #tpu.memory_space<vmem>>, vector<1x1x10x32xbf16>
    %254 = vector.shape_cast %253 : vector<1x1x10x32xbf16> to vector<10x32xbf16>
    %255 = vector.extract_strided_slice %254 {offsets = [1, 0], sizes = [8, 32], strides = [1, 1]} : vector<10x32xbf16> to vector<8x32xbf16>
    %cst_254 = arith.constant dense<0.000000e+00> : vector<8x128xf32>
    %256 = tpu.matmul %255, %15, %cst_254 {dimension_numbers = #tpu.dot_dimension_numbers<[1], [0], [0], [1], [0, 0, 1, 1], [], []>} : vector<8x32xbf16>, vector<32x128xbf16>, vector<8x128xf32> -> vector<8x128xf32>
    %257 = arith.addf %252, %256 : vector<8x128xf32>
    %c0_255 = arith.constant 0 : index
    %c6_256 = arith.constant 6 : index
    %c0_257 = arith.constant 0 : index
    %c0_258 = arith.constant 0 : index
    %258 = vector.load %arg2[%c0_255, %c6_256, %c0_257, %c0_258] : memref<1x8x10x32xbf16, #tpu.memory_space<vmem>>, vector<1x1x10x32xbf16>
    %259 = vector.shape_cast %258 : vector<1x1x10x32xbf16> to vector<10x32xbf16>
    %260 = vector.extract_strided_slice %259 {offsets = [2, 0], sizes = [8, 32], strides = [1, 1]} : vector<10x32xbf16> to vector<8x32xbf16>
    %cst_259 = arith.constant dense<0.000000e+00> : vector<8x128xf32>
    %261 = tpu.matmul %260, %17, %cst_259 {dimension_numbers = #tpu.dot_dimension_numbers<[1], [0], [0], [1], [0, 0, 1, 1], [], []>} : vector<8x32xbf16>, vector<32x128xbf16>, vector<8x128xf32> -> vector<8x128xf32>
    %262 = arith.addf %257, %261 : vector<8x128xf32>
    %263 = vector.broadcast %18 : vector<1x128xf32> to vector<8x128xf32>
    %264 = arith.addf %262, %263 : vector<8x128xf32>
    %265 = vector.extract_strided_slice %264 {offsets = [0, 0], sizes = [8, 1], strides = [1, 1]} : vector<8x128xf32> to vector<8x1xf32>
    %c0_260 = arith.constant 0 : index
    %c4_261 = arith.constant 4 : index
    %c0_262 = arith.constant 0 : index
    %c0_263 = arith.constant 0 : index
    %266 = vector.load %arg7[%c0_260, %c4_261, %c0_262, %c0_263] : memref<1x8x8x1xf32, #tpu.memory_space<vmem>>, vector<1x1x8x1xf32>
    %267 = vector.shape_cast %266 : vector<1x1x8x1xf32> to vector<8x1xf32>
    %268 = vector.shape_cast %265 : vector<8x1xf32> to vector<1x1x8x1xf32>
    tpu.vector_store %arg7[%c0_260, %c4_261, %c0_262, %c0_263], %268 {strides = array<i32>} : memref<1x8x8x1xf32, #tpu.memory_space<vmem>>, vector<1x1x8x1xf32>,
    %c0_264 = arith.constant 0 : index
    %c5_265 = arith.constant 5 : index
    %c0_266 = arith.constant 0 : index
    %c0_267 = arith.constant 0 : index
    %269 = vector.load %arg2[%c0_264, %c5_265, %c0_266, %c0_267] : memref<1x8x10x32xbf16, #tpu.memory_space<vmem>>, vector<1x1x10x32xbf16>
    %270 = vector.shape_cast %269 : vector<1x1x10x32xbf16> to vector<10x32xbf16>
    %271 = vector.extract_strided_slice %270 {offsets = [0, 0], sizes = [8, 32], strides = [1, 1]} : vector<10x32xbf16> to vector<8x32xbf16>
    %cst_268 = arith.constant dense<0.000000e+00> : vector<8x128xf32>
    %272 = tpu.matmul %271, %1, %cst_268 {dimension_numbers = #tpu.dot_dimension_numbers<[1], [0], [0], [1], [0, 0, 1, 1], [], []>} : vector<8x32xbf16>, vector<32x128xbf16>, vector<8x128xf32> -> vector<8x128xf32>
    %c0_269 = arith.constant 0 : index
    %c5_270 = arith.constant 5 : index
    %c0_271 = arith.constant 0 : index
    %c0_272 = arith.constant 0 : index
    %273 = vector.load %arg2[%c0_269, %c5_270, %c0_271, %c0_272] : memref<1x8x10x32xbf16, #tpu.memory_space<vmem>>, vector<1x1x10x32xbf16>
    %274 = vector.shape_cast %273 : vector<1x1x10x32xbf16> to vector<10x32xbf16>
    %275 = vector.extract_strided_slice %274 {offsets = [1, 0], sizes = [8, 32], strides = [1, 1]} : vector<10x32xbf16> to vector<8x32xbf16>
    %cst_273 = arith.constant dense<0.000000e+00> : vector<8x128xf32>
    %276 = tpu.matmul %275, %3, %cst_273 {dimension_numbers = #tpu.dot_dimension_numbers<[1], [0], [0], [1], [0, 0, 1, 1], [], []>} : vector<8x32xbf16>, vector<32x128xbf16>, vector<8x128xf32> -> vector<8x128xf32>
    %277 = arith.addf %272, %276 : vector<8x128xf32>
    %c0_274 = arith.constant 0 : index
    %c5_275 = arith.constant 5 : index
    %c0_276 = arith.constant 0 : index
    %c0_277 = arith.constant 0 : index
    %278 = vector.load %arg2[%c0_274, %c5_275, %c0_276, %c0_277] : memref<1x8x10x32xbf16, #tpu.memory_space<vmem>>, vector<1x1x10x32xbf16>
    %279 = vector.shape_cast %278 : vector<1x1x10x32xbf16> to vector<10x32xbf16>
    %280 = vector.extract_strided_slice %279 {offsets = [2, 0], sizes = [8, 32], strides = [1, 1]} : vector<10x32xbf16> to vector<8x32xbf16>
    %cst_278 = arith.constant dense<0.000000e+00> : vector<8x128xf32>
    %281 = tpu.matmul %280, %5, %cst_278 {dimension_numbers = #tpu.dot_dimension_numbers<[1], [0], [0], [1], [0, 0, 1, 1], [], []>} : vector<8x32xbf16>, vector<32x128xbf16>, vector<8x128xf32> -> vector<8x128xf32>
    %282 = arith.addf %277, %281 : vector<8x128xf32>
    %c0_279 = arith.constant 0 : index
    %c6_280 = arith.constant 6 : index
    %c0_281 = arith.constant 0 : index
    %c0_282 = arith.constant 0 : index
    %283 = vector.load %arg2[%c0_279, %c6_280, %c0_281, %c0_282] : memref<1x8x10x32xbf16, #tpu.memory_space<vmem>>, vector<1x1x10x32xbf16>
    %284 = vector.shape_cast %283 : vector<1x1x10x32xbf16> to vector<10x32xbf16>
    %285 = vector.extract_strided_slice %284 {offsets = [0, 0], sizes = [8, 32], strides = [1, 1]} : vector<10x32xbf16> to vector<8x32xbf16>
    %cst_283 = arith.constant dense<0.000000e+00> : vector<8x128xf32>
    %286 = tpu.matmul %285, %7, %cst_283 {dimension_numbers = #tpu.dot_dimension_numbers<[1], [0], [0], [1], [0, 0, 1, 1], [], []>} : vector<8x32xbf16>, vector<32x128xbf16>, vector<8x128xf32> -> vector<8x128xf32>
    %287 = arith.addf %282, %286 : vector<8x128xf32>
    %c0_284 = arith.constant 0 : index
    %c6_285 = arith.constant 6 : index
    %c0_286 = arith.constant 0 : index
    %c0_287 = arith.constant 0 : index
    %288 = vector.load %arg2[%c0_284, %c6_285, %c0_286, %c0_287] : memref<1x8x10x32xbf16, #tpu.memory_space<vmem>>, vector<1x1x10x32xbf16>
    %289 = vector.shape_cast %288 : vector<1x1x10x32xbf16> to vector<10x32xbf16>
    %290 = vector.extract_strided_slice %289 {offsets = [1, 0], sizes = [8, 32], strides = [1, 1]} : vector<10x32xbf16> to vector<8x32xbf16>
    %cst_288 = arith.constant dense<0.000000e+00> : vector<8x128xf32>
    %291 = tpu.matmul %290, %9, %cst_288 {dimension_numbers = #tpu.dot_dimension_numbers<[1], [0], [0], [1], [0, 0, 1, 1], [], []>} : vector<8x32xbf16>, vector<32x128xbf16>, vector<8x128xf32> -> vector<8x128xf32>
    %292 = arith.addf %287, %291 : vector<8x128xf32>
    %c0_289 = arith.constant 0 : index
    %c6_290 = arith.constant 6 : index
    %c0_291 = arith.constant 0 : index
    %c0_292 = arith.constant 0 : index
    %293 = vector.load %arg2[%c0_289, %c6_290, %c0_291, %c0_292] : memref<1x8x10x32xbf16, #tpu.memory_space<vmem>>, vector<1x1x10x32xbf16>
    %294 = vector.shape_cast %293 : vector<1x1x10x32xbf16> to vector<10x32xbf16>
    %295 = vector.extract_strided_slice %294 {offsets = [2, 0], sizes = [8, 32], strides = [1, 1]} : vector<10x32xbf16> to vector<8x32xbf16>
    %cst_293 = arith.constant dense<0.000000e+00> : vector<8x128xf32>
    %296 = tpu.matmul %295, %11, %cst_293 {dimension_numbers = #tpu.dot_dimension_numbers<[1], [0], [0], [1], [0, 0, 1, 1], [], []>} : vector<8x32xbf16>, vector<32x128xbf16>, vector<8x128xf32> -> vector<8x128xf32>
    %297 = arith.addf %292, %296 : vector<8x128xf32>
    %c0_294 = arith.constant 0 : index
    %c7_295 = arith.constant 7 : index
    %c0_296 = arith.constant 0 : index
    %c0_297 = arith.constant 0 : index
    %298 = vector.load %arg2[%c0_294, %c7_295, %c0_296, %c0_297] : memref<1x8x10x32xbf16, #tpu.memory_space<vmem>>, vector<1x1x10x32xbf16>
    %299 = vector.shape_cast %298 : vector<1x1x10x32xbf16> to vector<10x32xbf16>
    %300 = vector.extract_strided_slice %299 {offsets = [0, 0], sizes = [8, 32], strides = [1, 1]} : vector<10x32xbf16> to vector<8x32xbf16>
    %cst_298 = arith.constant dense<0.000000e+00> : vector<8x128xf32>
    %301 = tpu.matmul %300, %13, %cst_298 {dimension_numbers = #tpu.dot_dimension_numbers<[1], [0], [0], [1], [0, 0, 1, 1], [], []>} : vector<8x32xbf16>, vector<32x128xbf16>, vector<8x128xf32> -> vector<8x128xf32>
    %302 = arith.addf %297, %301 : vector<8x128xf32>
    %c0_299 = arith.constant 0 : index
    %c7_300 = arith.constant 7 : index
    %c0_301 = arith.constant 0 : index
    %c0_302 = arith.constant 0 : index
    %303 = vector.load %arg2[%c0_299, %c7_300, %c0_301, %c0_302] : memref<1x8x10x32xbf16, #tpu.memory_space<vmem>>, vector<1x1x10x32xbf16>
    %304 = vector.shape_cast %303 : vector<1x1x10x32xbf16> to vector<10x32xbf16>
    %305 = vector.extract_strided_slice %304 {offsets = [1, 0], sizes = [8, 32], strides = [1, 1]} : vector<10x32xbf16> to vector<8x32xbf16>
    %cst_303 = arith.constant dense<0.000000e+00> : vector<8x128xf32>
    %306 = tpu.matmul %305, %15, %cst_303 {dimension_numbers = #tpu.dot_dimension_numbers<[1], [0], [0], [1], [0, 0, 1, 1], [], []>} : vector<8x32xbf16>, vector<32x128xbf16>, vector<8x128xf32> -> vector<8x128xf32>
    %307 = arith.addf %302, %306 : vector<8x128xf32>
    %c0_304 = arith.constant 0 : index
    %c7_305 = arith.constant 7 : index
    %c0_306 = arith.constant 0 : index
    %c0_307 = arith.constant 0 : index
    %308 = vector.load %arg2[%c0_304, %c7_305, %c0_306, %c0_307] : memref<1x8x10x32xbf16, #tpu.memory_space<vmem>>, vector<1x1x10x32xbf16>
    %309 = vector.shape_cast %308 : vector<1x1x10x32xbf16> to vector<10x32xbf16>
    %310 = vector.extract_strided_slice %309 {offsets = [2, 0], sizes = [8, 32], strides = [1, 1]} : vector<10x32xbf16> to vector<8x32xbf16>
    %cst_308 = arith.constant dense<0.000000e+00> : vector<8x128xf32>
    %311 = tpu.matmul %310, %17, %cst_308 {dimension_numbers = #tpu.dot_dimension_numbers<[1], [0], [0], [1], [0, 0, 1, 1], [], []>} : vector<8x32xbf16>, vector<32x128xbf16>, vector<8x128xf32> -> vector<8x128xf32>
    %312 = arith.addf %307, %311 : vector<8x128xf32>
    %313 = vector.broadcast %18 : vector<1x128xf32> to vector<8x128xf32>
    %314 = arith.addf %312, %313 : vector<8x128xf32>
    %315 = vector.extract_strided_slice %314 {offsets = [0, 0], sizes = [8, 1], strides = [1, 1]} : vector<8x128xf32> to vector<8x1xf32>
    %c0_309 = arith.constant 0 : index
    %c5_310 = arith.constant 5 : index
    %c0_311 = arith.constant 0 : index
    %c0_312 = arith.constant 0 : index
    %316 = vector.load %arg7[%c0_309, %c5_310, %c0_311, %c0_312] : memref<1x8x8x1xf32, #tpu.memory_space<vmem>>, vector<1x1x8x1xf32>
    %317 = vector.shape_cast %316 : vector<1x1x8x1xf32> to vector<8x1xf32>
    %318 = vector.shape_cast %315 : vector<8x1xf32> to vector<1x1x8x1xf32>
    tpu.vector_store %arg7[%c0_309, %c5_310, %c0_311, %c0_312], %318 {strides = array<i32>} : memref<1x8x8x1xf32, #tpu.memory_space<vmem>>, vector<1x1x8x1xf32>,
    %c0_313 = arith.constant 0 : index
    %c6_314 = arith.constant 6 : index
    %c0_315 = arith.constant 0 : index
    %c0_316 = arith.constant 0 : index
    %319 = vector.load %arg2[%c0_313, %c6_314, %c0_315, %c0_316] : memref<1x8x10x32xbf16, #tpu.memory_space<vmem>>, vector<1x1x10x32xbf16>
    %320 = vector.shape_cast %319 : vector<1x1x10x32xbf16> to vector<10x32xbf16>
    %321 = vector.extract_strided_slice %320 {offsets = [0, 0], sizes = [8, 32], strides = [1, 1]} : vector<10x32xbf16> to vector<8x32xbf16>
    %cst_317 = arith.constant dense<0.000000e+00> : vector<8x128xf32>
    %322 = tpu.matmul %321, %1, %cst_317 {dimension_numbers = #tpu.dot_dimension_numbers<[1], [0], [0], [1], [0, 0, 1, 1], [], []>} : vector<8x32xbf16>, vector<32x128xbf16>, vector<8x128xf32> -> vector<8x128xf32>
    %c0_318 = arith.constant 0 : index
    %c6_319 = arith.constant 6 : index
    %c0_320 = arith.constant 0 : index
    %c0_321 = arith.constant 0 : index
    %323 = vector.load %arg2[%c0_318, %c6_319, %c0_320, %c0_321] : memref<1x8x10x32xbf16, #tpu.memory_space<vmem>>, vector<1x1x10x32xbf16>
    %324 = vector.shape_cast %323 : vector<1x1x10x32xbf16> to vector<10x32xbf16>
    %325 = vector.extract_strided_slice %324 {offsets = [1, 0], sizes = [8, 32], strides = [1, 1]} : vector<10x32xbf16> to vector<8x32xbf16>
    %cst_322 = arith.constant dense<0.000000e+00> : vector<8x128xf32>
    %326 = tpu.matmul %325, %3, %cst_322 {dimension_numbers = #tpu.dot_dimension_numbers<[1], [0], [0], [1], [0, 0, 1, 1], [], []>} : vector<8x32xbf16>, vector<32x128xbf16>, vector<8x128xf32> -> vector<8x128xf32>
    %327 = arith.addf %322, %326 : vector<8x128xf32>
    %c0_323 = arith.constant 0 : index
    %c6_324 = arith.constant 6 : index
    %c0_325 = arith.constant 0 : index
    %c0_326 = arith.constant 0 : index
    %328 = vector.load %arg2[%c0_323, %c6_324, %c0_325, %c0_326] : memref<1x8x10x32xbf16, #tpu.memory_space<vmem>>, vector<1x1x10x32xbf16>
    %329 = vector.shape_cast %328 : vector<1x1x10x32xbf16> to vector<10x32xbf16>
    %330 = vector.extract_strided_slice %329 {offsets = [2, 0], sizes = [8, 32], strides = [1, 1]} : vector<10x32xbf16> to vector<8x32xbf16>
    %cst_327 = arith.constant dense<0.000000e+00> : vector<8x128xf32>
    %331 = tpu.matmul %330, %5, %cst_327 {dimension_numbers = #tpu.dot_dimension_numbers<[1], [0], [0], [1], [0, 0, 1, 1], [], []>} : vector<8x32xbf16>, vector<32x128xbf16>, vector<8x128xf32> -> vector<8x128xf32>
    %332 = arith.addf %327, %331 : vector<8x128xf32>
    %c0_328 = arith.constant 0 : index
    %c7_329 = arith.constant 7 : index
    %c0_330 = arith.constant 0 : index
    %c0_331 = arith.constant 0 : index
    %333 = vector.load %arg2[%c0_328, %c7_329, %c0_330, %c0_331] : memref<1x8x10x32xbf16, #tpu.memory_space<vmem>>, vector<1x1x10x32xbf16>
    %334 = vector.shape_cast %333 : vector<1x1x10x32xbf16> to vector<10x32xbf16>
    %335 = vector.extract_strided_slice %334 {offsets = [0, 0], sizes = [8, 32], strides = [1, 1]} : vector<10x32xbf16> to vector<8x32xbf16>
    %cst_332 = arith.constant dense<0.000000e+00> : vector<8x128xf32>
    %336 = tpu.matmul %335, %7, %cst_332 {dimension_numbers = #tpu.dot_dimension_numbers<[1], [0], [0], [1], [0, 0, 1, 1], [], []>} : vector<8x32xbf16>, vector<32x128xbf16>, vector<8x128xf32> -> vector<8x128xf32>
    %337 = arith.addf %332, %336 : vector<8x128xf32>
    %c0_333 = arith.constant 0 : index
    %c7_334 = arith.constant 7 : index
    %c0_335 = arith.constant 0 : index
    %c0_336 = arith.constant 0 : index
    %338 = vector.load %arg2[%c0_333, %c7_334, %c0_335, %c0_336] : memref<1x8x10x32xbf16, #tpu.memory_space<vmem>>, vector<1x1x10x32xbf16>
    %339 = vector.shape_cast %338 : vector<1x1x10x32xbf16> to vector<10x32xbf16>
    %340 = vector.extract_strided_slice %339 {offsets = [1, 0], sizes = [8, 32], strides = [1, 1]} : vector<10x32xbf16> to vector<8x32xbf16>
    %cst_337 = arith.constant dense<0.000000e+00> : vector<8x128xf32>
    %341 = tpu.matmul %340, %9, %cst_337 {dimension_numbers = #tpu.dot_dimension_numbers<[1], [0], [0], [1], [0, 0, 1, 1], [], []>} : vector<8x32xbf16>, vector<32x128xbf16>, vector<8x128xf32> -> vector<8x128xf32>
    %342 = arith.addf %337, %341 : vector<8x128xf32>
    %c0_338 = arith.constant 0 : index
    %c7_339 = arith.constant 7 : index
    %c0_340 = arith.constant 0 : index
    %c0_341 = arith.constant 0 : index
    %343 = vector.load %arg2[%c0_338, %c7_339, %c0_340, %c0_341] : memref<1x8x10x32xbf16, #tpu.memory_space<vmem>>, vector<1x1x10x32xbf16>
    %344 = vector.shape_cast %343 : vector<1x1x10x32xbf16> to vector<10x32xbf16>
    %345 = vector.extract_strided_slice %344 {offsets = [2, 0], sizes = [8, 32], strides = [1, 1]} : vector<10x32xbf16> to vector<8x32xbf16>
    %cst_342 = arith.constant dense<0.000000e+00> : vector<8x128xf32>
    %346 = tpu.matmul %345, %11, %cst_342 {dimension_numbers = #tpu.dot_dimension_numbers<[1], [0], [0], [1], [0, 0, 1, 1], [], []>} : vector<8x32xbf16>, vector<32x128xbf16>, vector<8x128xf32> -> vector<8x128xf32>
    %347 = arith.addf %342, %346 : vector<8x128xf32>
    %c0_343 = arith.constant 0 : index
    %c0_344 = arith.constant 0 : index
    %c0_345 = arith.constant 0 : index
    %c0_346 = arith.constant 0 : index
    %c0_347 = arith.constant 0 : index
    %348 = vector.load %arg3[%c0_343, %c0_344, %c0_345, %c0_346, %c0_347] : memref<1x1x2x10x32xbf16, #tpu.memory_space<vmem>>, vector<1x1x1x10x32xbf16>
    %349 = vector.shape_cast %348 : vector<1x1x1x10x32xbf16> to vector<10x32xbf16>
    %350 = vector.extract_strided_slice %349 {offsets = [0, 0], sizes = [8, 32], strides = [1, 1]} : vector<10x32xbf16> to vector<8x32xbf16>
    %cst_348 = arith.constant dense<0.000000e+00> : vector<8x128xf32>
    %351 = tpu.matmul %350, %13, %cst_348 {dimension_numbers = #tpu.dot_dimension_numbers<[1], [0], [0], [1], [0, 0, 1, 1], [], []>} : vector<8x32xbf16>, vector<32x128xbf16>, vector<8x128xf32> -> vector<8x128xf32>
    %352 = arith.addf %347, %351 : vector<8x128xf32>
    %c0_349 = arith.constant 0 : index
    %c0_350 = arith.constant 0 : index
    %c0_351 = arith.constant 0 : index
    %c0_352 = arith.constant 0 : index
    %c0_353 = arith.constant 0 : index
    %353 = vector.load %arg3[%c0_349, %c0_350, %c0_351, %c0_352, %c0_353] : memref<1x1x2x10x32xbf16, #tpu.memory_space<vmem>>, vector<1x1x1x10x32xbf16>
    %354 = vector.shape_cast %353 : vector<1x1x1x10x32xbf16> to vector<10x32xbf16>
    %355 = vector.extract_strided_slice %354 {offsets = [1, 0], sizes = [8, 32], strides = [1, 1]} : vector<10x32xbf16> to vector<8x32xbf16>
    %cst_354 = arith.constant dense<0.000000e+00> : vector<8x128xf32>
    %356 = tpu.matmul %355, %15, %cst_354 {dimension_numbers = #tpu.dot_dimension_numbers<[1], [0], [0], [1], [0, 0, 1, 1], [], []>} : vector<8x32xbf16>, vector<32x128xbf16>, vector<8x128xf32> -> vector<8x128xf32>
    %357 = arith.addf %352, %356 : vector<8x128xf32>
    %c0_355 = arith.constant 0 : index
    %c0_356 = arith.constant 0 : index
    %c0_357 = arith.constant 0 : index
    %c0_358 = arith.constant 0 : index
    %c0_359 = arith.constant 0 : index
    %358 = vector.load %arg3[%c0_355, %c0_356, %c0_357, %c0_358, %c0_359] : memref<1x1x2x10x32xbf16, #tpu.memory_space<vmem>>, vector<1x1x1x10x32xbf16>
    %359 = vector.shape_cast %358 : vector<1x1x1x10x32xbf16> to vector<10x32xbf16>
    %360 = vector.extract_strided_slice %359 {offsets = [2, 0], sizes = [8, 32], strides = [1, 1]} : vector<10x32xbf16> to vector<8x32xbf16>
    %cst_360 = arith.constant dense<0.000000e+00> : vector<8x128xf32>
    %361 = tpu.matmul %360, %17, %cst_360 {dimension_numbers = #tpu.dot_dimension_numbers<[1], [0], [0], [1], [0, 0, 1, 1], [], []>} : vector<8x32xbf16>, vector<32x128xbf16>, vector<8x128xf32> -> vector<8x128xf32>
    %362 = arith.addf %357, %361 : vector<8x128xf32>
    %363 = vector.broadcast %18 : vector<1x128xf32> to vector<8x128xf32>
    %364 = arith.addf %362, %363 : vector<8x128xf32>
    %365 = vector.extract_strided_slice %364 {offsets = [0, 0], sizes = [8, 1], strides = [1, 1]} : vector<8x128xf32> to vector<8x1xf32>
    %c0_361 = arith.constant 0 : index
    %c6_362 = arith.constant 6 : index
    %c0_363 = arith.constant 0 : index
    %c0_364 = arith.constant 0 : index
    %366 = vector.load %arg7[%c0_361, %c6_362, %c0_363, %c0_364] : memref<1x8x8x1xf32, #tpu.memory_space<vmem>>, vector<1x1x8x1xf32>
    %367 = vector.shape_cast %366 : vector<1x1x8x1xf32> to vector<8x1xf32>
    %368 = vector.shape_cast %365 : vector<8x1xf32> to vector<1x1x8x1xf32>
    tpu.vector_store %arg7[%c0_361, %c6_362, %c0_363, %c0_364], %368 {strides = array<i32>} : memref<1x8x8x1xf32, #tpu.memory_space<vmem>>, vector<1x1x8x1xf32>,
    %c0_365 = arith.constant 0 : index
    %c7_366 = arith.constant 7 : index
    %c0_367 = arith.constant 0 : index
    %c0_368 = arith.constant 0 : index
    %369 = vector.load %arg2[%c0_365, %c7_366, %c0_367, %c0_368] : memref<1x8x10x32xbf16, #tpu.memory_space<vmem>>, vector<1x1x10x32xbf16>
    %370 = vector.shape_cast %369 : vector<1x1x10x32xbf16> to vector<10x32xbf16>
    %371 = vector.extract_strided_slice %370 {offsets = [0, 0], sizes = [8, 32], strides = [1, 1]} : vector<10x32xbf16> to vector<8x32xbf16>
    %cst_369 = arith.constant dense<0.000000e+00> : vector<8x128xf32>
    %372 = tpu.matmul %371, %1, %cst_369 {dimension_numbers = #tpu.dot_dimension_numbers<[1], [0], [0], [1], [0, 0, 1, 1], [], []>} : vector<8x32xbf16>, vector<32x128xbf16>, vector<8x128xf32> -> vector<8x128xf32>
    %c0_370 = arith.constant 0 : index
    %c7_371 = arith.constant 7 : index
    %c0_372 = arith.constant 0 : index
    %c0_373 = arith.constant 0 : index
    %373 = vector.load %arg2[%c0_370, %c7_371, %c0_372, %c0_373] : memref<1x8x10x32xbf16, #tpu.memory_space<vmem>>, vector<1x1x10x32xbf16>
    %374 = vector.shape_cast %373 : vector<1x1x10x32xbf16> to vector<10x32xbf16>
    %375 = vector.extract_strided_slice %374 {offsets = [1, 0], sizes = [8, 32], strides = [1, 1]} : vector<10x32xbf16> to vector<8x32xbf16>
    %cst_374 = arith.constant dense<0.000000e+00> : vector<8x128xf32>
    %376 = tpu.matmul %375, %3, %cst_374 {dimension_numbers = #tpu.dot_dimension_numbers<[1], [0], [0], [1], [0, 0, 1, 1], [], []>} : vector<8x32xbf16>, vector<32x128xbf16>, vector<8x128xf32> -> vector<8x128xf32>
    %377 = arith.addf %372, %376 : vector<8x128xf32>
    %c0_375 = arith.constant 0 : index
    %c7_376 = arith.constant 7 : index
    %c0_377 = arith.constant 0 : index
    %c0_378 = arith.constant 0 : index
    %378 = vector.load %arg2[%c0_375, %c7_376, %c0_377, %c0_378] : memref<1x8x10x32xbf16, #tpu.memory_space<vmem>>, vector<1x1x10x32xbf16>
    %379 = vector.shape_cast %378 : vector<1x1x10x32xbf16> to vector<10x32xbf16>
    %380 = vector.extract_strided_slice %379 {offsets = [2, 0], sizes = [8, 32], strides = [1, 1]} : vector<10x32xbf16> to vector<8x32xbf16>
    %cst_379 = arith.constant dense<0.000000e+00> : vector<8x128xf32>
    %381 = tpu.matmul %380, %5, %cst_379 {dimension_numbers = #tpu.dot_dimension_numbers<[1], [0], [0], [1], [0, 0, 1, 1], [], []>} : vector<8x32xbf16>, vector<32x128xbf16>, vector<8x128xf32> -> vector<8x128xf32>
    %382 = arith.addf %377, %381 : vector<8x128xf32>
    %c0_380 = arith.constant 0 : index
    %c0_381 = arith.constant 0 : index
    %c0_382 = arith.constant 0 : index
    %c0_383 = arith.constant 0 : index
    %c0_384 = arith.constant 0 : index
    %383 = vector.load %arg3[%c0_380, %c0_381, %c0_382, %c0_383, %c0_384] : memref<1x1x2x10x32xbf16, #tpu.memory_space<vmem>>, vector<1x1x1x10x32xbf16>
    %384 = vector.shape_cast %383 : vector<1x1x1x10x32xbf16> to vector<10x32xbf16>
    %385 = vector.extract_strided_slice %384 {offsets = [0, 0], sizes = [8, 32], strides = [1, 1]} : vector<10x32xbf16> to vector<8x32xbf16>
    %cst_385 = arith.constant dense<0.000000e+00> : vector<8x128xf32>
    %386 = tpu.matmul %385, %7, %cst_385 {dimension_numbers = #tpu.dot_dimension_numbers<[1], [0], [0], [1], [0, 0, 1, 1], [], []>} : vector<8x32xbf16>, vector<32x128xbf16>, vector<8x128xf32> -> vector<8x128xf32>
    %387 = arith.addf %382, %386 : vector<8x128xf32>
    %c0_386 = arith.constant 0 : index
    %c0_387 = arith.constant 0 : index
    %c0_388 = arith.constant 0 : index
    %c0_389 = arith.constant 0 : index
    %c0_390 = arith.constant 0 : index
    %388 = vector.load %arg3[%c0_386, %c0_387, %c0_388, %c0_389, %c0_390] : memref<1x1x2x10x32xbf16, #tpu.memory_space<vmem>>, vector<1x1x1x10x32xbf16>
    %389 = vector.shape_cast %388 : vector<1x1x1x10x32xbf16> to vector<10x32xbf16>
    %390 = vector.extract_strided_slice %389 {offsets = [1, 0], sizes = [8, 32], strides = [1, 1]} : vector<10x32xbf16> to vector<8x32xbf16>
    %cst_391 = arith.constant dense<0.000000e+00> : vector<8x128xf32>
    %391 = tpu.matmul %390, %9, %cst_391 {dimension_numbers = #tpu.dot_dimension_numbers<[1], [0], [0], [1], [0, 0, 1, 1], [], []>} : vector<8x32xbf16>, vector<32x128xbf16>, vector<8x128xf32> -> vector<8x128xf32>
    %392 = arith.addf %387, %391 : vector<8x128xf32>
    %c0_392 = arith.constant 0 : index
    %c0_393 = arith.constant 0 : index
    %c0_394 = arith.constant 0 : index
    %c0_395 = arith.constant 0 : index
    %c0_396 = arith.constant 0 : index
    %393 = vector.load %arg3[%c0_392, %c0_393, %c0_394, %c0_395, %c0_396] : memref<1x1x2x10x32xbf16, #tpu.memory_space<vmem>>, vector<1x1x1x10x32xbf16>
    %394 = vector.shape_cast %393 : vector<1x1x1x10x32xbf16> to vector<10x32xbf16>
    %395 = vector.extract_strided_slice %394 {offsets = [2, 0], sizes = [8, 32], strides = [1, 1]} : vector<10x32xbf16> to vector<8x32xbf16>
    %cst_397 = arith.constant dense<0.000000e+00> : vector<8x128xf32>
    %396 = tpu.matmul %395, %11, %cst_397 {dimension_numbers = #tpu.dot_dimension_numbers<[1], [0], [0], [1], [0, 0, 1, 1], [], []>} : vector<8x32xbf16>, vector<32x128xbf16>, vector<8x128xf32> -> vector<8x128xf32>
    %397 = arith.addf %392, %396 : vector<8x128xf32>
    %c0_398 = arith.constant 0 : index
    %c0_399 = arith.constant 0 : index
    %c1_400 = arith.constant 1 : index
    %c0_401 = arith.constant 0 : index
    %c0_402 = arith.constant 0 : index
    %398 = vector.load %arg3[%c0_398, %c0_399, %c1_400, %c0_401, %c0_402] : memref<1x1x2x10x32xbf16, #tpu.memory_space<vmem>>, vector<1x1x1x10x32xbf16>
    %399 = vector.shape_cast %398 : vector<1x1x1x10x32xbf16> to vector<10x32xbf16>
    %400 = vector.extract_strided_slice %399 {offsets = [0, 0], sizes = [8, 32], strides = [1, 1]} : vector<10x32xbf16> to vector<8x32xbf16>
    %cst_403 = arith.constant dense<0.000000e+00> : vector<8x128xf32>
    %401 = tpu.matmul %400, %13, %cst_403 {dimension_numbers = #tpu.dot_dimension_numbers<[1], [0], [0], [1], [0, 0, 1, 1], [], []>} : vector<8x32xbf16>, vector<32x128xbf16>, vector<8x128xf32> -> vector<8x128xf32>
    %402 = arith.addf %397, %401 : vector<8x128xf32>
    %c0_404 = arith.constant 0 : index
    %c0_405 = arith.constant 0 : index
    %c1_406 = arith.constant 1 : index
    %c0_407 = arith.constant 0 : index
    %c0_408 = arith.constant 0 : index
    %403 = vector.load %arg3[%c0_404, %c0_405, %c1_406, %c0_407, %c0_408] : memref<1x1x2x10x32xbf16, #tpu.memory_space<vmem>>, vector<1x1x1x10x32xbf16>
    %404 = vector.shape_cast %403 : vector<1x1x1x10x32xbf16> to vector<10x32xbf16>
    %405 = vector.extract_strided_slice %404 {offsets = [1, 0], sizes = [8, 32], strides = [1, 1]} : vector<10x32xbf16> to vector<8x32xbf16>
    %cst_409 = arith.constant dense<0.000000e+00> : vector<8x128xf32>
    %406 = tpu.matmul %405, %15, %cst_409 {dimension_numbers = #tpu.dot_dimension_numbers<[1], [0], [0], [1], [0, 0, 1, 1], [], []>} : vector<8x32xbf16>, vector<32x128xbf16>, vector<8x128xf32> -> vector<8x128xf32>
    %407 = arith.addf %402, %406 : vector<8x128xf32>
    %c0_410 = arith.constant 0 : index
    %c0_411 = arith.constant 0 : index
    %c1_412 = arith.constant 1 : index
    %c0_413 = arith.constant 0 : index
    %c0_414 = arith.constant 0 : index
    %408 = vector.load %arg3[%c0_410, %c0_411, %c1_412, %c0_413, %c0_414] : memref<1x1x2x10x32xbf16, #tpu.memory_space<vmem>>, vector<1x1x1x10x32xbf16>
    %409 = vector.shape_cast %408 : vector<1x1x1x10x32xbf16> to vector<10x32xbf16>
    %410 = vector.extract_strided_slice %409 {offsets = [2, 0], sizes = [8, 32], strides = [1, 1]} : vector<10x32xbf16> to vector<8x32xbf16>
    %cst_415 = arith.constant dense<0.000000e+00> : vector<8x128xf32>
    %411 = tpu.matmul %410, %17, %cst_415 {dimension_numbers = #tpu.dot_dimension_numbers<[1], [0], [0], [1], [0, 0, 1, 1], [], []>} : vector<8x32xbf16>, vector<32x128xbf16>, vector<8x128xf32> -> vector<8x128xf32>
    %412 = arith.addf %407, %411 : vector<8x128xf32>
    %413 = vector.broadcast %18 : vector<1x128xf32> to vector<8x128xf32>
    %414 = arith.addf %412, %413 : vector<8x128xf32>
    %415 = vector.extract_strided_slice %414 {offsets = [0, 0], sizes = [8, 1], strides = [1, 1]} : vector<8x128xf32> to vector<8x1xf32>
    %c0_416 = arith.constant 0 : index
    %c7_417 = arith.constant 7 : index
    %c0_418 = arith.constant 0 : index
    %c0_419 = arith.constant 0 : index
    %416 = vector.load %arg7[%c0_416, %c7_417, %c0_418, %c0_419] : memref<1x8x8x1xf32, #tpu.memory_space<vmem>>, vector<1x1x8x1xf32>
    %417 = vector.shape_cast %416 : vector<1x1x8x1xf32> to vector<8x1xf32>
    %418 = vector.shape_cast %415 : vector<8x1xf32> to vector<1x1x8x1xf32>
    tpu.vector_store %arg7[%c0_416, %c7_417, %c0_418, %c0_419], %418 {strides = array<i32>} : memref<1x8x8x1xf32, #tpu.memory_space<vmem>>, vector<1x1x8x1xf32>,
    return
  }
  func.func @transform_0(%arg0: i32, %arg1: i32) -> (i32, i32, i32, i32) {
    %c0_i32 = arith.constant 0 : i32
    %c0_i32_0 = arith.constant 0 : i32
    %c0_i32_1 = arith.constant 0 : i32
    return %arg0, %arg1, %c0_i32, %c0_i32_0 : i32, i32, i32, i32
  }
  func.func @transform_1(%arg0: i32, %arg1: i32) -> (i32, i32, i32, i32, i32) {
    %c0_i32 = arith.constant 0 : i32
    %c0_i32_0 = arith.constant 0 : i32
    %c0_i32_1 = arith.constant 0 : i32
    %c0_i32_2 = arith.constant 0 : i32
    return %arg0, %arg1, %c0_i32, %c0_i32_0, %c0_i32_1 : i32, i32, i32, i32, i32
  }
  func.func @transform_2(%arg0: i32, %arg1: i32) -> (i32, i32, i32) {
    %c0_i32 = arith.constant 0 : i32
    %c0_i32_0 = arith.constant 0 : i32
    %c0_i32_1 = arith.constant 0 : i32
    %c0_i32_2 = arith.constant 0 : i32
    return %c0_i32, %c0_i32_0, %c0_i32_1 : i32, i32, i32
  }
  func.func @transform_3(%arg0: i32, %arg1: i32) -> (i32, i32) {
    %c0_i32 = arith.constant 0 : i32
    %c0_i32_0 = arith.constant 0 : i32
    %c0_i32_1 = arith.constant 0 : i32
    return %c0_i32, %c0_i32_0 : i32, i32
  }
  func.func @transform_4(%arg0: i32, %arg1: i32) -> (i32, i32) {
    %c0_i32 = arith.constant 0 : i32
    %c0_i32_0 = arith.constant 0 : i32
    %c0_i32_1 = arith.constant 0 : i32
    return %c0_i32, %c0_i32_0 : i32, i32
  }
  func.func @transform_5(%arg0: i32, %arg1: i32) -> (i32, i32, i32, i32) {
    %c0_i32 = arith.constant 0 : i32
    %c0_i32_0 = arith.constant 0 : i32
    %c0_i32_1 = arith.constant 0 : i32
    return %arg0, %arg1, %c0_i32, %c0_i32_0 : i32, i32, i32, i32
  }
}

</mosaic_0001>

<bundles_post_ra>
// kernel: segformer_forward.10
= control target key start
LH: loop header
LB: loop body
LE: loop exit
PB: predicated region body
PF: predicated region fallthrough
CT: control target
= control target key end

     0   :  { %s5569_s18 = smov 0   ;;  %s5571_s19 = smov 0   ;;  %s6214_s0 = inlined_call_operand.vmem [shape: bf16[2,17,17,12], index: 0, kind: input, shape index: {}]   ;;  %s6215_s1 = inlined_call_operand.vmem [shape: bf16[2,1,1,17,12], index: 1, kind: input, shape index: {}]   ;;  %s6216_s2 = inlined_call_operand.vmem [shape: bf16[4,12,8], index: 2, kind: input, shape index: {}]   ;;  %s6217_s3 = inlined_call_operand.vmem [shape: f32[1,8], index: 3, kind: input, shape index: {}]   ;;  %s6218_s4 = inlined_call_operand.vmem [shape: f32[1,8], index: 4, kind: input, shape index: {}]   ;;  %s6219_s5 = inlined_call_operand.vmem [shape: bf16[2,16,16,8], index: 5, kind: output, shape index: {}]  }
   0x1   :  { %s5573_s20 = smov 0  }
   0x2 LB: > { %s27_s21 = sadd.s32 1, %s5531_s19  ;;  %p4381_p0 = scmp.ge.s32.totalorder %s5535_s20, 1  ;;  %s5535_s20 = sphi %s5573_s20, %s15_s20   ;;  %s5531_s19 = sphi %s5571_s19, %s6221_s19   ;;  %s5527_s18 = sphi %s5569_s18, %s6220_s18  }
   0x3   : > { %p29_p1 = scmp.ge.s32.totalorder %s27_s21, 2  ;;  %p235_p2 = scmp.lt.s32.totalorder %s5535_s20, 3 }
   0x5   : > { %s6223_s21 = smov (%p29_p1, %s27_s21), 0  ;;  %p236_p3 = pnand %p4381_p0, %p235_p2 }
   0x6   : > { %vm375_vm0 = vcmask (!%p236_p3), 1045504   ;;  %v5537_v0 = vmov (!%p236_p3), 0.0   ;;  %v5445_v1 = vld [vmem:[%s6216_s2 + $0x8] sm:$0x3f] (!%p236_p3)   ;;  %p293_p4 = scmp.lt.s32.totalorder (!%p236_p3), %s5527_s18, 1  ;;  %vm5538_vm1 = vmmov (!%p236_p3), 0  }
   0x7   : > { %239 = sbr.rel (%p236_p3) target bundleno = 594 (0x252), region = 40  ;;  %4841 = vmatprep.subr.bf16.mxu0 (!%p236_p3), %v5537_v0  ;;  %4865 = vmatprep.subr.bf16.mxu1 (!%p236_p3), %v5537_v0  ;;  %v5597_v2 = vsel (!%p236_p3), %vm375_vm0, %v5445_v1, 0  ;;  %vm353_vm2 = vsmask.f32 (!%p236_p3), 7424  ;;  %v5448_v5 = vld [vmem:[%s6216_s2] sm:$0x3f] (!%p236_p3)  }
   0x8   : > { %4843 = vmatprep.mubr.msk.bf16.mxu0 (!%p236_p3), %vm5538_vm1, %v5537_v0  ;;  %4867 = vmatprep.mubr.msk.bf16.mxu1 (!%p236_p3), %vm5538_vm1, %v5537_v0  ;;  %vm371_vm3 = vcmask (!%p236_p3), 97280   ;;  %v5619_v19 = vsel (!%p236_p3), %vm375_vm0, %v5448_v5, 0  ;;  %v5451_v23 = vld [vmem:[%s6216_s2 + $0x10] sm:$0x3f] (!%p236_p3)   ;;  %v5453_v25 = vld [vmem:[%s6216_s2 + $0x18] sm:$0x3f] (!%p236_p3)  }
   0x9   : > { %4842 = vmatpush3.bf16.msra.mxu0 (!%p236_p3), %v5597_v2  ;;  %4866 = vmatpush3.bf16.msra.mxu1 (!%p236_p3), %v5597_v2  ;;  %v5637_v24 = vsel (!%p236_p3), %vm375_vm0, %v5451_v23, 0  ;;  %v5657_v30 = vsel (!%p236_p3), %vm375_vm0, %v5453_v25, 0  ;;  %vm628_vm4 = vcmask (!%p236_p3), 60416  }
   0xa   : > { %4847 = vmatprep.subr.bf16.mxu0 (!%p236_p3), %v5537_v0  ;;  %4871 = vmatprep.subr.bf16.mxu1 (!%p236_p3), %v5537_v0 }
   0xe   : > { %s6225_s18 = smov (!%p293_p4, %s5527_s18), 1 }
   0xf   : > { %s5417_s24 = smul.u32 204, %s6225_s18  ;;  %s4680_s17 = sshll.u32 %s6225_s18, 7 }
  0x10   : > { %s5418_s9 = smul.u32 12, %s6225_s18  ;;  %s5969_s23 = scalar_lea.vmem %s6219_s5, %s4680_s17 }
  0x11   : > { %s5609_s27 = scalar_lea.vmem %s6214_s0, %s5417_s24 }
  0x12   : > { %v5446_v3 = vld [vmem:[%s5609_s27] sm:$0xff]   ;;  %v5447_v4 = vld [vmem:[%s5609_s27 + $0x8] ss:$0 sps:$4 sm:$0x11]   ;;  %v5449_v6 = vld [vmem:[%s5609_s27 + $0xc] sm:$0xff]   ;;  %s5879_s12 = scalar_lea.vmem %s6215_s1, %s5418_s9 }
  0x13   : > { %v355_v7 = vshrl.u32 %v5446_v3, 16  ;;  %v357_v8 = vshll.u32 %v5446_v3, 16  ;;  %v362_v9 = vshll.u32 %v5447_v4, 16  ;;  %v5450_v10 = vld [vmem:[%s5609_s27 + $0x14] ss:$0 sps:$4 sm:$0x11]  }
  0x14   : > { %v643_v11 = vshrl.u32 %v5449_v6, 16  ;;  %v645_v12 = vshll.u32 %v5449_v6, 16  ;;  %v650_v15 = vshll.u32 %v5450_v10, 16  ;;  %v5455_v26 = vld [vmem:[%s5609_s27 + $0x14] ss:$0 sps:$4 sm:$0x11]  }
  0x15   : > { %v359_v13 = vrot.slane %v357_v8, 1  ;;  %v364_v14 = vrot.slane %v362_v9, 1  ;;  %v5456_v27 = vld [vmem:[%s5609_s27 + $0x20] ss:$0 sps:$4 sm:$0x11]   ;;  %v5452_v28 = vld [vmem:[%s5609_s27 + $0xc] sm:$0xff]  }
  0x16   : > { %v647_v16 = vrot.slane %v645_v12, 1  ;;  %v652_v18 = vrot.slane %v650_v15, 1  ;;  %v5454_v29 = vld [vmem:[%s5609_s27 + $0x18] sm:$0xff]   ;;  %v539_v31 = vshll.u32 %v5452_v28, 16  ;;  %v544_v32 = vshll.u32 %v5455_v26, 16  ;;  %v5459_v36 = vld [vmem:[%s5609_s27 + $0x24] sm:$0xff]  }
  0x17   : > { %v360_v17 = vor.u32 %v359_v13, %v355_v7  ;;  %v801_v33 = vshll.u32 %v5454_v29, 16  ;;  %v806_v34 = vshll.u32 %v5456_v27, 16  ;;  %v5457_v35 = vld [vmem:[%s5609_s27 + $0x18] sm:$0xff]   ;;  %v537_v37 = vshrl.u32 %v5452_v28, 16  ;;  %v5461_v63 = vld [vmem:[%s5609_s27 + $0x24] sm:$0xff]   ;;  %v5462_v1 = vld [vmem:[%s5609_s27 + $0x30] sm:$0xff]  }
  0x18   : > { %v648_v20 = vor.u32 %v647_v16, %v643_v11  ;;  %v799_v38 = vshrl.u32 %v5454_v29, 16  ;;  %v541_v39 = vrot.slane %v539_v31, 1  ;;  %v546_v40 = vrot.slane %v544_v32, 1  ;;  %v5458_v43 = vld [vmem:[%s5609_s27 + $0x20] ss:$0 sps:$4 sm:$0x11]  }
  0x19   : > { %v365_v21 = vsel %vm353_vm2, %v360_v17, %v364_v14  ;;  %v803_v41 = vrot.slane %v801_v33, 1  ;;  %v808_v42 = vrot.slane %v806_v34, 1  ;;  %v5460_v44 = vld [vmem:[%s5609_s27 + $0x2c] ss:$0 sps:$4 sm:$0x11]   ;;  %v887_v45 = vshll.u32 %v5457_v35, 16 }
  0x1a   : > { %4844 = vmatmul.mubr.msk.bf16.vlgmr.msra.gmra.mrb[0].mxu0 %vm371_vm3, %v365_v21  ;;  %v653_v22 = vsel %vm353_vm2, %v648_v20, %v652_v18  ;;  %v1129_v46 = vshll.u32 %v5459_v36, 16  ;;  %v542_v47 = vor.u32 %v541_v39, %v537_v37  ;;  %v885_v49 = vshrl.u32 %v5457_v35, 16  ;;  %v5464_v5 = vld [vmem:[%s5609_s27 + $0x38] ss:$0 sps:$4 sm:$0x11]   ;;  %v5465_v10 = vld [vmem:[%s5609_s27 + $0x30] sm:$0xff]  }
  0x1b   : > { %4848 = vmatpush3.bf16.msra.mxu0 %v5619_v19  ;;  %4868 = vmatmul.mubr.msk.bf16.vlgmr.msra.gmra.mrb[0].mxu1 %vm371_vm3, %v653_v22  ;;  %v804_v48 = vor.u32 %v803_v41, %v799_v38  ;;  %v889_v50 = vrot.slane %v887_v45, 1  ;;  %v892_v51 = vshll.u32 %v5458_v43, 16  ;;  %v1134_v52 = vshll.u32 %v5460_v44, 16  ;;  %v5467_v14 = vld [vmem:[%s5609_s27 + $0x3c] sm:$0xff]   ;;  %v5470_v41 = vld [vmem:[%s5609_s27 + $0x48] sm:$0xff]  }
  0x1c   : > { %4872 = vmatpush3.bf16.msra.mxu1 %v5619_v19  ;;  %4849 = vmatprep.mubr.msk.bf16.mxu0 %vm5538_vm1, %v5537_v0  ;;  %v547_v53 = vsel %vm353_vm2, %v542_v47, %v546_v40  ;;  %v1127_v55 = vshrl.u32 %v5459_v36, 16  ;;  %v1131_v56 = vrot.slane %v1129_v46, 1  ;;  %v1043_v4 = vshll.u32 %v5461_v63, 16  ;;  %v5466_v17 = vld [vmem:[%s5609_s27 + $0x38] ss:$0 sps:$4 sm:$0x11]  }
  0x1d   : > { %4853 = vmatprep.subr.bf16.mxu0 %v5537_v0  ;;  %4873 = vmatprep.mubr.msk.bf16.mxu1 %vm5538_vm1, %v5537_v0  ;;  %v809_v54 = vsel %vm353_vm2, %v804_v48, %v808_v42  ;;  %v890_v57 = vor.u32 %v889_v50, %v885_v49  ;;  %v894_v58 = vrot.slane %v892_v51, 1  ;;  %v1136_v59 = vrot.slane %v1134_v52, 1  ;;  %v5468_v22 = vld [vmem:[%s5609_s27 + $0x44] ss:$0 sps:$4 sm:$0x11]   ;;  %v5469_v40 = vld [vmem:[%s5609_s27 + $0x3c] sm:$0xff]  }
  0x1e   : > { %4877 = vmatprep.subr.bf16.mxu1 %v5537_v0  ;;  %v1132_v60 = vor.u32 %v1131_v56, %v1127_v55  ;;  %v1041_v7 = vshrl.u32 %v5461_v63, 16  ;;  %v1045_v8 = vrot.slane %v1043_v4, 1  ;;  %v1283_v11 = vshrl.u32 %v5462_v1, 16  ;;  %v5471_v42 = vld [vmem:[%s5609_s27 + $0x44] ss:$0 sps:$4 sm:$0x11]  }
  0x1f   : > { %v895_v61 = vsel %vm353_vm2, %v890_v57, %v894_v58  ;;  %v1290_v13 = vshll.u32 %v5464_v5, 16  ;;  %v1371_v18 = vshll.u32 %v5465_v10, 16  ;;  %v1613_v23 = vshll.u32 %v5467_v14, 16  ;;  %v5472_v44 = vld [vmem:[%s5609_s27 + $0x50] ss:$0 sps:$4 sm:$0x11]  }
  0x20   : > { %v1137_v62 = vsel %vm353_vm2, %v1132_v60, %v1136_v59  ;;  %v1046_v15 = vor.u32 %v1045_v8, %v1041_v7  ;;  %v1369_v26 = vshrl.u32 %v5465_v10, 16  ;;  %v1611_v31 = vshrl.u32 %v5467_v14, 16  ;;  %v5473_v49 = vld [vmem:[%s5609_s27 + $0x48] sm:$0xff]   ;;  %v5474_v56 = vld [vmem:[%s5609_s27 + $0x50] ss:$0 sps:$4 sm:$0x11]  }
  0x21   : > { %v1292_v21 = vrot.slane %v1290_v13, 1  ;;  %v1373_v27 = vrot.slane %v1371_v18, 1  ;;  %v1615_v32 = vrot.slane %v1613_v23, 1  ;;  %v1618_v33 = vshll.u32 %v5468_v22, 16 }
  0x22   : > { %v1527_v43 = vshll.u32 %v5469_v40, 16  ;;  %v1769_v45 = vshll.u32 %v5470_v41, 16  ;;  %v1525_v46 = vshrl.u32 %v5469_v40, 16  ;;  %v1532_v48 = vshll.u32 %v5471_v42, 16 }
  0x23   : > { %v1374_v34 = vor.u32 %v1373_v27, %v1369_v26  ;;  %v1620_v37 = vrot.slane %v1618_v33, 1  ;;  %v1767_v50 = vshrl.u32 %v5470_v41, 16  ;;  %v1774_v52 = vshll.u32 %v5472_v44, 16  ;;  %v5476_v60 = vld [vmem:[%s5609_s27 + $0x5c] ss:$0 sps:$4 sm:$0x11]  }
  0x24   : > { %v1529_v47 = vrot.slane %v1527_v43, 1  ;;  %v1771_v51 = vrot.slane %v1769_v45, 1  ;;  %v1534_v55 = vrot.slane %v1532_v48, 1  ;;  %v1855_v57 = vshll.u32 %v5473_v49, 16 }
  0x25   : > { %v1776_v59 = vrot.slane %v1774_v52, 1  ;;  %v2102_v7 = vshll.u32 %v5476_v60, 16  ;;  %v5480_v18 = vld [vmem:[%s5609_s27 + $0x68] ss:$0 sps:$4 sm:$0x11]  }
  0x26   : > { %4850 = vmatmul.mubr.msk.bf16.vlgmr.msra.gmra.mrb[0].mxu0 %vm371_vm3, %v5446_v3  ;;  %v5463_v3 = vld [vmem:[%s5609_s27 + $0x2c] ss:$0 sps:$4 sm:$0x11]   ;;  %v1772_v58 = vor.u32 %v1771_v51, %v1767_v50  ;;  %v5482_v33 = vld [vmem:[%s5609_s27 + $0x68] ss:$0 sps:$4 sm:$0x11]  }
  0x27   : > { %4854 = vmatpush3.bf16.msra.mxu0 %v5637_v24  ;;  %4874 = vmatmul.mubr.msk.bf16.vlgmr.msra.gmra.mrb[0].mxu1 %vm371_vm3, %v5449_v6  ;;  %v1285_v6 = vshll.u32 %v5462_v1, 16  ;;  %v1048_v9 = vshll.u32 %v5463_v3, 16  ;;  %v1860_v3 = vshll.u32 %v5474_v56, 16  ;;  %v2344_v42 = vshll.u32 %v5482_v33, 16 }
  0x28   : > { %4878 = vmatpush3.bf16.msra.mxu1 %v5637_v24  ;;  %4855 = vmatprep.mubr.msk.bf16.mxu0 %vm5538_vm1, %v5537_v0  ;;  %v1777_v4 = vsel %vm353_vm2, %v1772_v58, %v1776_v59 }
  0x29   : > { %4859 = vmatprep.subr.bf16.mxu0 %v5537_v0  ;;  %4879 = vmatprep.mubr.msk.bf16.mxu1 %vm5538_vm1, %v5537_v0  ;;  %v1287_v12 = vrot.slane %v1285_v6, 1  ;;  %v1050_v16 = vrot.slane %v1048_v9, 1  ;;  %v1862_v9 = vrot.slane %v1860_v3, 1  ;;  %v2346_v48 = vrot.slane %v2344_v42, 1  ;;  %v5927_v42 = vld [vmem:[%s5609_s27 + $0x90] sm:$0xff]  }
  0x2a   : > { %4883 = vmatprep.subr.bf16.mxu1 %v5537_v0 }
  0x2b   : > { %v1288_v20 = vor.u32 %v1287_v12, %v1283_v11  ;;  %v1051_v25 = vsel %vm353_vm2, %v1046_v15, %v1050_v16  ;;  %v2104_v11 = vrot.slane %v2102_v7, 1  ;;  %v5478_v15 = vld [vmem:[%s5609_s27 + $0x60] sm:$0xff]   ;;  %v5479_v16 = vld [vmem:[%s5609_s27 + $0x5c] ss:$0 sps:$4 sm:$0x11]  }
  0x2c   : > { %v2016_v23 = vshll.u32 %v5479_v16, 16  ;;  %v2251_v26 = vshrl.u32 %v5478_v15, 16  ;;  %v5490_v7 = vld [vmem:[%s5609_s27 + $0x80] ss:$0 sps:$4 sm:$0x11]  }
  0x2d   : > { %v2828_v16 = vshll.u32 %v5490_v7, 16 }
  0x32   : > { %4856 = vmatmul.mubr.msk.bf16.vlgmr.msra.gmra.mrb[0].mxu0 %vm371_vm3, %v5452_v28  ;;  %v1376_v28 = vshll.u32 %v5466_v17, 16 }
  0x33   : > { %4860 = vmatpush3.bf16.msra.mxu0 %v5657_v30  ;;  %4880 = vmatmul.mubr.msk.bf16.vlgmr.msra.gmra.mrb[0].mxu1 %vm371_vm3, %v5454_v29  ;;  %v1293_v29 = vsel %vm353_vm2, %v1288_v20, %v1292_v21  ;;  %v2253_v20 = vshll.u32 %v5478_v15, 16 }
  0x34   : > { %4884 = vmatpush3.bf16.msra.mxu1 %v5657_v30  ;;  %4861 = vmatprep.mubr.msk.bf16.mxu0 %vm5538_vm1, %v5537_v0 }
  0x35   : > { %4885 = vmatprep.mubr.msk.bf16.mxu1 %vm5538_vm1, %v5537_v0  ;;  %4889 = vmatprep.subr.bf16.mxu0 %v5537_v0  ;;  %v2255_v27 = vrot.slane %v2253_v20, 1 }
  0x36   : > { %4913 = vmatprep.subr.bf16.mxu1 %v5537_v0 }
  0x3e   : > { %4862 = vmatmul.mubr.msk.bf16.vlgmr.msra.gmra.mrb[0].mxu0 %vm371_vm3, %v547_v53  ;;  %v5475_v53 = vld [vmem:[%s5609_s27 + $0x54] sm:$0xff]  }
  0x3f   : > { %4886 = vmatmul.mubr.msk.bf16.vlgmr.msra.gmra.mrb[0].mxu1 %vm371_vm3, %v809_v54  ;;  %4890 = vmatpush3.bf16.msra.mxu0 %v5597_v2  ;;  %v1530_v54 = vor.u32 %v1529_v47, %v1525_v46  ;;  %v2095_v5 = vshrl.u32 %v5475_v53, 16 }
  0x40   : > { %4914 = vmatpush3.bf16.msra.mxu1 %v5597_v2  ;;  %4891 = vmatprep.mubr.msk.bf16.mxu0 %vm5538_vm1, %v5537_v0 }
  0x41   : > { %4895 = vmatprep.subr.bf16.mxu0 %v5537_v0  ;;  %4915 = vmatprep.mubr.msk.bf16.mxu1 %vm5538_vm1, %v5537_v0 }
  0x42   : > { %4919 = vmatprep.subr.bf16.mxu1 %v5537_v0 }
  0x46   : > { %4892 = vmatmul.mubr.msk.bf16.vlgmr.msra.gmra.mrb[4].mxu0 %vm371_vm3, %v895_v61  ;;  %v2097_v61 = vshll.u32 %v5475_v53, 16 }
  0x47   : > { %4896 = vmatpush3.bf16.msra.mxu0 %v5619_v19  ;;  %4916 = vmatmul.mubr.msk.bf16.vlgmr.msra.gmra.mrb[4].mxu1 %vm371_vm3, %v1137_v62  ;;  %v1535_v62 = vsel %vm353_vm2, %v1530_v54, %v1534_v55  ;;  %v5486_v54 = vld [vmem:[%s5609_s27 + $0x78] sm:$0xff]   ;;  %v5487_v55 = vld [vmem:[%s5609_s27 + $0x74] ss:$0 sps:$4 sm:$0x11]  }
  0x48   : > { %4920 = vmatpush3.bf16.msra.mxu1 %v5619_v19  ;;  %4897 = vmatprep.mubr.msk.bf16.mxu0 %vm5538_vm1, %v5537_v0  ;;  %v2099_v6 = vrot.slane %v2097_v61, 1  ;;  %v2737_v58 = vshll.u32 %v5486_v54, 16  ;;  %v2500_v61 = vshll.u32 %v5487_v55, 16 }
  0x49   : > { %4901 = vmatprep.subr.bf16.mxu0 %v5537_v0  ;;  %4921 = vmatprep.mubr.msk.bf16.mxu1 %vm5538_vm1, %v5537_v0 }
  0x4a   : > { %4925 = vmatprep.subr.bf16.mxu1 %v5537_v0 }
  0x52   : > { %4898 = vmatmul.mubr.msk.bf16.vlgmr.msra.gmra.mrb[4].mxu0 %vm371_vm3, %v5457_v35  ;;  %v1378_v35 = vrot.slane %v1376_v28, 1  ;;  %v2258_v28 = vshll.u32 %v5480_v18, 16 }
  0x53   : > { %4902 = vmatpush3.bf16.msra.mxu0 %v5637_v24  ;;  %4922 = vmatmul.mubr.msk.bf16.vlgmr.msra.gmra.mrb[4].mxu1 %vm371_vm3, %v5459_v36  ;;  %v1616_v36 = vor.u32 %v1615_v32, %v1611_v31  ;;  %v2018_v32 = vrot.slane %v2016_v23, 1  ;;  %v2830_v23 = vrot.slane %v2828_v16, 1 }
  0x54   : > { %4926 = vmatpush3.bf16.msra.mxu1 %v5637_v24  ;;  %4903 = vmatprep.mubr.msk.bf16.mxu0 %vm5538_vm1, %v5537_v0  ;;  %v1379_v38 = vsel %vm353_vm2, %v1374_v34, %v1378_v35  ;;  %v2256_v35 = vor.u32 %v2255_v27, %v2251_v26 }
  0x55   : > { %4907 = vmatprep.subr.bf16.mxu0 %v5537_v0  ;;  %4927 = vmatprep.mubr.msk.bf16.mxu1 %vm5538_vm1, %v5537_v0  ;;  %v1621_v39 = vsel %vm353_vm2, %v1616_v36, %v1620_v37  ;;  %v2260_v36 = vrot.slane %v2258_v28, 1  ;;  %v5484_v37 = vld [vmem:[%s5609_s27 + $0x74] ss:$0 sps:$4 sm:$0x11]  }
  0x56   : > { %4931 = vmatprep.subr.bf16.mxu1 %v5537_v0  ;;  %v2586_v46 = vshll.u32 %v5484_v37, 16 }
  0x57   : > { %v2261_v43 = vsel %vm353_vm2, %v2256_v35, %v2260_v36 }
  0x58   : > { %v2588_v50 = vrot.slane %v2586_v46, 1 }
  0x5e   : > { %4904 = vmatmul.mubr.msk.bf16.vlgmr.msra.gmra.mrb[4].mxu0 %vm371_vm3, %v5461_v63  ;;  %v1853_v63 = vshrl.u32 %v5473_v49, 16 }
  0x5f   : > { %4908 = vmatpush3.bf16.msra.mxu0 %v5657_v30  ;;  %4928 = vmatmul.mubr.msk.bf16.vlgmr.msra.gmra.mrb[4].mxu1 %vm371_vm3, %v5462_v1  ;;  %v1857_v1 = vrot.slane %v1855_v57, 1  ;;  %v5488_v57 = vld [vmem:[%s5609_s27 + $0x80] ss:$0 sps:$4 sm:$0x11]  }
  0x60   : > { %4932 = vmatpush3.bf16.msra.mxu1 %v5657_v30  ;;  %4909 = vmatprep.mubr.msk.bf16.mxu0 %vm5538_vm1, %v5537_v0  ;;  %v2742_v3 = vshll.u32 %v5488_v57, 16 }
  0x61   : > { %4933 = vmatprep.mubr.msk.bf16.mxu1 %vm5538_vm1, %v5537_v0  ;;  %4937 = vmatprep.subr.bf16.mxu0 %v5537_v0  ;;  %v1858_v8 = vor.u32 %v1857_v1, %v1853_v63  ;;  %v2735_v63 = vshrl.u32 %v5486_v54, 16  ;;  %v2739_v1 = vrot.slane %v2737_v58, 1  ;;  %v5498_v58 = vld [vmem:[%s5609_s27 + $0x98] ss:$0 sps:$4 sm:$0x11]  }
  0x62   : > { %4961 = vmatprep.subr.bf16.mxu1 %v5537_v0 }
  0x63   : > { %v1863_v12 = vsel %vm353_vm2, %v1858_v8, %v1862_v9  ;;  %v2740_v9 = vor.u32 %v2739_v1, %v2735_v63  ;;  %v5500_v63 = vld [vmem:[%s5609_s27 + $0xa4] ss:$0 sps:$4 sm:$0x11]  }
  0x6a   : > { %4910 = vmatmul.mubr.msk.bf16.vlgmr.msra.gmra.mrb[4].mxu0 %vm371_vm3, %v1051_v25  ;;  %v5481_v25 = vld [vmem:[%s5609_s27 + $0x60] sm:$0xff]  }
  0x6b   : > { %4934 = vmatmul.mubr.msk.bf16.vlgmr.msra.gmra.mrb[4].mxu1 %vm371_vm3, %v1293_v29  ;;  %4938 = vmatpush3.bf16.msra.mxu0 %v5597_v2  ;;  %v5483_v29 = vld [vmem:[%s5609_s27 + $0x6c] sm:$0xff]   ;;  %v2339_v34 = vshll.u32 %v5481_v25, 16 }
  0x6c   : > { %4962 = vmatpush3.bf16.msra.mxu1 %v5597_v2  ;;  %4939 = vmatprep.mubr.msk.bf16.mxu0 %vm5538_vm1, %v5537_v0  ;;  %v2579_v44 = vshrl.u32 %v5483_v29, 16 }
  0x6d   : > { %4943 = vmatprep.subr.bf16.mxu0 %v5537_v0  ;;  %4963 = vmatprep.mubr.msk.bf16.mxu1 %vm5538_vm1, %v5537_v0 }
  0x6e   : > { %4967 = vmatprep.subr.bf16.mxu1 %v5537_v0 }
  0x72   : > { %4940 = vmatmul.mubr.msk.bf16.vlgmr.msra.gmra.mrb[8].mxu0 %vm371_vm3, %v1379_v38  ;;  %v2581_v38 = vshll.u32 %v5483_v29, 16 }
  0x73   : > { %4944 = vmatpush3.bf16.msra.mxu0 %v5619_v19  ;;  %4964 = vmatmul.mubr.msk.bf16.vlgmr.msra.gmra.mrb[8].mxu1 %vm371_vm3, %v1621_v39 }
  0x74   : > { %4968 = vmatpush3.bf16.msra.mxu1 %v5619_v19  ;;  %4945 = vmatprep.mubr.msk.bf16.mxu0 %vm5538_vm1, %v5537_v0  ;;  %v2583_v45 = vrot.slane %v2581_v38, 1 }
  0x75   : > { %4949 = vmatprep.subr.bf16.mxu0 %v5537_v0  ;;  %4969 = vmatprep.mubr.msk.bf16.mxu1 %vm5538_vm1, %v5537_v0 }
  0x76   : > { %4973 = vmatprep.subr.bf16.mxu1 %v5537_v0 }
  0x7e   : > { %4946 = vmatmul.mubr.msk.bf16.vlgmr.msra.gmra.mrb[8].mxu0 %vm371_vm3, %v5465_v10  ;;  %v2100_v10 = vor.u32 %v2099_v6, %v2095_v5  ;;  %v2502_v6 = vrot.slane %v2500_v61, 1 }
  0x7f   : > { %4950 = vmatpush3.bf16.msra.mxu0 %v5637_v24  ;;  %4970 = vmatmul.mubr.msk.bf16.vlgmr.msra.gmra.mrb[8].mxu1 %vm371_vm3, %v5467_v14  ;;  %v5477_v14 = vld [vmem:[%s5609_s27 + $0x54] sm:$0xff]  }
  0x80   : > { %4974 = vmatpush3.bf16.msra.mxu1 %v5637_v24  ;;  %4951 = vmatprep.mubr.msk.bf16.mxu0 %vm5538_vm1, %v5537_v0  ;;  %v2105_v13 = vsel %vm353_vm2, %v2100_v10, %v2104_v11  ;;  %v2011_v17 = vshll.u32 %v5477_v14, 16  ;;  %v2009_v21 = vshrl.u32 %v5477_v14, 16  ;;  %v2744_v10 = vrot.slane %v2742_v3, 1  ;;  %v5492_v11 = vld [vmem:[%s5609_s27 + $0x8c] ss:$0 sps:$4 sm:$0x11]  }
  0x81   : > { %4955 = vmatprep.subr.bf16.mxu0 %v5537_v0  ;;  %4975 = vmatprep.mubr.msk.bf16.mxu1 %vm5538_vm1, %v5537_v0 }
  0x82   : > { %4979 = vmatprep.subr.bf16.mxu1 %v5537_v0  ;;  %v2013_v22 = vrot.slane %v2011_v17, 1  ;;  %v2745_v17 = vsel %vm353_vm2, %v2740_v9, %v2744_v10  ;;  %v3305_v10 = vshrl.u32 %v5927_v42, 16 }
  0x84   : > { %v2014_v31 = vor.u32 %v2013_v22, %v2009_v21  ;;  %v3070_v21 = vshll.u32 %v5492_v11, 16 }
  0x86   : > { %v2019_v39 = vsel %vm353_vm2, %v2014_v31, %v2018_v32  ;;  %v3072_v26 = vrot.slane %v3070_v21, 1  ;;  %v5494_v31 = vld [vmem:[%s5609_s27 + $0x90] sm:$0xff]   ;;  %v5495_v32 = vld [vmem:[%s5609_s27 + $0x8c] ss:$0 sps:$4 sm:$0x11]  }
  0x87   : > { %v3221_v35 = vshll.u32 %v5494_v31, 16  ;;  %v2984_v38 = vshll.u32 %v5495_v32, 16 }
  0x8a   : > { %4952 = vmatmul.mubr.msk.bf16.vlgmr.msra.gmra.mrb[8].mxu0 %vm371_vm3, %v5469_v40  ;;  %v2337_v40 = vshrl.u32 %v5481_v25, 16 }
  0x8b   : > { %4956 = vmatpush3.bf16.msra.mxu0 %v5657_v30  ;;  %4976 = vmatmul.mubr.msk.bf16.vlgmr.msra.gmra.mrb[8].mxu1 %vm371_vm3, %v5470_v41  ;;  %v2341_v41 = vrot.slane %v2339_v34, 1  ;;  %v5496_v34 = vld [vmem:[%s5609_s27 + $0x98] ss:$0 sps:$4 sm:$0x11]  }
  0x8c   : > { %4980 = vmatpush3.bf16.msra.mxu1 %v5657_v30  ;;  %4957 = vmatprep.mubr.msk.bf16.mxu0 %vm5538_vm1, %v5537_v0 }
  0x8d   : > { %4981 = vmatprep.mubr.msk.bf16.mxu1 %vm5538_vm1, %v5537_v0  ;;  %4985 = vmatprep.subr.bf16.mxu0 %v5537_v0  ;;  %v2342_v47 = vor.u32 %v2341_v41, %v2337_v40  ;;  %v3223_v40 = vrot.slane %v3221_v35, 1  ;;  %v3226_v41 = vshll.u32 %v5496_v34, 16  ;;  %v5502_v34 = vld [vmem:[%s5609_s27 + $0xa8] sm:$0xff]   ;;  %v5503_v35 = vld [vmem:[%s5609_s27 + $0xa4] ss:$0 sps:$4 sm:$0x11]  }
  0x8e   : > { %5009 = vmatprep.subr.bf16.mxu1 %v5537_v0 }
  0x8f   : > { %v2347_v51 = vsel %vm353_vm2, %v2342_v47, %v2346_v48  ;;  %v2986_v48 = vrot.slane %v2984_v38, 1  ;;  %v3705_v38 = vshll.u32 %v5502_v34, 16 }
  0x96   : > { %4958 = vmatmul.mubr.msk.bf16.vlgmr.msra.gmra.mrb[8].mxu0 %vm371_vm3, %v1535_v62  ;;  %v5489_v62 = vld [vmem:[%s5609_s27 + $0x78] sm:$0xff]  }
  0x97   : > { %4982 = vmatmul.mubr.msk.bf16.vlgmr.msra.gmra.mrb[8].mxu1 %vm371_vm3, %v1777_v4  ;;  %4986 = vmatpush3.bf16.msra.mxu0 %v5597_v2  ;;  %v5491_v4 = vld [vmem:[%s5609_s27 + $0x84] sm:$0xff]   ;;  %v2823_v8 = vshll.u32 %v5489_v62, 16 }
  0x98   : > { %5010 = vmatpush3.bf16.msra.mxu1 %v5597_v2  ;;  %4987 = vmatprep.mubr.msk.bf16.mxu0 %vm5538_vm1, %v5537_v0  ;;  %v3063_v18 = vshrl.u32 %v5491_v4, 16 }
  0x99   : > { %4991 = vmatprep.subr.bf16.mxu0 %v5537_v0  ;;  %5011 = vmatprep.mubr.msk.bf16.mxu1 %vm5538_vm1, %v5537_v0 }
  0x9a   : > { %5015 = vmatprep.subr.bf16.mxu1 %v5537_v0 }
  0x9e   : > { %4988 = vmatmul.mubr.msk.bf16.vlgmr.msra.gmra.mrb[12].mxu0 %vm371_vm3, %v1863_v12  ;;  %v3065_v12 = vshll.u32 %v5491_v4, 16 }
  0x9f   : > { %4992 = vmatpush3.bf16.msra.mxu0 %v5619_v19  ;;  %5012 = vmatmul.mubr.msk.bf16.vlgmr.msra.gmra.mrb[12].mxu1 %vm371_vm3, %v2105_v13 }
  0xa0   : > { %5016 = vmatpush3.bf16.msra.mxu1 %v5619_v19  ;;  %4993 = vmatprep.mubr.msk.bf16.mxu0 %vm5538_vm1, %v5537_v0  ;;  %v3067_v20 = vrot.slane %v3065_v12, 1 }
  0xa1   : > { %4997 = vmatprep.subr.bf16.mxu0 %v5537_v0  ;;  %5017 = vmatprep.mubr.msk.bf16.mxu1 %vm5538_vm1, %v5537_v0 }
  0xa2   : > { %5021 = vmatprep.subr.bf16.mxu1 %v5537_v0 }
  0xaa   : > { %4994 = vmatmul.mubr.msk.bf16.vlgmr.msra.gmra.mrb[12].mxu0 %vm371_vm3, %v5473_v49  ;;  %v2584_v49 = vor.u32 %v2583_v45, %v2579_v44  ;;  %v5940_v44 = vld [vmem:[%s5609_s27 + $0x9c] sm:$0xff]  }
  0xab   : > { %4998 = vmatpush3.bf16.msra.mxu0 %v5637_v24  ;;  %5018 = vmatmul.mubr.msk.bf16.vlgmr.msra.gmra.mrb[12].mxu1 %vm371_vm3, %v5475_v53  ;;  %v5485_v53 = vld [vmem:[%s5609_s27 + $0x6c] sm:$0xff]   ;;  %v5945_v45 = vld [vmem:[%s6218_s4] ss:$0 sm:$0xff]  ;;  %v3549_v1 = vshll.u32 %v5940_v44, 16 }
  0xac   : > { %5022 = vmatpush3.bf16.msra.mxu1 %v5637_v24  ;;  %4999 = vmatprep.mubr.msk.bf16.mxu0 %vm5538_vm1, %v5537_v0  ;;  %v2589_v52 = vsel %vm353_vm2, %v2584_v49, %v2588_v50  ;;  %v2495_v56 = vshll.u32 %v5485_v53, 16  ;;  %v2493_v59 = vshrl.u32 %v5485_v53, 16  ;;  %v3228_v50 = vrot.slane %v3226_v41, 1 }
  0xad   : > { %5003 = vmatprep.subr.bf16.mxu0 %v5537_v0  ;;  %5023 = vmatprep.mubr.msk.bf16.mxu1 %vm5538_vm1, %v5537_v0  ;;  %v3468_v41 = vshll.u32 %v5503_v35, 16 }
  0xae   : > { %5027 = vmatprep.subr.bf16.mxu1 %v5537_v0  ;;  %v2497_v60 = vrot.slane %v2495_v56, 1 }
  0xb0   : > { %v2498_v5 = vor.u32 %v2497_v60, %v2493_v59 }
  0xb2   : > { %v2503_v13 = vsel %vm353_vm2, %v2498_v5, %v2502_v6 }
  0xb6   : > { %5000 = vmatmul.mubr.msk.bf16.vlgmr.msra.gmra.mrb[12].mxu0 %vm371_vm3, %v5477_v14  ;;  %v2821_v14 = vshrl.u32 %v5489_v62, 16 }
  0xb7   : > { %5004 = vmatpush3.bf16.msra.mxu0 %v5657_v30  ;;  %5024 = vmatmul.mubr.msk.bf16.vlgmr.msra.gmra.mrb[12].mxu1 %vm371_vm3, %v5478_v15  ;;  %v2825_v15 = vrot.slane %v2823_v8, 1 }
  0xb8   : > { %5028 = vmatpush3.bf16.msra.mxu1 %v5657_v30  ;;  %5005 = vmatprep.mubr.msk.bf16.mxu0 %vm5538_vm1, %v5537_v0 }
  0xb9   : > { %5029 = vmatprep.mubr.msk.bf16.mxu1 %vm5538_vm1, %v5537_v0  ;;  %5033 = vmatprep.subr.bf16.mxu0 %v5537_v0  ;;  %v2826_v22 = vor.u32 %v2825_v15, %v2821_v14  ;;  %v3312_v14 = vshll.u32 %v5498_v58, 16  ;;  %v3547_v15 = vshrl.u32 %v5940_v44, 16 }
  0xba   : > { %5057 = vmatprep.subr.bf16.mxu1 %v5537_v0 }
  0xbb   : > { %v2831_v27 = vsel %vm353_vm2, %v2826_v22, %v2830_v23 }
  0xc2   : > { %5006 = vmatmul.mubr.msk.bf16.vlgmr.msra.gmra.mrb[12].mxu0 %vm371_vm3, %v2019_v39  ;;  %v3219_v39 = vshrl.u32 %v5494_v31, 16 }
  0xc3   : > { %5030 = vmatmul.mubr.msk.bf16.vlgmr.msra.gmra.mrb[12].mxu1 %vm371_vm3, %v2261_v43  ;;  %5034 = vmatpush3.bf16.msra.mxu0 %v5597_v2  ;;  %v5934_v43 = vld [vmem:[%s6217_s3] ss:$0 sm:$0xff] }
  0xc4   : > { %5058 = vmatpush3.bf16.msra.mxu1 %v5597_v2  ;;  %5035 = vmatprep.mubr.msk.bf16.mxu0 %vm5538_vm1, %v5537_v0  ;;  %v3224_v49 = vor.u32 %v3223_v40, %v3219_v39 }
  0xc5   : > { %5039 = vmatprep.subr.bf16.mxu0 %v5537_v0  ;;  %5059 = vmatprep.mubr.msk.bf16.mxu1 %vm5538_vm1, %v5537_v0 }
  0xc6   : > { %5063 = vmatprep.subr.bf16.mxu1 %v5537_v0  ;;  %v3229_v7 = vsel %vm353_vm2, %v3224_v49, %v3228_v50 }
  0xca   : > { %5036 = vmatmul.mubr.msk.bf16.vlgmr.msra.gmra.mrb[16].mxu0 %vm371_vm3, %v2347_v51 }
  0xcb   : > { %5040 = vmatpush3.bf16.msra.mxu0 %v5619_v19  ;;  %5060 = vmatmul.mubr.msk.bf16.vlgmr.msra.gmra.mrb[16].mxu1 %vm371_vm3, %v2589_v52 }
  0xcc   : > { %5064 = vmatpush3.bf16.msra.mxu1 %v5619_v19  ;;  %5041 = vmatprep.mubr.msk.bf16.mxu0 %vm5538_vm1, %v5537_v0 }
  0xcd   : > { %5045 = vmatprep.subr.bf16.mxu0 %v5537_v0  ;;  %5065 = vmatprep.mubr.msk.bf16.mxu1 %vm5538_vm1, %v5537_v0 }
  0xce   : > { %5069 = vmatprep.subr.bf16.mxu1 %v5537_v0 }
  0xd6   : > { %5042 = vmatmul.mubr.msk.bf16.vlgmr.msra.gmra.mrb[16].mxu0 %vm371_vm3, %v5481_v25  ;;  %v3068_v25 = vor.u32 %v3067_v20, %v3063_v18  ;;  %v3551_v18 = vrot.slane %v3549_v1, 1  ;;  %v3554_v20 = vshll.u32 %v5500_v63, 16 }
  0xd7   : > { %5046 = vmatpush3.bf16.msra.mxu0 %v5637_v24  ;;  %5066 = vmatmul.mubr.msk.bf16.vlgmr.msra.gmra.mrb[16].mxu1 %vm371_vm3, %v5483_v29  ;;  %v5493_v29 = vld [vmem:[%s5609_s27 + $0x84] sm:$0xff]  }
  0xd8   : > { %5070 = vmatpush3.bf16.msra.mxu1 %v5637_v24  ;;  %5047 = vmatprep.mubr.msk.bf16.mxu0 %vm5538_vm1, %v5537_v0  ;;  %v3073_v28 = vsel %vm353_vm2, %v3068_v25, %v3072_v26  ;;  %v2979_v33 = vshll.u32 %v5493_v29, 16  ;;  %v2977_v36 = vshrl.u32 %v5493_v29, 16 }
  0xd9   : > { %5051 = vmatprep.subr.bf16.mxu0 %v5537_v0  ;;  %5071 = vmatprep.mubr.msk.bf16.mxu1 %vm5538_vm1, %v5537_v0 }
  0xda   : > { %5075 = vmatprep.subr.bf16.mxu1 %v5537_v0  ;;  %v2981_v37 = vrot.slane %v2979_v33, 1  ;;  %v5501_v33 = vld [vmem:[%s5609_s27 + $0x9c] sm:$0xff]  }
  0xdb   : > { %v3461_v39 = vshrl.u32 %v5501_v33, 16 }
  0xdc   : > { %v2982_v47 = vor.u32 %v2981_v37, %v2977_v36  ;;  %v3463_v36 = vshll.u32 %v5501_v33, 16  ;;  %v5504_v37 = vld [vmem:[%s5609_s27 + $0xb0] ss:$0 sps:$4 sm:$0x11]  }
  0xde   : > { %v2987_v6 = vsel %vm353_vm2, %v2982_v47, %v2986_v48  ;;  %v3465_v40 = vrot.slane %v3463_v36, 1  ;;  %v6021_v47 = vld [vmem:[%s5609_s27 + $0xa8] sm:$0xff]   ;;  %v6029_v48 = vld [vmem:[%s5609_s27 + $0xb4] sm:$0xff]   ;;  %v5511_v36 = vld [vmem:[%s5609_s27 + $0xbc] ss:$0 sps:$4 sm:$0x11]  }
  0xe0   : > { %v3466_v50 = vor.u32 %v3465_v40, %v3461_v39 }
  0xe2   : > { %5048 = vmatmul.mubr.msk.bf16.vlgmr.msra.gmra.mrb[16].mxu0 %vm371_vm3, %v5485_v53 }
  0xe3   : > { %5052 = vmatpush3.bf16.msra.mxu0 %v5657_v30  ;;  %5072 = vmatmul.mubr.msk.bf16.vlgmr.msra.gmra.mrb[16].mxu1 %vm371_vm3, %v5486_v54  ;;  %v3307_v54 = vshll.u32 %v5927_v42, 16 }
  0xe4   : > { %5076 = vmatpush3.bf16.msra.mxu1 %v5657_v30  ;;  %5053 = vmatprep.mubr.msk.bf16.mxu0 %vm5538_vm1, %v5537_v0 }
  0xe5   : > { %5077 = vmatprep.mubr.msk.bf16.mxu1 %vm5538_vm1, %v5537_v0  ;;  %5081 = vmatprep.subr.bf16.mxu0 %v5537_v0  ;;  %v3309_v11 = vrot.slane %v3307_v54, 1 }
  0xe6   : > { %5105 = vmatprep.subr.bf16.mxu1 %v5537_v0 }
  0xe7   : > { %v3310_v26 = vor.u32 %v3309_v11, %v3305_v10 }
  0xee   : > { %5054 = vmatmul.mubr.msk.bf16.vlgmr.msra.gmra.mrb[16].mxu0 %vm371_vm3, %v2503_v13 }
  0xef   : > { %5078 = vmatmul.mubr.msk.bf16.vlgmr.msra.gmra.mrb[16].mxu1 %vm371_vm3, %v2745_v17  ;;  %5082 = vmatpush3.bf16.msra.mxu0 %v5597_v2 }
  0xf0   : > { %5106 = vmatpush3.bf16.msra.mxu1 %v5597_v2  ;;  %5083 = vmatprep.mubr.msk.bf16.mxu0 %vm5538_vm1, %v5537_v0 }
  0xf1   : > { %5087 = vmatprep.subr.bf16.mxu0 %v5537_v0  ;;  %5107 = vmatprep.mubr.msk.bf16.mxu1 %vm5538_vm1, %v5537_v0 }
  0xf2   : > { %5111 = vmatprep.subr.bf16.mxu1 %v5537_v0 }
  0xf6   : > { %5084 = vmatmul.mubr.msk.bf16.vlgmr.msra.gmra.mrb[20].mxu0 %vm371_vm3, %v2831_v27  ;;  %v3314_v27 = vrot.slane %v3312_v14, 1 }
  0xf7   : > { %5088 = vmatpush3.bf16.msra.mxu0 %v5619_v19  ;;  %5108 = vmatmul.mubr.msk.bf16.vlgmr.msra.gmra.mrb[20].mxu1 %vm371_vm3, %v3073_v28  ;;  %v3552_v28 = vor.u32 %v3551_v18, %v3547_v15  ;;  %v4031_v18 = vshrl.u32 %v6029_v48, 16 }
  0xf8   : > { %5112 = vmatpush3.bf16.msra.mxu1 %v5619_v19  ;;  %5089 = vmatprep.mubr.msk.bf16.mxu0 %vm5538_vm1, %v5537_v0 }
  0xf9   : > { %5093 = vmatprep.subr.bf16.mxu0 %v5537_v0  ;;  %5113 = vmatprep.mubr.msk.bf16.mxu1 %vm5538_vm1, %v5537_v0 }
  0xfa   : > { %5117 = vmatprep.subr.bf16.mxu1 %v5537_v0 }
 0x102   : > { %5090 = vmatmul.mubr.msk.bf16.vlgmr.msra.gmra.mrb[20].mxu0 %vm371_vm3, %v5489_v62 }
 0x103   : > { %5094 = vmatpush3.bf16.msra.mxu0 %v5637_v24  ;;  %5114 = vmatmul.mubr.msk.bf16.vlgmr.msra.gmra.mrb[20].mxu1 %vm371_vm3, %v5491_v4 }
 0x104   : > { %5118 = vmatpush3.bf16.msra.mxu1 %v5637_v24  ;;  %5095 = vmatprep.mubr.msk.bf16.mxu0 %vm5538_vm1, %v5537_v0 }
 0x105   : > { %5099 = vmatprep.subr.bf16.mxu0 %v5537_v0  ;;  %5119 = vmatprep.mubr.msk.bf16.mxu1 %vm5538_vm1, %v5537_v0 }
 0x106   : > { %5123 = vmatprep.subr.bf16.mxu1 %v5537_v0 }
 0x10e   : > { %5096 = vmatmul.mubr.msk.bf16.vlgmr.msra.gmra.mrb[20].mxu0 %vm371_vm3, %v5493_v29  ;;  %v3556_v29 = vrot.slane %v3554_v20, 1 }
 0x10f   : > { %5100 = vmatpush3.bf16.msra.mxu0 %v5657_v30  ;;  %5120 = vmatmul.mubr.msk.bf16.vlgmr.msra.gmra.mrb[20].mxu1 %vm371_vm3, %v5494_v31  ;;  %v3315_v31 = vsel %vm353_vm2, %v3310_v26, %v3314_v27 }
 0x110   : > { %5124 = vmatpush3.bf16.msra.mxu1 %v5657_v30  ;;  %5101 = vmatprep.mubr.msk.bf16.mxu0 %vm5538_vm1, %v5537_v0  ;;  %v3557_v32 = vsel %vm353_vm2, %v3552_v28, %v3556_v29 }
 0x111   : > { %v593_v46 = vpop.f32.mrb[0].mxu0  ;;  %5125 = vmatprep.mubr.msk.bf16.mxu1 %vm5538_vm1, %v5537_v0  ;;  %5129 = vmatprep.subr.bf16.mxu0 %v5537_v0 }
 0x112   : > { %v608_v51 = vmul.f32 %v5934_v43, %v593_v46  ;;  %v847_v52 = vpop.f32.mrb[0].mxu1  ;;  %v4863_v53 = vpop.f32.mrb[1].mxu0  ;;  %5153 = vmatprep.subr.bf16.mxu1 %v5537_v0  ;;  %v3710_v46 = vshll.u32 %v5504_v37, 16 }
 0x113   : > { %v856_v55 = vmul.f32 %v5934_v43, %v847_v52  ;;  %v4887_v56 = vpop.f32.mrb[1].mxu1  ;;  %v596_v57 = vpop.f32.mrb[2].mxu0 }
 0x114   : > { %v616_v59 = vadd.f32 %v5945_v45, %v608_v51  ;;  %v609_v60 = vmul.f32 %v5934_v43, %v596_v57  ;;  %v850_v61 = vpop.f32.mrb[2].mxu1  ;;  %v4864_v62 = vpop.f32.mrb[3].mxu0  ;;  %v3470_v51 = vrot.slane %v3468_v41, 1  ;;  %v3712_v53 = vrot.slane %v3710_v46, 1 }
 0x115   : > { %v858_v3 = vadd.f32 %v5945_v45, %v856_v55  ;;  %v857_v4 = vmul.f32 %v5934_v43, %v850_v61  ;;  %v4888_v5 = vpop.f32.mrb[3].mxu1  ;;  %v3791_v57 = vshll.u32 %v6021_v47, 16  ;;  %v5506_v61 = vld [vmem:[%s5609_s27 + $0xb0] ss:$0 sps:$4 sm:$0x11]   ;;  %v3952_v41 = vshll.u32 %v5511_v36, 16 }
 0x116   : > { %v618_v8 = vmax.f32 %v616_v59, 0.0  ;;  %v617_v9 = vadd.f32 %v5945_v45, %v609_v60  ;;  %v4033_v5 = vshll.u32 %v6029_v48, 16 }
 0x117   : > { %v860_v12 = vmax.f32 %v858_v3, 0.0  ;;  %v859_v13 = vadd.f32 %v5945_v45, %v857_v4  ;;  %v5508_v4 = vld [vmem:[%s5609_s27 + $0xbc] ss:$0 sps:$4 sm:$0x11]   ;;  %v3793_v14 = vrot.slane %v3791_v57, 1 }
 0x118   : > { %v4681_v16 = vpack.c.bf16 %v618_v8, %v618_v8  ;;  %v619_v17 = vmax.f32 %v617_v9, 0.0  ;;  %v3471_v9 = vsel %vm353_vm2, %v3466_v50, %v3470_v51 }
 0x119   : > { %v4683_v21 = vpack.c.bf16 %v860_v12, %v860_v12  ;;  %v861_v22 = vmax.f32 %v859_v13, 0.0  ;;  %v3789_v13 = vshrl.u32 %v6021_v47, 16 }
 0x11a   : > { %629 = vst.msk [vmem:[%s5969_s23] sm:$0xf] %vm628_vm4, %v4681_v16  ;;  %v4682_v23 = vpack.c.bf16 %v619_v17, %v619_v17  ;;  %5102 = vmatmul.mubr.msk.bf16.vlgmr.msra.gmra.mrb[20].mxu0 %vm371_vm3, %v2987_v6  ;;  %v3796_v17 = vshll.u32 %v5506_v61, 16 }
 0x11b   : > { %4427 = vst.msk [vmem:[%s5969_s23 + $0x8] sm:$0xf] %vm628_vm4, %v4683_v21  ;;  %v4684_v25 = vpack.c.bf16 %v861_v22, %v861_v22  ;;  %5126 = vmatmul.mubr.msk.bf16.vlgmr.msra.gmra.mrb[20].mxu1 %vm371_vm3, %v3229_v7  ;;  %5130 = vmatpush3.bf16.msra.mxu0 %v5597_v2  ;;  %v4035_v22 = vrot.slane %v4033_v5, 1  ;;  %v3794_v29 = vor.u32 %v3793_v14, %v3789_v13 }
 0x11c   : > { %630 = vst.msk [vmem:[%s5969_s23 + $0x4] sm:$0xf] %vm628_vm4, %v4682_v23  ;;  %5154 = vmatpush3.bf16.msra.mxu1 %v5597_v2  ;;  %5131 = vmatprep.mubr.msk.bf16.mxu0 %vm5538_vm1, %v5537_v0  ;;  %v4038_v23 = vshll.u32 %v5508_v4, 16 }
 0x11d   : > { %4428 = vst.msk [vmem:[%s5969_s23 + $0xc] sm:$0xf] %vm628_vm4, %v4684_v25  ;;  %5135 = vmatprep.subr.bf16.mxu0 %v5537_v0  ;;  %5155 = vmatprep.mubr.msk.bf16.mxu1 %vm5538_vm1, %v5537_v0 }
 0x11e   : > { %5159 = vmatprep.subr.bf16.mxu1 %v5537_v0 }
 0x122   : > { %5132 = vmatmul.mubr.msk.bf16.vlgmr.msra.gmra.mrb[24].mxu0 %vm371_vm3, %v3315_v31  ;;  %v3798_v31 = vrot.slane %v3796_v17, 1 }
 0x123   : > { %5136 = vmatpush3.bf16.msra.mxu0 %v5619_v19  ;;  %5156 = vmatmul.mubr.msk.bf16.vlgmr.msra.gmra.mrb[24].mxu1 %vm371_vm3, %v3557_v32  ;;  %v4036_v32 = vor.u32 %v4035_v22, %v4031_v18 }
 0x124   : > { %5160 = vmatpush3.bf16.msra.mxu1 %v5619_v19  ;;  %5137 = vmatprep.mubr.msk.bf16.mxu0 %vm5538_vm1, %v5537_v0 }
 0x125   : > { %5141 = vmatprep.subr.bf16.mxu0 %v5537_v0  ;;  %5161 = vmatprep.mubr.msk.bf16.mxu1 %vm5538_vm1, %v5537_v0 }
 0x126   : > { %5165 = vmatprep.subr.bf16.mxu1 %v5537_v0 }
 0x12e   : > { %5138 = vmatmul.mubr.msk.bf16.vlgmr.msra.gmra.mrb[24].mxu0 %vm371_vm3, %v5927_v42  ;;  %v3703_v42 = vshrl.u32 %v5502_v34, 16 }
 0x12f   : > { %5142 = vmatpush3.bf16.msra.mxu0 %v5637_v24  ;;  %5162 = vmatmul.mubr.msk.bf16.vlgmr.msra.gmra.mrb[24].mxu1 %vm371_vm3, %v5940_v44  ;;  %v3707_v44 = vrot.slane %v3705_v38, 1  ;;  %v5512_v38 = vld [vmem:[%s5879_s12 + $0x8] ss:$0 sps:$4 sm:$0x11]  }
 0x130   : > { %5166 = vmatpush3.bf16.msra.mxu1 %v5637_v24  ;;  %5143 = vmatprep.mubr.msk.bf16.mxu0 %vm5538_vm1, %v5537_v0  ;;  %v4193_v46 = vshll.u32 %v5512_v38, 16 }
 0x131   : > { %5147 = vmatprep.subr.bf16.mxu0 %v5537_v0  ;;  %5167 = vmatprep.mubr.msk.bf16.mxu1 %vm5538_vm1, %v5537_v0  ;;  %v3708_v52 = vor.u32 %v3707_v44, %v3703_v42 }
 0x132   : > { %5171 = vmatprep.subr.bf16.mxu1 %v5537_v0 }
 0x133   : > { %v3713_v10 = vsel %vm353_vm2, %v3708_v52, %v3712_v53 }
 0x13a   : > { %5144 = vmatmul.mubr.msk.bf16.vlgmr.msra.gmra.mrb[24].mxu0 %vm371_vm3, %v5501_v33  ;;  %v4040_v33 = vrot.slane %v4038_v23, 1 }
 0x13b   : > { %5148 = vmatpush3.bf16.msra.mxu0 %v5657_v30  ;;  %5168 = vmatmul.mubr.msk.bf16.vlgmr.msra.gmra.mrb[24].mxu1 %vm371_vm3, %v5502_v34  ;;  %v3799_v34 = vsel %vm353_vm2, %v3794_v29, %v3798_v31 }
 0x13c   : > { %5172 = vmatpush3.bf16.msra.mxu1 %v5657_v30  ;;  %5149 = vmatprep.mubr.msk.bf16.mxu0 %vm5538_vm1, %v5537_v0  ;;  %v4041_v35 = vsel %vm353_vm2, %v4036_v32, %v4040_v33 }
 0x13d   : > { %v1089_v49 = vpop.f32.mrb[4].mxu0  ;;  %5173 = vmatprep.mubr.msk.bf16.mxu1 %vm5538_vm1, %v5537_v0  ;;  %5177 = vmatprep.subr.bf16.mxu0 %v5537_v0 }
 0x13e   : > { %v1098_v54 = vmul.f32 %v5934_v43, %v1089_v49  ;;  %v1331_v55 = vpop.f32.mrb[4].mxu1  ;;  %v4911_v56 = vpop.f32.mrb[5].mxu0  ;;  %5201 = vmatprep.subr.bf16.mxu1 %v5537_v0 }
 0x13f   : > { %v1340_v58 = vmul.f32 %v5934_v43, %v1331_v55  ;;  %v4935_v59 = vpop.f32.mrb[5].mxu1  ;;  %v1092_v60 = vpop.f32.mrb[6].mxu0 }
 0x140   : > { %v1100_v62 = vadd.f32 %v5945_v45, %v1098_v54  ;;  %v1099_v63 = vmul.f32 %v5934_v43, %v1092_v60  ;;  %v1334_v1 = vpop.f32.mrb[6].mxu1  ;;  %v4912_v3 = vpop.f32.mrb[7].mxu0  ;;  %v4195_v60 = vrot.slane %v4193_v46, 1 }
 0x141   : > { %v1342_v6 = vadd.f32 %v5945_v45, %v1340_v58  ;;  %v1341_v7 = vmul.f32 %v5934_v43, %v1334_v1  ;;  %v4936_v8 = vpop.f32.mrb[7].mxu1 }
 0x142   : > { %v1102_v11 = vmax.f32 %v1100_v62, 0.0  ;;  %v1101_v12 = vadd.f32 %v5945_v45, %v1099_v63 }
 0x143   : > { %v1344_v15 = vmax.f32 %v1342_v6, 0.0  ;;  %v1343_v16 = vadd.f32 %v5945_v45, %v1341_v7 }
 0x144   : > { %v4685_v20 = vpack.c.bf16 %v1102_v11, %v1102_v11  ;;  %v1103_v21 = vmax.f32 %v1101_v12, 0.0 }
 0x145   : > { %v4687_v25 = vpack.c.bf16 %v1344_v15, %v1344_v15  ;;  %v1345_v26 = vmax.f32 %v1343_v16, 0.0 }
 0x146   : > { %4445 = vst.msk [vmem:[%s5969_s23 + $0x10] sm:$0xf] %vm628_vm4, %v4685_v20  ;;  %v4686_v27 = vpack.c.bf16 %v1103_v21, %v1103_v21  ;;  %5150 = vmatmul.mubr.msk.bf16.vlgmr.msra.gmra.mrb[24].mxu0 %vm371_vm3, %v3471_v9 }
 0x147   : > { %4463 = vst.msk [vmem:[%s5969_s23 + $0x18] sm:$0xf] %vm628_vm4, %v4687_v25  ;;  %v4688_v28 = vpack.c.bf16 %v1345_v26, %v1345_v26  ;;  %5174 = vmatmul.mubr.msk.bf16.vlgmr.msra.gmra.mrb[24].mxu1 %vm371_vm3, %v3713_v10  ;;  %5178 = vmatpush3.bf16.msra.mxu0 %v5597_v2 }
 0x148   : > { %4446 = vst.msk [vmem:[%s5969_s23 + $0x14] sm:$0xf] %vm628_vm4, %v4686_v27  ;;  %5202 = vmatpush3.bf16.msra.mxu1 %v5597_v2  ;;  %5179 = vmatprep.mubr.msk.bf16.mxu0 %vm5538_vm1, %v5537_v0  ;;  %v5509_v2 = vld [vmem:[%s5609_s27 + $0xb4] sm:$0xff]  }
 0x149   : > { %4464 = vst.msk [vmem:[%s5969_s23 + $0x1c] sm:$0xf] %vm628_vm4, %v4688_v28  ;;  %5183 = vmatprep.subr.bf16.mxu0 %v5537_v0  ;;  %5203 = vmatprep.mubr.msk.bf16.mxu1 %vm5538_vm1, %v5537_v0  ;;  %v3947_v37 = vshll.u32 %v5509_v2, 16 }
 0x14a   : > { %5207 = vmatprep.subr.bf16.mxu1 %v5537_v0 }
 0x14b   : > { %v3949_v40 = vrot.slane %v3947_v37, 1 }
 0x14e   : > { %5180 = vmatmul.mubr.msk.bf16.vlgmr.msra.gmra.mrb[28].mxu0 %vm371_vm3, %v3799_v34 }
 0x14f   : > { %5184 = vmatpush3.bf16.msra.mxu0 %v5619_v19  ;;  %5204 = vmatmul.mubr.msk.bf16.vlgmr.msra.gmra.mrb[28].mxu1 %vm371_vm3, %v4041_v35 }
 0x150   : > { %5208 = vmatpush3.bf16.msra.mxu1 %v5619_v19  ;;  %5185 = vmatprep.mubr.msk.bf16.mxu0 %vm5538_vm1, %v5537_v0  ;;  %v5510_v19 = vld [vmem:[%s5879_s12] sm:$0xff]  }
 0x151   : > { %5189 = vmatprep.subr.bf16.mxu0 %v5537_v0  ;;  %5209 = vmatprep.mubr.msk.bf16.mxu1 %vm5538_vm1, %v5537_v0  ;;  %v4188_v39 = vshll.u32 %v5510_v19, 16  ;;  %v4186_v42 = vshrl.u32 %v5510_v19, 16 }
 0x152   : > { %5213 = vmatprep.subr.bf16.mxu1 %v5537_v0 }
 0x153   : > { %v4190_v44 = vrot.slane %v4188_v39, 1 }
 0x155   : > { %v4191_v59 = vor.u32 %v4190_v44, %v4186_v42 }
 0x157   : > { %v4196_v8 = vsel %vm353_vm2, %v4191_v59, %v4195_v60 }
 0x15a   : > { %5186 = vmatmul.mubr.msk.bf16.vlgmr.msra.gmra.mrb[28].mxu0 %vm371_vm3, %v6021_v47 }
 0x15b   : > { %5190 = vmatpush3.bf16.msra.mxu0 %v5637_v24  ;;  %5210 = vmatmul.mubr.msk.bf16.vlgmr.msra.gmra.mrb[28].mxu1 %vm371_vm3, %v6029_v48 }
 0x15c   : > { %5214 = vmatpush3.bf16.msra.mxu1 %v5637_v24  ;;  %5191 = vmatprep.mubr.msk.bf16.mxu0 %vm5538_vm1, %v5537_v0  ;;  %v3945_v24 = vshrl.u32 %v5509_v2, 16 }
 0x15d   : > { %5195 = vmatprep.subr.bf16.mxu0 %v5537_v0  ;;  %5215 = vmatprep.mubr.msk.bf16.mxu1 %vm5538_vm1, %v5537_v0 }
 0x15e   : > { %5219 = vmatprep.subr.bf16.mxu1 %v5537_v0  ;;  %v3950_v54 = vor.u32 %v3949_v40, %v3945_v24 }
 0x166   : > { %5192 = vmatmul.mubr.msk.bf16.vlgmr.msra.gmra.mrb[28].mxu0 %vm371_vm3, %v5509_v2 }
 0x167   : > { %5196 = vmatpush3.bf16.msra.mxu0 %v5657_v30  ;;  %5216 = vmatmul.mubr.msk.bf16.vlgmr.msra.gmra.mrb[28].mxu1 %vm371_vm3, %v5510_v19 }
 0x168   : > { %5220 = vmatpush3.bf16.msra.mxu1 %v5657_v30  ;;  %5197 = vmatprep.mubr.msk.bf16.mxu0 %vm5538_vm1, %v5537_v0  ;;  %v3954_v30 = vrot.slane %v3952_v41, 1 }
 0x169   : > { %v1573_v47 = vpop.f32.mrb[8].mxu0  ;;  %5221 = vmatprep.mubr.msk.bf16.mxu1 %vm5538_vm1, %v5537_v0 }
 0x16a   : > { %v1582_v48 = vmul.f32 %v5934_v43, %v1573_v47  ;;  %v1815_v49 = vpop.f32.mrb[8].mxu1  ;;  %v4959_v50 = vpop.f32.mrb[9].mxu0  ;;  %v3955_v5 = vsel %vm353_vm2, %v3950_v54, %v3954_v30 }
 0x16b   : > { %v1824_v51 = vmul.f32 %v5934_v43, %v1815_v49  ;;  %v4983_v52 = vpop.f32.mrb[9].mxu1  ;;  %v1576_v53 = vpop.f32.mrb[10].mxu0 }
 0x16c   : > { %v1584_v55 = vadd.f32 %v5945_v45, %v1582_v48  ;;  %v1583_v56 = vmul.f32 %v5934_v43, %v1576_v53  ;;  %v1818_v57 = vpop.f32.mrb[10].mxu1  ;;  %v4960_v58 = vpop.f32.mrb[11].mxu0 }
 0x16d   : > { %v1826_v0 = vadd.f32 %v5945_v45, %v1824_v51  ;;  %v1825_v61 = vmul.f32 %v5934_v43, %v1818_v57  ;;  %v4984_v62 = vpop.f32.mrb[11].mxu1 }
 0x16e   : > { %v1586_v63 = vmax.f32 %v1584_v55, 0.0  ;;  %v1585_v1 = vadd.f32 %v5945_v45, %v1583_v56 }
 0x16f   : > { %v1828_v3 = vmax.f32 %v1826_v0, 0.0  ;;  %v1827_v4 = vadd.f32 %v5945_v45, %v1825_v61 }
 0x170   : > { %v4689_v6 = vpack.c.bf16 %v1586_v63, %v1586_v63  ;;  %v1587_v7 = vmax.f32 %v1585_v1, 0.0 }
 0x171   : > { %v4691_v9 = vpack.c.bf16 %v1828_v3, %v1828_v3  ;;  %v1829_v10 = vmax.f32 %v1827_v4, 0.0 }
 0x172   : > { %4481 = vst.msk [vmem:[%s5969_s23 + $0x20] sm:$0xf] %vm628_vm4, %v4689_v6  ;;  %v4690_v11 = vpack.c.bf16 %v1587_v7, %v1587_v7  ;;  %5198 = vmatmul.mubr.msk.bf16.vlgmr.msra.gmra.mrb[28].mxu0 %vm371_vm3, %v3955_v5 }
 0x173   : > { %4499 = vst.msk [vmem:[%s5969_s23 + $0x28] sm:$0xf] %vm628_vm4, %v4691_v9  ;;  %v4692_v12 = vpack.c.bf16 %v1829_v10, %v1829_v10  ;;  %5222 = vmatmul.mubr.msk.bf16.vlgmr.msra.gmra.mrb[28].mxu1 %vm371_vm3, %v4196_v8 }
 0x174   : > { %4482 = vst.msk [vmem:[%s5969_s23 + $0x24] sm:$0xf] %vm628_vm4, %v4690_v11 }
 0x175   : > { %4500 = vst.msk [vmem:[%s5969_s23 + $0x2c] sm:$0xf] %vm628_vm4, %v4692_v12 }
 0x195   : > { %v2057_v13 = vpop.f32.mrb[12].mxu0 }
 0x196   : > { %v2066_v14 = vmul.f32 %v5934_v43, %v2057_v13  ;;  %v2299_v15 = vpop.f32.mrb[12].mxu1  ;;  %v5007_v16 = vpop.f32.mrb[13].mxu0 }
 0x197   : > { %v2308_v17 = vmul.f32 %v5934_v43, %v2299_v15  ;;  %v5031_v18 = vpop.f32.mrb[13].mxu1  ;;  %v2060_v20 = vpop.f32.mrb[14].mxu0 }
 0x198   : > { %v2068_v21 = vadd.f32 %v5945_v45, %v2066_v14  ;;  %v2067_v22 = vmul.f32 %v5934_v43, %v2060_v20  ;;  %v2302_v23 = vpop.f32.mrb[14].mxu1  ;;  %v5008_v25 = vpop.f32.mrb[15].mxu0 }
 0x199   : > { %v2310_v26 = vadd.f32 %v5945_v45, %v2308_v17  ;;  %v2309_v27 = vmul.f32 %v5934_v43, %v2302_v23  ;;  %v5032_v28 = vpop.f32.mrb[15].mxu1 }
 0x19a   : > { %v2070_v29 = vmax.f32 %v2068_v21, 0.0  ;;  %v2069_v31 = vadd.f32 %v5945_v45, %v2067_v22 }
 0x19b   : > { %v2312_v32 = vmax.f32 %v2310_v26, 0.0  ;;  %v2311_v33 = vadd.f32 %v5945_v45, %v2309_v27 }
 0x19c   : > { %v4693_v34 = vpack.c.bf16 %v2070_v29, %v2070_v29  ;;  %v2071_v35 = vmax.f32 %v2069_v31, 0.0 }
 0x19d   : > { %v4695_v2 = vpack.c.bf16 %v2312_v32, %v2312_v32  ;;  %v2313_v19 = vmax.f32 %v2311_v33, 0.0 }
 0x19e   : > { %4517 = vst.msk [vmem:[%s5969_s23 + $0x30] sm:$0xf] %vm628_vm4, %v4693_v34  ;;  %v4694_v36 = vpack.c.bf16 %v2071_v35, %v2071_v35 }
 0x19f   : > { %4535 = vst.msk [vmem:[%s5969_s23 + $0x38] sm:$0xf] %vm628_vm4, %v4695_v2  ;;  %v4696_v37 = vpack.c.bf16 %v2313_v19, %v2313_v19 }
 0x1a0   : > { %4518 = vst.msk [vmem:[%s5969_s23 + $0x34] sm:$0xf] %vm628_vm4, %v4694_v36 }
 0x1a1   : > { %4536 = vst.msk [vmem:[%s5969_s23 + $0x3c] sm:$0xf] %vm628_vm4, %v4696_v37 }
 0x1c1   : > { %v2541_v38 = vpop.f32.mrb[16].mxu0 }
 0x1c2   : > { %v2550_v39 = vmul.f32 %v5934_v43, %v2541_v38  ;;  %v2783_v24 = vpop.f32.mrb[16].mxu1  ;;  %v5055_v40 = vpop.f32.mrb[17].mxu0 }
 0x1c3   : > { %v2792_v41 = vmul.f32 %v5934_v43, %v2783_v24  ;;  %v5079_v42 = vpop.f32.mrb[17].mxu1  ;;  %v2544_v44 = vpop.f32.mrb[18].mxu0 }
 0x1c4   : > { %v2552_v46 = vadd.f32 %v5945_v45, %v2550_v39  ;;  %v2551_v47 = vmul.f32 %v5934_v43, %v2544_v44  ;;  %v2786_v48 = vpop.f32.mrb[18].mxu1  ;;  %v5056_v49 = vpop.f32.mrb[19].mxu0 }
 0x1c5   : > { %v2794_v50 = vadd.f32 %v5945_v45, %v2792_v41  ;;  %v2793_v51 = vmul.f32 %v5934_v43, %v2786_v48  ;;  %v5080_v52 = vpop.f32.mrb[19].mxu1 }
 0x1c6   : > { %v2554_v53 = vmax.f32 %v2552_v46, 0.0  ;;  %v2553_v54 = vadd.f32 %v5945_v45, %v2551_v47 }
 0x1c7   : > { %v2796_v30 = vmax.f32 %v2794_v50, 0.0  ;;  %v2795_v55 = vadd.f32 %v5945_v45, %v2793_v51 }
 0x1c8   : > { %v4697_v56 = vpack.c.bf16 %v2554_v53, %v2554_v53  ;;  %v2555_v57 = vmax.f32 %v2553_v54, 0.0 }
 0x1c9   : > { %v4699_v58 = vpack.c.bf16 %v2796_v30, %v2796_v30  ;;  %v2797_v59 = vmax.f32 %v2795_v55, 0.0 }
 0x1ca   : > { %4553 = vst.msk [vmem:[%s5969_s23 + $0x40] sm:$0xf] %vm628_vm4, %v4697_v56  ;;  %v4698_v60 = vpack.c.bf16 %v2555_v57, %v2555_v57 }
 0x1cb   : > { %4571 = vst.msk [vmem:[%s5969_s23 + $0x48] sm:$0xf] %vm628_vm4, %v4699_v58  ;;  %v4700_v0 = vpack.c.bf16 %v2797_v59, %v2797_v59 }
 0x1cc   : > { %4554 = vst.msk [vmem:[%s5969_s23 + $0x44] sm:$0xf] %vm628_vm4, %v4698_v60 }
 0x1cd   : > { %4572 = vst.msk [vmem:[%s5969_s23 + $0x4c] sm:$0xf] %vm628_vm4, %v4700_v0 }
 0x1ed   : > { %v3025_v61 = vpop.f32.mrb[20].mxu0 }
 0x1ee   : > { %v3034_v62 = vmul.f32 %v5934_v43, %v3025_v61  ;;  %v3267_v63 = vpop.f32.mrb[20].mxu1  ;;  %v5103_v1 = vpop.f32.mrb[21].mxu0 }
 0x1ef   : > { %v3276_v3 = vmul.f32 %v5934_v43, %v3267_v63  ;;  %v5127_v4 = vpop.f32.mrb[21].mxu1  ;;  %v3028_v5 = vpop.f32.mrb[22].mxu0 }
 0x1f0   : > { %v3036_v6 = vadd.f32 %v5945_v45, %v3034_v62  ;;  %v3035_v7 = vmul.f32 %v5934_v43, %v3028_v5  ;;  %v3270_v8 = vpop.f32.mrb[22].mxu1  ;;  %v5104_v9 = vpop.f32.mrb[23].mxu0 }
 0x1f1   : > { %v3278_v10 = vadd.f32 %v5945_v45, %v3276_v3  ;;  %v3277_v11 = vmul.f32 %v5934_v43, %v3270_v8  ;;  %v5128_v12 = vpop.f32.mrb[23].mxu1 }
 0x1f2   : > { %v3038_v13 = vmax.f32 %v3036_v6, 0.0  ;;  %v3037_v14 = vadd.f32 %v5945_v45, %v3035_v7 }
 0x1f3   : > { %v3280_v15 = vmax.f32 %v3278_v10, 0.0  ;;  %v3279_v16 = vadd.f32 %v5945_v45, %v3277_v11 }
 0x1f4   : > { %v4701_v17 = vpack.c.bf16 %v3038_v13, %v3038_v13  ;;  %v3039_v18 = vmax.f32 %v3037_v14, 0.0 }
 0x1f5   : > { %v4703_v20 = vpack.c.bf16 %v3280_v15, %v3280_v15  ;;  %v3281_v21 = vmax.f32 %v3279_v16, 0.0 }
 0x1f6   : > { %4589 = vst.msk [vmem:[%s5969_s23 + $0x50] sm:$0xf] %vm628_vm4, %v4701_v17  ;;  %v4702_v22 = vpack.c.bf16 %v3039_v18, %v3039_v18 }
 0x1f7   : > { %4607 = vst.msk [vmem:[%s5969_s23 + $0x58] sm:$0xf] %vm628_vm4, %v4703_v20  ;;  %v4704_v23 = vpack.c.bf16 %v3281_v21, %v3281_v21 }
 0x1f8   : > { %4590 = vst.msk [vmem:[%s5969_s23 + $0x54] sm:$0xf] %vm628_vm4, %v4702_v22 }
 0x1f9   : > { %4608 = vst.msk [vmem:[%s5969_s23 + $0x5c] sm:$0xf] %vm628_vm4, %v4704_v23 }
 0x219   : > { %v3509_v25 = vpop.f32.mrb[24].mxu0 }
 0x21a   : > { %v3518_v26 = vmul.f32 %v5934_v43, %v3509_v25  ;;  %v3751_v27 = vpop.f32.mrb[24].mxu1  ;;  %v5151_v28 = vpop.f32.mrb[25].mxu0 }
 0x21b   : > { %v3760_v29 = vmul.f32 %v5934_v43, %v3751_v27  ;;  %v5175_v31 = vpop.f32.mrb[25].mxu1  ;;  %v3512_v32 = vpop.f32.mrb[26].mxu0 }
 0x21c   : > { %v3520_v33 = vadd.f32 %v5945_v45, %v3518_v26  ;;  %v3519_v34 = vmul.f32 %v5934_v43, %v3512_v32  ;;  %v3754_v35 = vpop.f32.mrb[26].mxu1  ;;  %v5152_v2 = vpop.f32.mrb[27].mxu0 }
 0x21d   : > { %v3762_v19 = vadd.f32 %v5945_v45, %v3760_v29  ;;  %v3761_v36 = vmul.f32 %v5934_v43, %v3754_v35  ;;  %v5176_v37 = vpop.f32.mrb[27].mxu1 }
 0x21e   : > { %v3522_v38 = vmax.f32 %v3520_v33, 0.0  ;;  %v3521_v39 = vadd.f32 %v5945_v45, %v3519_v34 }
 0x21f   : > { %v3764_v24 = vmax.f32 %v3762_v19, 0.0  ;;  %v3763_v40 = vadd.f32 %v5945_v45, %v3761_v36 }
 0x220   : > { %v4705_v41 = vpack.c.bf16 %v3522_v38, %v3522_v38  ;;  %v3523_v42 = vmax.f32 %v3521_v39, 0.0 }
 0x221   : > { %v4707_v44 = vpack.c.bf16 %v3764_v24, %v3764_v24  ;;  %v3765_v46 = vmax.f32 %v3763_v40, 0.0 }
 0x222   : > { %4625 = vst.msk [vmem:[%s5969_s23 + $0x60] sm:$0xf] %vm628_vm4, %v4705_v41  ;;  %v4706_v47 = vpack.c.bf16 %v3523_v42, %v3523_v42 }
 0x223   : > { %4643 = vst.msk [vmem:[%s5969_s23 + $0x68] sm:$0xf] %vm628_vm4, %v4707_v44  ;;  %v4708_v48 = vpack.c.bf16 %v3765_v46, %v3765_v46 }
 0x224   : > { %4626 = vst.msk [vmem:[%s5969_s23 + $0x64] sm:$0xf] %vm628_vm4, %v4706_v47 }
 0x225   : > { %4644 = vst.msk [vmem:[%s5969_s23 + $0x6c] sm:$0xf] %vm628_vm4, %v4708_v48 }
 0x245   : > { %v3993_v49 = vpop.f32.mrb[28].mxu0 }
 0x246   : > { %v4002_v50 = vmul.f32 %v5934_v43, %v3993_v49  ;;  %v4234_v51 = vpop.f32.mrb[28].mxu1  ;;  %v5199_v52 = vpop.f32.mrb[29].mxu0 }
 0x247   : > { %v4243_v53 = vmul.f32 %v5934_v43, %v4234_v51  ;;  %v5223_v54 = vpop.f32.mrb[29].mxu1  ;;  %v3996_v30 = vpop.f32.mrb[30].mxu0 }
 0x248   : > { %v4004_v55 = vadd.f32 %v5945_v45, %v4002_v50  ;;  %v4003_v56 = vmul.f32 %v5934_v43, %v3996_v30  ;;  %v4237_v57 = vpop.f32.mrb[30].mxu1  ;;  %v5200_v58 = vpop.f32.mrb[31].mxu0 }
 0x249   : > { %v4245_v59 = vadd.f32 %v5945_v45, %v4243_v53  ;;  %v4244_v60 = vmul.f32 %v5934_v43, %v4237_v57  ;;  %v5224_v0 = vpop.f32.mrb[31].mxu1 }
 0x24a   : > { %v4006_v61 = vmax.f32 %v4004_v55, 0.0  ;;  %v4005_v62 = vadd.f32 %v5945_v45, %v4003_v56 }
 0x24b   : > { %v4247_v63 = vmax.f32 %v4245_v59, 0.0  ;;  %v4246_v1 = vadd.f32 %v5945_v45, %v4244_v60 }
 0x24c   : > { %v4709_v3 = vpack.c.bf16 %v4006_v61, %v4006_v61  ;;  %v4007_v4 = vmax.f32 %v4005_v62, 0.0 }
 0x24d   : > { %v4711_v5 = vpack.c.bf16 %v4247_v63, %v4247_v63  ;;  %v4248_v6 = vmax.f32 %v4246_v1, 0.0 }
 0x24e   : > { %4661 = vst.msk [vmem:[%s5969_s23 + $0x70] sm:$0xf] %vm628_vm4, %v4709_v3  ;;  %v4710_v7 = vpack.c.bf16 %v4007_v4, %v4007_v4 }
 0x24f   : > { %4676 = vst.msk [vmem:[%s5969_s23 + $0x78] sm:$0xf] %vm628_vm4, %v4711_v5  ;;  %v4712_v8 = vpack.c.bf16 %v4248_v6, %v4248_v6 }
 0x250   : > { %4662 = vst.msk [vmem:[%s5969_s23 + $0x74] sm:$0xf] %vm628_vm4, %v4710_v7 }
 0x251   : > { %4677 = vst.msk [vmem:[%s5969_s23 + $0x7c] sm:$0xf] %vm628_vm4, %v4712_v8 }
 0x252 PF: > { %s15_s20 = sadd.s32 1, %s5535_s20   ;;  %s6220_s18 = smov %s5531_s19 }
 0x253   : > { %p12_p5 = scmp.ge.s32.totalorder %s15_s20, 4   ;;  %s6221_s19 = smov %s6223_s21 }
 0x255   :  { %14 = sbr.rel (!%p12_p5) target bundleno = 2 (0x2), region = 106 }

// kernel: segformer_forward.11
= control target key start
LH: loop header
LB: loop body
LE: loop exit
PB: predicated region body
PF: predicated region fallthrough
CT: control target
= control target key end

     0   :  { %s2865_s18 = smov 0   ;;  %s2867_s19 = smov 0   ;;  %s3246_s0 = inlined_call_operand.vmem [shape: bf16[2,9,9,32], index: 0, kind: input, shape index: {}]   ;;  %s3247_s1 = inlined_call_operand.vmem [shape: bf16[2,1,1,9,32], index: 1, kind: input, shape index: {}]   ;;  %s3248_s2 = inlined_call_operand.vmem [shape: bf16[4,32,16], index: 2, kind: input, shape index: {}]   ;;  %s3249_s3 = inlined_call_operand.vmem [shape: f32[1,16], index: 3, kind: input, shape index: {}]   ;;  %s3250_s4 = inlined_call_operand.vmem [shape: f32[1,16], index: 4, kind: input, shape index: {}]   ;;  %s3251_s5 = inlined_call_operand.vmem [shape: bf16[2,8,8,16], index: 5, kind: output, shape index: {}]  }
   0x1   :  { %s2869_s20 = smov 0  }
   0x2 LB: > { %s27_s21 = sadd.s32 1, %s2827_s19  ;;  %p2195_p0 = scmp.ge.s32.totalorder %s2831_s20, 1  ;;  %s2831_s20 = sphi %s2869_s20, %s15_s20   ;;  %s2827_s19 = sphi %s2867_s19, %s3253_s19   ;;  %s2823_s18 = sphi %s2865_s18, %s3252_s18  }
   0x3   : > { %p29_p1 = scmp.ge.s32.totalorder %s27_s21, 2  ;;  %p235_p2 = scmp.lt.s32.totalorder %s2831_s20, 3 }
   0x5   : > { %s3255_s21 = smov (%p29_p1, %s27_s21), 0  ;;  %p236_p3 = pnand %p2195_p0, %p235_p2 }
   0x6   : > { %v2886_v0 = vld [vmem:[%s3248_s2 + $0x10] sm:$0xff] (!%p236_p3)   ;;  %v2833_v1 = vmov (!%p236_p3), 0.0   ;;  %v2895_v2 = vld [vmem:[%s3248_s2 + $0x18] sm:$0xff] (!%p236_p3)   ;;  %p292_p4 = scmp.lt.s32.totalorder (!%p236_p3), %s2823_s18, 1  ;;  %vm2834_vm0 = vmmov (!%p236_p3), 0   ;;  %vm374_vm1 = vcmask (!%p236_p3), 261120  }
   0x7   : > { %239 = sbr.rel (%p236_p3) target bundleno = 417 (0x1a1), region = 40  ;;  %2406 = vmatprep.subr.bf16.mxu0 (!%p236_p3), %v2833_v1  ;;  %2438 = vmatprep.subr.bf16.mxu1 (!%p236_p3), %v2833_v1  ;;  %v2922_v14 = vld [vmem:[%s3248_s2] sm:$0xff] (!%p236_p3)   ;;  %v2930_v18 = vld [vmem:[%s3248_s2 + $0x8] sm:$0xff] (!%p236_p3)   ;;  %v2974_v26 = vld [vmem:[%s3248_s2 + $0x30] sm:$0xff] (!%p236_p3)   ;;  %vm616_vm2 = vcmask (!%p236_p3), 125952  }
   0x8   : > { %2407 = vmatpush3.bf16.msra.mxu0 (!%p236_p3), %v2886_v0  ;;  %2439 = vmatpush3.bf16.msra.mxu1 (!%p236_p3), %v2886_v0  ;;  %v2946_v19 = vld [vmem:[%s3248_s2 + $0x20] sm:$0xff] (!%p236_p3)   ;;  %v2954_v20 = vld [vmem:[%s3248_s2 + $0x28] sm:$0xff] (!%p236_p3)   ;;  %v2982_v30 = vld [vmem:[%s3248_s2 + $0x38] sm:$0xff] (!%p236_p3)  }
   0x9   : > { %2408 = vmatprep.subr.bf16.mxu0 (!%p236_p3), %v2833_v1  ;;  %2440 = vmatprep.subr.bf16.mxu1 (!%p236_p3), %v2833_v1 }
   0xa   : > { %2410 = vmatprep.mubr.msk.bf16.mxu0 (!%p236_p3), %vm2834_vm0, %v2833_v1  ;;  %2442 = vmatprep.mubr.msk.bf16.mxu1 (!%p236_p3), %vm2834_vm0, %v2833_v1 }
   0xc   : > { %2409 = vmatpush3.bf16.msra.mxu0 (!%p236_p3), %v2895_v2  ;;  %2441 = vmatpush3.bf16.msra.mxu1 (!%p236_p3), %v2895_v2 }
   0xd   : > { %2414 = vmatprep.subr.bf16.mxu0 (!%p236_p3), %v2833_v1  ;;  %2446 = vmatprep.subr.bf16.mxu1 (!%p236_p3), %v2833_v1 }
   0xe   : > { %s3257_s18 = smov (!%p292_p4, %s2823_s18), 1 }
   0xf   : > { %s2758_s26 = smul.u32 72, %s3257_s18  ;;  %s2308_s17 = sshll.u32 %s3257_s18, 3 }
  0x10   : > { %s315_s24 = scalar_lea.vmem %s3247_s1, %s2308_s17 }
  0x11   : > { %s2913_s29 = scalar_lea.vmem %s3246_s0, %s2758_s26 }
  0x12   : > { %v348_v3 = vld [vmem:[%s2913_s29] sm:$0xf]  ;;  %v349_v4 = vld [vmem:[%s2913_s29 + $0x4] sm:$0x1]  ;;  %v2231_v5 = vld [vmem:[%s2913_s29 + $0x8] sm:$0xf] }
  0x13   : > { %v2213_v6 = vcombine.low %v348_v3, %v349_v4  ;;  %v2232_v7 = vld [vmem:[%s2913_s29 + $0xc] sm:$0x1]  ;;  %v2237_v22 = vld [vmem:[%s2913_s29 + $0x14] sm:$0x1]  ;;  %v2220_v23 = vld [vmem:[%s2913_s29 + $0x8] sm:$0xf] }
  0x14   : > { %v2233_v8 = vcombine.low %v2231_v5, %v2232_v7  ;;  %v2221_v21 = vld [vmem:[%s2913_s29 + $0xc] sm:$0x1]  ;;  %v2236_v25 = vld [vmem:[%s2913_s29 + $0x10] sm:$0xf]  ;;  %v2243_v32 = vld [vmem:[%s2913_s29 + $0x14] sm:$0x1] }
  0x15   : > { %v356_v9 = vshrl.u32 %v2213_v6, 16  ;;  %v358_v10 = vshll.u32 %v2213_v6, 16  ;;  %v2225_v24 = vcombine.low %v2220_v23, %v2221_v21  ;;  %v2239_v27 = vcombine.low %v2236_v25, %v2237_v22  ;;  %v2242_v31 = vld [vmem:[%s2913_s29 + $0x10] sm:$0xf]  ;;  %v2253_v33 = vld [vmem:[%s2913_s29 + $0x18] sm:$0xf] }
  0x16   : > { %v626_v11 = vshrl.u32 %v2233_v8, 16  ;;  %v628_v12 = vshll.u32 %v2233_v8, 16  ;;  %v2254_v34 = vld [vmem:[%s2913_s29 + $0x1c] sm:$0x1]  ;;  %v2244_v37 = vcombine.low %v2242_v31, %v2243_v32  ;;  %v2259_v52 = vld [vmem:[%s2913_s29 + $0x24] sm:$0x1] }
  0x17   : > { %v360_v13 = vrot.slane %v358_v10, 1  ;;  %v540_v28 = vshll.u32 %v2225_v24, 16  ;;  %v773_v29 = vshll.u32 %v2239_v27, 16  ;;  %v538_v35 = vshrl.u32 %v2225_v24, 16  ;;  %v2248_v51 = vld [vmem:[%s2913_s29 + $0x1c] sm:$0x1] }
  0x18   : > { %v630_v15 = vrot.slane %v628_v12, 1  ;;  %v771_v38 = vshrl.u32 %v2239_v27, 16  ;;  %v2255_v40 = vcombine.low %v2253_v33, %v2254_v34  ;;  %v837_v42 = vshll.u32 %v2244_v37, 16  ;;  %v2247_v53 = vld [vmem:[%s2913_s29 + $0x18] sm:$0xf] }
  0x19   : > { %v361_v16 = vor.u32 %v360_v13, %v356_v9  ;;  %v542_v36 = vrot.slane %v540_v28, 1  ;;  %v775_v39 = vrot.slane %v773_v29, 1  ;;  %v835_v45 = vshrl.u32 %v2244_v37, 16  ;;  %v2258_v55 = vld [vmem:[%s2913_s29 + $0x20] sm:$0xf] }
  0x1a   : > { %v631_v17 = vor.u32 %v630_v15, %v626_v11  ;;  %v1046_v44 = vshll.u32 %v2255_v40, 16  ;;  %v839_v46 = vrot.slane %v837_v42, 1  ;;  %v1044_v47 = vshrl.u32 %v2255_v40, 16  ;;  %v2264_v59 = vld [vmem:[%s2913_s29 + $0x20] sm:$0xf] }
  0x1b   : > { %2411 = vmatmul.mubr.msk.bf16.vlgmr.msra.gmra.mrb[0].mxu0 %vm374_vm1, %v361_v16  ;;  %v543_v41 = vor.u32 %v542_v36, %v538_v35  ;;  %v776_v43 = vor.u32 %v775_v39, %v771_v38  ;;  %v2250_v54 = vcombine.low %v2247_v53, %v2248_v51  ;;  %v2261_v56 = vcombine.low %v2258_v55, %v2259_v52  ;;  %v2265_v60 = vld [vmem:[%s2913_s29 + $0x24] sm:$0x1]  ;;  %v2275_v61 = vld [vmem:[%s2913_s29 + $0x28] sm:$0xf]  ;;  %v2276_v62 = vld [vmem:[%s2913_s29 + $0x2c] sm:$0x1] }
  0x1c   : > { %2415 = vmatpush3.bf16.msra.mxu0 %v2922_v14  ;;  %2443 = vmatmul.mubr.msk.bf16.vlgmr.msra.gmra.mrb[0].mxu1 %vm374_vm1, %v631_v17  ;;  %v1048_v48 = vrot.slane %v1046_v44, 1  ;;  %v840_v49 = vor.u32 %v839_v46, %v835_v45  ;;  %v2266_v4 = vcombine.low %v2264_v59, %v2265_v60  ;;  %v2277_v7 = vcombine.low %v2275_v61, %v2276_v62  ;;  %v2270_v22 = vld [vmem:[%s2913_s29 + $0x2c] sm:$0x1]  ;;  %v2269_v24 = vld [vmem:[%s2913_s29 + $0x28] sm:$0xf] }
  0x1d   : > { %2447 = vmatpush3.bf16.msra.mxu1 %v2922_v14  ;;  %2416 = vmatprep.subr.bf16.mxu0 %v2833_v1  ;;  %v982_v57 = vshll.u32 %v2250_v54, 16  ;;  %v1191_v58 = vshll.u32 %v2261_v56, 16  ;;  %v980_v63 = vshrl.u32 %v2250_v54, 16  ;;  %v2280_v27 = vld [vmem:[%s2913_s29 + $0x30] sm:$0xf] }
  0x1e   : > { %2448 = vmatprep.subr.bf16.mxu1 %v2833_v1  ;;  %2418 = vmatprep.mubr.msk.bf16.mxu0 %vm2834_vm0, %v2833_v1  ;;  %v1049_v50 = vor.u32 %v1048_v48, %v1044_v47  ;;  %v1255_v9 = vshll.u32 %v2266_v4, 16  ;;  %v1464_v11 = vshll.u32 %v2277_v7, 16  ;;  %v1253_v12 = vshrl.u32 %v2266_v4, 16  ;;  %v2286_v32 = vld [vmem:[%s2913_s29 + $0x30] sm:$0xf] }
  0x1f   : > { %2450 = vmatprep.mubr.msk.bf16.mxu1 %vm2834_vm0, %v2833_v1  ;;  %v1193_v6 = vrot.slane %v1191_v58, 1  ;;  %v1462_v15 = vshrl.u32 %v2277_v7, 16  ;;  %v2297_v34 = vld [vmem:[%s2913_s29 + $0x38] sm:$0xf]  ;;  %v2298_v35 = vld [vmem:[%s2913_s29 + $0x3c] sm:$0x1] }
  0x20   : > { %2417 = vmatpush3.bf16.msra.mxu0 %v2930_v18  ;;  %v1257_v13 = vrot.slane %v1255_v9, 1  ;;  %v1466_v16 = vrot.slane %v1464_v11, 1 }
  0x21   : > { %2449 = vmatpush3.bf16.msra.mxu1 %v2930_v18  ;;  %2422 = vmatprep.subr.bf16.mxu0 %v2833_v1 }
  0x22   : > { %2454 = vmatprep.subr.bf16.mxu1 %v2833_v1  ;;  %v1258_v17 = vor.u32 %v1257_v13, %v1253_v12  ;;  %v1467_v21 = vor.u32 %v1466_v16, %v1462_v15 }
  0x27   : > { %2419 = vmatmul.mubr.msk.bf16.vlgmr.msra.gmra.mrb[0].mxu0 %vm374_vm1, %v348_v3  ;;  %v984_v3 = vrot.slane %v982_v57, 1 }
  0x28   : > { %2423 = vmatpush3.bf16.msra.mxu0 %v2946_v19  ;;  %2451 = vmatmul.mubr.msk.bf16.vlgmr.msra.gmra.mrb[0].mxu1 %vm374_vm1, %v2231_v5  ;;  %v1189_v5 = vshrl.u32 %v2261_v56, 16 }
  0x29   : > { %2455 = vmatpush3.bf16.msra.mxu1 %v2946_v19  ;;  %2424 = vmatprep.subr.bf16.mxu0 %v2833_v1  ;;  %v985_v8 = vor.u32 %v984_v3, %v980_v63 }
  0x2a   : > { %2456 = vmatprep.subr.bf16.mxu1 %v2833_v1  ;;  %2426 = vmatprep.mubr.msk.bf16.mxu0 %vm2834_vm0, %v2833_v1  ;;  %v1194_v10 = vor.u32 %v1193_v6, %v1189_v5 }
  0x2b   : > { %2458 = vmatprep.mubr.msk.bf16.mxu1 %vm2834_vm0, %v2833_v1 }
  0x2c   : > { %2425 = vmatpush3.bf16.msra.mxu0 %v2954_v20 }
  0x2d   : > { %2457 = vmatpush3.bf16.msra.mxu1 %v2954_v20  ;;  %2430 = vmatprep.subr.bf16.mxu0 %v2833_v1 }
  0x2e   : > { %2462 = vmatprep.subr.bf16.mxu1 %v2833_v1 }
  0x33   : > { %2427 = vmatmul.mubr.msk.bf16.vlgmr.msra.gmra.mrb[0].mxu0 %vm374_vm1, %v2220_v23  ;;  %v2281_v23 = vld [vmem:[%s2913_s29 + $0x34] sm:$0x1] }
  0x34   : > { %2431 = vmatpush3.bf16.msra.mxu0 %v2974_v26  ;;  %2459 = vmatmul.mubr.msk.bf16.vlgmr.msra.gmra.mrb[0].mxu1 %vm374_vm1, %v2236_v25  ;;  %v2272_v25 = vcombine.low %v2269_v24, %v2270_v22  ;;  %v2283_v28 = vcombine.low %v2280_v27, %v2281_v23 }
  0x35   : > { %2463 = vmatpush3.bf16.msra.mxu1 %v2974_v26  ;;  %2432 = vmatprep.subr.bf16.mxu0 %v2833_v1 }
  0x36   : > { %2464 = vmatprep.subr.bf16.mxu1 %v2833_v1  ;;  %2434 = vmatprep.mubr.msk.bf16.mxu0 %vm2834_vm0, %v2833_v1  ;;  %v1400_v29 = vshll.u32 %v2272_v25, 16  ;;  %v1398_v36 = vshrl.u32 %v2272_v25, 16  ;;  %v1607_v39 = vshrl.u32 %v2283_v28, 16 }
  0x37   : > { %2466 = vmatprep.mubr.msk.bf16.mxu1 %vm2834_vm0, %v2833_v1 }
  0x38   : > { %2433 = vmatpush3.bf16.msra.mxu0 %v2982_v30  ;;  %v1402_v37 = vrot.slane %v1400_v29, 1 }
  0x39   : > { %2465 = vmatpush3.bf16.msra.mxu1 %v2982_v30  ;;  %2470 = vmatprep.subr.bf16.mxu0 %v2833_v1 }
  0x3a   : > { %2502 = vmatprep.subr.bf16.mxu1 %v2833_v1  ;;  %v1403_v42 = vor.u32 %v1402_v37, %v1398_v36 }
  0x3f   : > { %2435 = vmatmul.mubr.msk.bf16.vlgmr.msra.gmra.mrb[0].mxu0 %vm374_vm1, %v543_v41  ;;  %v2299_v41 = vcombine.low %v2297_v34, %v2298_v35 }
  0x40   : > { %2467 = vmatmul.mubr.msk.bf16.vlgmr.msra.gmra.mrb[0].mxu1 %vm374_vm1, %v776_v43  ;;  %2471 = vmatpush3.bf16.msra.mxu0 %v2886_v0 }
  0x41   : > { %2503 = vmatpush3.bf16.msra.mxu1 %v2886_v0  ;;  %2472 = vmatprep.subr.bf16.mxu0 %v2833_v1  ;;  %v1882_v45 = vshll.u32 %v2299_v41, 16  ;;  %v1880_v48 = vshrl.u32 %v2299_v41, 16 }
  0x42   : > { %2504 = vmatprep.subr.bf16.mxu1 %v2833_v1  ;;  %2474 = vmatprep.mubr.msk.bf16.mxu0 %vm2834_vm0, %v2833_v1 }
  0x43   : > { %2506 = vmatprep.mubr.msk.bf16.mxu1 %vm2834_vm0, %v2833_v1 }
  0x44   : > { %2473 = vmatpush3.bf16.msra.mxu0 %v2895_v2 }
  0x45   : > { %2505 = vmatpush3.bf16.msra.mxu1 %v2895_v2  ;;  %2478 = vmatprep.subr.bf16.mxu0 %v2833_v1 }
  0x46   : > { %2510 = vmatprep.subr.bf16.mxu1 %v2833_v1 }
  0x47   : > { %2475 = vmatmul.mubr.msk.bf16.vlgmr.msra.gmra.mrb[4].mxu0 %vm374_vm1, %v840_v49  ;;  %v1884_v49 = vrot.slane %v1882_v45, 1 }
  0x48   : > { %2479 = vmatpush3.bf16.msra.mxu0 %v2922_v14  ;;  %2507 = vmatmul.mubr.msk.bf16.vlgmr.msra.gmra.mrb[4].mxu1 %vm374_vm1, %v1049_v50 }
  0x49   : > { %2511 = vmatpush3.bf16.msra.mxu1 %v2922_v14  ;;  %2480 = vmatprep.subr.bf16.mxu0 %v2833_v1  ;;  %v1885_v51 = vor.u32 %v1884_v49, %v1880_v48 }
  0x4a   : > { %2512 = vmatprep.subr.bf16.mxu1 %v2833_v1  ;;  %2482 = vmatprep.mubr.msk.bf16.mxu0 %vm2834_vm0, %v2833_v1 }
  0x4b   : > { %2514 = vmatprep.mubr.msk.bf16.mxu1 %vm2834_vm0, %v2833_v1 }
  0x4c   : > { %2481 = vmatpush3.bf16.msra.mxu0 %v2930_v18 }
  0x4d   : > { %2513 = vmatpush3.bf16.msra.mxu1 %v2930_v18  ;;  %2486 = vmatprep.subr.bf16.mxu0 %v2833_v1 }
  0x4e   : > { %2518 = vmatprep.subr.bf16.mxu1 %v2833_v1 }
  0x53   : > { %2483 = vmatmul.mubr.msk.bf16.vlgmr.msra.gmra.mrb[4].mxu0 %vm374_vm1, %v2242_v31  ;;  %v1609_v31 = vshll.u32 %v2283_v28, 16 }
  0x54   : > { %2487 = vmatpush3.bf16.msra.mxu0 %v2946_v19  ;;  %2515 = vmatmul.mubr.msk.bf16.vlgmr.msra.gmra.mrb[4].mxu1 %vm374_vm1, %v2253_v33  ;;  %v2287_v33 = vld [vmem:[%s2913_s29 + $0x34] sm:$0x1] }
  0x55   : > { %2519 = vmatpush3.bf16.msra.mxu1 %v2946_v19  ;;  %2488 = vmatprep.subr.bf16.mxu0 %v2833_v1  ;;  %v2288_v38 = vcombine.low %v2286_v32, %v2287_v33  ;;  %v1611_v40 = vrot.slane %v1609_v31, 1 }
  0x56   : > { %2520 = vmatprep.subr.bf16.mxu1 %v2833_v1  ;;  %2490 = vmatprep.mubr.msk.bf16.mxu0 %vm2834_vm0, %v2833_v1 }
  0x57   : > { %2522 = vmatprep.mubr.msk.bf16.mxu1 %vm2834_vm0, %v2833_v1  ;;  %v1673_v43 = vshll.u32 %v2288_v38, 16  ;;  %v1612_v44 = vor.u32 %v1611_v40, %v1607_v39  ;;  %v1671_v46 = vshrl.u32 %v2288_v38, 16 }
  0x58   : > { %2489 = vmatpush3.bf16.msra.mxu0 %v2954_v20 }
  0x59   : > { %2521 = vmatpush3.bf16.msra.mxu1 %v2954_v20  ;;  %2494 = vmatprep.subr.bf16.mxu0 %v2833_v1  ;;  %v1675_v47 = vrot.slane %v1673_v43, 1 }
  0x5a   : > { %2526 = vmatprep.subr.bf16.mxu1 %v2833_v1 }
  0x5b   : > { %v1676_v50 = vor.u32 %v1675_v47, %v1671_v46 }
  0x5f   : > { %2491 = vmatmul.mubr.msk.bf16.vlgmr.msra.gmra.mrb[4].mxu0 %vm374_vm1, %v2247_v53 }
  0x60   : > { %2495 = vmatpush3.bf16.msra.mxu0 %v2974_v26  ;;  %2523 = vmatmul.mubr.msk.bf16.vlgmr.msra.gmra.mrb[4].mxu1 %vm374_vm1, %v2258_v55 }
  0x61   : > { %2527 = vmatpush3.bf16.msra.mxu1 %v2974_v26  ;;  %2496 = vmatprep.subr.bf16.mxu0 %v2833_v1 }
  0x62   : > { %2528 = vmatprep.subr.bf16.mxu1 %v2833_v1  ;;  %2498 = vmatprep.mubr.msk.bf16.mxu0 %vm2834_vm0, %v2833_v1 }
  0x63   : > { %2530 = vmatprep.mubr.msk.bf16.mxu1 %vm2834_vm0, %v2833_v1 }
  0x64   : > { %2497 = vmatpush3.bf16.msra.mxu0 %v2982_v30 }
  0x65   : > { %2529 = vmatpush3.bf16.msra.mxu1 %v2982_v30  ;;  %2534 = vmatprep.subr.bf16.mxu0 %v2833_v1 }
  0x66   : > { %2566 = vmatprep.subr.bf16.mxu1 %v2833_v1 }
  0x6b   : > { %2499 = vmatmul.mubr.msk.bf16.vlgmr.msra.gmra.mrb[4].mxu0 %vm374_vm1, %v985_v8 }
  0x6c   : > { %2531 = vmatmul.mubr.msk.bf16.vlgmr.msra.gmra.mrb[4].mxu1 %vm374_vm1, %v1194_v10  ;;  %2535 = vmatpush3.bf16.msra.mxu0 %v2886_v0 }
  0x6d   : > { %2567 = vmatpush3.bf16.msra.mxu1 %v2886_v0  ;;  %2536 = vmatprep.subr.bf16.mxu0 %v2833_v1 }
  0x6e   : > { %2568 = vmatprep.subr.bf16.mxu1 %v2833_v1  ;;  %2538 = vmatprep.mubr.msk.bf16.mxu0 %vm2834_vm0, %v2833_v1 }
  0x6f   : > { %2570 = vmatprep.mubr.msk.bf16.mxu1 %vm2834_vm0, %v2833_v1 }
  0x70   : > { %2537 = vmatpush3.bf16.msra.mxu0 %v2895_v2 }
  0x71   : > { %2569 = vmatpush3.bf16.msra.mxu1 %v2895_v2  ;;  %2542 = vmatprep.subr.bf16.mxu0 %v2833_v1 }
  0x72   : > { %2574 = vmatprep.subr.bf16.mxu1 %v2833_v1 }
  0x73   : > { %2539 = vmatmul.mubr.msk.bf16.vlgmr.msra.gmra.mrb[8].mxu0 %vm374_vm1, %v1258_v17 }
  0x74   : > { %2543 = vmatpush3.bf16.msra.mxu0 %v2922_v14  ;;  %2571 = vmatmul.mubr.msk.bf16.vlgmr.msra.gmra.mrb[8].mxu1 %vm374_vm1, %v1467_v21 }
  0x75   : > { %2575 = vmatpush3.bf16.msra.mxu1 %v2922_v14  ;;  %2544 = vmatprep.subr.bf16.mxu0 %v2833_v1 }
  0x76   : > { %2576 = vmatprep.subr.bf16.mxu1 %v2833_v1  ;;  %2546 = vmatprep.mubr.msk.bf16.mxu0 %vm2834_vm0, %v2833_v1 }
  0x77   : > { %2578 = vmatprep.mubr.msk.bf16.mxu1 %vm2834_vm0, %v2833_v1 }
  0x78   : > { %2545 = vmatpush3.bf16.msra.mxu0 %v2930_v18 }
  0x79   : > { %2577 = vmatpush3.bf16.msra.mxu1 %v2930_v18  ;;  %2550 = vmatprep.subr.bf16.mxu0 %v2833_v1 }
  0x7a   : > { %2582 = vmatprep.subr.bf16.mxu1 %v2833_v1 }
  0x7f   : > { %2547 = vmatmul.mubr.msk.bf16.vlgmr.msra.gmra.mrb[8].mxu0 %vm374_vm1, %v2264_v59  ;;  %v3192_v59 = vld [vmem:[%s3249_s3] ss:$0 sm:$0xff] }
  0x80   : > { %2551 = vmatpush3.bf16.msra.mxu0 %v2946_v19  ;;  %2579 = vmatmul.mubr.msk.bf16.vlgmr.msra.gmra.mrb[8].mxu1 %vm374_vm1, %v2275_v61 }
  0x81   : > { %2583 = vmatpush3.bf16.msra.mxu1 %v2946_v19  ;;  %2552 = vmatprep.subr.bf16.mxu0 %v2833_v1 }
  0x82   : > { %2584 = vmatprep.subr.bf16.mxu1 %v2833_v1  ;;  %2554 = vmatprep.mubr.msk.bf16.mxu0 %vm2834_vm0, %v2833_v1 }
  0x83   : > { %2586 = vmatprep.mubr.msk.bf16.mxu1 %vm2834_vm0, %v2833_v1 }
  0x84   : > { %2553 = vmatpush3.bf16.msra.mxu0 %v2954_v20 }
  0x85   : > { %2585 = vmatpush3.bf16.msra.mxu1 %v2954_v20  ;;  %2558 = vmatprep.subr.bf16.mxu0 %v2833_v1 }
  0x86   : > { %2590 = vmatprep.subr.bf16.mxu1 %v2833_v1 }
  0x8b   : > { %2555 = vmatmul.mubr.msk.bf16.vlgmr.msra.gmra.mrb[8].mxu0 %vm374_vm1, %v2269_v24 }
  0x8c   : > { %2559 = vmatpush3.bf16.msra.mxu0 %v2974_v26  ;;  %2587 = vmatmul.mubr.msk.bf16.vlgmr.msra.gmra.mrb[8].mxu1 %vm374_vm1, %v2280_v27 }
  0x8d   : > { %2591 = vmatpush3.bf16.msra.mxu1 %v2974_v26  ;;  %2560 = vmatprep.subr.bf16.mxu0 %v2833_v1 }
  0x8e   : > { %2592 = vmatprep.subr.bf16.mxu1 %v2833_v1  ;;  %2562 = vmatprep.mubr.msk.bf16.mxu0 %vm2834_vm0, %v2833_v1 }
  0x8f   : > { %2594 = vmatprep.mubr.msk.bf16.mxu1 %vm2834_vm0, %v2833_v1 }
  0x90   : > { %2561 = vmatpush3.bf16.msra.mxu0 %v2982_v30 }
  0x91   : > { %2593 = vmatpush3.bf16.msra.mxu1 %v2982_v30  ;;  %2598 = vmatprep.subr.bf16.mxu0 %v2833_v1 }
  0x92   : > { %2630 = vmatprep.subr.bf16.mxu1 %v2833_v1 }
  0x97   : > { %2563 = vmatmul.mubr.msk.bf16.vlgmr.msra.gmra.mrb[8].mxu0 %vm374_vm1, %v1403_v42 }
  0x98   : > { %2595 = vmatmul.mubr.msk.bf16.vlgmr.msra.gmra.mrb[8].mxu1 %vm374_vm1, %v1612_v44  ;;  %2599 = vmatpush3.bf16.msra.mxu0 %v2886_v0 }
  0x99   : > { %2631 = vmatpush3.bf16.msra.mxu1 %v2886_v0  ;;  %2600 = vmatprep.subr.bf16.mxu0 %v2833_v1  ;;  %v2292_v0 = vld [vmem:[%s2913_s29 + $0x3c] sm:$0x1] }
  0x9a   : > { %2632 = vmatprep.subr.bf16.mxu1 %v2833_v1  ;;  %2602 = vmatprep.mubr.msk.bf16.mxu0 %vm2834_vm0, %v2833_v1 }
  0x9b   : > { %2634 = vmatprep.mubr.msk.bf16.mxu1 %vm2834_vm0, %v2833_v1 }
  0x9c   : > { %2601 = vmatpush3.bf16.msra.mxu0 %v2895_v2 }
  0x9d   : > { %2633 = vmatpush3.bf16.msra.mxu1 %v2895_v2  ;;  %2606 = vmatprep.subr.bf16.mxu0 %v2833_v1  ;;  %v1973_v2 = vld [vmem:[%s315_s24 + $0x4] sm:$0x1] }
  0x9e   : > { %2638 = vmatprep.subr.bf16.mxu1 %v2833_v1 }
  0x9f   : > { %2603 = vmatmul.mubr.msk.bf16.vlgmr.msra.gmra.mrb[12].mxu0 %vm374_vm1, %v1676_v50 }
  0xa0   : > { %2607 = vmatpush3.bf16.msra.mxu0 %v2922_v14  ;;  %2635 = vmatmul.mubr.msk.bf16.vlgmr.msra.gmra.mrb[12].mxu1 %vm374_vm1, %v1885_v51 }
  0xa1   : > { %2639 = vmatpush3.bf16.msra.mxu1 %v2922_v14  ;;  %2608 = vmatprep.subr.bf16.mxu0 %v2833_v1  ;;  %v2291_v14 = vld [vmem:[%s2913_s29 + $0x38] sm:$0xf]  ;;  %s2309_s29 = sshll.u32 %s3257_s18, 5 }
  0xa2   : > { %2640 = vmatprep.subr.bf16.mxu1 %v2833_v1  ;;  %2610 = vmatprep.mubr.msk.bf16.mxu0 %vm2834_vm0, %v2833_v1  ;;  %s3207_s7 = scalar_lea.vmem %s3251_s5, %s2309_s29 }
  0xa3   : > { %2642 = vmatprep.mubr.msk.bf16.mxu1 %vm2834_vm0, %v2833_v1 }
  0xa4   : > { %2609 = vmatpush3.bf16.msra.mxu0 %v2930_v18 }
  0xa5   : > { %2641 = vmatpush3.bf16.msra.mxu1 %v2930_v18  ;;  %2614 = vmatprep.subr.bf16.mxu0 %v2833_v1  ;;  %v2294_v18 = vcombine.low %v2291_v14, %v2292_v0 }
  0xa6   : > { %2646 = vmatprep.subr.bf16.mxu1 %v2833_v1 }
  0xa7   : > { %v1818_v53 = vshll.u32 %v2294_v18, 16 }
  0xa9   : > { %v1820_v55 = vrot.slane %v1818_v53, 1 }
  0xab   : > { %2611 = vmatmul.mubr.msk.bf16.vlgmr.msra.gmra.mrb[12].mxu0 %vm374_vm1, %v2286_v32 }
  0xac   : > { %2615 = vmatpush3.bf16.msra.mxu0 %v2946_v19  ;;  %2643 = vmatmul.mubr.msk.bf16.vlgmr.msra.gmra.mrb[12].mxu1 %vm374_vm1, %v2297_v34 }
  0xad   : > { %2647 = vmatpush3.bf16.msra.mxu1 %v2946_v19  ;;  %2616 = vmatprep.subr.bf16.mxu0 %v2833_v1  ;;  %v1972_v19 = vld [vmem:[%s315_s24] sm:$0xf] }
  0xae   : > { %2648 = vmatprep.subr.bf16.mxu1 %v2833_v1  ;;  %2618 = vmatprep.mubr.msk.bf16.mxu0 %vm2834_vm0, %v2833_v1  ;;  %v2303_v52 = vcombine.low %v1972_v19, %v1973_v2 }
  0xaf   : > { %2650 = vmatprep.mubr.msk.bf16.mxu1 %vm2834_vm0, %v2833_v1 }
  0xb0   : > { %2617 = vmatpush3.bf16.msra.mxu0 %v2954_v20  ;;  %v2026_v54 = vshll.u32 %v2303_v52, 16  ;;  %v2024_v56 = vshrl.u32 %v2303_v52, 16 }
  0xb1   : > { %2649 = vmatpush3.bf16.msra.mxu1 %v2954_v20  ;;  %2622 = vmatprep.subr.bf16.mxu0 %v2833_v1  ;;  %v1816_v20 = vshrl.u32 %v2294_v18, 16 }
  0xb2   : > { %2654 = vmatprep.subr.bf16.mxu1 %v2833_v1  ;;  %v2028_v57 = vrot.slane %v2026_v54, 1 }
  0xb4   : > { %v2029_v58 = vor.u32 %v2028_v57, %v2024_v56 }
  0xb7   : > { %2619 = vmatmul.mubr.msk.bf16.vlgmr.msra.gmra.mrb[12].mxu0 %vm374_vm1, %v2291_v14 }
  0xb8   : > { %2623 = vmatpush3.bf16.msra.mxu0 %v2974_v26  ;;  %2651 = vmatmul.mubr.msk.bf16.vlgmr.msra.gmra.mrb[12].mxu1 %vm374_vm1, %v1972_v19 }
  0xb9   : > { %2655 = vmatpush3.bf16.msra.mxu1 %v2974_v26  ;;  %2624 = vmatprep.subr.bf16.mxu0 %v2833_v1  ;;  %v1821_v26 = vor.u32 %v1820_v55, %v1816_v20 }
  0xba   : > { %2656 = vmatprep.subr.bf16.mxu1 %v2833_v1  ;;  %2626 = vmatprep.mubr.msk.bf16.mxu0 %vm2834_vm0, %v2833_v1 }
  0xbb   : > { %2658 = vmatprep.mubr.msk.bf16.mxu1 %vm2834_vm0, %v2833_v1  ;;  %v3197_v1 = vld [vmem:[%s3250_s4] ss:$0 sm:$0xff] }
  0xbc   : > { %2625 = vmatpush3.bf16.msra.mxu0 %v2982_v30 }
  0xbd   : > { %2657 = vmatpush3.bf16.msra.mxu1 %v2982_v30 }
  0xc3   : > { %2627 = vmatmul.mubr.msk.bf16.vlgmr.msra.gmra.mrb[12].mxu0 %vm374_vm1, %v1821_v26 }
  0xc4   : > { %2659 = vmatmul.mubr.msk.bf16.vlgmr.msra.gmra.mrb[12].mxu1 %vm374_vm1, %v2029_v58 }
 0x112   : > { %v593_v60 = vpop.f32.mrb[0].mxu0 }
 0x113   : > { %v606_v61 = vmul.f32 %v3192_v59, %v593_v60  ;;  %v814_v30 = vpop.f32.mrb[0].mxu1  ;;  %v2436_v62 = vpop.f32.mrb[1].mxu0 }
 0x114   : > { %v821_v63 = vmul.f32 %v3192_v59, %v814_v30  ;;  %v2468_v3 = vpop.f32.mrb[1].mxu1  ;;  %v596_v4 = vpop.f32.mrb[2].mxu0 }
 0x115   : > { %v613_v5 = vadd.f32 %v3197_v1, %v606_v61  ;;  %v817_v6 = vpop.f32.mrb[2].mxu1  ;;  %v2437_v7 = vpop.f32.mrb[3].mxu0 }
 0x116   : > { %v822_v8 = vadd.f32 %v3197_v1, %v821_v63  ;;  %v2469_v9 = vpop.f32.mrb[3].mxu1 }
 0x117   : > { %v614_v10 = vmax.f32 %v613_v5, 0.0 }
 0x118   : > { %v823_v11 = vmax.f32 %v822_v8, 0.0 }
 0x119   : > { %v615_v12 = vpack.c.bf16 %v614_v10, %v614_v10 }
 0x11a   : > { %v824_v13 = vpack.c.bf16 %v823_v11, %v823_v11 }
 0x11b   : > { %617 = vst.msk [vmem:[%s3207_s7] sm:$0xf] %vm616_vm2, %v615_v12 }
 0x11c   : > { %2241 = vst.msk [vmem:[%s3207_s7 + $0x4] sm:$0xf] %vm616_vm2, %v824_v13 }
 0x13e   : > { %v1023_v15 = vpop.f32.mrb[4].mxu0 }
 0x13f   : > { %v1030_v16 = vmul.f32 %v3192_v59, %v1023_v15  ;;  %v1232_v17 = vpop.f32.mrb[4].mxu1  ;;  %v2500_v21 = vpop.f32.mrb[5].mxu0 }
 0x140   : > { %v1239_v22 = vmul.f32 %v3192_v59, %v1232_v17  ;;  %v2532_v23 = vpop.f32.mrb[5].mxu1  ;;  %v1026_v24 = vpop.f32.mrb[6].mxu0 }
 0x141   : > { %v1031_v25 = vadd.f32 %v3197_v1, %v1030_v16  ;;  %v1235_v27 = vpop.f32.mrb[6].mxu1  ;;  %v2501_v28 = vpop.f32.mrb[7].mxu0 }
 0x142   : > { %v1240_v29 = vadd.f32 %v3197_v1, %v1239_v22  ;;  %v2533_v31 = vpop.f32.mrb[7].mxu1 }
 0x143   : > { %v1032_v32 = vmax.f32 %v1031_v25, 0.0 }
 0x144   : > { %v1241_v33 = vmax.f32 %v1240_v29, 0.0 }
 0x145   : > { %v1033_v34 = vpack.c.bf16 %v1032_v32, %v1032_v32 }
 0x146   : > { %v1242_v35 = vpack.c.bf16 %v1241_v33, %v1241_v33 }
 0x147   : > { %2252 = vst.msk [vmem:[%s3207_s7 + $0x8] sm:$0xf] %vm616_vm2, %v1033_v34 }
 0x148   : > { %2263 = vst.msk [vmem:[%s3207_s7 + $0xc] sm:$0xf] %vm616_vm2, %v1242_v35 }
 0x16a   : > { %v1441_v36 = vpop.f32.mrb[8].mxu0 }
 0x16b   : > { %v1448_v37 = vmul.f32 %v3192_v59, %v1441_v36  ;;  %v1650_v38 = vpop.f32.mrb[8].mxu1  ;;  %v2564_v39 = vpop.f32.mrb[9].mxu0 }
 0x16c   : > { %v1657_v40 = vmul.f32 %v3192_v59, %v1650_v38  ;;  %v2596_v41 = vpop.f32.mrb[9].mxu1  ;;  %v1444_v42 = vpop.f32.mrb[10].mxu0 }
 0x16d   : > { %v1449_v43 = vadd.f32 %v3197_v1, %v1448_v37  ;;  %v1653_v44 = vpop.f32.mrb[10].mxu1  ;;  %v2565_v45 = vpop.f32.mrb[11].mxu0 }
 0x16e   : > { %v1658_v46 = vadd.f32 %v3197_v1, %v1657_v40  ;;  %v2597_v47 = vpop.f32.mrb[11].mxu1 }
 0x16f   : > { %v1450_v48 = vmax.f32 %v1449_v43, 0.0 }
 0x170   : > { %v1659_v49 = vmax.f32 %v1658_v46, 0.0 }
 0x171   : > { %v1451_v50 = vpack.c.bf16 %v1450_v48, %v1450_v48 }
 0x172   : > { %v1660_v51 = vpack.c.bf16 %v1659_v49, %v1659_v49 }
 0x173   : > { %2274 = vst.msk [vmem:[%s3207_s7 + $0x10] sm:$0xf] %vm616_vm2, %v1451_v50 }
 0x174   : > { %2285 = vst.msk [vmem:[%s3207_s7 + $0x14] sm:$0xf] %vm616_vm2, %v1660_v51 }
 0x196   : > { %v1859_v0 = vpop.f32.mrb[12].mxu0 }
 0x197   : > { %v1866_v2 = vmul.f32 %v3192_v59, %v1859_v0  ;;  %v2067_v14 = vpop.f32.mrb[12].mxu1  ;;  %v2628_v18 = vpop.f32.mrb[13].mxu0 }
 0x198   : > { %v2074_v19 = vmul.f32 %v3192_v59, %v2067_v14  ;;  %v2660_v52 = vpop.f32.mrb[13].mxu1  ;;  %v1862_v53 = vpop.f32.mrb[14].mxu0 }
 0x199   : > { %v1867_v54 = vadd.f32 %v3197_v1, %v1866_v2  ;;  %v2070_v20 = vpop.f32.mrb[14].mxu1  ;;  %v2629_v55 = vpop.f32.mrb[15].mxu0 }
 0x19a   : > { %v2075_v56 = vadd.f32 %v3197_v1, %v2074_v19  ;;  %v2661_v57 = vpop.f32.mrb[15].mxu1 }
 0x19b   : > { %v1868_v26 = vmax.f32 %v1867_v54, 0.0 }
 0x19c   : > { %v2076_v58 = vmax.f32 %v2075_v56, 0.0 }
 0x19d   : > { %v1869_v60 = vpack.c.bf16 %v1868_v26, %v1868_v26 }
 0x19e   : > { %v2077_v61 = vpack.c.bf16 %v2076_v58, %v2076_v58 }
 0x19f   : > { %2296 = vst.msk [vmem:[%s3207_s7 + $0x18] sm:$0xf] %vm616_vm2, %v1869_v60 }
 0x1a0   : > { %2305 = vst.msk [vmem:[%s3207_s7 + $0x1c] sm:$0xf] %vm616_vm2, %v2077_v61 }
 0x1a1 PF: > { %s15_s20 = sadd.s32 1, %s2831_s20   ;;  %s3252_s18 = smov %s2827_s19 }
 0x1a2   : > { %p12_p5 = scmp.ge.s32.totalorder %s15_s20, 4   ;;  %s3253_s19 = smov %s3255_s21 }
 0x1a4   :  { %14 = sbr.rel (!%p12_p5) target bundleno = 2 (0x2), region = 90 }

// kernel: segformer_forward.12
= control target key start
LH: loop header
LB: loop body
LE: loop exit
PB: predicated region body
PF: predicated region fallthrough
CT: control target
= control target key end

     0   :  { %s1886_s18 = smov 0   ;;  %s1888_s19 = smov 0   ;;  %s2202_s0 = inlined_call_operand.vmem [shape: bf16[2,5,5,64], index: 0, kind: input, shape index: {}]   ;;  %s2203_s1 = inlined_call_operand.vmem [shape: bf16[2,1,1,5,64], index: 1, kind: input, shape index: {}]   ;;  %s2204_s2 = inlined_call_operand.vmem [shape: bf16[4,64,32], index: 2, kind: input, shape index: {}]   ;;  %s2205_s3 = inlined_call_operand.vmem [shape: f32[1,32], index: 3, kind: input, shape index: {}]   ;;  %s2206_s4 = inlined_call_operand.vmem [shape: f32[1,32], index: 4, kind: input, shape index: {}]   ;;  %s2207_s5 = inlined_call_operand.vmem [shape: bf16[2,4,4,32], index: 5, kind: output, shape index: {}]  }
   0x1   :  { %s1890_s20 = smov 0  }
   0x2 LB: > { %s27_s21 = sadd.s32 1, %s1848_s19  ;;  %p1376_p0 = scmp.ge.s32.totalorder %s1852_s20, 1  ;;  %s1852_s20 = sphi %s1890_s20, %s15_s20   ;;  %s1848_s19 = sphi %s1888_s19, %s2209_s19   ;;  %s1844_s18 = sphi %s1886_s18, %s2208_s18  }
   0x3   : > { %p29_p1 = scmp.ge.s32.totalorder %s27_s21, 2  ;;  %p230_p2 = scmp.lt.s32.totalorder %s1852_s20, 3 }
   0x5   : > { %s2211_s21 = smov (%p29_p1, %s27_s21), 0  ;;  %p231_p3 = pnand %p1376_p0, %p230_p2 }
   0x6   : > { %v1907_v0 = vld [vmem:[%s2204_s2 + $0x20] sm:$0xff] (!%p231_p3)   ;;  %v1854_v1 = vmov (!%p231_p3), 0.0   ;;  %v1916_v2 = vld [vmem:[%s2204_s2 + $0x28] sm:$0xff] (!%p231_p3)   ;;  %p282_p4 = scmp.lt.s32.totalorder (!%p231_p3), %s1844_s18, 1  ;;  %vm1855_vm0 = vmmov (!%p231_p3), 0   ;;  %v1931_v3 = vld [vmem:[%s2204_s2 + $0x30] sm:$0xff] (!%p231_p3)  }
   0x7   : > { %234 = sbr.rel (%p231_p3) target bundleno = 360 (0x168), region = 40  ;;  %1539 = vmatprep.subr.bf16.mxu0 (!%p231_p3), %v1854_v1  ;;  %1587 = vmatprep.subr.bf16.mxu1 (!%p231_p3), %v1854_v1  ;;  %v1948_v6 = vld [vmem:[%s2204_s2 + $0x38] sm:$0xff] (!%p231_p3)   ;;  %vm385_vm1 = vcmask (!%p231_p3), 523264   ;;  %v1959_v15 = vld [vmem:[%s2204_s2] sm:$0xff] (!%p231_p3)   ;;  %v1968_v18 = vld [vmem:[%s2204_s2 + $0x8] sm:$0xff] (!%p231_p3)   ;;  %vm660_vm2 = vcmask (!%p231_p3), 254976  }
   0x8   : > { %1540 = vmatpush3.bf16.msra.mxu0 (!%p231_p3), %v1907_v0  ;;  %1588 = vmatpush3.bf16.msra.mxu1 (!%p231_p3), %v1907_v0  ;;  %v1981_v19 = vld [vmem:[%s2204_s2 + $0x10] sm:$0xff] (!%p231_p3)   ;;  %v1990_v20 = vld [vmem:[%s2204_s2 + $0x18] sm:$0xff] (!%p231_p3)   ;;  %v1999_v21 = vld [vmem:[%s2204_s2 + $0x40] sm:$0xff] (!%p231_p3)  }
   0x9   : > { %1541 = vmatprep.subr.bf16.mxu0 (!%p231_p3), %v1854_v1  ;;  %1589 = vmatprep.subr.bf16.mxu1 (!%p231_p3), %v1854_v1  ;;  %v2010_v22 = vld [vmem:[%s2204_s2 + $0x48] sm:$0xff] (!%p231_p3)   ;;  %v2023_v23 = vld [vmem:[%s2204_s2 + $0x50] sm:$0xff] (!%p231_p3)   ;;  %v2032_v24 = vld [vmem:[%s2204_s2 + $0x58] sm:$0xff] (!%p231_p3)  }
   0xa   : > { %1547 = vmatprep.mubr.msk.bf16.mxu0 (!%p231_p3), %vm1855_vm0, %v1854_v1  ;;  %1595 = vmatprep.mubr.msk.bf16.mxu1 (!%p231_p3), %vm1855_vm0, %v1854_v1  ;;  %v2042_v26 = vld [vmem:[%s2204_s2 + $0x60] sm:$0xff] (!%p231_p3)   ;;  %v2054_v30 = vld [vmem:[%s2204_s2 + $0x68] sm:$0xff] (!%p231_p3)   ;;  %v2067_v33 = vld [vmem:[%s2204_s2 + $0x70] sm:$0xff] (!%p231_p3)  }
   0xb   : > { %v2076_v38 = vld [vmem:[%s2204_s2 + $0x78] sm:$0xff] (!%p231_p3)  }
   0xc   : > { %1542 = vmatpush3.bf16.msra.mxu0 (!%p231_p3), %v1916_v2  ;;  %1590 = vmatpush3.bf16.msra.mxu1 (!%p231_p3), %v1916_v2 }
   0xd   : > { %1543 = vmatprep.subr.bf16.mxu0 (!%p231_p3), %v1854_v1  ;;  %1591 = vmatprep.subr.bf16.mxu1 (!%p231_p3), %v1854_v1 }
   0xe   : > { %s2213_s18 = smov (!%p282_p4, %s1844_s18), 1 }
   0xf   : > { %s1779_s28 = smul.u32 20, %s2213_s18  ;;  %s1378_s13 = sshll.u32 %s2213_s18, 2 }
  0x10   : > { %1544 = vmatpush3.bf16.msra.mxu0 %v1931_v3  ;;  %1592 = vmatpush3.bf16.msra.mxu1 %v1931_v3  ;;  %s301_s16 = scalar_lea.vmem %s2203_s1, %s1378_s13  ;;  %s1458_s24 = sshll.u32 %s2213_s18, 3 }
  0x11   : > { %s1939_s6 = scalar_lea.vmem %s2202_s0, %s1779_s28  ;;  %1545 = vmatprep.subr.bf16.mxu0 %v1854_v1  ;;  %1593 = vmatprep.subr.bf16.mxu1 %v1854_v1  ;;  %v1165_v54 = vld [vmem:[%s301_s16] sm:$0x7]  ;;  %s310_s27 = scalar_lea.vmem %s2207_s5, %s1458_s24 }
  0x12   : > { %v350_v4 = vld [vmem:[%s1939_s6] sm:$0x7]  ;;  %v1430_v5 = vld [vmem:[%s1939_s6 + $0x4] sm:$0x7]  ;;  %v1434_v27 = vld [vmem:[%s1939_s6 + $0x8] sm:$0x7]  ;;  %v1453_v56 = vcombine.low %v1165_v54, %v1165_v54 }
  0x13   : > { %v1405_v7 = vcombine.low %v350_v4, %v350_v4  ;;  %v1431_v8 = vcombine.low %v1430_v5, %v1430_v5  ;;  %v1416_v25 = vld [vmem:[%s1939_s6 + $0x4] sm:$0x7]  ;;  %v1436_v29 = vcombine.low %v1434_v27, %v1434_v27  ;;  %v1439_v41 = vld [vmem:[%s1939_s6 + $0x8] sm:$0x7]  ;;  %v1448_v42 = vld [vmem:[%s1939_s6 + $0xc] sm:$0x7] }
  0x14   : > { %1546 = vmatpush3.bf16.msra.mxu0 %v1948_v6  ;;  %1594 = vmatpush3.bf16.msra.mxu1 %v1948_v6  ;;  %v1422_v28 = vcombine.low %v1416_v25, %v1416_v25  ;;  %v1440_v43 = vcombine.low %v1439_v41, %v1439_v41  ;;  %v1449_v44 = vcombine.low %v1448_v42, %v1448_v42  ;;  %v1443_v53 = vld [vmem:[%s1939_s6 + $0xc] sm:$0x7]  ;;  %v1216_v58 = vshll.u32 %v1453_v56, 16 }
  0x15   : > { %v355_v9 = vshrl.u32 %v1405_v7, 16  ;;  %v357_v10 = vshll.u32 %v1405_v7, 16  ;;  %v667_v11 = vshrl.u32 %v1431_v8, 16  ;;  %v669_v12 = vshll.u32 %v1431_v8, 16  ;;  %1551 = vmatprep.subr.bf16.mxu0 %v1854_v1  ;;  %1599 = vmatprep.subr.bf16.mxu1 %v1854_v1 }
  0x16   : > { %v572_v31 = vshll.u32 %v1422_v28, 16  ;;  %v811_v32 = vshll.u32 %v1436_v29, 16  ;;  %v570_v34 = vshrl.u32 %v1422_v28, 16  ;;  %v809_v36 = vshrl.u32 %v1436_v29, 16 }
  0x17   : > { %v359_v13 = vrot.slane %v357_v10, 1  ;;  %v671_v14 = vrot.slane %v669_v12, 1  ;;  %v872_v45 = vshll.u32 %v1440_v43, 16  ;;  %v1075_v46 = vshll.u32 %v1449_v44, 16 }
  0x18   : > { %v574_v35 = vrot.slane %v572_v31, 1  ;;  %v813_v37 = vrot.slane %v811_v32, 1  ;;  %v870_v47 = vshrl.u32 %v1440_v43, 16  ;;  %v1073_v49 = vshrl.u32 %v1449_v44, 16 }
  0x19   : > { %v360_v16 = vor.u32 %v359_v13, %v355_v9  ;;  %v672_v17 = vor.u32 %v671_v14, %v667_v11  ;;  %v874_v48 = vrot.slane %v872_v45, 1  ;;  %v1077_v50 = vrot.slane %v1075_v46, 1 }
  0x1a   : > { %v575_v39 = vor.u32 %v574_v35, %v570_v34  ;;  %v814_v40 = vor.u32 %v813_v37, %v809_v36  ;;  %v1445_v55 = vcombine.low %v1443_v53, %v1443_v53  ;;  %v1214_v61 = vshrl.u32 %v1453_v56, 16 }
  0x1b   : > { %1548 = vmatmul.mubr.msk.bf16.vlgmr.msra.gmra.mrb[0].mxu0 %vm385_vm1, %v360_v16  ;;  %1596 = vmatmul.mubr.msk.bf16.vlgmr.msra.gmra.mrb[0].mxu1 %vm385_vm1, %v672_v17  ;;  %v875_v51 = vor.u32 %v874_v48, %v870_v47  ;;  %v1078_v52 = vor.u32 %v1077_v50, %v1073_v49  ;;  %v1218_v62 = vrot.slane %v1216_v58, 1 }
  0x1c   : > { %1552 = vmatpush3.bf16.msra.mxu0 %v1959_v15  ;;  %1600 = vmatpush3.bf16.msra.mxu1 %v1959_v15  ;;  %v1014_v57 = vshll.u32 %v1445_v55, 16  ;;  %v1012_v59 = vshrl.u32 %v1445_v55, 16 }
  0x1d   : > { %1553 = vmatprep.subr.bf16.mxu0 %v1854_v1  ;;  %1601 = vmatprep.subr.bf16.mxu1 %v1854_v1 }
  0x1e   : > { %1559 = vmatprep.mubr.msk.bf16.mxu0 %vm1855_vm0, %v1854_v1  ;;  %1607 = vmatprep.mubr.msk.bf16.mxu1 %vm1855_vm0, %v1854_v1  ;;  %v1016_v60 = vrot.slane %v1014_v57, 1 }
  0x20   : > { %1554 = vmatpush3.bf16.msra.mxu0 %v1968_v18  ;;  %1602 = vmatpush3.bf16.msra.mxu1 %v1968_v18  ;;  %v1017_v63 = vor.u32 %v1016_v60, %v1012_v59 }
  0x21   : > { %1555 = vmatprep.subr.bf16.mxu0 %v1854_v1  ;;  %1603 = vmatprep.subr.bf16.mxu1 %v1854_v1 }
  0x24   : > { %1556 = vmatpush3.bf16.msra.mxu0 %v1981_v19  ;;  %1604 = vmatpush3.bf16.msra.mxu1 %v1981_v19 }
  0x25   : > { %1557 = vmatprep.subr.bf16.mxu0 %v1854_v1  ;;  %1605 = vmatprep.subr.bf16.mxu1 %v1854_v1 }
  0x28   : > { %1558 = vmatpush3.bf16.msra.mxu0 %v1990_v20  ;;  %1606 = vmatpush3.bf16.msra.mxu1 %v1990_v20 }
  0x29   : > { %1563 = vmatprep.subr.bf16.mxu0 %v1854_v1  ;;  %1611 = vmatprep.subr.bf16.mxu1 %v1854_v1 }
  0x2b   : > { %1560 = vmatmul.mubr.msk.bf16.vlgmr.msra.gmra.mrb[0].mxu0 %vm385_vm1, %v350_v4  ;;  %1608 = vmatmul.mubr.msk.bf16.vlgmr.msra.gmra.mrb[0].mxu1 %vm385_vm1, %v1430_v5 }
  0x2c   : > { %1564 = vmatpush3.bf16.msra.mxu0 %v1999_v21  ;;  %1612 = vmatpush3.bf16.msra.mxu1 %v1999_v21 }
  0x2d   : > { %1565 = vmatprep.subr.bf16.mxu0 %v1854_v1  ;;  %1613 = vmatprep.subr.bf16.mxu1 %v1854_v1 }
  0x2e   : > { %1571 = vmatprep.mubr.msk.bf16.mxu0 %vm1855_vm0, %v1854_v1  ;;  %1619 = vmatprep.mubr.msk.bf16.mxu1 %vm1855_vm0, %v1854_v1 }
  0x30   : > { %1566 = vmatpush3.bf16.msra.mxu0 %v2010_v22  ;;  %1614 = vmatpush3.bf16.msra.mxu1 %v2010_v22 }
  0x31   : > { %1567 = vmatprep.subr.bf16.mxu0 %v1854_v1  ;;  %1615 = vmatprep.subr.bf16.mxu1 %v1854_v1 }
  0x34   : > { %1568 = vmatpush3.bf16.msra.mxu0 %v2023_v23  ;;  %1616 = vmatpush3.bf16.msra.mxu1 %v2023_v23 }
  0x35   : > { %1569 = vmatprep.subr.bf16.mxu0 %v1854_v1  ;;  %1617 = vmatprep.subr.bf16.mxu1 %v1854_v1 }
  0x38   : > { %1570 = vmatpush3.bf16.msra.mxu0 %v2032_v24  ;;  %1618 = vmatpush3.bf16.msra.mxu1 %v2032_v24 }
  0x39   : > { %1575 = vmatprep.subr.bf16.mxu0 %v1854_v1  ;;  %1623 = vmatprep.subr.bf16.mxu1 %v1854_v1 }
  0x3b   : > { %1572 = vmatmul.mubr.msk.bf16.vlgmr.msra.gmra.mrb[0].mxu0 %vm385_vm1, %v1416_v25  ;;  %1620 = vmatmul.mubr.msk.bf16.vlgmr.msra.gmra.mrb[0].mxu1 %vm385_vm1, %v1434_v27 }
  0x3c   : > { %1576 = vmatpush3.bf16.msra.mxu0 %v2042_v26  ;;  %1624 = vmatpush3.bf16.msra.mxu1 %v2042_v26 }
  0x3d   : > { %1577 = vmatprep.subr.bf16.mxu0 %v1854_v1  ;;  %1625 = vmatprep.subr.bf16.mxu1 %v1854_v1 }
  0x3e   : > { %1583 = vmatprep.mubr.msk.bf16.mxu0 %vm1855_vm0, %v1854_v1  ;;  %1631 = vmatprep.mubr.msk.bf16.mxu1 %vm1855_vm0, %v1854_v1 }
  0x40   : > { %1578 = vmatpush3.bf16.msra.mxu0 %v2054_v30  ;;  %1626 = vmatpush3.bf16.msra.mxu1 %v2054_v30 }
  0x41   : > { %1579 = vmatprep.subr.bf16.mxu0 %v1854_v1  ;;  %1627 = vmatprep.subr.bf16.mxu1 %v1854_v1 }
  0x44   : > { %1580 = vmatpush3.bf16.msra.mxu0 %v2067_v33  ;;  %1628 = vmatpush3.bf16.msra.mxu1 %v2067_v33 }
  0x45   : > { %1581 = vmatprep.subr.bf16.mxu0 %v1854_v1  ;;  %1629 = vmatprep.subr.bf16.mxu1 %v1854_v1 }
  0x48   : > { %1582 = vmatpush3.bf16.msra.mxu0 %v2076_v38  ;;  %1630 = vmatpush3.bf16.msra.mxu1 %v2076_v38 }
  0x49   : > { %1635 = vmatprep.subr.bf16.mxu0 %v1854_v1  ;;  %1683 = vmatprep.subr.bf16.mxu1 %v1854_v1 }
  0x4b   : > { %1584 = vmatmul.mubr.msk.bf16.vlgmr.msra.gmra.mrb[0].mxu0 %vm385_vm1, %v575_v39  ;;  %1632 = vmatmul.mubr.msk.bf16.vlgmr.msra.gmra.mrb[0].mxu1 %vm385_vm1, %v814_v40 }
  0x4c   : > { %1636 = vmatpush3.bf16.msra.mxu0 %v1907_v0  ;;  %1684 = vmatpush3.bf16.msra.mxu1 %v1907_v0  ;;  %v1219_v0 = vor.u32 %v1218_v62, %v1214_v61 }
  0x4d   : > { %1637 = vmatprep.subr.bf16.mxu0 %v1854_v1  ;;  %1685 = vmatprep.subr.bf16.mxu1 %v1854_v1 }
  0x4e   : > { %1643 = vmatprep.mubr.msk.bf16.mxu0 %vm1855_vm0, %v1854_v1  ;;  %1691 = vmatprep.mubr.msk.bf16.mxu1 %vm1855_vm0, %v1854_v1 }
  0x50   : > { %1638 = vmatpush3.bf16.msra.mxu0 %v1916_v2  ;;  %1686 = vmatpush3.bf16.msra.mxu1 %v1916_v2  ;;  %v1428_v2 = vld [vmem:[%s2205_s3] ss:$0 sm:$0xff] }
  0x51   : > { %1639 = vmatprep.subr.bf16.mxu0 %v1854_v1  ;;  %1687 = vmatprep.subr.bf16.mxu1 %v1854_v1 }
  0x54   : > { %1640 = vmatpush3.bf16.msra.mxu0 %v1931_v3  ;;  %1688 = vmatpush3.bf16.msra.mxu1 %v1931_v3  ;;  %v1429_v3 = vld [vmem:[%s2206_s4] ss:$0 sm:$0xff] }
  0x55   : > { %1641 = vmatprep.subr.bf16.mxu0 %v1854_v1  ;;  %1689 = vmatprep.subr.bf16.mxu1 %v1854_v1 }
  0x58   : > { %1642 = vmatpush3.bf16.msra.mxu0 %v1948_v6  ;;  %1690 = vmatpush3.bf16.msra.mxu1 %v1948_v6 }
  0x59   : > { %1647 = vmatprep.subr.bf16.mxu0 %v1854_v1  ;;  %1695 = vmatprep.subr.bf16.mxu1 %v1854_v1 }
  0x5b   : > { %1644 = vmatmul.mubr.msk.bf16.vlgmr.msra.gmra.mrb[4].mxu0 %vm385_vm1, %v875_v51  ;;  %1692 = vmatmul.mubr.msk.bf16.vlgmr.msra.gmra.mrb[4].mxu1 %vm385_vm1, %v1078_v52 }
  0x5c   : > { %1648 = vmatpush3.bf16.msra.mxu0 %v1959_v15  ;;  %1696 = vmatpush3.bf16.msra.mxu1 %v1959_v15 }
  0x5d   : > { %1649 = vmatprep.subr.bf16.mxu0 %v1854_v1  ;;  %1697 = vmatprep.subr.bf16.mxu1 %v1854_v1 }
  0x5e   : > { %1655 = vmatprep.mubr.msk.bf16.mxu0 %vm1855_vm0, %v1854_v1  ;;  %1703 = vmatprep.mubr.msk.bf16.mxu1 %vm1855_vm0, %v1854_v1 }
  0x60   : > { %1650 = vmatpush3.bf16.msra.mxu0 %v1968_v18  ;;  %1698 = vmatpush3.bf16.msra.mxu1 %v1968_v18 }
  0x61   : > { %1651 = vmatprep.subr.bf16.mxu0 %v1854_v1  ;;  %1699 = vmatprep.subr.bf16.mxu1 %v1854_v1 }
  0x64   : > { %1652 = vmatpush3.bf16.msra.mxu0 %v1981_v19  ;;  %1700 = vmatpush3.bf16.msra.mxu1 %v1981_v19 }
  0x65   : > { %1653 = vmatprep.subr.bf16.mxu0 %v1854_v1  ;;  %1701 = vmatprep.subr.bf16.mxu1 %v1854_v1 }
  0x68   : > { %1654 = vmatpush3.bf16.msra.mxu0 %v1990_v20  ;;  %1702 = vmatpush3.bf16.msra.mxu1 %v1990_v20 }
  0x69   : > { %1659 = vmatprep.subr.bf16.mxu0 %v1854_v1  ;;  %1707 = vmatprep.subr.bf16.mxu1 %v1854_v1 }
  0x6b   : > { %1656 = vmatmul.mubr.msk.bf16.vlgmr.msra.gmra.mrb[4].mxu0 %vm385_vm1, %v1439_v41  ;;  %1704 = vmatmul.mubr.msk.bf16.vlgmr.msra.gmra.mrb[4].mxu1 %vm385_vm1, %v1448_v42 }
  0x6c   : > { %1660 = vmatpush3.bf16.msra.mxu0 %v1999_v21  ;;  %1708 = vmatpush3.bf16.msra.mxu1 %v1999_v21 }
  0x6d   : > { %1661 = vmatprep.subr.bf16.mxu0 %v1854_v1  ;;  %1709 = vmatprep.subr.bf16.mxu1 %v1854_v1 }
  0x6e   : > { %1667 = vmatprep.mubr.msk.bf16.mxu0 %vm1855_vm0, %v1854_v1  ;;  %1715 = vmatprep.mubr.msk.bf16.mxu1 %vm1855_vm0, %v1854_v1 }
  0x70   : > { %1662 = vmatpush3.bf16.msra.mxu0 %v2010_v22  ;;  %1710 = vmatpush3.bf16.msra.mxu1 %v2010_v22 }
  0x71   : > { %1663 = vmatprep.subr.bf16.mxu0 %v1854_v1  ;;  %1711 = vmatprep.subr.bf16.mxu1 %v1854_v1 }
  0x74   : > { %1664 = vmatpush3.bf16.msra.mxu0 %v2023_v23  ;;  %1712 = vmatpush3.bf16.msra.mxu1 %v2023_v23 }
  0x75   : > { %1665 = vmatprep.subr.bf16.mxu0 %v1854_v1  ;;  %1713 = vmatprep.subr.bf16.mxu1 %v1854_v1 }
  0x78   : > { %1666 = vmatpush3.bf16.msra.mxu0 %v2032_v24  ;;  %1714 = vmatpush3.bf16.msra.mxu1 %v2032_v24 }
  0x79   : > { %1671 = vmatprep.subr.bf16.mxu0 %v1854_v1  ;;  %1719 = vmatprep.subr.bf16.mxu1 %v1854_v1 }
  0x7b   : > { %1668 = vmatmul.mubr.msk.bf16.vlgmr.msra.gmra.mrb[4].mxu0 %vm385_vm1, %v1443_v53  ;;  %1716 = vmatmul.mubr.msk.bf16.vlgmr.msra.gmra.mrb[4].mxu1 %vm385_vm1, %v1165_v54 }
  0x7c   : > { %1672 = vmatpush3.bf16.msra.mxu0 %v2042_v26  ;;  %1720 = vmatpush3.bf16.msra.mxu1 %v2042_v26 }
  0x7d   : > { %1673 = vmatprep.subr.bf16.mxu0 %v1854_v1  ;;  %1721 = vmatprep.subr.bf16.mxu1 %v1854_v1 }
  0x7e   : > { %1679 = vmatprep.mubr.msk.bf16.mxu0 %vm1855_vm0, %v1854_v1  ;;  %1727 = vmatprep.mubr.msk.bf16.mxu1 %vm1855_vm0, %v1854_v1 }
  0x80   : > { %1674 = vmatpush3.bf16.msra.mxu0 %v2054_v30  ;;  %1722 = vmatpush3.bf16.msra.mxu1 %v2054_v30 }
  0x81   : > { %1675 = vmatprep.subr.bf16.mxu0 %v1854_v1  ;;  %1723 = vmatprep.subr.bf16.mxu1 %v1854_v1 }
  0x84   : > { %1676 = vmatpush3.bf16.msra.mxu0 %v2067_v33  ;;  %1724 = vmatpush3.bf16.msra.mxu1 %v2067_v33 }
  0x85   : > { %1677 = vmatprep.subr.bf16.mxu0 %v1854_v1  ;;  %1725 = vmatprep.subr.bf16.mxu1 %v1854_v1 }
  0x88   : > { %1678 = vmatpush3.bf16.msra.mxu0 %v2076_v38  ;;  %1726 = vmatpush3.bf16.msra.mxu1 %v2076_v38 }
  0x8b   : > { %1680 = vmatmul.mubr.msk.bf16.vlgmr.msra.gmra.mrb[4].mxu0 %vm385_vm1, %v1017_v63  ;;  %1728 = vmatmul.mubr.msk.bf16.vlgmr.msra.gmra.mrb[4].mxu1 %vm385_vm1, %v1219_v0 }
 0x11e   : > { %v637_v1 = vpop.f32.mrb[0].mxu0  ;;  %v852_v4 = vpop.f32.mrb[0].mxu1 }
 0x11f   : > { %v650_v5 = vmul.f32 %v1428_v2, %v637_v1  ;;  %v859_v6 = vmul.f32 %v1428_v2, %v852_v4  ;;  %v1585_v7 = vpop.f32.mrb[1].mxu0  ;;  %v1633_v8 = vpop.f32.mrb[1].mxu1 }
 0x120   : > { %v640_v9 = vpop.f32.mrb[2].mxu0  ;;  %v855_v10 = vpop.f32.mrb[2].mxu1 }
 0x121   : > { %v657_v11 = vadd.f32 %v1429_v3, %v650_v5  ;;  %v860_v12 = vadd.f32 %v1429_v3, %v859_v6  ;;  %v1586_v13 = vpop.f32.mrb[3].mxu0  ;;  %v1634_v14 = vpop.f32.mrb[3].mxu1 }
 0x123   : > { %v658_v15 = vmax.f32 %v657_v11, 0.0  ;;  %v861_v16 = vmax.f32 %v860_v12, 0.0 }
 0x125   : > { %v659_v17 = vpack.c.bf16 %v658_v15, %v658_v15  ;;  %v862_v18 = vpack.c.bf16 %v861_v16, %v861_v16 }
 0x127   : > { %661 = vst.msk [vmem:[%s310_s27] sm:$0x3] %vm660_vm2, %v659_v17  ;;  %1438 = vst.msk [vmem:[%s310_s27 + $0x2] sm:$0x3] %vm660_vm2, %v862_v18 }
 0x15e   : > { %v1055_v19 = vpop.f32.mrb[4].mxu0  ;;  %v1257_v20 = vpop.f32.mrb[4].mxu1 }
 0x15f   : > { %v1062_v21 = vmul.f32 %v1428_v2, %v1055_v19  ;;  %v1264_v22 = vmul.f32 %v1428_v2, %v1257_v20  ;;  %v1681_v23 = vpop.f32.mrb[5].mxu0  ;;  %v1729_v24 = vpop.f32.mrb[5].mxu1 }
 0x160   : > { %v1058_v25 = vpop.f32.mrb[6].mxu0  ;;  %v1260_v26 = vpop.f32.mrb[6].mxu1 }
 0x161   : > { %v1063_v27 = vadd.f32 %v1429_v3, %v1062_v21  ;;  %v1265_v28 = vadd.f32 %v1429_v3, %v1264_v22  ;;  %v1682_v29 = vpop.f32.mrb[7].mxu0  ;;  %v1730_v30 = vpop.f32.mrb[7].mxu1 }
 0x163   : > { %v1064_v31 = vmax.f32 %v1063_v27, 0.0  ;;  %v1266_v32 = vmax.f32 %v1265_v28, 0.0 }
 0x165   : > { %v1065_v33 = vpack.c.bf16 %v1064_v31, %v1064_v31  ;;  %v1267_v34 = vpack.c.bf16 %v1266_v32, %v1266_v32 }
 0x167   : > { %1447 = vst.msk [vmem:[%s310_s27 + $0x4] sm:$0x3] %vm660_vm2, %v1065_v33  ;;  %1455 = vst.msk [vmem:[%s310_s27 + $0x6] sm:$0x3] %vm660_vm2, %v1267_v34 }
 0x168 PF: > { %s15_s20 = sadd.s32 1, %s1852_s20   ;;  %s2208_s18 = smov %s1848_s19 }
 0x169   : > { %p12_p5 = scmp.ge.s32.totalorder %s15_s20, 4   ;;  %s2209_s19 = smov %s2211_s21 }
 0x16b   :  { %14 = sbr.rel (!%p12_p5) target bundleno = 2 (0x2), region = 82 }

// kernel: segformer_forward.13
= control target key start
LH: loop header
LB: loop body
LE: loop exit
PB: predicated region body
PF: predicated region fallthrough
CT: control target
= control target key end

     0   :  { %s1553_s18 = smov 0   ;;  %s1555_s19 = smov 0   ;;  %s1808_s0 = inlined_call_operand.vmem [shape: bf16[2,3,3,128], index: 0, kind: input, shape index: {}]   ;;  %s1809_s1 = inlined_call_operand.vmem [shape: bf16[2,1,1,3,128], index: 1, kind: input, shape index: {}]   ;;  %s1810_s2 = inlined_call_operand.vmem [shape: bf16[4,128,64], index: 2, kind: input, shape index: {}]   ;;  %s1811_s3 = inlined_call_operand.vmem [shape: f32[1,64], index: 3, kind: input, shape index: {}]   ;;  %s1812_s4 = inlined_call_operand.vmem [shape: f32[1,64], index: 4, kind: input, shape index: {}]   ;;  %s1813_s5 = inlined_call_operand.vmem [shape: bf16[2,2,2,64], index: 5, kind: output, shape index: {}]  }
   0x1   :  { %s1557_s20 = smov 0  }
   0x2 LB: > { %s27_s21 = sadd.s32 1, %s1514_s19  ;;  %p1089_p0 = scmp.ge.s32.totalorder %s1518_s20, 1  ;;  %s1518_s20 = sphi %s1557_s20, %s15_s20   ;;  %s1514_s19 = sphi %s1555_s19, %s1815_s19   ;;  %s1510_s18 = sphi %s1553_s18, %s1814_s18  }
   0x3   : > { %p29_p1 = scmp.ge.s32.totalorder %s27_s21, 2  ;;  %p230_p2 = scmp.lt.s32.totalorder %s1518_s20, 3 }
   0x5   : > { %s1817_s21 = smov (%p29_p1, %s27_s21), 0  ;;  %p231_p3 = pnand %p1089_p0, %p230_p2 }
   0x6   : > { %v1464_v0 = vld [vmem:[%s1810_s2 + $0x40] sm:$0xff] (!%p231_p3)   ;;  %v1520_v1 = vmov (!%p231_p3), 0.0   ;;  %v1465_v2 = vld [vmem:[%s1810_s2 + $0x48] sm:$0xff] (!%p231_p3)   ;;  %p281_p4 = scmp.lt.s32.totalorder (!%p231_p3), %s1510_s18, 1  ;;  %vm1521_vm0 = vmmov (!%p231_p3), 0   ;;  %v385_v3 = vlaneseq (!%p231_p3)  ;;  %v1466_v4 = vld [vmem:[%s1810_s2 + $0x50] sm:$0xff] (!%p231_p3)  }
   0x7   : > { %234 = sbr.rel (%p231_p3) target bundleno = 356 (0x164), region = 40  ;;  %1252 = vmatprep.subr.bf16.mxu0 (!%p231_p3), %v1520_v1  ;;  %1332 = vmatprep.subr.bf16.mxu1 (!%p231_p3), %v1520_v1  ;;  %v1522_v5 = vmov (!%p231_p3), 1983009808   ;;  %v1467_v8 = vld [vmem:[%s1810_s2 + $0x58] sm:$0xff] (!%p231_p3)   ;;  %v1468_v10 = vld [vmem:[%s1810_s2 + $0x60] sm:$0xff] (!%p231_p3)   ;;  %v1469_v16 = vld [vmem:[%s1810_s2 + $0x68] sm:$0xff] (!%p231_p3)  }
   0x8   : > { %1253 = vmatpush3.bf16.msra.mxu0 (!%p231_p3), %v1464_v0  ;;  %1333 = vmatpush3.bf16.msra.mxu1 (!%p231_p3), %v1464_v0  ;;  %v383_v6 = vunpack.c.l.s4 (!%p231_p3), %v1522_v5  ;;  %v386_v7 = vshrl.u32 (!%p231_p3), %v385_v3, 7  ;;  %v1470_v19 = vld [vmem:[%s1810_s2 + $0x70] sm:$0xff] (!%p231_p3)   ;;  %v1471_v25 = vld [vmem:[%s1810_s2 + $0x78] sm:$0xff] (!%p231_p3)   ;;  %v1472_v31 = vld [vmem:[%s1810_s2] sm:$0xff] (!%p231_p3)   ;;  %vm785_vm1 = vcmask (!%p231_p3), 516096  }
   0x9   : > { %1254 = vmatprep.subr.bf16.mxu0 (!%p231_p3), %v1520_v1  ;;  %1334 = vmatprep.subr.bf16.mxu1 (!%p231_p3), %v1520_v1  ;;  %v1473_v32 = vld [vmem:[%s1810_s2 + $0x8] sm:$0xff] (!%p231_p3)   ;;  %v1474_v33 = vld [vmem:[%s1810_s2 + $0x10] sm:$0xff] (!%p231_p3)   ;;  %v1475_v34 = vld [vmem:[%s1810_s2 + $0x18] sm:$0xff] (!%p231_p3)  }
   0xa   : > { %1268 = vmatprep.mubr.msk.bf16.mxu0 (!%p231_p3), %vm1521_vm0, %v1520_v1  ;;  %1348 = vmatprep.mubr.msk.bf16.mxu1 (!%p231_p3), %vm1521_vm0, %v1520_v1  ;;  %v384_v9 = vunpack.c.0.s8 (!%p231_p3), %v383_v6  ;;  %v1476_v35 = vld [vmem:[%s1810_s2 + $0x20] sm:$0xff] (!%p231_p3)   ;;  %v1477_v36 = vld [vmem:[%s1810_s2 + $0x28] sm:$0xff] (!%p231_p3)   ;;  %v1478_v37 = vld [vmem:[%s1810_s2 + $0x30] sm:$0xff] (!%p231_p3)  }
   0xb   : > { %v1479_v38 = vld [vmem:[%s1810_s2 + $0x38] sm:$0xff] (!%p231_p3)   ;;  %v1480_v39 = vld [vmem:[%s1810_s2 + $0x80] sm:$0xff] (!%p231_p3)   ;;  %v1481_v40 = vld [vmem:[%s1810_s2 + $0x88] sm:$0xff] (!%p231_p3)  }
   0xc   : > { %1255 = vmatpush3.bf16.msra.mxu0 (!%p231_p3), %v1465_v2  ;;  %1335 = vmatpush3.bf16.msra.mxu1 (!%p231_p3), %v1465_v2  ;;  %v387_v12 = vsub.s32 (!%p231_p3), %v384_v9, %v386_v7  ;;  %v1482_v41 = vld [vmem:[%s1810_s2 + $0x90] sm:$0xff] (!%p231_p3)   ;;  %v1483_v42 = vld [vmem:[%s1810_s2 + $0x98] sm:$0xff] (!%p231_p3)   ;;  %v1484_v43 = vld [vmem:[%s1810_s2 + $0xa0] sm:$0xff] (!%p231_p3)  }
   0xd   : > { %1256 = vmatprep.subr.bf16.mxu0 (!%p231_p3), %v1520_v1  ;;  %1336 = vmatprep.subr.bf16.mxu1 (!%p231_p3), %v1520_v1  ;;  %v1485_v44 = vld [vmem:[%s1810_s2 + $0xa8] sm:$0xff] (!%p231_p3)   ;;  %v1486_v45 = vld [vmem:[%s1810_s2 + $0xb0] sm:$0xff] (!%p231_p3)   ;;  %v1487_v46 = vld [vmem:[%s1810_s2 + $0xb8] sm:$0xff] (!%p231_p3)  }
   0xe   : > { %s1819_s18 = smov (!%p281_p4, %s1510_s18), 1  ;;  %v1488_v47 = vld [vmem:[%s1810_s2 + $0xc0] sm:$0xff]   ;;  %v1489_v48 = vld [vmem:[%s1810_s2 + $0xc8] sm:$0xff]   ;;  %v1490_v49 = vld [vmem:[%s1810_s2 + $0xd0] sm:$0xff]  }
   0xf   : > { %s1436_s28 = smul.u32 6, %s1819_s18  ;;  %s1091_s13 = sshll.u32 %s1819_s18, 1  ;;  %v1491_v50 = vld [vmem:[%s1810_s2 + $0xd8] sm:$0xff]   ;;  %v1492_v51 = vld [vmem:[%s1810_s2 + $0xe0] sm:$0xff]   ;;  %v1493_v52 = vld [vmem:[%s1810_s2 + $0xe8] sm:$0xff]  }
  0x10   : > { %1257 = vmatpush3.bf16.msra.mxu0 %v1466_v4  ;;  %1337 = vmatpush3.bf16.msra.mxu1 %v1466_v4  ;;  %s300_s22 = scalar_lea.vmem %s1809_s1, %s1091_s13  ;;  %v1494_v55 = vld [vmem:[%s1810_s2 + $0xf0] sm:$0xff]   ;;  %v1495_v60 = vld [vmem:[%s1810_s2 + $0xf8] sm:$0xff]   ;;  %v1174_v63 = vld [vmem:[%s1811_s3] ss:$0 sm:$0xff]  ;;  %s308_s15 = scalar_lea.vmem %s1813_s5, %s1091_s13 }
  0x11   : > { %s1599_s8 = scalar_lea.vmem %s1808_s0, %s1436_s28  ;;  %1258 = vmatprep.subr.bf16.mxu0 %v1520_v1  ;;  %1338 = vmatprep.subr.bf16.mxu1 %v1520_v1  ;;  %v1643_v27 = vld [vmem:[%s300_s22] sm:$0x3] }
  0x12   : > { %v1607_v11 = vld [vmem:[%s1599_s8] sm:$0x3]  ;;  %v1610_v13 = vld [vmem:[%s1599_s8 + $0x2] sm:$0x3]  ;;  %v1646_v28 = vrot.slane %v1643_v27, %v387_v12 }
  0x13   : > { %v388_v14 = vrot.slane %v1607_v11, %v387_v12  ;;  %v795_v15 = vrot.slane %v1610_v13, %v387_v12  ;;  %v1633_v24 = vld [vmem:[%s1599_s8 + $0x2] sm:$0x3]  ;;  %v1175_v0 = vld [vmem:[%s1812_s4] ss:$0 sm:$0xff] }
  0x14   : > { %1259 = vmatpush3.bf16.msra.mxu0 %v1467_v8  ;;  %1339 = vmatpush3.bf16.msra.mxu1 %v1467_v8  ;;  %v1639_v26 = vrot.slane %v1633_v24, %v387_v12  ;;  %v937_v54 = vshll.u32 %v1646_v28, 16  ;;  %v935_v58 = vshrl.u32 %v1646_v28, 16 }
  0x15   : > { %1260 = vmatprep.subr.bf16.mxu0 %v1520_v1  ;;  %1340 = vmatprep.subr.bf16.mxu1 %v1520_v1  ;;  %v392_v17 = vshll.u32 %v388_v14, 16  ;;  %v799_v18 = vshll.u32 %v795_v15, 16  ;;  %v390_v20 = vshrl.u32 %v388_v14, 16  ;;  %v797_v21 = vshrl.u32 %v795_v15, 16 }
  0x16   : > { %v675_v53 = vshll.u32 %v1639_v26, 16  ;;  %v673_v56 = vshrl.u32 %v1639_v26, 16  ;;  %v939_v59 = vrot.slane %v937_v54, 1 }
  0x17   : > { %v394_v22 = vrot.slane %v392_v17, 1  ;;  %v801_v23 = vrot.slane %v799_v18, 1 }
  0x18   : > { %1261 = vmatpush3.bf16.msra.mxu0 %v1468_v10  ;;  %1341 = vmatpush3.bf16.msra.mxu1 %v1468_v10  ;;  %v677_v57 = vrot.slane %v675_v53, 1  ;;  %v940_v62 = vor.u32 %v939_v59, %v935_v58 }
  0x19   : > { %1262 = vmatprep.subr.bf16.mxu0 %v1520_v1  ;;  %1342 = vmatprep.subr.bf16.mxu1 %v1520_v1  ;;  %v395_v29 = vor.u32 %v394_v22, %v390_v20  ;;  %v802_v30 = vor.u32 %v801_v23, %v797_v21 }
  0x1a   : > { %v678_v61 = vor.u32 %v677_v57, %v673_v56 }
  0x1c   : > { %1263 = vmatpush3.bf16.msra.mxu0 %v1469_v16  ;;  %1343 = vmatpush3.bf16.msra.mxu1 %v1469_v16 }
  0x1d   : > { %1264 = vmatprep.subr.bf16.mxu0 %v1520_v1  ;;  %1344 = vmatprep.subr.bf16.mxu1 %v1520_v1 }
  0x20   : > { %1265 = vmatpush3.bf16.msra.mxu0 %v1470_v19  ;;  %1345 = vmatpush3.bf16.msra.mxu1 %v1470_v19 }
  0x21   : > { %1266 = vmatprep.subr.bf16.mxu0 %v1520_v1  ;;  %1346 = vmatprep.subr.bf16.mxu1 %v1520_v1 }
  0x24   : > { %1267 = vmatpush3.bf16.msra.mxu0 %v1471_v25  ;;  %1347 = vmatpush3.bf16.msra.mxu1 %v1471_v25 }
  0x25   : > { %1272 = vmatprep.subr.bf16.mxu0 %v1520_v1  ;;  %1352 = vmatprep.subr.bf16.mxu1 %v1520_v1 }
  0x27   : > { %1269 = vmatmul.mubr.bf16.vlgmr.msra.gmra.mrb[0].mxu0 %v395_v29  ;;  %1349 = vmatmul.mubr.bf16.vlgmr.msra.gmra.mrb[0].mxu1 %v802_v30 }
  0x28   : > { %1273 = vmatpush3.bf16.msra.mxu0 %v1472_v31  ;;  %1353 = vmatpush3.bf16.msra.mxu1 %v1472_v31 }
  0x29   : > { %1274 = vmatprep.subr.bf16.mxu0 %v1520_v1  ;;  %1354 = vmatprep.subr.bf16.mxu1 %v1520_v1 }
  0x2a   : > { %1288 = vmatprep.mubr.msk.bf16.mxu0 %vm1521_vm0, %v1520_v1  ;;  %1368 = vmatprep.mubr.msk.bf16.mxu1 %vm1521_vm0, %v1520_v1 }
  0x2c   : > { %1275 = vmatpush3.bf16.msra.mxu0 %v1473_v32  ;;  %1355 = vmatpush3.bf16.msra.mxu1 %v1473_v32 }
  0x2d   : > { %1276 = vmatprep.subr.bf16.mxu0 %v1520_v1  ;;  %1356 = vmatprep.subr.bf16.mxu1 %v1520_v1 }
  0x30   : > { %1277 = vmatpush3.bf16.msra.mxu0 %v1474_v33  ;;  %1357 = vmatpush3.bf16.msra.mxu1 %v1474_v33 }
  0x31   : > { %1278 = vmatprep.subr.bf16.mxu0 %v1520_v1  ;;  %1358 = vmatprep.subr.bf16.mxu1 %v1520_v1 }
  0x34   : > { %1279 = vmatpush3.bf16.msra.mxu0 %v1475_v34  ;;  %1359 = vmatpush3.bf16.msra.mxu1 %v1475_v34 }
  0x35   : > { %1280 = vmatprep.subr.bf16.mxu0 %v1520_v1  ;;  %1360 = vmatprep.subr.bf16.mxu1 %v1520_v1 }
  0x38   : > { %1281 = vmatpush3.bf16.msra.mxu0 %v1476_v35  ;;  %1361 = vmatpush3.bf16.msra.mxu1 %v1476_v35 }
  0x39   : > { %1282 = vmatprep.subr.bf16.mxu0 %v1520_v1  ;;  %1362 = vmatprep.subr.bf16.mxu1 %v1520_v1 }
  0x3c   : > { %1283 = vmatpush3.bf16.msra.mxu0 %v1477_v36  ;;  %1363 = vmatpush3.bf16.msra.mxu1 %v1477_v36 }
  0x3d   : > { %1284 = vmatprep.subr.bf16.mxu0 %v1520_v1  ;;  %1364 = vmatprep.subr.bf16.mxu1 %v1520_v1 }
  0x40   : > { %1285 = vmatpush3.bf16.msra.mxu0 %v1478_v37  ;;  %1365 = vmatpush3.bf16.msra.mxu1 %v1478_v37 }
  0x41   : > { %1286 = vmatprep.subr.bf16.mxu0 %v1520_v1  ;;  %1366 = vmatprep.subr.bf16.mxu1 %v1520_v1 }
  0x44   : > { %1287 = vmatpush3.bf16.msra.mxu0 %v1479_v38  ;;  %1367 = vmatpush3.bf16.msra.mxu1 %v1479_v38 }
  0x45   : > { %1292 = vmatprep.subr.bf16.mxu0 %v1520_v1  ;;  %1372 = vmatprep.subr.bf16.mxu1 %v1520_v1 }
  0x47   : > { %1289 = vmatmul.mubr.bf16.vlgmr.msra.gmra.mrb[0].mxu0 %v1607_v11  ;;  %1369 = vmatmul.mubr.bf16.vlgmr.msra.gmra.mrb[0].mxu1 %v1610_v13 }
  0x48   : > { %1293 = vmatpush3.bf16.msra.mxu0 %v1480_v39  ;;  %1373 = vmatpush3.bf16.msra.mxu1 %v1480_v39 }
  0x49   : > { %1294 = vmatprep.subr.bf16.mxu0 %v1520_v1  ;;  %1374 = vmatprep.subr.bf16.mxu1 %v1520_v1 }
  0x4a   : > { %1308 = vmatprep.mubr.msk.bf16.mxu0 %vm1521_vm0, %v1520_v1  ;;  %1388 = vmatprep.mubr.msk.bf16.mxu1 %vm1521_vm0, %v1520_v1 }
  0x4c   : > { %1295 = vmatpush3.bf16.msra.mxu0 %v1481_v40  ;;  %1375 = vmatpush3.bf16.msra.mxu1 %v1481_v40 }
  0x4d   : > { %1296 = vmatprep.subr.bf16.mxu0 %v1520_v1  ;;  %1376 = vmatprep.subr.bf16.mxu1 %v1520_v1 }
  0x50   : > { %1297 = vmatpush3.bf16.msra.mxu0 %v1482_v41  ;;  %1377 = vmatpush3.bf16.msra.mxu1 %v1482_v41 }
  0x51   : > { %1298 = vmatprep.subr.bf16.mxu0 %v1520_v1  ;;  %1378 = vmatprep.subr.bf16.mxu1 %v1520_v1 }
  0x54   : > { %1299 = vmatpush3.bf16.msra.mxu0 %v1483_v42  ;;  %1379 = vmatpush3.bf16.msra.mxu1 %v1483_v42 }
  0x55   : > { %1300 = vmatprep.subr.bf16.mxu0 %v1520_v1  ;;  %1380 = vmatprep.subr.bf16.mxu1 %v1520_v1 }
  0x58   : > { %1301 = vmatpush3.bf16.msra.mxu0 %v1484_v43  ;;  %1381 = vmatpush3.bf16.msra.mxu1 %v1484_v43 }
  0x59   : > { %1302 = vmatprep.subr.bf16.mxu0 %v1520_v1  ;;  %1382 = vmatprep.subr.bf16.mxu1 %v1520_v1 }
  0x5c   : > { %1303 = vmatpush3.bf16.msra.mxu0 %v1485_v44  ;;  %1383 = vmatpush3.bf16.msra.mxu1 %v1485_v44 }
  0x5d   : > { %1304 = vmatprep.subr.bf16.mxu0 %v1520_v1  ;;  %1384 = vmatprep.subr.bf16.mxu1 %v1520_v1 }
  0x60   : > { %1305 = vmatpush3.bf16.msra.mxu0 %v1486_v45  ;;  %1385 = vmatpush3.bf16.msra.mxu1 %v1486_v45 }
  0x61   : > { %1306 = vmatprep.subr.bf16.mxu0 %v1520_v1  ;;  %1386 = vmatprep.subr.bf16.mxu1 %v1520_v1 }
  0x64   : > { %1307 = vmatpush3.bf16.msra.mxu0 %v1487_v46  ;;  %1387 = vmatpush3.bf16.msra.mxu1 %v1487_v46 }
  0x65   : > { %1312 = vmatprep.subr.bf16.mxu0 %v1520_v1  ;;  %1392 = vmatprep.subr.bf16.mxu1 %v1520_v1 }
  0x67   : > { %1309 = vmatmul.mubr.bf16.vlgmr.msra.gmra.mrb[0].mxu0 %v1633_v24  ;;  %1389 = vmatmul.mubr.bf16.vlgmr.msra.gmra.mrb[0].mxu1 %v1643_v27 }
  0x68   : > { %1313 = vmatpush3.bf16.msra.mxu0 %v1488_v47  ;;  %1393 = vmatpush3.bf16.msra.mxu1 %v1488_v47 }
  0x69   : > { %1314 = vmatprep.subr.bf16.mxu0 %v1520_v1  ;;  %1394 = vmatprep.subr.bf16.mxu1 %v1520_v1 }
  0x6a   : > { %1328 = vmatprep.mubr.msk.bf16.mxu0 %vm1521_vm0, %v1520_v1  ;;  %1408 = vmatprep.mubr.msk.bf16.mxu1 %vm1521_vm0, %v1520_v1 }
  0x6c   : > { %1315 = vmatpush3.bf16.msra.mxu0 %v1489_v48  ;;  %1395 = vmatpush3.bf16.msra.mxu1 %v1489_v48 }
  0x6d   : > { %1316 = vmatprep.subr.bf16.mxu0 %v1520_v1  ;;  %1396 = vmatprep.subr.bf16.mxu1 %v1520_v1 }
  0x70   : > { %1317 = vmatpush3.bf16.msra.mxu0 %v1490_v49  ;;  %1397 = vmatpush3.bf16.msra.mxu1 %v1490_v49 }
  0x71   : > { %1318 = vmatprep.subr.bf16.mxu0 %v1520_v1  ;;  %1398 = vmatprep.subr.bf16.mxu1 %v1520_v1 }
  0x74   : > { %1319 = vmatpush3.bf16.msra.mxu0 %v1491_v50  ;;  %1399 = vmatpush3.bf16.msra.mxu1 %v1491_v50 }
  0x75   : > { %1320 = vmatprep.subr.bf16.mxu0 %v1520_v1  ;;  %1400 = vmatprep.subr.bf16.mxu1 %v1520_v1 }
  0x78   : > { %1321 = vmatpush3.bf16.msra.mxu0 %v1492_v51  ;;  %1401 = vmatpush3.bf16.msra.mxu1 %v1492_v51 }
  0x79   : > { %1322 = vmatprep.subr.bf16.mxu0 %v1520_v1  ;;  %1402 = vmatprep.subr.bf16.mxu1 %v1520_v1 }
  0x7c   : > { %1323 = vmatpush3.bf16.msra.mxu0 %v1493_v52  ;;  %1403 = vmatpush3.bf16.msra.mxu1 %v1493_v52 }
  0x7d   : > { %1324 = vmatprep.subr.bf16.mxu0 %v1520_v1  ;;  %1404 = vmatprep.subr.bf16.mxu1 %v1520_v1 }
  0x80   : > { %1325 = vmatpush3.bf16.msra.mxu0 %v1494_v55  ;;  %1405 = vmatpush3.bf16.msra.mxu1 %v1494_v55 }
  0x81   : > { %1326 = vmatprep.subr.bf16.mxu0 %v1520_v1  ;;  %1406 = vmatprep.subr.bf16.mxu1 %v1520_v1 }
  0x84   : > { %1327 = vmatpush3.bf16.msra.mxu0 %v1495_v60  ;;  %1407 = vmatpush3.bf16.msra.mxu1 %v1495_v60 }
  0x87   : > { %1329 = vmatmul.mubr.bf16.vlgmr.msra.gmra.mrb[0].mxu0 %v678_v61  ;;  %1409 = vmatmul.mubr.bf16.vlgmr.msra.gmra.mrb[0].mxu1 %v940_v62 }
 0x15a   : > { %v762_v2 = vpop.f32.mrb[0].mxu0  ;;  %v976_v3 = vpop.f32.mrb[0].mxu1 }
 0x15b   : > { %v775_v4 = vmul.f32 %v1174_v63, %v762_v2  ;;  %v983_v5 = vmul.f32 %v1174_v63, %v976_v3  ;;  %v1330_v1 = vpop.f32.mrb[1].mxu0  ;;  %v1410_v6 = vpop.f32.mrb[1].mxu1 }
 0x15c   : > { %v765_v7 = vpop.f32.mrb[2].mxu0  ;;  %v979_v8 = vpop.f32.mrb[2].mxu1 }
 0x15d   : > { %v782_v9 = vadd.f32 %v1175_v0, %v775_v4  ;;  %v984_v10 = vadd.f32 %v1175_v0, %v983_v5  ;;  %v1331_v11 = vpop.f32.mrb[3].mxu0  ;;  %v1411_v12 = vpop.f32.mrb[3].mxu1 }
 0x15f   : > { %v783_v13 = vmax.f32 %v782_v9, 0.0  ;;  %v985_v14 = vmax.f32 %v984_v10, 0.0 }
 0x161   : > { %v784_v15 = vpack.c.bf16 %v783_v13, %v783_v13  ;;  %v986_v16 = vpack.c.bf16 %v985_v14, %v985_v14 }
 0x163   : > { %786 = vst.msk [vmem:[%s308_s15] sm:$0x1] %vm785_vm1, %v784_v15  ;;  %1177 = vst.msk [vmem:[%s308_s15 + $0x1] sm:$0x1] %vm785_vm1, %v986_v16 }
 0x164 PF: > { %s15_s20 = sadd.s32 1, %s1518_s20   ;;  %s1814_s18 = smov %s1514_s19 }
 0x165   : > { %p12_p5 = scmp.ge.s32.totalorder %s15_s20, 4   ;;  %s1815_s19 = smov %s1817_s21 }
 0x167   :  { %14 = sbr.rel (!%p12_p5) target bundleno = 2 (0x2), region = 78 }

// kernel: segformer_forward.16
= control target key start
LH: loop header
LB: loop body
LE: loop exit
PB: predicated region body
PF: predicated region fallthrough
CT: control target
= control target key end

     0   :  { %v123_v0 = vmov 0.0   ;;  %vm124_vm0 = vmmov 0   ;;  %vm45_vm1 = vcmask 523264   ;;  %vm89_vm2 = vcmask 261120   ;;  %s158_s1 = inlined_call_operand.vmem [shape: bf16[64,32], index: 1, kind: input, shape index: {}]   ;;  %s159_s0 = inlined_call_operand.vmem [shape: bf16[8,64], index: 0, kind: input, shape index: {}]   ;;  %s160_s2 = inlined_call_operand.vmem [shape: f32[8,32], index: 2, kind: output, shape index: {}]  }
   0x1   :  { %105 = vmatprep.subr.bf16.mxu0 %v123_v0  ;;  %v119_v1 = vld [vmem:[%s158_s1] sm:$0xff]   ;;  %113 = vmatprep.mubr.msk.bf16.mxu0 %vm124_vm0, %v123_v0  ;;  %v120_v2 = vld [vmem:[%s158_s1 + $0x8] sm:$0xff]   ;;  %v121_v3 = vld [vmem:[%s158_s1 + $0x10] sm:$0xff]  }
   0x2   :  { %106 = vmatpush3.bf16.msra.mxu0 %v119_v1  ;;  %v122_v4 = vld [vmem:[%s158_s1 + $0x18] sm:$0xff]   ;;  %v12_v5 = vld [vmem:[%s159_s0] sm:$0xf] }
   0x3   :  { %107 = vmatprep.subr.bf16.mxu0 %v123_v0 }
   0x6   :  { %108 = vmatpush3.bf16.msra.mxu0 %v120_v2 }
   0x7   :  { %109 = vmatprep.subr.bf16.mxu0 %v123_v0 }
   0xa   :  { %110 = vmatpush3.bf16.msra.mxu0 %v121_v3 }
   0xb   :  { %111 = vmatprep.subr.bf16.mxu0 %v123_v0 }
   0xe   :  { %112 = vmatpush3.bf16.msra.mxu0 %v122_v4 }
  0x11   :  { %114 = vmatmul.mubr.msk.bf16.vlgmr.msra.gmra.mrb[0].mxu0 %vm45_vm1, %v12_v5 }
  0xe4   :  { %v83_v6 = vpop.f32.mrb[0].mxu0 }
  0xe5   :  { %90 = vst.msk [vmem:[%s160_s2] sm:$0xff] %vm89_vm2, %v83_v6  ;;  %v115_v7 = vpop.f32.mrb[1].mxu0 }
  0xe6   :  { %v86_v8 = vpop.f32.mrb[2].mxu0 }
  0xe7   :  { %v116_v9 = vpop.f32.mrb[3].mxu0 }

// kernel: segformer_forward.15
= control target key start
LH: loop header
LB: loop body
LE: loop exit
PB: predicated region body
PF: predicated region fallthrough
CT: control target
= control target key end

     0   :  { %v170_v0 = vmov 0.0   ;;  %vm171_vm0 = vmmov 0   ;;  %vm117_vm1 = vcmask 254976   ;;  %s217_s1 = inlined_call_operand.vmem [shape: bf16[128,32], index: 1, kind: input, shape index: {}]   ;;  %s218_s0 = inlined_call_operand.vmem [shape: bf16[2,128], index: 0, kind: input, shape index: {}]   ;;  %s219_s2 = inlined_call_operand.vmem [shape: f32[2,32], index: 2, kind: output, shape index: {}]  }
   0x1   :  { %140 = vmatprep.subr.bf16.mxu0 %v170_v0  ;;  %v162_v1 = vld [vmem:[%s217_s1] sm:$0xff]   ;;  %156 = vmatprep.mubr.msk.bf16.mxu0 %vm171_vm0, %v170_v0  ;;  %v163_v2 = vld [vmem:[%s217_s1 + $0x8] sm:$0xff]   ;;  %v164_v3 = vld [vmem:[%s217_s1 + $0x10] sm:$0xff]  }
   0x2   :  { %141 = vmatpush3.bf16.msra.mxu0 %v162_v1  ;;  %v165_v4 = vld [vmem:[%s217_s1 + $0x18] sm:$0xff]   ;;  %v166_v5 = vld [vmem:[%s217_s1 + $0x20] sm:$0xff]   ;;  %v167_v6 = vld [vmem:[%s217_s1 + $0x28] sm:$0xff]  }
   0x3   :  { %142 = vmatprep.subr.bf16.mxu0 %v170_v0  ;;  %v168_v7 = vld [vmem:[%s217_s1 + $0x30] sm:$0xff]   ;;  %v169_v8 = vld [vmem:[%s217_s1 + $0x38] sm:$0xff]   ;;  %v12_v9 = vld [vmem:[%s218_s0] sm:$0x1] }
   0x6   :  { %143 = vmatpush3.bf16.msra.mxu0 %v163_v2 }
   0x7   :  { %144 = vmatprep.subr.bf16.mxu0 %v170_v0 }
   0xa   :  { %145 = vmatpush3.bf16.msra.mxu0 %v164_v3 }
   0xb   :  { %146 = vmatprep.subr.bf16.mxu0 %v170_v0 }
   0xe   :  { %147 = vmatpush3.bf16.msra.mxu0 %v165_v4 }
   0xf   :  { %148 = vmatprep.subr.bf16.mxu0 %v170_v0 }
  0x12   :  { %149 = vmatpush3.bf16.msra.mxu0 %v166_v5 }
  0x13   :  { %150 = vmatprep.subr.bf16.mxu0 %v170_v0 }
  0x16   :  { %151 = vmatpush3.bf16.msra.mxu0 %v167_v6 }
  0x17   :  { %152 = vmatprep.subr.bf16.mxu0 %v170_v0 }
  0x1a   :  { %153 = vmatpush3.bf16.msra.mxu0 %v168_v7 }
  0x1b   :  { %154 = vmatprep.subr.bf16.mxu0 %v170_v0 }
  0x1e   :  { %155 = vmatpush3.bf16.msra.mxu0 %v169_v8 }
  0x21   :  { %157 = vmatmul.mubr.bf16.vlgmr.msra.gmra.mrb[0].mxu0 %v12_v9 }
  0xf4   :  { %v111_v10 = vpop.f32.mrb[0].mxu0 }
  0xf5   :  { %118 = vst.msk [vmem:[%s219_s2] sm:$0x3] %vm117_vm1, %v111_v10  ;;  %v158_v11 = vpop.f32.mrb[1].mxu0 }
  0xf6   :  { %v114_v12 = vpop.f32.mrb[2].mxu0 }
  0xf7   :  { %v159_v13 = vpop.f32.mrb[3].mxu0 }

// kernel: segformer_forward.14
= control target key start
LH: loop header
LB: loop body
LE: loop exit
PB: predicated region body
PF: predicated region fallthrough
CT: control target
= control target key end

     0   :  { %s1533_s18 = smov 0   ;;  %s1535_s19 = smov 0   ;;  %s1782_s0 = inlined_call_operand.vmem [shape: bf16[2,2,2,256], index: 0, kind: input, shape index: {}]   ;;  %s1783_s1 = inlined_call_operand.vmem [shape: bf16[2,1,1,2,256], index: 1, kind: input, shape index: {}]   ;;  %s1784_s2 = inlined_call_operand.vmem [shape: bf16[4,256,128], index: 2, kind: input, shape index: {}]   ;;  %s1785_s3 = inlined_call_operand.vmem [shape: f32[1,128], index: 3, kind: input, shape index: {}]   ;;  %s1786_s4 = inlined_call_operand.vmem [shape: f32[1,128], index: 4, kind: input, shape index: {}]   ;;  %s1787_s5 = inlined_call_operand.vmem [shape: bf16[2,1,1,128], index: 5, kind: output, shape index: {}]  }
   0x1   :  { %s1537_s20 = smov 0  }
   0x2 LB: > { %s27_s21 = sadd.s32 1, %s1496_s19  ;;  %p1134_p0 = scmp.ge.s32.totalorder %s1500_s20, 1  ;;  %s1500_s20 = sphi %s1537_s20, %s15_s20   ;;  %s1496_s19 = sphi %s1535_s19, %s1789_s19   ;;  %s1492_s18 = sphi %s1533_s18, %s1788_s18  }
   0x3   : > { %p29_p1 = scmp.ge.s32.totalorder %s27_s21, 2  ;;  %p221_p2 = scmp.lt.s32.totalorder %s1500_s20, 3 }
   0x5   : > { %s1791_s21 = smov (%p29_p1, %s27_s21), 0  ;;  %p222_p3 = pnand %p1134_p0, %p221_p2 }
   0x6   : > { %v1414_v0 = vld [vmem:[%s1784_s2 + $0xc0] sm:$0xff] (!%p222_p3)   ;;  %v1418_v4 = vld [vmem:[%s1784_s2 + $0xc8] sm:$0xff] (!%p222_p3)   ;;  %v1422_v8 = vld [vmem:[%s1784_s2 + $0xd0] sm:$0xff] (!%p222_p3)   ;;  %p261_p4 = scmp.lt.s32.totalorder (!%p222_p3), %s1492_s18, 1  ;;  %v430_v30 = vlaneseq (!%p222_p3)  ;;  %v1502_v34 = vmov (!%p222_p3), 1966171168  }
   0x7   : > { %225 = sbr.rel (%p222_p3) target bundleno = 301 (0x12d), region = 40  ;;  %v1415_v1 = vld [vmem:[%s1784_s2 + $0x40] sm:$0xff] (!%p222_p3)   ;;  %1301 = vmatprep.subr.bf16.mxu0 (!%p222_p3), %v1414_v0  ;;  %v1419_v5 = vld [vmem:[%s1784_s2 + $0x48] sm:$0xff] (!%p222_p3)   ;;  %v1423_v9 = vld [vmem:[%s1784_s2 + $0x50] sm:$0xff] (!%p222_p3)   ;;  %v428_v35 = vunpack.c.l.s4 (!%p222_p3), %v1502_v34  ;;  %vm1035_vm0 = vcmask (!%p222_p3), 1040384  }
   0x8   : > { %v1416_v2 = vld [vmem:[%s1784_s2 + $0x80] sm:$0xff] (!%p222_p3)   ;;  %1323 = vmatprep.subr.bf16.mxu1 (!%p222_p3), %v1415_v1  ;;  %v1420_v6 = vld [vmem:[%s1784_s2 + $0x88] sm:$0xff] (!%p222_p3)   ;;  %v1424_v10 = vld [vmem:[%s1784_s2 + $0x90] sm:$0xff] (!%p222_p3)   ;;  %v431_v36 = vshrl.u32 (!%p222_p3), %v430_v30, 7  ;;  %vm1036_vm1 = vsmask.f32 (!%p222_p3), 256 }
   0x9   : > { %v1417_v3 = vld [vmem:[%s1784_s2] sm:$0xff] (!%p222_p3)   ;;  %1302 = vmatpush3.bf16.msra.mxu0 (!%p222_p3), %v1416_v2  ;;  %v1421_v7 = vld [vmem:[%s1784_s2 + $0x8] sm:$0xff] (!%p222_p3)   ;;  %v1425_v11 = vld [vmem:[%s1784_s2 + $0x10] sm:$0xff] (!%p222_p3)   ;;  %v429_v40 = vunpack.c.0.s8 (!%p222_p3), %v428_v35 }
   0xa   : > { %1324 = vmatpush3.bf16.msra.mxu1 (!%p222_p3), %v1417_v3  ;;  %1303 = vmatprep.subr.bf16.mxu0 (!%p222_p3), %v1418_v4  ;;  %v1426_v12 = vld [vmem:[%s1784_s2 + $0xd8] sm:$0xff] (!%p222_p3)   ;;  %v1430_v16 = vld [vmem:[%s1784_s2 + $0xe0] sm:$0xff] (!%p222_p3)   ;;  %v1434_v20 = vld [vmem:[%s1784_s2 + $0xe8] sm:$0xff] (!%p222_p3)  }
   0xb   : > { %1325 = vmatprep.subr.bf16.mxu1 (!%p222_p3), %v1419_v5  ;;  %v1427_v13 = vld [vmem:[%s1784_s2 + $0x58] sm:$0xff] (!%p222_p3)   ;;  %v1431_v17 = vld [vmem:[%s1784_s2 + $0x60] sm:$0xff] (!%p222_p3)   ;;  %v1435_v21 = vld [vmem:[%s1784_s2 + $0x68] sm:$0xff] (!%p222_p3)   ;;  %v1663_v41 = vsub.s32 (!%p222_p3), %v429_v40, %v431_v36 }
   0xc   : > { %v1428_v14 = vld [vmem:[%s1784_s2 + $0x98] sm:$0xff] (!%p222_p3)   ;;  %v1432_v18 = vld [vmem:[%s1784_s2 + $0xa0] sm:$0xff] (!%p222_p3)   ;;  %v1436_v22 = vld [vmem:[%s1784_s2 + $0xa8] sm:$0xff] (!%p222_p3)  }
   0xd   : > { %1304 = vmatpush3.bf16.msra.mxu0 (!%p222_p3), %v1420_v6  ;;  %v1429_v15 = vld [vmem:[%s1784_s2 + $0x18] sm:$0xff] (!%p222_p3)   ;;  %v1433_v19 = vld [vmem:[%s1784_s2 + $0x20] sm:$0xff] (!%p222_p3)   ;;  %v1437_v23 = vld [vmem:[%s1784_s2 + $0x28] sm:$0xff] (!%p222_p3)  }
   0xe   : > { %1326 = vmatpush3.bf16.msra.mxu1 %v1421_v7  ;;  %1305 = vmatprep.subr.bf16.mxu0 %v1422_v8  ;;  %s1793_s18 = smov (!%p261_p4, %s1492_s18), 1  ;;  %v1438_v24 = vld [vmem:[%s1784_s2 + $0xf0] sm:$0xff]   ;;  %v1442_v28 = vld [vmem:[%s1784_s2 + $0xf8] sm:$0xff]   ;;  %v1446_v37 = vld [vmem:[%s1784_s2 + $0x140] sm:$0xff]  }
   0xf   : > { %1327 = vmatprep.subr.bf16.mxu1 %v1423_v9  ;;  %v1439_v25 = vld [vmem:[%s1784_s2 + $0x70] sm:$0xff]   ;;  %s1135_s9 = sshll.u32 %s1793_s18, 2  ;;  %v1443_v29 = vld [vmem:[%s1784_s2 + $0x78] sm:$0xff]   ;;  %v1447_v38 = vld [vmem:[%s1784_s2 + $0x1c0] sm:$0xff]   ;;  %s1136_s6 = sshll.u32 %s1793_s18, 1 }
  0x10   : > { %v1440_v26 = vld [vmem:[%s1784_s2 + $0xb0] sm:$0xff]   ;;  %s268_s22 = scalar_lea.vmem %s1782_s0, %s1135_s9  ;;  %v1444_v31 = vld [vmem:[%s1784_s2 + $0xb8] sm:$0xff]   ;;  %v1448_v44 = vld [vmem:[%s1784_s2 + $0x100] sm:$0xff]   ;;  %s276_s15 = scalar_lea.vmem %s1783_s1, %s1136_s6 }
  0x11   : > { %1306 = vmatpush3.bf16.msra.mxu0 %v1424_v10  ;;  %v1441_v27 = vld [vmem:[%s1784_s2 + $0x30] sm:$0xff]   ;;  %v1445_v32 = vld [vmem:[%s1784_s2 + $0x38] sm:$0xff]   ;;  %v1233_v33 = vld.sshfl [vmem:[%s268_s22] sm:$0x11 pattern:$0x75316420]  ;;  %s282_s13 = scalar_lea.vmem %s1787_s5, %s1793_s18 }
  0x12   : > { %1328 = vmatpush3.bf16.msra.mxu1 %v1425_v11  ;;  %1307 = vmatprep.subr.bf16.mxu0 %v1426_v12  ;;  %v426_v39 = vcombine.high %v1233_v33, %v1233_v33  ;;  %v433_v43 = vrot.slane %v1233_v33, %v1663_v41  ;;  %v1449_v45 = vld [vmem:[%s1784_s2 + $0x180] sm:$0xff]   ;;  %v1451_v46 = vld [vmem:[%s1784_s2 + $0x1c8] sm:$0xff]   ;;  %v1455_v51 = vld [vmem:[%s1784_s2 + $0x1d0] sm:$0xff]  }
  0x13   : > { %1329 = vmatprep.subr.bf16.mxu1 %v1427_v13  ;;  %v1450_v49 = vld [vmem:[%s1784_s2 + $0x148] sm:$0xff]   ;;  %v1454_v53 = vld [vmem:[%s1784_s2 + $0x150] sm:$0xff]   ;;  %v1459_v55 = vld [vmem:[%s1784_s2 + $0x1d8] sm:$0xff]  }
  0x14   : > { %v440_v42 = vrot.slane %v426_v39, %v1663_v41  ;;  %v442_v48 = vshrl.u32 %v433_v43, 16  ;;  %v1453_v50 = vld [vmem:[%s1784_s2 + $0x188] sm:$0xff]   ;;  %v1457_v54 = vld [vmem:[%s1784_s2 + $0x190] sm:$0xff]   ;;  %v1458_v57 = vld [vmem:[%s1784_s2 + $0x158] sm:$0xff]  }
  0x15   : > { %1308 = vmatpush3.bf16.msra.mxu0 %v1428_v14  ;;  %v1452_v52 = vld [vmem:[%s1784_s2 + $0x108] sm:$0xff]   ;;  %v1456_v56 = vld [vmem:[%s1784_s2 + $0x110] sm:$0xff]   ;;  %v1461_v58 = vld [vmem:[%s1784_s2 + $0x198] sm:$0xff]  }
  0x16   : > { %1330 = vmatpush3.bf16.msra.mxu1 %v1429_v15  ;;  %1309 = vmatprep.subr.bf16.mxu0 %v1430_v16  ;;  %v445_v47 = vshrl.u32 %v440_v42, 16  ;;  %v1463_v59 = vld [vmem:[%s1784_s2 + $0x1e0] sm:$0xff]   ;;  %v1460_v60 = vld [vmem:[%s1784_s2 + $0x118] sm:$0xff]   ;;  %v1467_v63 = vld [vmem:[%s1784_s2 + $0x1e8] sm:$0xff]  }
  0x17   : > { %1331 = vmatprep.subr.bf16.mxu1 %v1431_v17  ;;  %715 = vmatprep.mubr.bf16.mxu1 %v440_v42  ;;  %v1462_v61 = vld [vmem:[%s1784_s2 + $0x160] sm:$0xff]   ;;  %v1466_v1 = vld [vmem:[%s1784_s2 + $0x168] sm:$0xff]   ;;  %v1471_v3 = vld [vmem:[%s1784_s2 + $0x1f0] sm:$0xff]  }
  0x18   : > { %577 = vmatprep.mubr.bf16.mxu0 %v445_v47  ;;  %v1465_v62 = vld [vmem:[%s1784_s2 + $0x1a0] sm:$0xff]   ;;  %v1469_v2 = vld [vmem:[%s1784_s2 + $0x1a8] sm:$0xff]   ;;  %v1470_v5 = vld [vmem:[%s1784_s2 + $0x170] sm:$0xff]  }
  0x19   : > { %1310 = vmatpush3.bf16.msra.mxu0 %v1432_v18  ;;  %v1464_v0 = vld [vmem:[%s1784_s2 + $0x120] sm:$0xff]   ;;  %v1468_v4 = vld [vmem:[%s1784_s2 + $0x128] sm:$0xff]   ;;  %v1473_v6 = vld [vmem:[%s1784_s2 + $0x1b0] sm:$0xff]  }
  0x1a   : > { %1332 = vmatpush3.bf16.msra.mxu1 %v1433_v19  ;;  %1311 = vmatprep.subr.bf16.mxu0 %v1434_v20  ;;  %v1475_v7 = vld [vmem:[%s1784_s2 + $0x1f8] sm:$0xff]   ;;  %v1472_v8 = vld [vmem:[%s1784_s2 + $0x130] sm:$0xff]   ;;  %v1266_v9 = vld.sshfl [vmem:[%s276_s15] sm:$0x11 pattern:$0x75316420] }
  0x1b   : > { %1333 = vmatprep.subr.bf16.mxu1 %v1435_v21  ;;  %v1474_v10 = vld [vmem:[%s1784_s2 + $0x178] sm:$0xff]   ;;  %v732_v11 = vcombine.high %v1266_v9, %v1266_v9  ;;  %v739_v12 = vrot.slane %v1266_v9, %v1663_v41  ;;  %v415_v40 = vld [vmem:[%s1785_s3] sm:$0x1]  ;;  %vm1037_vm2 = vmand %vm1035_vm0, %vm1036_vm1 }
  0x1c   : > { %v1477_v13 = vld [vmem:[%s1784_s2 + $0x1b8] sm:$0xff]   ;;  %v416_v42 = vld [vmem:[%s1786_s4] sm:$0x1] }
  0x1d   : > { %1312 = vmatpush3.bf16.msra.mxu0 %v1436_v22  ;;  %v746_v14 = vrot.slane %v732_v11, %v1663_v41  ;;  %v1476_v15 = vld [vmem:[%s1784_s2 + $0x138] sm:$0xff]   ;;  %v887_v17 = vshrl.u32 %v739_v12, 16 }
  0x1e   : > { %1334 = vmatpush3.bf16.msra.mxu1 %v1437_v23  ;;  %1313 = vmatprep.subr.bf16.mxu0 %v1438_v24 }
  0x1f   : > { %1335 = vmatprep.subr.bf16.mxu1 %v1439_v25  ;;  %v890_v16 = vshrl.u32 %v746_v14, 16 }
  0x21   : > { %1314 = vmatpush3.bf16.msra.mxu0 %v1440_v26 }
  0x22   : > { %1336 = vmatpush3.bf16.msra.mxu1 %v1441_v27  ;;  %1315 = vmatprep.subr.bf16.mxu0 %v1442_v28 }
  0x23   : > { %1337 = vmatprep.subr.bf16.mxu1 %v1443_v29 }
  0x25   : > { %1316 = vmatpush3.bf16.msra.mxu0 %v1444_v31 }
  0x26   : > { %1338 = vmatpush3.bf16.msra.mxu1 %v1445_v32  ;;  %1345 = vmatprep.subr.bf16.mxu0 %v1446_v37 }
  0x27   : > { %1367 = vmatprep.subr.bf16.mxu1 %v1447_v38 }
  0x28   : > { %578 = vmatmul.mubr.bf16.vlgmr.msra.gmra.mrb[0].mxu0 %v442_v48 }
  0x29   : > { %716 = vmatmul.mubr.bf16.vlgmr.msra.gmra.mrb[0].mxu1 %v433_v43  ;;  %1346 = vmatpush3.bf16.msra.mxu0 %v1448_v44 }
  0x2a   : > { %1368 = vmatpush3.bf16.msra.mxu1 %v1449_v45  ;;  %1347 = vmatprep.subr.bf16.mxu0 %v1450_v49 }
  0x2b   : > { %1369 = vmatprep.subr.bf16.mxu1 %v1451_v46  ;;  %877 = vmatprep.mubr.bf16.mxu0 %v746_v14  ;;  %v1038_v46 = vld [vmem:[%s282_s13] sm:$0x1] }
  0x2c   : > { %1022 = vmatprep.mubr.bf16.mxu1 %v890_v16 }
  0x2d   : > { %1348 = vmatpush3.bf16.msra.mxu0 %v1452_v52 }
  0x2e   : > { %1370 = vmatpush3.bf16.msra.mxu1 %v1453_v50  ;;  %1349 = vmatprep.subr.bf16.mxu0 %v1454_v53 }
  0x2f   : > { %1371 = vmatprep.subr.bf16.mxu1 %v1455_v51 }
  0x31   : > { %1350 = vmatpush3.bf16.msra.mxu0 %v1456_v56 }
  0x32   : > { %1372 = vmatpush3.bf16.msra.mxu1 %v1457_v54  ;;  %1351 = vmatprep.subr.bf16.mxu0 %v1458_v57 }
  0x33   : > { %1373 = vmatprep.subr.bf16.mxu1 %v1459_v55 }
  0x35   : > { %1352 = vmatpush3.bf16.msra.mxu0 %v1460_v60 }
  0x36   : > { %1374 = vmatpush3.bf16.msra.mxu1 %v1461_v58  ;;  %1353 = vmatprep.subr.bf16.mxu0 %v1462_v61 }
  0x37   : > { %1375 = vmatprep.subr.bf16.mxu1 %v1463_v59 }
  0x39   : > { %1354 = vmatpush3.bf16.msra.mxu0 %v1464_v0 }
  0x3a   : > { %1376 = vmatpush3.bf16.msra.mxu1 %v1465_v62  ;;  %1355 = vmatprep.subr.bf16.mxu0 %v1466_v1 }
  0x3b   : > { %1377 = vmatprep.subr.bf16.mxu1 %v1467_v63 }
  0x3d   : > { %1356 = vmatpush3.bf16.msra.mxu0 %v1468_v4 }
  0x3e   : > { %1378 = vmatpush3.bf16.msra.mxu1 %v1469_v2  ;;  %1357 = vmatprep.subr.bf16.mxu0 %v1470_v5 }
  0x3f   : > { %1379 = vmatprep.subr.bf16.mxu1 %v1471_v3 }
  0x41   : > { %1358 = vmatpush3.bf16.msra.mxu0 %v1472_v8 }
  0x42   : > { %1380 = vmatpush3.bf16.msra.mxu1 %v1473_v6  ;;  %1359 = vmatprep.subr.bf16.mxu0 %v1474_v10 }
  0x43   : > { %1381 = vmatprep.subr.bf16.mxu1 %v1475_v7 }
  0x45   : > { %1360 = vmatpush3.bf16.msra.mxu0 %v1476_v15 }
  0x46   : > { %1382 = vmatpush3.bf16.msra.mxu1 %v1477_v13 }
  0x48   : > { %878 = vmatmul.mubr.bf16.vlgmr.msra.gmra.mrb[4].mxu0 %v739_v12 }
  0x49   : > { %1023 = vmatmul.mubr.bf16.vlgmr.msra.gmra.mrb[4].mxu1 %v887_v17 }
  0xfb   : > { %v1317_v20 = vpop.f32.mrb[0].mxu0 }
  0xfc   : > { %v1339_v18 = vpop.f32.mrb[0].mxu1  ;;  %v1318_v23 = vpop.f32.mrb[1].mxu0 }
  0xfd   : > { %v1340_v19 = vpop.f32.mrb[1].mxu1  ;;  %v1319_v25 = vadd.f32 %v1318_v23, %v1317_v20  ;;  %v1320_v26 = vpop.f32.mrb[2].mxu0 }
  0xfe   : > { %v1341_v21 = vadd.f32 %v1340_v19, %v1339_v18  ;;  %v1342_v22 = vpop.f32.mrb[2].mxu1  ;;  %v1321_v27 = vpop.f32.mrb[3].mxu0 }
  0xff   : > { %v1343_v24 = vpop.f32.mrb[3].mxu1 }
 0x100   : > { %v718_v28 = vadd.f32 %v1341_v21, %v1319_v25 }
 0x11b   : > { %v1361_v31 = vpop.f32.mrb[4].mxu0 }
 0x11c   : > { %v1383_v29 = vpop.f32.mrb[4].mxu1  ;;  %v1362_v34 = vpop.f32.mrb[5].mxu0 }
 0x11d   : > { %v1384_v30 = vpop.f32.mrb[5].mxu1  ;;  %v1363_v36 = vadd.f32 %v1362_v34, %v1361_v31  ;;  %v1364_v37 = vpop.f32.mrb[6].mxu0 }
 0x11e   : > { %v1385_v32 = vadd.f32 %v1384_v30, %v1383_v29  ;;  %v1386_v33 = vpop.f32.mrb[6].mxu1  ;;  %v1365_v38 = vpop.f32.mrb[7].mxu0 }
 0x11f   : > { %v1387_v35 = vpop.f32.mrb[7].mxu1  ;;  %v885_v39 = vadd.f32 %v1363_v36, %v718_v28 }
 0x121   : > { %v1030_v41 = vadd.f32 %v1385_v32, %v885_v39 }
 0x123   : > { %v1031_v43 = vmul.f32 %v1030_v41, %v415_v40 }
 0x125   : > { %v1032_v44 = vadd.f32 %v1031_v43, %v416_v42 }
 0x127   : > { %v1033_v45 = vmax.f32 %v1032_v44, 0.0 }
 0x129   : > { %v1034_v47 = vpack.c.bf16 %v1033_v45, %v1033_v45 }
 0x12b   : > { %v1039_v48 = vsel %vm1037_vm2, %v1034_v47, %v1038_v46 }
 0x12c   : > { %1040 = vst [vmem:[%s282_s13] sm:$0x1] %v1039_v48 }
 0x12d PF: > { %s15_s20 = sadd.s32 1, %s1500_s20   ;;  %s1788_s18 = smov %s1496_s19 }
 0x12e   : > { %p12_p5 = scmp.ge.s32.totalorder %s15_s20, 4   ;;  %s1789_s19 = smov %s1791_s21 }
 0x130   :  { %14 = sbr.rel (!%p12_p5) target bundleno = 2 (0x2), region = 76 }

// kernel: segformer_forward.17
= control target key start
LH: loop header
LB: loop body
LE: loop exit
PB: predicated region body
PF: predicated region fallthrough
CT: control target
= control target key end

     0   :  { %vm42_vm0 = vcmask 261120   ;;  %s173_s1 = inlined_call_operand.vmem [shape: bf16[32,32], index: 1, kind: input, shape index: {}]   ;;  %s174_s0 = inlined_call_operand.vmem [shape: bf16[32,32], index: 0, kind: input, shape index: {}]   ;;  %s175_s2 = inlined_call_operand.vmem [shape: f32[32,32], index: 2, kind: output, shape index: {}]  }
   0x1   :  { %v124_v0 = vld [vmem:[%s173_s1] sm:$0xff]   ;;  %v125_v1 = vld [vmem:[%s173_s1 + $0x8] sm:$0xff]  }
   0x2   :  { %116 = vmatprep.subr.bf16.mxu0 %v124_v0  ;;  %v126_v2 = vld [vmem:[%s174_s0] sm:$0xff]   ;;  %v127_v3 = vld [vmem:[%s174_s0 + $0x8] sm:$0xff]  }
   0x3   :  { %117 = vmatpush3.bf16.msra.mxu0 %v124_v0  ;;  %120 = vmatprep.mubr.msk.bf16.mxu0 %vm42_vm0, %v126_v2 }
   0x4   :  { %118 = vmatprep.subr.bf16.mxu0 %v125_v1 }
   0x7   :  { %119 = vmatpush3.bf16.msra.mxu0 %v125_v1 }
   0xa   :  { %121 = vmatmul.mubr.msk.bf16.vlgmr.msra.gmra.mrb[0].mxu0 %vm42_vm0, %v127_v3 }
  0xdd   :  { %v122_v4 = vpop.f32.mrb[0].mxu0 }
  0xde   :  { %100 = vst.msk [vmem:[%s175_s2 + $0x10] sm:$0xff] %vm42_vm0, %v122_v4  ;;  %v83_v5 = vpop.f32.mrb[1].mxu0 }
  0xdf   :  { %98 = vst.msk [vmem:[%s175_s2] sm:$0xff] %vm42_vm0, %v83_v5  ;;  %v123_v6 = vpop.f32.mrb[2].mxu0 }
  0xe0   :  { %101 = vst.msk [vmem:[%s175_s2 + $0x18] sm:$0xff] %vm42_vm0, %v123_v6  ;;  %v86_v7 = vpop.f32.mrb[3].mxu0 }
  0xe1   :  { %99 = vst.msk [vmem:[%s175_s2 + $0x8] sm:$0xff] %vm42_vm0, %v86_v7 }

// kernel: segformer_forward.18
= control target key start
LH: loop header
LB: loop body
LE: loop exit
PB: predicated region body
PF: predicated region fallthrough
CT: control target
= control target key end

     0   :  { %vm76_vm0 = vcmask 130048   ;;  %vm198_vm1 = vcmask 261120   ;;  %s388_s1 = inlined_call_operand.vmem [shape: bf16[16,32], index: 1, kind: input, shape index: {}]   ;;  %s389_s0 = inlined_call_operand.vmem [shape: bf16[128,16], index: 0, kind: input, shape index: {}]   ;;  %s390_s2 = inlined_call_operand.vmem [shape: f32[128,32], index: 2, kind: output, shape index: {}]  }
   0x1   :  { %v265_v0 = vld [vmem:[%s388_s1] sm:$0xff]   ;;  %v268_v3 = vld [vmem:[%s389_s0 + $0x8] sm:$0xff]   ;;  %v270_v5 = vld [vmem:[%s389_s0 + $0x10] sm:$0xff]  }
   0x2   :  { %v266_v1 = vld [vmem:[%s389_s0] sm:$0xff]   ;;  %245 = vmatprep.subr.bf16.mxu0 %v265_v0  ;;  %263 = vmatprep.subr.bf16.mxu1 %v265_v0  ;;  %v269_v4 = vld [vmem:[%s389_s0 + $0x28] sm:$0xff]   ;;  %v271_v6 = vld [vmem:[%s389_s0 + $0x30] sm:$0xff]  }
   0x3   :  { %v267_v2 = vld [vmem:[%s389_s0 + $0x20] sm:$0xff]   ;;  %246 = vmatpush3.bf16.msra.mxu0 %v265_v0  ;;  %264 = vmatpush3.bf16.msra.mxu1 %v265_v0  ;;  %v272_v7 = vld [vmem:[%s389_s0 + $0x18] sm:$0xff]  }
   0x4   :  { %247 = vmatprep.mubr.msk.bf16.mxu0 %vm76_vm0, %v266_v1  ;;  %255 = vmatprep.mubr.msk.bf16.mxu1 %vm76_vm0, %v267_v2  ;;  %v273_v8 = vld [vmem:[%s389_s0 + $0x38] sm:$0xff]  }
   0x6   :  { %248 = vmatmul.mubr.msk.bf16.vlgmr.msra.gmra.mrb[0].mxu0 %vm76_vm0, %v268_v3  ;;  %256 = vmatmul.mubr.msk.bf16.vlgmr.msra.gmra.mrb[0].mxu1 %vm76_vm0, %v269_v4 }
   0x7   :  { %251 = vmatprep.mubr.msk.bf16.mxu0 %vm76_vm0, %v270_v5  ;;  %259 = vmatprep.mubr.msk.bf16.mxu1 %vm76_vm0, %v271_v6 }
   0xe   :  { %252 = vmatmul.mubr.msk.bf16.gmra.mrb[4].mxu0 %vm76_vm0, %v272_v7  ;;  %260 = vmatmul.mubr.msk.bf16.gmra.mrb[4].mxu1 %vm76_vm0, %v273_v8 }
  0xd9   :  { %v249_v9 = vpop.f32.mrb[0].mxu0  ;;  %v257_v10 = vpop.f32.mrb[0].mxu1 }
  0xda   :  { %201 = vst.msk [vmem:[%s390_s2 + $0x10] sm:$0xff] %vm198_vm1, %v249_v9  ;;  %209 = vst.msk [vmem:[%s390_s2 + $0x50] sm:$0xff] %vm198_vm1, %v257_v10  ;;  %v135_v11 = vpop.f32.mrb[1].mxu0  ;;  %v167_v12 = vpop.f32.mrb[1].mxu1 }
  0xdb   :  { %199 = vst.msk [vmem:[%s390_s2] sm:$0xff] %vm198_vm1, %v135_v11  ;;  %207 = vst.msk [vmem:[%s390_s2 + $0x40] sm:$0xff] %vm198_vm1, %v167_v12  ;;  %v250_v13 = vpop.f32.mrb[2].mxu0  ;;  %v258_v14 = vpop.f32.mrb[2].mxu1 }
  0xdc   :  { %202 = vst.msk [vmem:[%s390_s2 + $0x18] sm:$0xff] %vm198_vm1, %v250_v13  ;;  %210 = vst.msk [vmem:[%s390_s2 + $0x58] sm:$0xff] %vm198_vm1, %v258_v14  ;;  %v138_v15 = vpop.f32.mrb[3].mxu0  ;;  %v170_v16 = vpop.f32.mrb[3].mxu1 }
  0xdd   :  { %200 = vst.msk [vmem:[%s390_s2 + $0x8] sm:$0xff] %vm198_vm1, %v138_v15  ;;  %208 = vst.msk [vmem:[%s390_s2 + $0x48] sm:$0xff] %vm198_vm1, %v170_v16 }
  0xe1   :  { %v253_v17 = vpop.f32.mrb[4].mxu0  ;;  %v261_v18 = vpop.f32.mrb[4].mxu1 }
  0xe2   :  { %205 = vst.msk [vmem:[%s390_s2 + $0x30] sm:$0xff] %vm198_vm1, %v253_v17  ;;  %213 = vst.msk [vmem:[%s390_s2 + $0x70] sm:$0xff] %vm198_vm1, %v261_v18  ;;  %v151_v19 = vpop.f32.mrb[5].mxu0  ;;  %v183_v20 = vpop.f32.mrb[5].mxu1 }
  0xe3   :  { %203 = vst.msk [vmem:[%s390_s2 + $0x20] sm:$0xff] %vm198_vm1, %v151_v19  ;;  %211 = vst.msk [vmem:[%s390_s2 + $0x60] sm:$0xff] %vm198_vm1, %v183_v20  ;;  %v254_v21 = vpop.f32.mrb[6].mxu0  ;;  %v262_v22 = vpop.f32.mrb[6].mxu1 }
  0xe4   :  { %206 = vst.msk [vmem:[%s390_s2 + $0x38] sm:$0xff] %vm198_vm1, %v254_v21  ;;  %214 = vst.msk [vmem:[%s390_s2 + $0x78] sm:$0xff] %vm198_vm1, %v262_v22  ;;  %v154_v23 = vpop.f32.mrb[7].mxu0  ;;  %v186_v24 = vpop.f32.mrb[7].mxu1 }
  0xe5   :  { %204 = vst.msk [vmem:[%s390_s2 + $0x28] sm:$0xff] %vm198_vm1, %v154_v23  ;;  %212 = vst.msk [vmem:[%s390_s2 + $0x68] sm:$0xff] %vm198_vm1, %v186_v24 }

// kernel: segformer_forward.19
= control target key start
LH: loop header
LB: loop body
LE: loop exit
PB: predicated region body
PF: predicated region fallthrough
CT: control target
= control target key end

     0   :  { %s5287_s18 = smov 0   ;;  %s5289_s19 = smov 0   ;;  %s6149_s0 = inlined_call_operand.vmem [shape: bf16[2,10,10,32], index: 0, kind: input, shape index: {}]   ;;  %s6150_s1 = inlined_call_operand.vmem [shape: bf16[2,1,2,10,32], index: 1, kind: input, shape index: {}]   ;;  %s6151_s2 = inlined_call_operand.vmem [shape: bf16[9,32,128], index: 2, kind: input, shape index: {}]   ;;  %s6152_s3 = inlined_call_operand.vmem [shape: f32[1,128], index: 3, kind: input, shape index: {}]   ;;  %s6153_s4 = inlined_call_operand.vmem [shape: f32[1,128], index: 4, kind: input, shape index: {}]   ;;  %s6154_s5 = inlined_call_operand.vmem [shape: f32[2,8,8,1], index: 5, kind: output, shape index: {}]  }
   0x1   :  { %s5291_s20 = smov 0  }
   0x2 LB: > { %s27_s3 = sadd.s32 1, %s5249_s19  ;;  %p4146_p0 = scmp.ge.s32.totalorder %s5253_s20, 1  ;;  %s5253_s20 = sphi %s5291_s20, %s15_s20   ;;  %s5249_s19 = sphi %s5289_s19, %s6156_s19   ;;  %s5245_s18 = sphi %s5287_s18, %s6155_s18  }
   0x3   : > { %p29_p1 = scmp.ge.s32.totalorder %s27_s3, 2  ;;  %p235_p2 = scmp.lt.s32.totalorder %s5253_s20, 3 }
   0x5   : > { %s6158_s3 = smov (%p29_p1, %s27_s3), 0  ;;  %p236_p3 = pnand %p4146_p0, %p235_p2 }
   0x6   : > { %v5308_v0 = vld [vmem:[%s6151_s2 + $0x10] sm:$0xff] (!%p236_p3)   ;;  %v5255_v1 = vmov (!%p236_p3), 0.0   ;;  %v5315_v2 = vld [vmem:[%s6151_s2] sm:$0xff] (!%p236_p3)   ;;  %v5321_v3 = vld [vmem:[%s6151_s2 + $0x18] sm:$0xff] (!%p236_p3)   ;;  %vm5256_vm0 = vmmov (!%p236_p3), 0   ;;  %p292_p4 = scmp.lt.s32.totalorder (!%p236_p3), %s5245_s18, 1 }
   0x7   : > { %239 = sbr.rel (%p236_p3) target bundleno = 526 (0x20e), region = 40  ;;  %4568 = vmatprep.subr.bf16.mxu0 (!%p236_p3), %v5255_v1  ;;  %4576 = vmatprep.subr.bf16.mxu1 (!%p236_p3), %v5255_v1  ;;  %v5330_v4 = vld [vmem:[%s6151_s2 + $0x8] sm:$0xff] (!%p236_p3)   ;;  %vm398_vm1 = vcmask (!%p236_p3), 261120   ;;  %v5344_v5 = vld [vmem:[%s6151_s2 + $0x30] sm:$0xff] (!%p236_p3)   ;;  %v5359_v9 = vld [vmem:[%s6151_s2 + $0x38] sm:$0xff] (!%p236_p3)   ;;  %vm929_vm2 = vcmask (!%p236_p3), 7168  }
   0x8   : > { %4569 = vmatpush3.bf16.msra.mxu0 (!%p236_p3), %v5308_v0  ;;  %4580 = vmatprep.mubr.msk.bf16.mxu1 (!%p236_p3), %vm5256_vm0, %v5255_v1  ;;  %v5368_v14 = vld [vmem:[%s6151_s2 + $0x20] sm:$0xff] (!%p236_p3)   ;;  %v5376_v17 = vld [vmem:[%s6151_s2 + $0x50] sm:$0xff] (!%p236_p3)   ;;  %v5388_v21 = vld [vmem:[%s6151_s2 + $0x28] sm:$0xff] (!%p236_p3)  }
   0x9   : > { %4577 = vmatpush3.bf16.msra.mxu1 (!%p236_p3), %v5315_v2  ;;  %4570 = vmatprep.subr.bf16.mxu0 (!%p236_p3), %v5255_v1  ;;  %v5397_v22 = vld [vmem:[%s6151_s2 + $0x58] sm:$0xff] (!%p236_p3)   ;;  %v5409_v26 = vld [vmem:[%s6151_s2 + $0x40] sm:$0xff] (!%p236_p3)   ;;  %v5418_v29 = vld [vmem:[%s6151_s2 + $0x70] sm:$0xff] (!%p236_p3)  }
   0xa   : > { %4578 = vmatprep.subr.bf16.mxu1 (!%p236_p3), %v5255_v1  ;;  %4572 = vmatprep.mubr.msk.bf16.mxu0 (!%p236_p3), %vm5256_vm0, %v5255_v1  ;;  %v5429_v34 = vld [vmem:[%s6151_s2 + $0x48] sm:$0xff] (!%p236_p3)   ;;  %v5441_v38 = vld [vmem:[%s6151_s2 + $0x78] sm:$0xff] (!%p236_p3)   ;;  %v5450_v40 = vld [vmem:[%s6151_s2 + $0x60] sm:$0xff] (!%p236_p3)  }
   0xb   : > { %v5460_v43 = vld [vmem:[%s6151_s2 + $0x68] sm:$0xff] (!%p236_p3)   ;;  %v5474_v46 = vld [vmem:[%s6151_s2 + $0x80] sm:$0xff] (!%p236_p3)  }
   0xc   : > { %4571 = vmatpush3.bf16.msra.mxu0 (!%p236_p3), %v5321_v3  ;;  %v5487_v50 = vld [vmem:[%s6151_s2 + $0x88] sm:$0xff] (!%p236_p3)  }
   0xd   : > { %4579 = vmatpush3.bf16.msra.mxu1 (!%p236_p3), %v5330_v4  ;;  %4584 = vmatprep.subr.bf16.mxu0 (!%p236_p3), %v5255_v1 }
   0xe   : > { %s6160_s18 = smov (!%p292_p4, %s5245_s18), 1  ;;  %4592 = vmatprep.subr.bf16.mxu1 %v5255_v1 }
   0xf   : > { %s5144_s29 = smul.u32 80, %s6160_s18  ;;  %s4350_s24 = sshll.u32 %s6160_s18, 4 }
  0x10   : > { %s4351_s28 = sshll.u32 %s6160_s18, 6 }
  0x11   : > { %s5349_s9 = scalar_lea.vmem %s6149_s0, %s5144_s29  ;;  %s5895_s29 = scalar_lea.vmem %s6150_s1, %s4350_s24 }
  0x12   : > { %v372_v6 = vld [vmem:[%s5349_s9] sm:$0xf]  ;;  %v373_v7 = vld [vmem:[%s5349_s9 + $0x4] sm:$0x1]  ;;  %v4194_v12 = vld [vmem:[%s5349_s9 + $0x8] sm:$0xf]  ;;  %s6042_s8 = scalar_lea.vmem %s6154_s5, %s4351_s28 }
  0x13   : > { %v4184_v8 = vcombine.low %v372_v6, %v373_v7  ;;  %4581 = vmatmul.mubr.msk.bf16.vlgmr.msra.gmra.mrb[0].mxu1 %vm398_vm1, %v372_v6  ;;  %v4195_v15 = vld [vmem:[%s5349_s9 + $0xc] sm:$0x1]  ;;  %v5381_v19 = vld [vmem:[%s5349_s9 + $0x10] sm:$0xf]  ;;  %v4207_v20 = vld [vmem:[%s5349_s9 + $0x14] sm:$0x1] }
  0x14   : > { %4593 = vmatpush3.bf16.msra.mxu1 %v5344_v5  ;;  %4596 = vmatprep.mubr.msk.bf16.mxu1 %vm5256_vm0, %v5255_v1  ;;  %v4199_v18 = vcombine.low %v4194_v12, %v4195_v15  ;;  %v5400_v23 = vcombine.low %v5381_v19, %v4207_v20  ;;  %v5421_v30 = vld [vmem:[%s5349_s9 + $0x8] sm:$0xf]  ;;  %v4220_v31 = vld [vmem:[%s5349_s9 + $0xc] sm:$0x1]  ;;  %v4225_v48 = vld [vmem:[%s5349_s9 + $0x10] sm:$0xf] }
  0x15   : > { %v380_v10 = vshrl.u32 %v4184_v8, 16  ;;  %v382_v11 = vshll.u32 %v4184_v8, 16  ;;  %4594 = vmatprep.subr.bf16.mxu1 %v5255_v1  ;;  %v497_v24 = vrot.slane %v4184_v8, 1  ;;  %v4221_v37 = vcombine.low %v5421_v30, %v4220_v31  ;;  %v4226_v49 = vld [vmem:[%s5349_s9 + $0x14] sm:$0x1] }
  0x16   : > { %v621_v25 = vshll.u32 %v4199_v18, 16  ;;  %v681_v27 = vrot.slane %v4199_v18, 1  ;;  %v805_v28 = vshll.u32 %v5400_v23, 16  ;;  %v619_v32 = vshrl.u32 %v4199_v18, 16  ;;  %v4231_v58 = vld [vmem:[%s5349_s9 + $0x18] sm:$0xf] }
  0x17   : > { %v384_v13 = vrot.slane %v382_v11, 1  ;;  %v803_v35 = vshrl.u32 %v5400_v23, 16  ;;  %v941_v42 = vshll.u32 %v4221_v37, 16  ;;  %v939_v44 = vshrl.u32 %v4221_v37, 16  ;;  %v4232_v59 = vld [vmem:[%s5349_s9 + $0x1c] sm:$0x1] }
  0x18   : > { %4595 = vmatpush3.bf16.msra.mxu1 %v5359_v9  ;;  %v623_v33 = vrot.slane %v621_v25, 1  ;;  %v807_v36 = vrot.slane %v805_v28, 1  ;;  %v4228_v51 = vcombine.low %v4225_v48, %v4226_v49  ;;  %v865_v52 = vrot.slane %v5400_v23, 1  ;;  %v4238_v63 = vld [vmem:[%s5349_s9 + $0x10] sm:$0xf] }
  0x19   : > { %v385_v16 = vor.u32 %v384_v13, %v380_v10  ;;  %4608 = vmatprep.subr.bf16.mxu1 %v5255_v1  ;;  %v943_v45 = vrot.slane %v941_v42, 1  ;;  %v1031_v53 = vrot.slane %v4221_v37, 1  ;;  %v4234_v60 = vcombine.low %v4231_v58, %v4232_v59  ;;  %v4239_v6 = vld [vmem:[%s5349_s9 + $0x14] sm:$0x1]  ;;  %v4245_v20 = vld [vmem:[%s5349_s9 + $0x1c] sm:$0x1] }
  0x1a   : > { %v624_v39 = vor.u32 %v623_v33, %v619_v32  ;;  %v808_v41 = vor.u32 %v807_v36, %v803_v35  ;;  %v1130_v54 = vshll.u32 %v4228_v51, 16  ;;  %v1128_v55 = vshrl.u32 %v4228_v51, 16  ;;  %v4250_v23 = vld [vmem:[%s5349_s9 + $0x20] sm:$0xf]  ;;  %v5598_v33 = vld [vmem:[%s5349_s9 + $0x18] sm:$0xf] }
  0x1b   : > { %4573 = vmatmul.mubr.msk.bf16.vlgmr.msra.gmra.mrb[0].mxu0 %vm398_vm1, %v385_v16  ;;  %4597 = vmatmul.mubr.msk.bf16.vlgmr.msra.gmra.mrb[4].mxu1 %vm398_vm1, %v4194_v12  ;;  %v944_v47 = vor.u32 %v943_v45, %v939_v44  ;;  %v1278_v61 = vshll.u32 %v4234_v60, 16  ;;  %v1178_v62 = vrot.slane %v4228_v51, 1  ;;  %v1326_v7 = vrot.slane %v4234_v60, 1  ;;  %v4258_v35 = vld [vmem:[%s5349_s9 + $0x1c] sm:$0x1] }
  0x1c   : > { %4585 = vmatpush3.bf16.msra.mxu0 %v5368_v14  ;;  %4588 = vmatprep.mubr.msk.bf16.mxu0 %vm5256_vm0, %v5255_v1  ;;  %v1132_v56 = vrot.slane %v1130_v54, 1  ;;  %v1276_v8 = vshrl.u32 %v4234_v60, 16  ;;  %v4240_v11 = vcombine.low %v4238_v63, %v4239_v6  ;;  %v4259_v42 = vcombine.low %v5598_v33, %v4258_v35 }
  0x1d   : > { %4586 = vmatprep.subr.bf16.mxu0 %v5255_v1  ;;  %4609 = vmatpush3.bf16.msra.mxu1 %v5376_v17  ;;  %v1280_v10 = vrot.slane %v1278_v61, 1  ;;  %v4269_v61 = vld [vmem:[%s5349_s9 + $0x28] sm:$0xf] }
  0x1e   : > { %4610 = vmatprep.subr.bf16.mxu1 %v5255_v1  ;;  %4612 = vmatprep.mubr.msk.bf16.mxu1 %vm5256_vm0, %v5255_v1  ;;  %v1133_v57 = vor.u32 %v1132_v56, %v1128_v55  ;;  %v1384_v13 = vshll.u32 %v4240_v11, 16  ;;  %v1382_v15 = vshrl.u32 %v4240_v11, 16  ;;  %v1474_v28 = vrot.slane %v4240_v11, 1 }
  0x1f   : > { %v1281_v12 = vor.u32 %v1280_v10, %v1276_v8  ;;  %v1917_v56 = vrot.slane %v4259_v42, 1  ;;  %v4276_v8 = vld [vmem:[%s5349_s9 + $0x20] sm:$0xf]  ;;  %v4277_v10 = vld [vmem:[%s5349_s9 + $0x24] sm:$0x1] }
  0x20   : > { %4587 = vmatpush3.bf16.msra.mxu0 %v5388_v21  ;;  %v1386_v16 = vrot.slane %v1384_v13, 1 }
  0x21   : > { %4600 = vmatprep.subr.bf16.mxu0 %v5255_v1  ;;  %4611 = vmatpush3.bf16.msra.mxu1 %v5397_v22 }
  0x22   : > { %4624 = vmatprep.subr.bf16.mxu1 %v5255_v1  ;;  %v1387_v18 = vor.u32 %v1386_v16, %v1382_v15  ;;  %v4278_v15 = vcombine.low %v4276_v8, %v4277_v10 }
  0x23   : > { %4589 = vmatmul.mubr.msk.bf16.vlgmr.msra.gmra.mrb[4].mxu0 %vm398_vm1, %v497_v24  ;;  %v4251_v24 = vld [vmem:[%s5349_s9 + $0x24] sm:$0x1] }
  0x24   : > { %4601 = vmatpush3.bf16.msra.mxu0 %v5409_v26  ;;  %4604 = vmatprep.mubr.msk.bf16.mxu0 %vm5256_vm0, %v5255_v1 }
  0x25   : > { %4602 = vmatprep.subr.bf16.mxu0 %v5255_v1  ;;  %4613 = vmatmul.mubr.msk.bf16.vlgmr.msra.gmra.mrb[8].mxu1 %vm398_vm1, %v681_v27  ;;  %v5587_v27 = vcombine.low %v4250_v23, %v4251_v24  ;;  %v4282_v24 = vld [vmem:[%s5349_s9 + $0x28] sm:$0xf] }
  0x26   : > { %4625 = vmatpush3.bf16.msra.mxu1 %v5418_v29  ;;  %4628 = vmatprep.mubr.msk.bf16.mxu1 %vm5256_vm0, %v5255_v1 }
  0x27   : > { %4626 = vmatprep.subr.bf16.mxu1 %v5255_v1  ;;  %v1721_v32 = vshll.u32 %v5587_v27, 16  ;;  %v1769_v55 = vrot.slane %v5587_v27, 1 }
  0x28   : > { %4603 = vmatpush3.bf16.msra.mxu0 %v5429_v34 }
  0x29   : > { %4616 = vmatprep.subr.bf16.mxu0 %v5255_v1 }
  0x2a   : > { %4627 = vmatpush3.bf16.msra.mxu1 %v5441_v38 }
  0x2b   : > { %4605 = vmatmul.mubr.msk.bf16.vlgmr.msra.gmra.mrb[8].mxu0 %vm398_vm1, %v624_v39  ;;  %4640 = vmatprep.subr.bf16.mxu1 %v5255_v1  ;;  %v1719_v39 = vshrl.u32 %v5587_v27, 16  ;;  %v4288_v27 = vld [vmem:[%s5349_s9 + $0x30] sm:$0xf] }
  0x2c   : > { %4617 = vmatpush3.bf16.msra.mxu0 %v5450_v40  ;;  %4620 = vmatprep.mubr.msk.bf16.mxu0 %vm5256_vm0, %v5255_v1 }
  0x2d   : > { %4618 = vmatprep.subr.bf16.mxu0 %v5255_v1  ;;  %4629 = vmatmul.mubr.msk.bf16.vlgmr.msra.gmra.mrb[12].mxu1 %vm398_vm1, %v808_v41  ;;  %v1723_v41 = vrot.slane %v1721_v32, 1  ;;  %v2360_v32 = vrot.slane %v4278_v15, 1 }
  0x2e   : > { %4641 = vmatpush3.bf16.msra.mxu1 %v5308_v0  ;;  %4644 = vmatprep.mubr.msk.bf16.mxu1 %vm5256_vm0, %v5255_v1 }
  0x2f   : > { %4642 = vmatprep.subr.bf16.mxu1 %v5255_v1  ;;  %v1724_v45 = vor.u32 %v1723_v41, %v1719_v39  ;;  %v4296_v39 = vld [vmem:[%s5349_s9 + $0x2c] sm:$0x1] }
  0x30   : > { %4619 = vmatpush3.bf16.msra.mxu0 %v5460_v43 }
  0x31   : > { %4632 = vmatprep.subr.bf16.mxu0 %v5255_v1 }
  0x32   : > { %4643 = vmatpush3.bf16.msra.mxu1 %v5321_v3 }
  0x33   : > { %4621 = vmatmul.mubr.msk.bf16.vlgmr.msra.gmra.mrb[12].mxu0 %vm398_vm1, %v5381_v19  ;;  %4656 = vmatprep.subr.bf16.mxu1 %v5255_v1  ;;  %v4244_v19 = vld [vmem:[%s5349_s9 + $0x18] sm:$0xf] }
  0x34   : > { %4633 = vmatpush3.bf16.msra.mxu0 %v5474_v46  ;;  %4636 = vmatprep.mubr.msk.bf16.mxu0 %vm5256_vm0, %v5255_v1  ;;  %v4247_v25 = vcombine.low %v4244_v19, %v4245_v20 }
  0x35   : > { %4634 = vmatprep.subr.bf16.mxu0 %v5255_v1  ;;  %4645 = vmatmul.mubr.msk.bf16.vlgmr.msra.gmra.mrb[16].mxu1 %vm398_vm1, %v944_v47  ;;  %v1827_v47 = vshll.u32 %v4259_v42, 16 }
  0x36   : > { %4657 = vmatpush3.bf16.msra.mxu1 %v5368_v14  ;;  %4660 = vmatprep.mubr.msk.bf16.mxu1 %vm5256_vm0, %v5255_v1  ;;  %v1621_v31 = vrot.slane %v4247_v25, 1  ;;  %v1571_v36 = vshrl.u32 %v4247_v25, 16 }
  0x37   : > { %4658 = vmatprep.subr.bf16.mxu1 %v5255_v1  ;;  %v1829_v49 = vrot.slane %v1827_v47, 1 }
  0x38   : > { %4635 = vmatpush3.bf16.msra.mxu0 %v5487_v50 }
  0x39   : > { %4648 = vmatprep.subr.bf16.mxu0 %v5255_v1 }
  0x3a   : > { %4659 = vmatpush3.bf16.msra.mxu1 %v5388_v21 }
  0x3b   : > { %4637 = vmatmul.mubr.msk.bf16.vlgmr.msra.gmra.mrb[16].mxu0 %vm398_vm1, %v865_v52  ;;  %4672 = vmatprep.subr.bf16.mxu1 %v5255_v1  ;;  %v4263_v52 = vld [vmem:[%s5349_s9 + $0x20] sm:$0xf] }
  0x3c   : > { %4649 = vmatpush3.bf16.msra.mxu0 %v5315_v2  ;;  %4652 = vmatprep.mubr.msk.bf16.mxu0 %vm5256_vm0, %v5255_v1 }
  0x3d   : > { %4650 = vmatprep.subr.bf16.mxu0 %v5255_v1  ;;  %4661 = vmatmul.mubr.msk.bf16.vlgmr.msra.gmra.mrb[20].mxu1 %vm398_vm1, %v1031_v53  ;;  %v4264_v53 = vld [vmem:[%s5349_s9 + $0x24] sm:$0x1] }
  0x3e   : > { %4673 = vmatpush3.bf16.msra.mxu1 %v5409_v26  ;;  %4676 = vmatprep.mubr.msk.bf16.mxu1 %vm5256_vm0, %v5255_v1  ;;  %v4266_v54 = vcombine.low %v4263_v52, %v4264_v53 }
  0x3f   : > { %4674 = vmatprep.subr.bf16.mxu1 %v5255_v1 }
  0x40   : > { %4651 = vmatpush3.bf16.msra.mxu0 %v5330_v4 }
  0x41   : > { %4664 = vmatprep.subr.bf16.mxu0 %v5255_v1 }
  0x42   : > { %4675 = vmatpush3.bf16.msra.mxu1 %v5429_v34 }
  0x43   : > { %4653 = vmatmul.mubr.msk.bf16.vlgmr.msra.gmra.mrb[20].mxu0 %vm398_vm1, %v5421_v30  ;;  %4688 = vmatprep.subr.bf16.mxu1 %v5255_v1  ;;  %v1573_v30 = vshll.u32 %v4247_v25, 16  ;;  %v4283_v25 = vld [vmem:[%s5349_s9 + $0x2c] sm:$0x1] }
  0x44   : > { %4665 = vmatpush3.bf16.msra.mxu0 %v5344_v5  ;;  %4668 = vmatprep.mubr.msk.bf16.mxu0 %vm5256_vm0, %v5255_v1 }
  0x45   : > { %4666 = vmatprep.subr.bf16.mxu0 %v5255_v1  ;;  %4677 = vmatmul.mubr.msk.bf16.vlgmr.msra.gmra.mrb[24].mxu1 %vm398_vm1, %v1133_v57  ;;  %v1575_v37 = vrot.slane %v1573_v30, 1  ;;  %v2016_v57 = vshll.u32 %v4266_v54, 16  ;;  %v4285_v30 = vcombine.low %v4282_v24, %v4283_v25  ;;  %v5900_v25 = vld [vmem:[%s6151_s2 + $0x18] sm:$0xff]  }
  0x46   : > { %4689 = vmatpush3.bf16.msra.mxu1 %v5450_v40  ;;  %4692 = vmatprep.mubr.msk.bf16.mxu1 %vm5256_vm0, %v5255_v1 }
  0x47   : > { %4690 = vmatprep.subr.bf16.mxu1 %v5255_v1  ;;  %v1576_v44 = vor.u32 %v1575_v37, %v1571_v36  ;;  %v2018_v59 = vrot.slane %v2016_v57, 1  ;;  %v2507_v35 = vrot.slane %v4285_v30, 1  ;;  %v5745_v37 = vld [vmem:[%s5349_s9 + $0x28] sm:$0xf]  ;;  %v2457_v41 = vshrl.u32 %v4285_v30, 16 }
  0x48   : > { %4667 = vmatpush3.bf16.msra.mxu0 %v5359_v9  ;;  %v4297_v47 = vcombine.low %v5745_v37, %v4296_v39 }
  0x49   : > { %4680 = vmatprep.subr.bf16.mxu0 %v5255_v1 }
  0x4a   : > { %4691 = vmatpush3.bf16.msra.mxu1 %v5460_v43  ;;  %v2803_v57 = vrot.slane %v4297_v47, 1 }
  0x4b   : > { %4669 = vmatmul.mubr.msk.bf16.vlgmr.msra.gmra.mrb[24].mxu0 %vm398_vm1, %v4225_v48  ;;  %4704 = vmatprep.subr.bf16.mxu1 %v5255_v1  ;;  %v1825_v48 = vshrl.u32 %v4259_v42, 16 }
  0x4c   : > { %4681 = vmatpush3.bf16.msra.mxu0 %v5376_v17  ;;  %4684 = vmatprep.mubr.msk.bf16.mxu0 %vm5256_vm0, %v5255_v1 }
  0x4d   : > { %4682 = vmatprep.subr.bf16.mxu0 %v5255_v1  ;;  %4693 = vmatmul.mubr.msk.bf16.vlgmr.msra.gmra.mrb[28].mxu1 %vm398_vm1, %v4231_v58  ;;  %v1830_v51 = vor.u32 %v1829_v49, %v1825_v48  ;;  %v2014_v58 = vshrl.u32 %v4266_v54, 16 }
  0x4e   : > { %4705 = vmatpush3.bf16.msra.mxu1 %v5474_v46  ;;  %4708 = vmatprep.mubr.msk.bf16.mxu1 %vm5256_vm0, %v5255_v1 }
  0x4f   : > { %4706 = vmatprep.subr.bf16.mxu1 %v5255_v1  ;;  %v2019_v60 = vor.u32 %v2018_v59, %v2014_v58 }
  0x50   : > { %4683 = vmatpush3.bf16.msra.mxu0 %v5397_v22 }
  0x51   : > { %4696 = vmatprep.subr.bf16.mxu0 %v5255_v1 }
  0x52   : > { %4707 = vmatpush3.bf16.msra.mxu1 %v5487_v50 }
  0x53   : > { %4685 = vmatmul.mubr.msk.bf16.vlgmr.msra.gmra.mrb[28].mxu0 %vm398_vm1, %v1178_v62  ;;  %4720 = vmatprep.subr.bf16.mxu1 %v5255_v1  ;;  %v4270_v62 = vld [vmem:[%s5349_s9 + $0x2c] sm:$0x1] }
  0x54   : > { %4697 = vmatpush3.bf16.msra.mxu0 %v5418_v29  ;;  %4700 = vmatprep.mubr.msk.bf16.mxu0 %vm5256_vm0, %v5255_v1 }
  0x55   : > { %4698 = vmatprep.subr.bf16.mxu0 %v5255_v1  ;;  %4709 = vmatmul.mubr.msk.bf16.vlgmr.msra.gmra.mrb[32].mxu1 %vm398_vm1, %v1326_v7  ;;  %v2064_v7 = vrot.slane %v4266_v54, 1 }
  0x56   : > { %4721 = vmatpush3.bf16.msra.mxu1 %v5315_v2  ;;  %4724 = vmatprep.mubr.msk.bf16.mxu1 %vm5256_vm0, %v5255_v1 }
  0x57   : > { %4722 = vmatprep.subr.bf16.mxu1 %v5255_v1 }
  0x58   : > { %4699 = vmatpush3.bf16.msra.mxu0 %v5441_v38 }
  0x59   : > { %4712 = vmatprep.subr.bf16.mxu0 %v5255_v1 }
  0x5a   : > { %4723 = vmatpush3.bf16.msra.mxu1 %v5330_v4 }
  0x5b   : > { %4701 = vmatmul.mubr.msk.bf16.vlgmr.msra.gmra.mrb[32].mxu0 %vm398_vm1, %v1281_v12  ;;  %4736 = vmatprep.subr.bf16.mxu1 %v5255_v1 }
  0x5c   : > { %4713 = vmatpush3.bf16.msra.mxu0 %v5308_v0  ;;  %4716 = vmatprep.mubr.msk.bf16.mxu0 %vm5256_vm0, %v5255_v1 }
  0x5d   : > { %4714 = vmatprep.subr.bf16.mxu0 %v5255_v1  ;;  %4725 = vmatmul.mubr.msk.bf16.vlgmr.msra.gmra.mrb[36].mxu1 %vm398_vm1, %v4238_v63  ;;  %v4272_v63 = vcombine.low %v4269_v61, %v4270_v62 }
  0x5e   : > { %4737 = vmatpush3.bf16.msra.mxu1 %v5344_v5  ;;  %4740 = vmatprep.mubr.msk.bf16.mxu1 %vm5256_vm0, %v5255_v1 }
  0x5f   : > { %4738 = vmatprep.subr.bf16.mxu1 %v5255_v1  ;;  %v2164_v6 = vshll.u32 %v4272_v63, 16  ;;  %v2212_v11 = vrot.slane %v4272_v63, 1  ;;  %v2162_v12 = vshrl.u32 %v4272_v63, 16 }
  0x60   : > { %4715 = vmatpush3.bf16.msra.mxu0 %v5321_v3 }
  0x61   : > { %4728 = vmatprep.subr.bf16.mxu0 %v5255_v1  ;;  %v2166_v13 = vrot.slane %v2164_v6, 1 }
  0x62   : > { %4739 = vmatpush3.bf16.msra.mxu1 %v5359_v9 }
  0x63   : > { %4717 = vmatmul.mubr.msk.bf16.vlgmr.msra.gmra.mrb[36].mxu0 %vm398_vm1, %v1387_v18  ;;  %4752 = vmatprep.subr.bf16.mxu1 %v5255_v1  ;;  %v2167_v16 = vor.u32 %v2166_v13, %v2162_v12  ;;  %v2270_v18 = vshll.u32 %v4278_v15, 16 }
  0x64   : > { %4729 = vmatpush3.bf16.msra.mxu0 %v5368_v14  ;;  %4732 = vmatprep.mubr.msk.bf16.mxu0 %vm5256_vm0, %v5255_v1 }
  0x65   : > { %4730 = vmatprep.subr.bf16.mxu0 %v5255_v1  ;;  %4741 = vmatmul.mubr.msk.bf16.vlgmr.msra.gmra.mrb[40].mxu1 %vm398_vm1, %v4244_v19  ;;  %v2268_v19 = vshrl.u32 %v4278_v15, 16  ;;  %v2272_v20 = vrot.slane %v2270_v18, 1 }
  0x66   : > { %4753 = vmatpush3.bf16.msra.mxu1 %v5376_v17  ;;  %4756 = vmatprep.mubr.msk.bf16.mxu1 %vm5256_vm0, %v5255_v1 }
  0x67   : > { %4754 = vmatprep.subr.bf16.mxu1 %v5255_v1 }
  0x68   : > { %4731 = vmatpush3.bf16.msra.mxu0 %v5388_v21 }
  0x69   : > { %4744 = vmatprep.subr.bf16.mxu0 %v5255_v1 }
  0x6a   : > { %4755 = vmatpush3.bf16.msra.mxu1 %v5397_v22 }
  0x6b   : > { %4733 = vmatmul.mubr.msk.bf16.vlgmr.msra.gmra.mrb[40].mxu0 %vm398_vm1, %v1474_v28  ;;  %4768 = vmatprep.subr.bf16.mxu1 %v5255_v1  ;;  %v4289_v28 = vld [vmem:[%s5349_s9 + $0x34] sm:$0x1] }
  0x6c   : > { %4745 = vmatpush3.bf16.msra.mxu0 %v5409_v26  ;;  %4748 = vmatprep.mubr.msk.bf16.mxu0 %vm5256_vm0, %v5255_v1 }
  0x6d   : > { %4746 = vmatprep.subr.bf16.mxu0 %v5255_v1  ;;  %4757 = vmatmul.mubr.msk.bf16.vlgmr.msra.gmra.mrb[44].mxu1 %vm398_vm1, %v1621_v31  ;;  %v5734_v31 = vcombine.low %v4288_v27, %v4289_v28 }
  0x6e   : > { %4769 = vmatpush3.bf16.msra.mxu1 %v5418_v29  ;;  %4772 = vmatprep.mubr.msk.bf16.mxu1 %vm5256_vm0, %v5255_v1 }
  0x6f   : > { %4770 = vmatprep.subr.bf16.mxu1 %v5255_v1  ;;  %v2607_v36 = vshll.u32 %v5734_v31, 16 }
  0x70   : > { %4747 = vmatpush3.bf16.msra.mxu0 %v5429_v34 }
  0x71   : > { %4760 = vmatprep.subr.bf16.mxu0 %v5255_v1 }
  0x72   : > { %4771 = vmatpush3.bf16.msra.mxu1 %v5441_v38 }
  0x73   : > { %4749 = vmatmul.mubr.msk.bf16.vlgmr.msra.gmra.mrb[44].mxu0 %vm398_vm1, %v1576_v44  ;;  %4784 = vmatprep.subr.bf16.mxu1 %v5255_v1  ;;  %v2605_v44 = vshrl.u32 %v5734_v31, 16 }
  0x74   : > { %4761 = vmatpush3.bf16.msra.mxu0 %v5450_v40  ;;  %4764 = vmatprep.mubr.msk.bf16.mxu0 %vm5256_vm0, %v5255_v1 }
  0x75   : > { %4762 = vmatprep.subr.bf16.mxu0 %v5255_v1  ;;  %4773 = vmatmul.mubr.msk.bf16.vlgmr.msra.gmra.mrb[48].mxu1 %vm398_vm1, %v1724_v45  ;;  %v2609_v45 = vrot.slane %v2607_v36, 1  ;;  %v5913_v36 = vld [vmem:[%s5895_s29] sm:$0xf] }
  0x76   : > { %4785 = vmatpush3.bf16.msra.mxu1 %v5308_v0  ;;  %4788 = vmatprep.mubr.msk.bf16.mxu1 %vm5256_vm0, %v5255_v1 }
  0x77   : > { %4786 = vmatprep.subr.bf16.mxu1 %v5255_v1  ;;  %v2610_v49 = vor.u32 %v2609_v45, %v2605_v44  ;;  %v5934_v45 = vld [vmem:[%s6151_s2 + $0x50] sm:$0xff]  }
  0x78   : > { %4763 = vmatpush3.bf16.msra.mxu0 %v5460_v43 }
  0x79   : > { %4776 = vmatprep.subr.bf16.mxu0 %v5255_v1 }
  0x7a   : > { %4787 = vmatpush3.bf16.msra.mxu1 %v5321_v3 }
  0x7b   : > { %4765 = vmatmul.mubr.msk.bf16.vlgmr.msra.gmra.mrb[48].mxu0 %vm398_vm1, %v4250_v23  ;;  %4800 = vmatprep.subr.bf16.mxu1 %v5255_v1  ;;  %v2273_v23 = vor.u32 %v2272_v20, %v2268_v19 }
  0x7c   : > { %4777 = vmatpush3.bf16.msra.mxu0 %v5474_v46  ;;  %4780 = vmatprep.mubr.msk.bf16.mxu0 %vm5256_vm0, %v5255_v1 }
  0x7d   : > { %4778 = vmatprep.subr.bf16.mxu0 %v5255_v1  ;;  %4789 = vmatmul.mubr.msk.bf16.vlgmr.msra.gmra.mrb[52].mxu1 %vm398_vm1, %v1830_v51  ;;  %v2713_v51 = vshll.u32 %v4297_v47, 16 }
  0x7e   : > { %4801 = vmatpush3.bf16.msra.mxu1 %v5368_v14  ;;  %4804 = vmatprep.mubr.msk.bf16.mxu1 %vm5256_vm0, %v5255_v1 }
  0x7f   : > { %4802 = vmatprep.subr.bf16.mxu1 %v5255_v1  ;;  %v2715_v53 = vrot.slane %v2713_v51, 1 }
  0x80   : > { %4779 = vmatpush3.bf16.msra.mxu0 %v5487_v50 }
  0x81   : > { %4792 = vmatprep.subr.bf16.mxu0 %v5255_v1 }
  0x82   : > { %4803 = vmatpush3.bf16.msra.mxu1 %v5388_v21 }
  0x83   : > { %4781 = vmatmul.mubr.msk.bf16.vlgmr.msra.gmra.mrb[52].mxu0 %vm398_vm1, %v1769_v55  ;;  %4816 = vmatprep.subr.bf16.mxu1 %v5255_v1  ;;  %v4301_v55 = vld [vmem:[%s5349_s9 + $0x30] sm:$0xf] }
  0x84   : > { %4793 = vmatpush3.bf16.msra.mxu0 %v5315_v2  ;;  %4796 = vmatprep.mubr.msk.bf16.mxu0 %vm5256_vm0, %v5255_v1 }
  0x85   : > { %4794 = vmatprep.subr.bf16.mxu0 %v5255_v1  ;;  %4805 = vmatmul.mubr.msk.bf16.vlgmr.msra.gmra.mrb[56].mxu1 %vm398_vm1, %v1917_v56  ;;  %v4302_v56 = vld [vmem:[%s5349_s9 + $0x34] sm:$0x1] }
  0x86   : > { %4817 = vmatpush3.bf16.msra.mxu1 %v5409_v26  ;;  %4820 = vmatprep.mubr.msk.bf16.mxu1 %vm5256_vm0, %v5255_v1 }
  0x87   : > { %4818 = vmatprep.subr.bf16.mxu1 %v5255_v1 }
  0x88   : > { %4795 = vmatpush3.bf16.msra.mxu0 %v5330_v4 }
  0x89   : > { %4808 = vmatprep.subr.bf16.mxu0 %v5255_v1 }
  0x8a   : > { %4819 = vmatpush3.bf16.msra.mxu1 %v5429_v34 }
  0x8b   : > { %4797 = vmatmul.mubr.msk.bf16.vlgmr.msra.gmra.mrb[56].mxu0 %vm398_vm1, %v5598_v33  ;;  %4832 = vmatprep.subr.bf16.mxu1 %v5255_v1  ;;  %v2459_v33 = vshll.u32 %v4285_v30, 16  ;;  %v4320_v30 = vld [vmem:[%s5349_s9 + $0x38] sm:$0xf] }
  0x8c   : > { %4809 = vmatpush3.bf16.msra.mxu0 %v5344_v5  ;;  %4812 = vmatprep.mubr.msk.bf16.mxu0 %vm5256_vm0, %v5255_v1 }
  0x8d   : > { %4810 = vmatprep.subr.bf16.mxu0 %v5255_v1  ;;  %4821 = vmatmul.mubr.msk.bf16.vlgmr.msra.gmra.mrb[60].mxu1 %vm398_vm1, %v2019_v60  ;;  %v2461_v42 = vrot.slane %v2459_v33, 1 }
  0x8e   : > { %4833 = vmatpush3.bf16.msra.mxu1 %v5450_v40  ;;  %4836 = vmatprep.mubr.msk.bf16.mxu1 %vm5256_vm0, %v5255_v1 }
  0x8f   : > { %4834 = vmatprep.subr.bf16.mxu1 %v5255_v1  ;;  %v2462_v48 = vor.u32 %v2461_v42, %v2457_v41  ;;  %v5921_v41 = vld [vmem:[%s6151_s2 + $0x20] sm:$0xff]  }
  0x90   : > { %4811 = vmatpush3.bf16.msra.mxu0 %v5359_v9 }
  0x91   : > { %4824 = vmatprep.subr.bf16.mxu0 %v5255_v1 }
  0x92   : > { %4835 = vmatpush3.bf16.msra.mxu1 %v5460_v43 }
  0x93   : > { %4813 = vmatmul.mubr.msk.bf16.vlgmr.msra.gmra.mrb[60].mxu0 %vm398_vm1, %v4263_v52  ;;  %4848 = vmatprep.subr.bf16.mxu1 %v5255_v1  ;;  %v2711_v52 = vshrl.u32 %v4297_v47, 16 }
  0x94   : > { %4825 = vmatpush3.bf16.msra.mxu0 %v5376_v17  ;;  %4828 = vmatprep.mubr.msk.bf16.mxu0 %vm5256_vm0, %v5255_v1 }
  0x95   : > { %4826 = vmatprep.subr.bf16.mxu0 %v5255_v1  ;;  %4837 = vmatmul.mubr.msk.bf16.vlgmr.msra.gmra.mrb[64].mxu1 %vm398_vm1, %v4269_v61  ;;  %v2716_v54 = vor.u32 %v2715_v53, %v2711_v52 }
  0x96   : > { %4849 = vmatpush3.bf16.msra.mxu1 %v5474_v46  ;;  %4852 = vmatprep.mubr.msk.bf16.mxu1 %vm5256_vm0, %v5255_v1 }
  0x97   : > { %4850 = vmatprep.subr.bf16.mxu1 %v5255_v1 }
  0x98   : > { %4827 = vmatpush3.bf16.msra.mxu0 %v5397_v22 }
  0x99   : > { %4840 = vmatprep.subr.bf16.mxu0 %v5255_v1 }
  0x9a   : > { %4851 = vmatpush3.bf16.msra.mxu1 %v5487_v50 }
  0x9b   : > { %4829 = vmatmul.mubr.msk.bf16.vlgmr.msra.gmra.mrb[64].mxu0 %vm398_vm1, %v2064_v7  ;;  %4864 = vmatprep.subr.bf16.mxu1 %v5255_v1 }
  0x9c   : > { %4841 = vmatpush3.bf16.msra.mxu0 %v5418_v29  ;;  %4844 = vmatprep.mubr.msk.bf16.mxu0 %vm5256_vm0, %v5255_v1 }
  0x9d   : > { %4842 = vmatprep.subr.bf16.mxu0 %v5255_v1  ;;  %4853 = vmatmul.mubr.msk.bf16.vlgmr.msra.gmra.mrb[68].mxu1 %vm398_vm1, %v2212_v11  ;;  %v5866_v11 = vld [vmem:[%s6151_s2 + $0x8] sm:$0xff]  }
  0x9e   : > { %4865 = vmatpush3.bf16.msra.mxu1 %v5315_v2  ;;  %4868 = vmatprep.mubr.msk.bf16.mxu1 %vm5256_vm0, %v5255_v1 }
  0x9f   : > { %4866 = vmatprep.subr.bf16.mxu1 %v5255_v1 }
  0xa0   : > { %4843 = vmatpush3.bf16.msra.mxu0 %v5441_v38 }
  0xa1   : > { %4856 = vmatprep.subr.bf16.mxu0 %v5255_v1 }
  0xa2   : > { %4867 = vmatpush3.bf16.msra.mxu1 %v5330_v4 }
  0xa3   : > { %4845 = vmatmul.mubr.msk.bf16.vlgmr.msra.gmra.mrb[68].mxu0 %vm398_vm1, %v2167_v16  ;;  %4880 = vmatprep.subr.bf16.mxu1 %v5255_v1  ;;  %v5886_v16 = vld [vmem:[%s6151_s2 + $0x30] sm:$0xff]  }
  0xa4   : > { %4857 = vmatpush3.bf16.msra.mxu0 %v5308_v0  ;;  %4860 = vmatprep.mubr.msk.bf16.mxu0 %vm5256_vm0, %v5255_v1 }
  0xa5   : > { %4858 = vmatprep.subr.bf16.mxu0 %v5255_v1  ;;  %4869 = vmatmul.mubr.msk.bf16.vlgmr.msra.gmra.mrb[72].mxu1 %vm398_vm1, %v4276_v8 }
  0xa6   : > { %4881 = vmatpush3.bf16.msra.mxu1 %v5344_v5  ;;  %4884 = vmatprep.mubr.msk.bf16.mxu1 %vm5256_vm0, %v5255_v1 }
  0xa7   : > { %4882 = vmatprep.subr.bf16.mxu1 %v5255_v1 }
  0xa8   : > { %4859 = vmatpush3.bf16.msra.mxu0 %v5321_v3 }
  0xa9   : > { %4872 = vmatprep.subr.bf16.mxu0 %v5255_v1 }
  0xaa   : > { %4883 = vmatpush3.bf16.msra.mxu1 %v5359_v9 }
  0xab   : > { %4861 = vmatmul.mubr.msk.bf16.vlgmr.msra.gmra.mrb[72].mxu0 %vm398_vm1, %v2273_v23  ;;  %4896 = vmatprep.subr.bf16.mxu1 %v5255_v1 }
  0xac   : > { %4873 = vmatpush3.bf16.msra.mxu0 %v5368_v14  ;;  %4876 = vmatprep.mubr.msk.bf16.mxu0 %vm5256_vm0, %v5255_v1 }
  0xad   : > { %4874 = vmatprep.subr.bf16.mxu0 %v5255_v1  ;;  %4885 = vmatmul.mubr.msk.bf16.vlgmr.msra.gmra.mrb[76].mxu1 %vm398_vm1, %v4282_v24 }
  0xae   : > { %4897 = vmatpush3.bf16.msra.mxu1 %v5376_v17  ;;  %4900 = vmatprep.mubr.msk.bf16.mxu1 %vm5256_vm0, %v5255_v1 }
  0xaf   : > { %4898 = vmatprep.subr.bf16.mxu1 %v5255_v1 }
  0xb0   : > { %4875 = vmatpush3.bf16.msra.mxu0 %v5388_v21 }
  0xb1   : > { %4888 = vmatprep.subr.bf16.mxu0 %v5255_v1 }
  0xb2   : > { %4899 = vmatpush3.bf16.msra.mxu1 %v5397_v22 }
  0xb3   : > { %4877 = vmatmul.mubr.msk.bf16.vlgmr.msra.gmra.mrb[76].mxu0 %vm398_vm1, %v2360_v32  ;;  %4912 = vmatprep.subr.bf16.mxu1 %v5255_v1 }
  0xb4   : > { %4889 = vmatpush3.bf16.msra.mxu0 %v5409_v26  ;;  %4892 = vmatprep.mubr.msk.bf16.mxu0 %vm5256_vm0, %v5255_v1 }
  0xb5   : > { %4890 = vmatprep.subr.bf16.mxu0 %v5255_v1  ;;  %4901 = vmatmul.mubr.msk.bf16.vlgmr.msra.gmra.mrb[80].mxu1 %vm398_vm1, %v2507_v35  ;;  %v5909_v35 = vld [vmem:[%s6151_s2 + $0x38] sm:$0xff]  }
  0xb6   : > { %4913 = vmatpush3.bf16.msra.mxu1 %v5418_v29  ;;  %4916 = vmatprep.mubr.msk.bf16.mxu1 %vm5256_vm0, %v5255_v1 }
  0xb7   : > { %4914 = vmatprep.subr.bf16.mxu1 %v5255_v1 }
  0xb8   : > { %4891 = vmatpush3.bf16.msra.mxu0 %v5429_v34 }
  0xb9   : > { %4904 = vmatprep.subr.bf16.mxu0 %v5255_v1 }
  0xba   : > { %4915 = vmatpush3.bf16.msra.mxu1 %v5441_v38 }
  0xbb   : > { %4893 = vmatmul.mubr.msk.bf16.vlgmr.msra.gmra.mrb[80].mxu0 %vm398_vm1, %v2462_v48  ;;  %4928 = vmatprep.subr.bf16.mxu1 %v5255_v1 }
  0xbc   : > { %4905 = vmatpush3.bf16.msra.mxu0 %v5450_v40  ;;  %4908 = vmatprep.mubr.msk.bf16.mxu0 %vm5256_vm0, %v5255_v1 }
  0xbd   : > { %4906 = vmatprep.subr.bf16.mxu0 %v5255_v1  ;;  %4917 = vmatmul.mubr.msk.bf16.vlgmr.msra.gmra.mrb[84].mxu1 %vm398_vm1, %v2610_v49 }
  0xbe   : > { %4929 = vmatpush3.bf16.msra.mxu1 %v5308_v0  ;;  %4932 = vmatprep.mubr.msk.bf16.mxu1 %vm5256_vm0, %v5255_v1  ;;  %v4304_v0 = vcombine.low %v4301_v55, %v4302_v56 }
  0xbf   : > { %4930 = vmatprep.subr.bf16.mxu1 %v5255_v1 }
  0xc0   : > { %4907 = vmatpush3.bf16.msra.mxu0 %v5460_v43  ;;  %v2902_v58 = vshll.u32 %v4304_v0, 16 }
  0xc1   : > { %4920 = vmatprep.subr.bf16.mxu0 %v5255_v1 }
  0xc2   : > { %4931 = vmatpush3.bf16.msra.mxu1 %v5321_v3  ;;  %v2655_v3 = vrot.slane %v5734_v31, 1  ;;  %v2904_v59 = vrot.slane %v2902_v58, 1  ;;  %v4321_v31 = vld [vmem:[%s5349_s9 + $0x3c] sm:$0x1]  ;;  %v5946_v58 = vld [vmem:[%s5349_s9 + $0x38] sm:$0xf] }
  0xc3   : > { %4909 = vmatmul.mubr.msk.bf16.vlgmr.msra.gmra.mrb[84].mxu0 %vm398_vm1, %v4288_v27  ;;  %4944 = vmatprep.subr.bf16.mxu1 %v5255_v1  ;;  %v4323_v39 = vcombine.low %v4320_v30, %v4321_v31 }
  0xc4   : > { %4921 = vmatpush3.bf16.msra.mxu0 %v5474_v46  ;;  %4924 = vmatprep.mubr.msk.bf16.mxu0 %vm5256_vm0, %v5255_v1 }
  0xc5   : > { %4922 = vmatprep.subr.bf16.mxu0 %v5255_v1  ;;  %4933 = vmatmul.mubr.msk.bf16.vlgmr.msra.gmra.mrb[88].mxu1 %vm398_vm1, %v2716_v54  ;;  %v3345_v51 = vshll.u32 %v4323_v39, 16 }
  0xc6   : > { %4945 = vmatpush3.bf16.msra.mxu1 %v5368_v14  ;;  %4948 = vmatprep.mubr.msk.bf16.mxu1 %vm5256_vm0, %v5255_v1  ;;  %v2900_v14 = vshrl.u32 %v4304_v0, 16 }
  0xc7   : > { %4946 = vmatprep.subr.bf16.mxu1 %v5255_v1 }
  0xc8   : > { %4923 = vmatpush3.bf16.msra.mxu0 %v5487_v50 }
  0xc9   : > { %4936 = vmatprep.subr.bf16.mxu0 %v5255_v1 }
  0xca   : > { %4947 = vmatpush3.bf16.msra.mxu1 %v5388_v21 }
  0xcb   : > { %4925 = vmatmul.mubr.msk.bf16.vlgmr.msra.gmra.mrb[88].mxu0 %vm398_vm1, %v2655_v3  ;;  %4960 = vmatprep.subr.bf16.mxu1 %v5255_v1 }
  0xcc   : > { %4937 = vmatpush3.bf16.msra.mxu0 %v5315_v2  ;;  %4940 = vmatprep.mubr.msk.bf16.mxu0 %vm5256_vm0, %v5255_v1  ;;  %v2905_v2 = vor.u32 %v2904_v59, %v2900_v14  ;;  %v4332_v14 = vld [vmem:[%s5349_s9 + $0x3c] sm:$0x1]  ;;  %v3343_v59 = vshrl.u32 %v4323_v39, 16 }
  0xcd   : > { %4938 = vmatprep.subr.bf16.mxu0 %v5255_v1  ;;  %4949 = vmatmul.mubr.msk.bf16.vlgmr.msra.gmra.mrb[92].mxu1 %vm398_vm1, %v2803_v57 }
  0xce   : > { %4961 = vmatpush3.bf16.msra.mxu1 %v5409_v26  ;;  %4964 = vmatprep.mubr.msk.bf16.mxu1 %vm5256_vm0, %v5255_v1 }
  0xcf   : > { %4962 = vmatprep.subr.bf16.mxu1 %v5255_v1 }
  0xd0   : > { %4939 = vmatpush3.bf16.msra.mxu0 %v5330_v4  ;;  %v4307_v4 = vld [vmem:[%s5349_s9 + $0x38] sm:$0xf] }
  0xd1   : > { %4952 = vmatprep.subr.bf16.mxu0 %v5255_v1 }
  0xd2   : > { %4963 = vmatpush3.bf16.msra.mxu1 %v5429_v34  ;;  %v4308_v34 = vld [vmem:[%s5349_s9 + $0x3c] sm:$0x1] }
  0xd3   : > { %4941 = vmatmul.mubr.msk.bf16.vlgmr.msra.gmra.mrb[92].mxu0 %vm398_vm1, %v5745_v37  ;;  %4976 = vmatprep.subr.bf16.mxu1 %v5255_v1  ;;  %v3439_v37 = vld [vmem:[%s5895_s29 + $0x4] sm:$0x1] }
  0xd4   : > { %4953 = vmatpush3.bf16.msra.mxu0 %v5344_v5  ;;  %4956 = vmatprep.mubr.msk.bf16.mxu0 %vm5256_vm0, %v5255_v1  ;;  %v4310_v5 = vcombine.low %v4307_v4, %v4308_v34  ;;  %v5929_v42 = vcombine.low %v5913_v36, %v3439_v37  ;;  %v5958_v34 = vcombine.low %v5946_v58, %v4332_v14  ;;  %v3734_v37 = vld [vmem:[%s5895_s29 + $0x4] sm:$0x1] }
  0xd5   : > { %4954 = vmatprep.subr.bf16.mxu0 %v5255_v1  ;;  %4965 = vmatmul.mubr.msk.bf16.vlgmr.msra.gmra.mrb[96].mxu1 %vm398_vm1, %v2905_v2  ;;  %v3347_v2 = vrot.slane %v3345_v51, 1 }
  0xd6   : > { %4977 = vmatpush3.bf16.msra.mxu1 %v5450_v40  ;;  %4980 = vmatprep.mubr.msk.bf16.mxu1 %vm5256_vm0, %v5255_v1  ;;  %v2950_v40 = vrot.slane %v4304_v0, 1  ;;  %v3098_v60 = vrot.slane %v4310_v5, 1  ;;  %v3048_v61 = vshrl.u32 %v4310_v5, 16  ;;  %v3492_v3 = vshll.u32 %v5929_v42, 16 }
  0xd7   : > { %4978 = vmatprep.subr.bf16.mxu1 %v5255_v1  ;;  %v3540_v51 = vrot.slane %v5929_v42, 1 }
  0xd8   : > { %4955 = vmatpush3.bf16.msra.mxu0 %v5359_v9  ;;  %v3050_v9 = vshll.u32 %v4310_v5, 16 }
  0xd9   : > { %4968 = vmatprep.subr.bf16.mxu0 %v5255_v1 }
  0xda   : > { %4979 = vmatpush3.bf16.msra.mxu1 %v5460_v43  ;;  %v4314_v43 = vld [vmem:[%s5349_s9 + $0x30] sm:$0xf]  ;;  %v3052_v62 = vrot.slane %v3050_v9, 1 }
  0xdb   : > { %4957 = vmatmul.mubr.msk.bf16.vlgmr.msra.gmra.mrb[96].mxu0 %vm398_vm1, %v4301_v55  ;;  %4992 = vmatprep.subr.bf16.mxu1 %v5255_v1  ;;  %v3393_v55 = vrot.slane %v4323_v39, 1  ;;  %v5963_v9 = vld [vmem:[%s6151_s2 + $0x70] sm:$0xff]  }
  0xdc   : > { %4969 = vmatpush3.bf16.msra.mxu0 %v5376_v17  ;;  %4972 = vmatprep.mubr.msk.bf16.mxu0 %vm5256_vm0, %v5255_v1  ;;  %v4315_v17 = vld [vmem:[%s5349_s9 + $0x34] sm:$0x1]  ;;  %v3053_v6 = vor.u32 %v3052_v62, %v3048_v61 }
  0xdd   : > { %4970 = vmatprep.subr.bf16.mxu0 %v5255_v1  ;;  %4981 = vmatmul.mubr.msk.bf16.vlgmr.msra.gmra.mrb[100].mxu1 %vm398_vm1, %v4307_v4  ;;  %v3494_v4 = vrot.slane %v3492_v3, 1 }
  0xde   : > { %4993 = vmatpush3.bf16.msra.mxu1 %v5474_v46  ;;  %4996 = vmatprep.mubr.msk.bf16.mxu1 %vm5256_vm0, %v5255_v1  ;;  %v5844_v46 = vcombine.low %v4314_v43, %v4315_v17  ;;  %v5972_v17 = vld [vmem:[%s6151_s2 + $0x48] sm:$0xff]  }
  0xdf   : > { %4994 = vmatprep.subr.bf16.mxu1 %v5255_v1 }
  0xe0   : > { %4971 = vmatpush3.bf16.msra.mxu0 %v5397_v22  ;;  %v3156_v7 = vshll.u32 %v5844_v46, 16  ;;  %v3154_v12 = vshrl.u32 %v5844_v46, 16  ;;  %v3246_v47 = vrot.slane %v5844_v46, 1 }
  0xe1   : > { %4984 = vmatprep.subr.bf16.mxu0 %v5255_v1 }
  0xe2   : > { %4995 = vmatpush3.bf16.msra.mxu1 %v5487_v50  ;;  %v5854_v50 = vld [vmem:[%s6151_s2] sm:$0xff]   ;;  %v3158_v13 = vrot.slane %v3156_v7, 1 }
  0xe3   : > { %4973 = vmatmul.mubr.msk.bf16.vlgmr.msra.gmra.mrb[100].mxu0 %vm398_vm1, %v2950_v40  ;;  %5008 = vmatprep.subr.bf16.mxu1 %v5255_v1 }
  0xe4   : > { %4985 = vmatpush3.bf16.msra.mxu0 %v5418_v29  ;;  %4988 = vmatprep.mubr.msk.bf16.mxu0 %vm5256_vm0, %v5255_v1  ;;  %v3159_v23 = vor.u32 %v3158_v13, %v3154_v12  ;;  %v5988_v12 = vld [vmem:[%s6151_s2 + $0x60] sm:$0xff]   ;;  %v3596_v13 = vshrl.u32 %v5958_v34, 16 }
  0xe5   : > { %4986 = vmatprep.subr.bf16.mxu0 %v5255_v1  ;;  %4997 = vmatmul.mubr.msk.bf16.vlgmr.msra.gmra.mrb[104].mxu1 %vm398_vm1, %v3098_v60 }
  0xe6   : > { %5009 = vmatpush3.bf16.msra.mxu1 %v5854_v50  ;;  %v491_v63 = vpop.f32.mrb[0].mxu1  ;;  %5012 = vmatprep.mubr.msk.bf16.mxu1 %vm5256_vm0, %v5255_v1 }
  0xe7   : > { %v4582_v29 = vpop.f32.mrb[1].mxu1  ;;  %5010 = vmatprep.subr.bf16.mxu1 %v5255_v1 }
  0xe8   : > { %4987 = vmatpush3.bf16.msra.mxu0 %v5441_v38  ;;  %v494_v8 = vpop.f32.mrb[2].mxu1  ;;  %v5875_v38 = vld [vmem:[%s6151_s2 + $0x10] sm:$0xff]   ;;  %v3598_v29 = vshll.u32 %v5958_v34, 16 }
  0xe9   : > { %5000 = vmatprep.subr.bf16.mxu0 %v5255_v1  ;;  %v4583_v10 = vpop.f32.mrb[3].mxu1  ;;  %v5980_v8 = vld [vmem:[%s6151_s2 + $0x78] sm:$0xff]  }
  0xea   : > { %5011 = vmatpush3.bf16.msra.mxu1 %v5866_v11 }
  0xeb   : > { %4989 = vmatmul.mubr.msk.bf16.vlgmr.msra.gmra.mrb[104].mxu0 %vm398_vm1, %v3053_v6  ;;  %5024 = vmatprep.subr.bf16.mxu1 %v5255_v1 }
  0xec   : > { %5001 = vmatpush3.bf16.msra.mxu0 %v5875_v38  ;;  %5004 = vmatprep.mubr.msk.bf16.mxu0 %vm5256_vm0, %v5255_v1 }
  0xed   : > { %5002 = vmatprep.subr.bf16.mxu0 %v5255_v1  ;;  %5013 = vmatmul.mubr.msk.bf16.vlgmr.msra.gmra.mrb[108].mxu1 %vm398_vm1, %v4314_v43  ;;  %v3348_v43 = vor.u32 %v3347_v2, %v3343_v59 }
  0xee   : > { %v436_v15 = vpop.f32.mrb[0].mxu0  ;;  %5025 = vmatpush3.bf16.msra.mxu1 %v5886_v16  ;;  %v606_v18 = vpop.f32.mrb[4].mxu1  ;;  %5028 = vmatprep.mubr.msk.bf16.mxu1 %vm5256_vm0, %v5255_v1 }
  0xef   : > { %v492_v19 = vadd.f32 %v491_v63, %v436_v15  ;;  %v4574_v20 = vpop.f32.mrb[1].mxu0  ;;  %v4598_v24 = vpop.f32.mrb[5].mxu1  ;;  %5026 = vmatprep.subr.bf16.mxu1 %v5255_v1  ;;  %v3600_v15 = vrot.slane %v3598_v29, 1 }
  0xf0   : > { %5003 = vmatpush3.bf16.msra.mxu0 %v5900_v25  ;;  %v439_v27 = vpop.f32.mrb[2].mxu0  ;;  %v609_v28 = vpop.f32.mrb[6].mxu1 }
  0xf1   : > { %v4575_v32 = vpop.f32.mrb[3].mxu0  ;;  %5016 = vmatprep.subr.bf16.mxu0 %v5255_v1  ;;  %v4599_v33 = vpop.f32.mrb[7].mxu1  ;;  %v3601_v31 = vor.u32 %v3600_v15, %v3596_v13 }
  0xf2   : > { %5027 = vmatpush3.bf16.msra.mxu1 %v5909_v35  ;;  %v6009_v33 = vld [vmem:[%s5895_s29] sm:$0xf] }
  0xf3   : > { %5005 = vmatmul.mubr.msk.bf16.vlgmr.msra.gmra.mrb[108].mxu0 %vm398_vm1, %v3159_v23  ;;  %5040 = vmatprep.subr.bf16.mxu1 %v5255_v1  ;;  %v6003_v23 = vld [vmem:[%s6151_s2 + $0x68] sm:$0xff]  }
  0xf4   : > { %5017 = vmatpush3.bf16.msra.mxu0 %v5921_v41  ;;  %5020 = vmatprep.mubr.msk.bf16.mxu0 %vm5256_vm0, %v5255_v1 }
  0xf5   : > { %5018 = vmatprep.subr.bf16.mxu0 %v5255_v1  ;;  %5029 = vmatmul.mubr.msk.bf16.vlgmr.msra.gmra.mrb[112].mxu1 %vm398_vm1, %v4320_v30 }
  0xf6   : > { %v547_v44 = vpop.f32.mrb[4].mxu0  ;;  %5041 = vmatpush3.bf16.msra.mxu1 %v5934_v45  ;;  %5044 = vmatprep.mubr.msk.bf16.mxu1 %vm5256_vm0, %v5255_v1 }
  0xf7   : > { %v553_v48 = vadd.f32 %v547_v44, %v492_v19  ;;  %v4590_v49 = vpop.f32.mrb[5].mxu0  ;;  %5042 = vmatprep.subr.bf16.mxu1 %v5255_v1  ;;  %v6018_v44 = vld [vmem:[%s6151_s2 + $0x80] sm:$0xff]  }
  0xf8   : > { %5019 = vmatpush3.bf16.msra.mxu0 %v5388_v21  ;;  %v550_v52 = vpop.f32.mrb[6].mxu0  ;;  %v731_v53 = vpop.f32.mrb[8].mxu1 }
  0xf9   : > { %v4591_v54 = vpop.f32.mrb[7].mxu0  ;;  %5032 = vmatprep.subr.bf16.mxu0 %v5255_v1  ;;  %v612_v56 = vadd.f32 %v606_v18, %v553_v48  ;;  %v4614_v0 = vpop.f32.mrb[9].mxu1 }
  0xfa   : > { %v734_v57 = vpop.f32.mrb[10].mxu1  ;;  %5043 = vmatpush3.bf16.msra.mxu1 %v5397_v22  ;;  %v3490_v22 = vshrl.u32 %v5929_v42, 16 }
  0xfb   : > { %5021 = vmatmul.mubr.msk.bf16.vlgmr.msra.gmra.mrb[112].mxu0 %vm398_vm1, %v3246_v47  ;;  %v4615_v21 = vpop.f32.mrb[11].mxu1  ;;  %5056 = vmatprep.subr.bf16.mxu1 %v5255_v1  ;;  %v5228_v57 = vld [vmem:[%s6151_s2 + $0x28] sm:$0xff]  }
  0xfc   : > { %5033 = vmatpush3.bf16.msra.mxu0 %v5409_v26  ;;  %5036 = vmatprep.mubr.msk.bf16.mxu0 %vm5256_vm0, %v5255_v1  ;;  %v3495_v6 = vor.u32 %v3494_v4, %v3490_v22  ;;  %v5229_v22 = vld [vmem:[%s6151_s2 + $0x40] sm:$0xff]  }
  0xfd   : > { %5034 = vmatprep.subr.bf16.mxu0 %v5255_v1  ;;  %5045 = vmatmul.mubr.msk.bf16.vlgmr.msra.gmra.mrb[116].mxu1 %vm398_vm1, %v3393_v55 }
  0xfe   : > { %v674_v5 = vpop.f32.mrb[8].mxu0  ;;  %5057 = vmatpush3.bf16.msra.mxu1 %v5963_v9  ;;  %5060 = vmatprep.mubr.msk.bf16.mxu1 %vm5256_vm0, %v5255_v1 }
  0xff   : > { %v680_v26 = vadd.f32 %v674_v5, %v612_v56  ;;  %v4606_v40 = vpop.f32.mrb[9].mxu0  ;;  %5058 = vmatprep.subr.bf16.mxu1 %v5255_v1  ;;  %v3688_v56 = vrot.slane %v5958_v34, 1 }
 0x100   : > { %5035 = vmatpush3.bf16.msra.mxu0 %v5972_v17  ;;  %v677_v60 = vpop.f32.mrb[10].mxu0  ;;  %v858_v61 = vpop.f32.mrb[12].mxu1 }
 0x101   : > { %v4607_v62 = vpop.f32.mrb[11].mxu0  ;;  %5048 = vmatprep.subr.bf16.mxu0 %v5255_v1  ;;  %v737_v46 = vadd.f32 %v731_v53, %v680_v26  ;;  %v4630_v63 = vpop.f32.mrb[13].mxu1 }
 0x102   : > { %v861_v7 = vpop.f32.mrb[14].mxu1  ;;  %5059 = vmatpush3.bf16.msra.mxu1 %v5980_v8  ;;  %v4341_v63 = vld [vmem:[%s5895_s29 + $0x8] sm:$0xf] }
 0x103   : > { %5037 = vmatmul.mubr.msk.bf16.vlgmr.msra.gmra.mrb[116].mxu0 %vm398_vm1, %v3348_v43  ;;  %v4631_v10 = vpop.f32.mrb[15].mxu1  ;;  %5072 = vmatprep.subr.bf16.mxu1 %v5255_v1 }
 0x104   : > { %5049 = vmatpush3.bf16.msra.mxu0 %v5988_v12  ;;  %5052 = vmatprep.mubr.msk.bf16.mxu0 %vm5256_vm0, %v5255_v1 }
 0x105   : > { %5050 = vmatprep.subr.bf16.mxu0 %v5255_v1  ;;  %5061 = vmatmul.mubr.msk.bf16.vlgmr.msra.gmra.mrb[120].mxu1 %vm398_vm1, %v3495_v6  ;;  %v4342_v6 = vld [vmem:[%s5895_s29 + $0xc] sm:$0x1] }
 0x106   : > { %v790_v18 = vpop.f32.mrb[12].mxu0  ;;  %5073 = vmatpush3.bf16.msra.mxu1 %v5875_v38  ;;  %5076 = vmatprep.mubr.msk.bf16.mxu1 %vm5256_vm0, %v5255_v1  ;;  %v4344_v15 = vcombine.low %v4341_v63, %v4342_v6 }
 0x107   : > { %v796_v19 = vadd.f32 %v790_v18, %v737_v46  ;;  %v4622_v20 = vpop.f32.mrb[13].mxu0  ;;  %5074 = vmatprep.subr.bf16.mxu1 %v5255_v1 }
 0x108   : > { %5051 = vmatpush3.bf16.msra.mxu0 %v6003_v23  ;;  %v793_v24 = vpop.f32.mrb[14].mxu0  ;;  %v982_v27 = vpop.f32.mrb[16].mxu1  ;;  %v3935_v20 = vshll.u32 %v4344_v15, 16 }
 0x109   : > { %v4623_v38 = vpop.f32.mrb[15].mxu0  ;;  %5064 = vmatprep.subr.bf16.mxu0 %v5255_v1  ;;  %v864_v28 = vadd.f32 %v858_v61, %v796_v19  ;;  %v4646_v30 = vpop.f32.mrb[17].mxu1 }
 0x10a   : > { %v985_v32 = vpop.f32.mrb[18].mxu1  ;;  %5075 = vmatpush3.bf16.msra.mxu1 %v5900_v25  ;;  %v6027_v25 = vcombine.low %v6009_v33, %v3734_v37  ;;  %v3937_v37 = vrot.slane %v3935_v20, 1 }
 0x10b   : > { %5053 = vmatmul.mubr.msk.bf16.vlgmr.msra.gmra.mrb[120].mxu0 %vm398_vm1, %v5913_v36  ;;  %v4647_v39 = vpop.f32.mrb[19].mxu1  ;;  %5088 = vmatprep.subr.bf16.mxu1 %v5255_v1  ;;  %v6032_v36 = vld [vmem:[%s6153_s4] ss:$0 sm:$0xff] }
 0x10c   : > { %5065 = vmatpush3.bf16.msra.mxu0 %v6018_v44  ;;  %5068 = vmatprep.mubr.msk.bf16.mxu0 %vm5256_vm0, %v5255_v1  ;;  %v3787_v0 = vshll.u32 %v6027_v25, 16  ;;  %v3785_v59 = vshrl.u32 %v6027_v25, 16 }
 0x10d   : > { %5066 = vmatprep.subr.bf16.mxu0 %v5255_v1  ;;  %5077 = vmatmul.mubr.msk.bf16.vlgmr.msra.gmra.mrb[124].mxu1 %vm398_vm1, %v3601_v31 }
 0x10e   : > { %v915_v47 = vpop.f32.mrb[16].mxu0  ;;  %5089 = vmatpush3.bf16.msra.mxu1 %v5921_v41  ;;  %5092 = vmatprep.mubr.msk.bf16.mxu1 %vm5256_vm0, %v5255_v1  ;;  %v6047_v41 = vld [vmem:[%s6151_s2 + $0x88] sm:$0xff]   ;;  %v3789_v2 = vrot.slane %v3787_v0, 1 }
 0x10f   : > { %v921_v48 = vadd.f32 %v915_v47, %v864_v28  ;;  %v4638_v49 = vpop.f32.mrb[17].mxu0  ;;  %5090 = vmatprep.subr.bf16.mxu1 %v5255_v1  ;;  %v3983_v28 = vrot.slane %v4344_v15, 1 }
 0x110   : > { %5067 = vmatpush3.bf16.msra.mxu0 %v6047_v41  ;;  %v918_v52 = vpop.f32.mrb[18].mxu0  ;;  %v1069_v53 = vpop.f32.mrb[20].mxu1  ;;  %v3790_v60 = vor.u32 %v3789_v2, %v3785_v59 }
 0x111   : > { %v928_v42 = vadd.f32 %v6032_v36, %v921_v48  ;;  %v4639_v54 = vpop.f32.mrb[19].mxu0  ;;  %5080 = vmatprep.subr.bf16.mxu0 %v5255_v1  ;;  %v4662_v55 = vpop.f32.mrb[21].mxu1 }
 0x112   : > { %v1072_v3 = vpop.f32.mrb[22].mxu1  ;;  %5091 = vmatpush3.bf16.msra.mxu1 %v5228_v57 }
 0x113   : > { %930 = vst.msk [vmem:[%s6042_s8] sm:$0xff] %vm929_vm2, %v928_v42  ;;  %5069 = vmatmul.mubr.msk.bf16.vlgmr.msra.gmra.mrb[124].mxu0 %vm398_vm1, %v3540_v51  ;;  %v4663_v14 = vpop.f32.mrb[23].mxu1  ;;  %5104 = vmatprep.subr.bf16.mxu1 %v5255_v1 }
 0x114   : > { %5081 = vmatpush3.bf16.msra.mxu0 %v5854_v50  ;;  %5084 = vmatprep.mubr.msk.bf16.mxu0 %vm5256_vm0, %v5255_v1 }
 0x115   : > { %5082 = vmatprep.subr.bf16.mxu0 %v5255_v1  ;;  %5093 = vmatmul.mubr.msk.bf16.vlgmr.msra.gmra.mrb[128].mxu1 %vm398_vm1, %v3688_v56 }
 0x116   : > { %v1025_v21 = vpop.f32.mrb[20].mxu0  ;;  %5105 = vmatpush3.bf16.msra.mxu1 %v5229_v22  ;;  %5108 = vmatprep.mubr.msk.bf16.mxu1 %vm5256_vm0, %v5255_v1 }
 0x117   : > { %v1026_v50 = vadd.f32 %v1025_v21, %v982_v27  ;;  %v4654_v4 = vpop.f32.mrb[21].mxu0  ;;  %5106 = vmatprep.subr.bf16.mxu1 %v5255_v1 }
 0x118   : > { %5083 = vmatpush3.bf16.msra.mxu0 %v5866_v11  ;;  %v1028_v34 = vpop.f32.mrb[22].mxu0  ;;  %v1171_v5 = vpop.f32.mrb[24].mxu1 }
 0x119   : > { %v4655_v26 = vpop.f32.mrb[23].mxu0  ;;  %5096 = vmatprep.subr.bf16.mxu0 %v5255_v1  ;;  %v1075_v40 = vadd.f32 %v1069_v53, %v1026_v50  ;;  %v4678_v43 = vpop.f32.mrb[25].mxu1 }
 0x11a   : > { %v1174_v61 = vpop.f32.mrb[26].mxu1  ;;  %5107 = vmatpush3.bf16.msra.mxu1 %v5972_v17 }
 0x11b   : > { %5085 = vmatmul.mubr.msk.bf16.vlgmr.msra.gmra.mrb[128].mxu0 %vm398_vm1, %v5946_v58  ;;  %v4679_v62 = vpop.f32.mrb[27].mxu1  ;;  %5120 = vmatprep.subr.bf16.mxu1 %v5255_v1 }
 0x11c   : > { %5097 = vmatpush3.bf16.msra.mxu0 %v5886_v16  ;;  %5100 = vmatprep.mubr.msk.bf16.mxu0 %vm5256_vm0, %v5255_v1 }
 0x11d   : > { %5098 = vmatprep.subr.bf16.mxu0 %v5255_v1  ;;  %5109 = vmatmul.mubr.msk.bf16.vlgmr.msra.gmra.mrb[132].mxu1 %vm398_vm1, %v3790_v60 }
 0x11e   : > { %v1115_v11 = vpop.f32.mrb[24].mxu0  ;;  %5121 = vmatpush3.bf16.msra.mxu1 %v5988_v12  ;;  %5124 = vmatprep.mubr.msk.bf16.mxu1 %vm5256_vm0, %v5255_v1 }
 0x11f   : > { %v1121_v58 = vadd.f32 %v1115_v11, %v1075_v40  ;;  %v4670_v17 = vpop.f32.mrb[25].mxu0  ;;  %5122 = vmatprep.subr.bf16.mxu1 %v5255_v1 }
 0x120   : > { %5099 = vmatpush3.bf16.msra.mxu0 %v5909_v35  ;;  %v1118_v16 = vpop.f32.mrb[26].mxu0  ;;  %v1263_v46 = vpop.f32.mrb[28].mxu1 }
 0x121   : > { %v4671_v29 = vpop.f32.mrb[27].mxu0  ;;  %5112 = vmatprep.subr.bf16.mxu0 %v5255_v1  ;;  %v1177_v7 = vadd.f32 %v1171_v5, %v1121_v58  ;;  %v4694_v10 = vpop.f32.mrb[29].mxu1 }
 0x122   : > { %v1266_v13 = vpop.f32.mrb[30].mxu1  ;;  %5123 = vmatpush3.bf16.msra.mxu1 %v6003_v23  ;;  %v3835_v23 = vrot.slane %v6027_v25, 1 }
 0x123   : > { %5101 = vmatmul.mubr.msk.bf16.vlgmr.msra.gmra.mrb[132].mxu0 %vm398_vm1, %v6009_v33  ;;  %v4695_v12 = vpop.f32.mrb[31].mxu1  ;;  %5136 = vmatprep.subr.bf16.mxu1 %v5255_v1  ;;  %v3933_v33 = vshrl.u32 %v4344_v15, 16 }
 0x124   : > { %5113 = vmatpush3.bf16.msra.mxu0 %v5934_v45  ;;  %5116 = vmatprep.mubr.msk.bf16.mxu0 %vm5256_vm0, %v5255_v1  ;;  %v5230_v45 = vld [vmem:[%s6151_s2 + $0x58] sm:$0xff]  }
 0x125   : > { %5114 = vmatprep.subr.bf16.mxu0 %v5255_v1  ;;  %5125 = vmatmul.mubr.msk.bf16.vlgmr.msra.gmra.mrb[136].mxu1 %vm398_vm1, %v4341_v63  ;;  %v3938_v48 = vor.u32 %v3937_v37, %v3933_v33 }
 0x126   : > { %v1216_v35 = vpop.f32.mrb[28].mxu0  ;;  %5137 = vmatpush3.bf16.msra.mxu1 %v6018_v44  ;;  %5140 = vmatprep.mubr.msk.bf16.mxu1 %vm5256_vm0, %v5255_v1 }
 0x127   : > { %v1222_v18 = vadd.f32 %v1216_v35, %v1177_v7  ;;  %v4686_v19 = vpop.f32.mrb[29].mxu0  ;;  %5138 = vmatprep.subr.bf16.mxu1 %v5255_v1 }
 0x128   : > { %5115 = vmatpush3.bf16.msra.mxu0 %v5230_v45  ;;  %v1219_v24 = vpop.f32.mrb[30].mxu0  ;;  %v1364_v27 = vpop.f32.mrb[32].mxu1 }
 0x129   : > { %v4687_v38 = vpop.f32.mrb[31].mxu0  ;;  %5128 = vmatprep.subr.bf16.mxu0 %v5255_v1  ;;  %v1269_v30 = vadd.f32 %v1263_v46, %v1222_v18  ;;  %v4710_v31 = vpop.f32.mrb[33].mxu1 }
 0x12a   : > { %v1367_v32 = vpop.f32.mrb[34].mxu1  ;;  %5139 = vmatpush3.bf16.msra.mxu1 %v6047_v41 }
 0x12b   : > { %5117 = vmatmul.mubr.msk.bf16.vlgmr.msra.gmra.mrb[136].mxu0 %vm398_vm1, %v3835_v23  ;;  %v4711_v39 = vpop.f32.mrb[35].mxu1 }
 0x12c   : > { %5129 = vmatpush3.bf16.msra.mxu0 %v5963_v9  ;;  %5132 = vmatprep.mubr.msk.bf16.mxu0 %vm5256_vm0, %v5255_v1 }
 0x12d   : > { %5130 = vmatprep.subr.bf16.mxu0 %v5255_v1  ;;  %5141 = vmatmul.mubr.msk.bf16.vlgmr.msra.gmra.mrb[140].mxu1 %vm398_vm1, %v3983_v28 }
 0x12e   : > { %v1319_v44 = vpop.f32.mrb[32].mxu0 }
 0x12f   : > { %v1325_v25 = vadd.f32 %v1319_v44, %v1269_v30  ;;  %v4702_v47 = vpop.f32.mrb[33].mxu0 }
 0x130   : > { %5131 = vmatpush3.bf16.msra.mxu0 %v5980_v8  ;;  %v1322_v49 = vpop.f32.mrb[34].mxu0  ;;  %v1468_v51 = vpop.f32.mrb[36].mxu1 }
 0x131   : > { %v1370_v41 = vadd.f32 %v1364_v27, %v1325_v25  ;;  %v4703_v52 = vpop.f32.mrb[35].mxu0  ;;  %v4726_v53 = vpop.f32.mrb[37].mxu1 }
 0x132   : > { %v1471_v9 = vpop.f32.mrb[38].mxu1 }
 0x133   : > { %v1371_v42 = vadd.f32 %v6032_v36, %v1370_v41  ;;  %5133 = vmatmul.mubr.msk.bf16.vlgmr.msra.gmra.mrb[140].mxu0 %vm398_vm1, %v3938_v48  ;;  %v4727_v1 = vpop.f32.mrb[39].mxu1 }
 0x135   : > { %4237 = vst.msk [vmem:[%s6042_s8 + $0x8] sm:$0xff] %vm929_vm2, %v1371_v42 }
 0x136   : > { %v1425_v54 = vpop.f32.mrb[36].mxu0 }
 0x137   : > { %v1469_v55 = vadd.f32 %v1468_v51, %v1425_v54  ;;  %v4718_v56 = vpop.f32.mrb[37].mxu0 }
 0x138   : > { %v1428_v0 = vpop.f32.mrb[38].mxu0  ;;  %v1558_v3 = vpop.f32.mrb[40].mxu1 }
 0x139   : > { %v4719_v57 = vpop.f32.mrb[39].mxu0  ;;  %v4742_v8 = vpop.f32.mrb[41].mxu1 }
 0x13a   : > { %v1561_v14 = vpop.f32.mrb[42].mxu1 }
 0x13b   : > { %v4743_v59 = vpop.f32.mrb[43].mxu1 }
 0x13e   : > { %v1512_v2 = vpop.f32.mrb[40].mxu0 }
 0x13f   : > { %v1518_v21 = vadd.f32 %v1512_v2, %v1469_v55  ;;  %v4734_v22 = vpop.f32.mrb[41].mxu0 }
 0x140   : > { %v1515_v50 = vpop.f32.mrb[42].mxu0  ;;  %v1659_v4 = vpop.f32.mrb[44].mxu1 }
 0x141   : > { %v4735_v34 = vpop.f32.mrb[43].mxu0  ;;  %v1564_v5 = vadd.f32 %v1558_v3, %v1518_v21  ;;  %v4758_v26 = vpop.f32.mrb[45].mxu1 }
 0x142   : > { %v1662_v40 = vpop.f32.mrb[46].mxu1 }
 0x143   : > { %v4759_v43 = vpop.f32.mrb[47].mxu1 }
 0x146   : > { %v1614_v60 = vpop.f32.mrb[44].mxu0 }
 0x147   : > { %v1620_v61 = vadd.f32 %v1614_v60, %v1564_v5  ;;  %v4750_v62 = vpop.f32.mrb[45].mxu0 }
 0x148   : > { %v1617_v11 = vpop.f32.mrb[46].mxu0  ;;  %v1762_v58 = vpop.f32.mrb[48].mxu1 }
 0x149   : > { %v4751_v17 = vpop.f32.mrb[47].mxu0  ;;  %v1665_v16 = vadd.f32 %v1659_v4, %v1620_v61  ;;  %v4774_v46 = vpop.f32.mrb[49].mxu1 }
 0x14a   : > { %v1765_v63 = vpop.f32.mrb[50].mxu1 }
 0x14b   : > { %v4775_v6 = vpop.f32.mrb[51].mxu1 }
 0x14e   : > { %v1706_v29 = vpop.f32.mrb[48].mxu0 }
 0x14f   : > { %v1712_v7 = vadd.f32 %v1706_v29, %v1665_v16  ;;  %v4766_v10 = vpop.f32.mrb[49].mxu0 }
 0x150   : > { %v1709_v13 = vpop.f32.mrb[50].mxu0  ;;  %v1868_v12 = vpop.f32.mrb[52].mxu1 }
 0x151   : > { %v4767_v15 = vpop.f32.mrb[51].mxu0  ;;  %v1768_v35 = vadd.f32 %v1762_v58, %v1712_v7  ;;  %v4790_v18 = vpop.f32.mrb[53].mxu1 }
 0x152   : > { %v1871_v19 = vpop.f32.mrb[54].mxu1 }
 0x153   : > { %v4791_v20 = vpop.f32.mrb[55].mxu1 }
 0x156   : > { %v1807_v23 = vpop.f32.mrb[52].mxu0 }
 0x157   : > { %v1813_v45 = vadd.f32 %v1807_v23, %v1768_v35  ;;  %v4782_v24 = vpop.f32.mrb[53].mxu0 }
 0x158   : > { %v1810_v27 = vpop.f32.mrb[54].mxu0  ;;  %v1955_v38 = vpop.f32.mrb[56].mxu1 }
 0x159   : > { %v1814_v28 = vadd.f32 %v6032_v36, %v1813_v45  ;;  %v4783_v30 = vpop.f32.mrb[55].mxu0  ;;  %v4806_v31 = vpop.f32.mrb[57].mxu1 }
 0x15a   : > { %v1958_v32 = vpop.f32.mrb[58].mxu1 }
 0x15b   : > { %4256 = vst.msk [vmem:[%s6042_s8 + $0x10] sm:$0xff] %vm929_vm2, %v1814_v28  ;;  %v4807_v33 = vpop.f32.mrb[59].mxu1 }
 0x15e   : > { %v1911_v37 = vpop.f32.mrb[56].mxu0 }
 0x15f   : > { %v1912_v39 = vadd.f32 %v1911_v37, %v1868_v12  ;;  %v4798_v44 = vpop.f32.mrb[57].mxu0 }
 0x160   : > { %v1914_v25 = vpop.f32.mrb[58].mxu0  ;;  %v2057_v47 = vpop.f32.mrb[60].mxu1 }
 0x161   : > { %v4799_v48 = vpop.f32.mrb[59].mxu0  ;;  %v1961_v49 = vadd.f32 %v1955_v38, %v1912_v39  ;;  %v4822_v51 = vpop.f32.mrb[61].mxu1 }
 0x162   : > { %v2060_v41 = vpop.f32.mrb[62].mxu1 }
 0x163   : > { %v4823_v52 = vpop.f32.mrb[63].mxu1 }
 0x166   : > { %v2001_v53 = vpop.f32.mrb[60].mxu0 }
 0x167   : > { %v2007_v9 = vadd.f32 %v2001_v53, %v1961_v49  ;;  %v4814_v42 = vpop.f32.mrb[61].mxu0 }
 0x168   : > { %v2004_v1 = vpop.f32.mrb[62].mxu0  ;;  %v2149_v54 = vpop.f32.mrb[64].mxu1 }
 0x169   : > { %v4815_v55 = vpop.f32.mrb[63].mxu0  ;;  %v2063_v56 = vadd.f32 %v2057_v47, %v2007_v9  ;;  %v4838_v0 = vpop.f32.mrb[65].mxu1 }
 0x16a   : > { %v2152_v3 = vpop.f32.mrb[66].mxu1 }
 0x16b   : > { %v4839_v57 = vpop.f32.mrb[67].mxu1 }
 0x16e   : > { %v2102_v8 = vpop.f32.mrb[64].mxu0 }
 0x16f   : > { %v2108_v14 = vadd.f32 %v2102_v8, %v2063_v56  ;;  %v4830_v59 = vpop.f32.mrb[65].mxu0 }
 0x170   : > { %v2105_v2 = vpop.f32.mrb[66].mxu0  ;;  %v2250_v21 = vpop.f32.mrb[68].mxu1 }
 0x171   : > { %v4831_v22 = vpop.f32.mrb[67].mxu0  ;;  %v2155_v50 = vadd.f32 %v2149_v54, %v2108_v14  ;;  %v4854_v4 = vpop.f32.mrb[69].mxu1 }
 0x172   : > { %v2253_v34 = vpop.f32.mrb[70].mxu1 }
 0x173   : > { %v4855_v5 = vpop.f32.mrb[71].mxu1 }
 0x176   : > { %v2205_v26 = vpop.f32.mrb[68].mxu0 }
 0x177   : > { %v2211_v40 = vadd.f32 %v2205_v26, %v2155_v50  ;;  %v4846_v43 = vpop.f32.mrb[69].mxu0 }
 0x178   : > { %v2208_v60 = vpop.f32.mrb[70].mxu0  ;;  %v2354_v61 = vpop.f32.mrb[72].mxu1 }
 0x179   : > { %v2256_v62 = vadd.f32 %v2250_v21, %v2211_v40  ;;  %v4847_v11 = vpop.f32.mrb[71].mxu0  ;;  %v4870_v58 = vpop.f32.mrb[73].mxu1 }
 0x17a   : > { %v2357_v17 = vpop.f32.mrb[74].mxu1 }
 0x17b   : > { %v2257_v16 = vadd.f32 %v6032_v36, %v2256_v62  ;;  %v4871_v46 = vpop.f32.mrb[75].mxu1 }
 0x17d   : > { %4275 = vst.msk [vmem:[%s6042_s8 + $0x18] sm:$0xff] %vm929_vm2, %v2257_v16 }
 0x17e   : > { %v2311_v63 = vpop.f32.mrb[72].mxu0 }
 0x17f   : > { %v2355_v6 = vadd.f32 %v2354_v61, %v2311_v63  ;;  %v4862_v29 = vpop.f32.mrb[73].mxu0 }
 0x180   : > { %v2314_v7 = vpop.f32.mrb[74].mxu0  ;;  %v2444_v10 = vpop.f32.mrb[76].mxu1 }
 0x181   : > { %v4863_v13 = vpop.f32.mrb[75].mxu0  ;;  %v4886_v12 = vpop.f32.mrb[77].mxu1 }
 0x182   : > { %v2447_v15 = vpop.f32.mrb[78].mxu1 }
 0x183   : > { %v4887_v35 = vpop.f32.mrb[79].mxu1 }
 0x186   : > { %v2398_v18 = vpop.f32.mrb[76].mxu0 }
 0x187   : > { %v2404_v19 = vadd.f32 %v2398_v18, %v2355_v6  ;;  %v4878_v20 = vpop.f32.mrb[77].mxu0 }
 0x188   : > { %v2401_v23 = vpop.f32.mrb[78].mxu0  ;;  %v2545_v45 = vpop.f32.mrb[80].mxu1 }
 0x189   : > { %v4879_v24 = vpop.f32.mrb[79].mxu0  ;;  %v2450_v27 = vadd.f32 %v2444_v10, %v2404_v19  ;;  %v4902_v38 = vpop.f32.mrb[81].mxu1 }
 0x18a   : > { %v2548_v28 = vpop.f32.mrb[82].mxu1 }
 0x18b   : > { %v4903_v30 = vpop.f32.mrb[83].mxu1 }
 0x18e   : > { %v2500_v31 = vpop.f32.mrb[80].mxu0 }
 0x18f   : > { %v2506_v32 = vadd.f32 %v2500_v31, %v2450_v27  ;;  %v4894_v33 = vpop.f32.mrb[81].mxu0 }
 0x190   : > { %v2503_v37 = vpop.f32.mrb[82].mxu0  ;;  %v2648_v39 = vpop.f32.mrb[84].mxu1 }
 0x191   : > { %v4895_v44 = vpop.f32.mrb[83].mxu0  ;;  %v2551_v25 = vadd.f32 %v2545_v45, %v2506_v32  ;;  %v4918_v47 = vpop.f32.mrb[85].mxu1 }
 0x192   : > { %v2651_v48 = vpop.f32.mrb[86].mxu1 }
 0x193   : > { %v4919_v49 = vpop.f32.mrb[87].mxu1 }
 0x196   : > { %v2592_v51 = vpop.f32.mrb[84].mxu0 }
 0x197   : > { %v2598_v41 = vadd.f32 %v2592_v51, %v2551_v25  ;;  %v4910_v52 = vpop.f32.mrb[85].mxu0 }
 0x198   : > { %v2595_v53 = vpop.f32.mrb[86].mxu0  ;;  %v2754_v9 = vpop.f32.mrb[88].mxu1 }
 0x199   : > { %v4911_v42 = vpop.f32.mrb[87].mxu0  ;;  %v2654_v1 = vadd.f32 %v2648_v39, %v2598_v41  ;;  %v4934_v54 = vpop.f32.mrb[89].mxu1 }
 0x19a   : > { %v2757_v55 = vpop.f32.mrb[90].mxu1 }
 0x19b   : > { %v4935_v56 = vpop.f32.mrb[91].mxu1 }
 0x19e   : > { %v2693_v0 = vpop.f32.mrb[88].mxu0 }
 0x19f   : > { %v2699_v3 = vadd.f32 %v2693_v0, %v2654_v1  ;;  %v4926_v57 = vpop.f32.mrb[89].mxu0 }
 0x1a0   : > { %v2696_v8 = vpop.f32.mrb[90].mxu0  ;;  %v2841_v14 = vpop.f32.mrb[92].mxu1 }
 0x1a1   : > { %v2700_v59 = vadd.f32 %v6032_v36, %v2699_v3  ;;  %v4927_v2 = vpop.f32.mrb[91].mxu0  ;;  %v4950_v21 = vpop.f32.mrb[93].mxu1 }
 0x1a2   : > { %v2844_v22 = vpop.f32.mrb[94].mxu1 }
 0x1a3   : > { %4294 = vst.msk [vmem:[%s6042_s8 + $0x20] sm:$0xff] %vm929_vm2, %v2700_v59  ;;  %v4951_v50 = vpop.f32.mrb[95].mxu1 }
 0x1a6   : > { %v2797_v4 = vpop.f32.mrb[92].mxu0 }
 0x1a7   : > { %v2798_v34 = vadd.f32 %v2797_v4, %v2754_v9  ;;  %v4942_v5 = vpop.f32.mrb[93].mxu0 }
 0x1a8   : > { %v2800_v26 = vpop.f32.mrb[94].mxu0  ;;  %v2943_v40 = vpop.f32.mrb[96].mxu1 }
 0x1a9   : > { %v4943_v43 = vpop.f32.mrb[95].mxu0  ;;  %v2847_v60 = vadd.f32 %v2841_v14, %v2798_v34  ;;  %v4966_v61 = vpop.f32.mrb[97].mxu1 }
 0x1aa   : > { %v2946_v62 = vpop.f32.mrb[98].mxu1 }
 0x1ab   : > { %v4967_v11 = vpop.f32.mrb[99].mxu1 }
 0x1ae   : > { %v2887_v58 = vpop.f32.mrb[96].mxu0 }
 0x1af   : > { %v2893_v17 = vadd.f32 %v2887_v58, %v2847_v60  ;;  %v4958_v16 = vpop.f32.mrb[97].mxu0 }
 0x1b0   : > { %v2890_v46 = vpop.f32.mrb[98].mxu0  ;;  %v3035_v63 = vpop.f32.mrb[100].mxu1 }
 0x1b1   : > { %v4959_v6 = vpop.f32.mrb[99].mxu0  ;;  %v2949_v29 = vadd.f32 %v2943_v40, %v2893_v17  ;;  %v4982_v7 = vpop.f32.mrb[101].mxu1 }
 0x1b2   : > { %v3038_v10 = vpop.f32.mrb[102].mxu1 }
 0x1b3   : > { %v4983_v13 = vpop.f32.mrb[103].mxu1 }
 0x1b6   : > { %v2988_v12 = vpop.f32.mrb[100].mxu0 }
 0x1b7   : > { %v2994_v15 = vadd.f32 %v2988_v12, %v2949_v29  ;;  %v4974_v35 = vpop.f32.mrb[101].mxu0 }
 0x1b8   : > { %v2991_v18 = vpop.f32.mrb[102].mxu0  ;;  %v3136_v19 = vpop.f32.mrb[104].mxu1 }
 0x1b9   : > { %v4975_v20 = vpop.f32.mrb[103].mxu0  ;;  %v3041_v23 = vadd.f32 %v3035_v63, %v2994_v15  ;;  %v4998_v45 = vpop.f32.mrb[105].mxu1 }
 0x1ba   : > { %v3139_v24 = vpop.f32.mrb[106].mxu1 }
 0x1bb   : > { %v4999_v27 = vpop.f32.mrb[107].mxu1 }
 0x1be   : > { %v3091_v38 = vpop.f32.mrb[104].mxu0 }
 0x1bf   : > { %v3097_v28 = vadd.f32 %v3091_v38, %v3041_v23  ;;  %v4990_v30 = vpop.f32.mrb[105].mxu0 }
 0x1c0   : > { %v3094_v31 = vpop.f32.mrb[106].mxu0  ;;  %v3240_v32 = vpop.f32.mrb[108].mxu1 }
 0x1c1   : > { %v3142_v33 = vadd.f32 %v3136_v19, %v3097_v28  ;;  %v4991_v37 = vpop.f32.mrb[107].mxu0  ;;  %v5014_v39 = vpop.f32.mrb[109].mxu1 }
 0x1c2   : > { %v3243_v44 = vpop.f32.mrb[110].mxu1 }
 0x1c3   : > { %v3143_v25 = vadd.f32 %v6032_v36, %v3142_v33  ;;  %v5015_v47 = vpop.f32.mrb[111].mxu1 }
 0x1c5   : > { %4313 = vst.msk [vmem:[%s6042_s8 + $0x28] sm:$0xff] %vm929_vm2, %v3143_v25 }
 0x1c6   : > { %v3197_v48 = vpop.f32.mrb[108].mxu0 }
 0x1c7   : > { %v3241_v49 = vadd.f32 %v3240_v32, %v3197_v48  ;;  %v5006_v51 = vpop.f32.mrb[109].mxu0 }
 0x1c8   : > { %v3200_v41 = vpop.f32.mrb[110].mxu0  ;;  %v3330_v52 = vpop.f32.mrb[112].mxu1 }
 0x1c9   : > { %v5007_v53 = vpop.f32.mrb[111].mxu0  ;;  %v5030_v9 = vpop.f32.mrb[113].mxu1 }
 0x1ca   : > { %v3333_v42 = vpop.f32.mrb[114].mxu1 }
 0x1cb   : > { %v5031_v1 = vpop.f32.mrb[115].mxu1 }
 0x1ce   : > { %v3284_v54 = vpop.f32.mrb[112].mxu0 }
 0x1cf   : > { %v3290_v55 = vadd.f32 %v3284_v54, %v3241_v49  ;;  %v5022_v56 = vpop.f32.mrb[113].mxu0 }
 0x1d0   : > { %v3287_v0 = vpop.f32.mrb[114].mxu0  ;;  %v3431_v3 = vpop.f32.mrb[116].mxu1 }
 0x1d1   : > { %v5023_v57 = vpop.f32.mrb[115].mxu0  ;;  %v3336_v8 = vadd.f32 %v3330_v52, %v3290_v55  ;;  %v5046_v14 = vpop.f32.mrb[117].mxu1 }
 0x1d2   : > { %v3434_v59 = vpop.f32.mrb[118].mxu1 }
 0x1d3   : > { %v5047_v2 = vpop.f32.mrb[119].mxu1 }
 0x1d6   : > { %v3386_v21 = vpop.f32.mrb[116].mxu0 }
 0x1d7   : > { %v3392_v22 = vadd.f32 %v3386_v21, %v3336_v8  ;;  %v5038_v50 = vpop.f32.mrb[117].mxu0 }
 0x1d8   : > { %v3389_v4 = vpop.f32.mrb[118].mxu0  ;;  %v3533_v34 = vpop.f32.mrb[120].mxu1 }
 0x1d9   : > { %v5039_v5 = vpop.f32.mrb[119].mxu0  ;;  %v3437_v26 = vadd.f32 %v3431_v3, %v3392_v22  ;;  %v5062_v40 = vpop.f32.mrb[121].mxu1 }
 0x1da   : > { %v3536_v43 = vpop.f32.mrb[122].mxu1 }
 0x1db   : > { %v5063_v60 = vpop.f32.mrb[123].mxu1 }
 0x1de   : > { %v3477_v61 = vpop.f32.mrb[120].mxu0 }
 0x1df   : > { %v3483_v62 = vadd.f32 %v3477_v61, %v3437_v26  ;;  %v5054_v11 = vpop.f32.mrb[121].mxu0 }
 0x1e0   : > { %v3480_v58 = vpop.f32.mrb[122].mxu0  ;;  %v3639_v17 = vpop.f32.mrb[124].mxu1 }
 0x1e1   : > { %v5055_v16 = vpop.f32.mrb[123].mxu0  ;;  %v3539_v46 = vadd.f32 %v3533_v34, %v3483_v62  ;;  %v5078_v63 = vpop.f32.mrb[125].mxu1 }
 0x1e2   : > { %v3642_v6 = vpop.f32.mrb[126].mxu1 }
 0x1e3   : > { %v5079_v29 = vpop.f32.mrb[127].mxu1 }
 0x1e6   : > { %v3578_v7 = vpop.f32.mrb[124].mxu0 }
 0x1e7   : > { %v3584_v10 = vadd.f32 %v3578_v7, %v3539_v46  ;;  %v5070_v13 = vpop.f32.mrb[125].mxu0 }
 0x1e8   : > { %v3581_v12 = vpop.f32.mrb[126].mxu0  ;;  %v3726_v15 = vpop.f32.mrb[128].mxu1 }
 0x1e9   : > { %v3585_v35 = vadd.f32 %v6032_v36, %v3584_v10  ;;  %v5071_v18 = vpop.f32.mrb[127].mxu0  ;;  %v5094_v19 = vpop.f32.mrb[129].mxu1 }
 0x1ea   : > { %v3729_v20 = vpop.f32.mrb[130].mxu1 }
 0x1eb   : > { %4330 = vst.msk [vmem:[%s6042_s8 + $0x30] sm:$0xff] %vm929_vm2, %v3585_v35  ;;  %v5095_v23 = vpop.f32.mrb[131].mxu1 }
 0x1ee   : > { %v3682_v45 = vpop.f32.mrb[128].mxu0 }
 0x1ef   : > { %v3683_v24 = vadd.f32 %v3682_v45, %v3639_v17  ;;  %v5086_v27 = vpop.f32.mrb[129].mxu0 }
 0x1f0   : > { %v3685_v38 = vpop.f32.mrb[130].mxu0  ;;  %v3828_v28 = vpop.f32.mrb[132].mxu1 }
 0x1f1   : > { %v5087_v30 = vpop.f32.mrb[131].mxu0  ;;  %v3732_v31 = vadd.f32 %v3726_v15, %v3683_v24  ;;  %v5110_v32 = vpop.f32.mrb[133].mxu1 }
 0x1f2   : > { %v3831_v33 = vpop.f32.mrb[134].mxu1 }
 0x1f3   : > { %v5111_v37 = vpop.f32.mrb[135].mxu1 }
 0x1f6   : > { %v3772_v39 = vpop.f32.mrb[132].mxu0 }
 0x1f7   : > { %v3778_v44 = vadd.f32 %v3772_v39, %v3732_v31  ;;  %v5102_v25 = vpop.f32.mrb[133].mxu0 }
 0x1f8   : > { %v3775_v47 = vpop.f32.mrb[134].mxu0  ;;  %v3920_v48 = vpop.f32.mrb[136].mxu1 }
 0x1f9   : > { %v5103_v49 = vpop.f32.mrb[135].mxu0  ;;  %v3834_v51 = vadd.f32 %v3828_v28, %v3778_v44  ;;  %v5126_v41 = vpop.f32.mrb[137].mxu1 }
 0x1fa   : > { %v3923_v52 = vpop.f32.mrb[138].mxu1 }
 0x1fb   : > { %v5127_v53 = vpop.f32.mrb[139].mxu1 }
 0x1fe   : > { %v3873_v9 = vpop.f32.mrb[136].mxu0 }
 0x1ff   : > { %v3879_v42 = vadd.f32 %v3873_v9, %v3834_v51  ;;  %v5118_v1 = vpop.f32.mrb[137].mxu0 }
 0x200   : > { %v3876_v54 = vpop.f32.mrb[138].mxu0  ;;  %v4021_v55 = vpop.f32.mrb[140].mxu1 }
 0x201   : > { %v5119_v56 = vpop.f32.mrb[139].mxu0  ;;  %v3926_v0 = vadd.f32 %v3920_v48, %v3879_v42  ;;  %v5142_v3 = vpop.f32.mrb[141].mxu1 }
 0x202   : > { %v4024_v57 = vpop.f32.mrb[142].mxu1 }
 0x203   : > { %v5143_v8 = vpop.f32.mrb[143].mxu1 }
 0x206   : > { %v3976_v14 = vpop.f32.mrb[140].mxu0 }
 0x207   : > { %v3982_v59 = vadd.f32 %v3976_v14, %v3926_v0  ;;  %v5134_v2 = vpop.f32.mrb[141].mxu0 }
 0x208   : > { %v3979_v21 = vpop.f32.mrb[142].mxu0 }
 0x209   : > { %v4027_v22 = vadd.f32 %v4021_v55, %v3982_v59  ;;  %v5135_v50 = vpop.f32.mrb[143].mxu0 }
 0x20b   : > { %v4028_v4 = vadd.f32 %v6032_v36, %v4027_v22 }
 0x20d   : > { %4347 = vst.msk [vmem:[%s6042_s8 + $0x38] sm:$0xff] %vm929_vm2, %v4028_v4 }
 0x20e PF: > { %s15_s20 = sadd.s32 1, %s5253_s20   ;;  %s6155_s18 = smov %s5249_s19 }
 0x20f   : > { %p12_p5 = scmp.ge.s32.totalorder %s15_s20, 4   ;;  %s6156_s19 = smov %s6158_s3 }
 0x211   :  { %14 = sbr.rel (!%p12_p5) target bundleno = 2 (0x2), region = 96 }

</bundles_post_ra>
